<compile_context>
chip_gen: v6e
topology: v6e:2x2x1
jax: 0.10.0
libtpu: 0.0.40
codegen_flags: <defaults>
</compile_context>

<pallas_src>
import functools

import jax
import jax.numpy as jnp
from jax.experimental import pallas as pl
from jax.experimental.pallas import tpu as pltpu


def _round_up(x, m):
    return (x + m - 1) // m * m


def lstm_classifier_kernel(x_ref, w_ih_ref, w_hh_ref, b_ref, w_lab_ref,
                           b_lab_ref, out_ref, gx_scr, h_scr, c_scr,
                           *, num_classes, seq_len, unroll, approx_recip):
    s_idx = pl.program_id(1)
    Sc, Bb, Ep = x_ref.shape
    Hp = w_hh_ref.shape[0]                 # padded hidden size (mult of 128)
    mm_dtype = w_hh_ref.dtype              # matmul operand dtype (f32 / bf16)

    # ---- Phase 1 (every s-chunk): streamed, hoisted input projection -------
    # One tall MXU matmul per chunk; result lands in the persistent gates_x
    # scratch so the recurrence never touches HBM for x again.
    x2d = x_ref[...].reshape(Sc * Bb, Ep).astype(mm_dtype)
    gx = jnp.dot(x2d, w_ih_ref[...], preferred_element_type=jnp.float32)
    gx = gx + b_ref[...]
    t0 = pl.multiple_of(s_idx * Sc, Sc)
    gx_scr[pl.ds(t0, Sc)] = gx.reshape(Sc, Bb, 4 * Hp)

    # ---- Phases 2+3: only once the whole sequence's gates_x is resident ----
    @pl.when(s_idx == pl.num_programs(1) - 1)
    def _epilogue():
        h_scr[...] = jnp.zeros_like(h_scr)
        c_scr[...] = jnp.zeros_like(c_scr)

        def step(t, carry):
            h_prev = h_scr[...]
            c_prev = c_scr[...]
            h_mm = h_prev.astype(mm_dtype)
            gx_t = gx_scr[t]
            # Four (Hp, Hp) gate matmuls interleaved with their activations:
            # sigmoid/tanh of gate k (EUP slot) overlaps the MXU push of
            # gate k+1.  All gate slices are 128-lane aligned.
            i_g = jax.nn.sigmoid(
                gx_t[:, 0 * Hp:1 * Hp]
                + jnp.dot(h_mm, w_hh_ref[:, 0 * Hp:1 * Hp],
                          preferred_element_type=jnp.float32))
            f_g = jax.nn.sigmoid(
                gx_t[:, 1 * Hp:2 * Hp]
                + jnp.dot(h_mm, w_hh_ref[:, 1 * Hp:2 * Hp],
                          preferred_element_type=jnp.float32))
            g_g = jnp.tanh(
                gx_t[:, 2 * Hp:3 * Hp]
                + jnp.dot(h_mm, w_hh_ref[:, 2 * Hp:3 * Hp],
                          preferred_element_type=jnp.float32))
            o_g = jax.nn.sigmoid(
                gx_t[:, 3 * Hp:4 * Hp]
                + jnp.dot(h_mm, w_hh_ref[:, 3 * Hp:4 * Hp],
                          preferred_element_type=jnp.float32))
            c_new = f_g * c_prev + i_g * g_g
            h_new = o_g * jnp.tanh(c_new)
            h_scr[...] = h_new
            c_scr[...] = c_new
            return carry

        jax.lax.fori_loop(0, seq_len, step, 0, unroll=unroll)

        # Linear head + softmax over the real class lanes.
        logits = jnp.dot(h_scr[...].astype(w_lab_ref.dtype), w_lab_ref[...],
                         preferred_element_type=jnp.float32) + b_lab_ref[...]
        lane = jax.lax.broadcasted_iota(jnp.int32, logits.shape, 1)
        logits = jnp.where(lane < num_classes, logits, jnp.float32(-1e30))
        m = jnp.max(logits, axis=-1, keepdims=True)
        e = jnp.exp(logits - m)
        denom = jnp.sum(e, axis=-1, keepdims=True)
        if approx_recip:
            out_ref[...] = e * pl.reciprocal(denom, approx=True)
        else:
            out_ref[...] = e / denom


def _vmem_bytes(s_chunk, b_blk, S_pad, Ep, Hp, Op, w_bytes, w_buffers):
    x_chunk = 2 * s_chunk * b_blk * Ep * 4          # f32 x, double-buffered
    gx = S_pad * b_blk * 4 * Hp * 4                 # gates_x scratch (f32)
    weights = w_buffers * ((Ep + Hp) * 4 * Hp + Hp * Op) * w_bytes
    biases = w_buffers * 8 * (4 * Hp + Op) * 4
    carry = 2 * b_blk * Hp * 4                      # h, c
    out = 2 * b_blk * Op * 4
    return x_chunk + gx + weights + biases + carry + out


def _choose_tiles(S, B, Ep, Hp, Op, w_bytes, vmem_budget):
    # Largest batch block (<=128, multiple of 8 sublanes) whose working set
    # fits the budget; S is streamed in ~2 MiB x-chunks.
    b_max = min(128, _round_up(B, 8))
    for b_blk in range(b_max, 7, -8):
        s_chunk = max(1, min(S, (2 << 20) // (b_blk * Ep * 4)))
        S_pad = _round_up(S, s_chunk)
        if _vmem_bytes(s_chunk, b_blk, S_pad, Ep, Hp, Op,
                       w_bytes, 1) <= vmem_budget:
            return b_blk, s_chunk, S_pad
    return 8, 1, S


def lstm_classifier_forward(tokens, params, *, matmul_dtype=jnp.bfloat16,
                            vmem_budget=48 << 20):
    # Embedding gather directly into time-major (S, B, E): no (B, S, E)
    # intermediate + transpose pass over HBM before the kernel.
    # TODO(synk): nn.Embedding's data-dependent HBM gather stays as jnp.take
    #             glue; a bf16 table + bf16 x streaming would halve its bytes.
    x = jnp.take(params["embedding"], tokens.T, axis=0).astype(jnp.float32)
    S, B, E = x.shape
    H = params["w_hh"].shape[0]
    O = params["w_lab"].shape[1]

    Ep = _round_up(E, 128)
    Hp = _round_up(H, 128)
    Op = _round_up(O, 128)
    w_bytes = jnp.dtype(matmul_dtype).itemsize

    # NOTE: vmem_budget should be lowered (and >=2 batch blocks kept) when
    # targeting v7x (64 MiB VMEM, 2 TensorCores).
    b_blk, s_chunk, S_pad = _choose_tiles(S, B, Ep, Hp, Op, w_bytes,
                                          vmem_budget)
    Bp = _round_up(B, b_blk)
    n_b = Bp // b_blk
    n_s = S_pad // s_chunk

    # Zero-pad activations/weights; padded rows/cols are exactly 0 so padded
    # hidden units stay identically 0 through the recurrence.
    x_p = jnp.zeros((S_pad, Bp, Ep), jnp.float32).at[:S, :B, :E].set(x)

    def pad_gate_mat(w, rows_pad):
        out = jnp.zeros((rows_pad, 4 * Hp), jnp.float32)
        for k in range(4):
            out = out.at[:w.shape[0], k * Hp:k * Hp + H].set(
                w[:, k * H:(k + 1) * H])
        return out

    # TODO(synk): for large H that is NOT a multiple of 128, pack the four
    #             gates into one round_up(4H,128)-wide slab instead of
    #             per-gate Hp slabs to avoid (Hp/H)x wasted MXU columns.
    w_ih_p = pad_gate_mat(params["w_ih"], Ep).astype(matmul_dtype)   # (Ep,4Hp)
    w_hh_p = pad_gate_mat(params["w_hh"], Hp).astype(matmul_dtype)   # (Hp,4Hp)
    b_p = pad_gate_mat(params["b"], 1)                               # f32
    w_lab_p = (jnp.zeros((Hp, Op), jnp.float32)
               .at[:H, :O].set(params["w_lab"]).astype(matmul_dtype))
    b_lab_p = jnp.zeros((1, Op), jnp.float32).at[:, :O].set(params["b_lab"])

    kernel = functools.partial(
        lstm_classifier_kernel, num_classes=O, seq_len=S,
        unroll=min(8, S), approx_recip=(matmul_dtype != jnp.float32))

    # Explicit VMEM limit (upper-bounded with double-buffered weights so the
    # no-Buffered(1) fallback also fits), with headroom.
    vmem_limit = int(min(
        128 << 20,
        max(16 << 20,
            1.25 * _vmem_bytes(s_chunk, b_blk, S_pad, Ep, Hp, Op, w_bytes, 2)
            + (2 << 20))))

    def call(single_buffer_weights):
        wkw = ({"pipeline_mode": pl.Buffered(1)}
               if single_buffer_weights else {})
        grid_spec = pltpu.PrefetchScalarGridSpec(
            num_scalar_prefetch=0,
            grid=(n_b, n_s),                       # (batch blocks, S chunks)
            in_specs=[
                pl.BlockSpec((s_chunk, b_blk, Ep), lambda b, s: (s, b, 0)),
                pl.BlockSpec((Ep, 4 * Hp), lambda b, s: (0, 0), **wkw),
                pl.BlockSpec((Hp, 4 * Hp), lambda b, s: (0, 0), **wkw),
                pl.BlockSpec((1, 4 * Hp), lambda b, s: (0, 0), **wkw),
                pl.BlockSpec((Hp, Op), lambda b, s: (0, 0), **wkw),
                pl.BlockSpec((1, Op), lambda b, s: (0, 0), **wkw),
            ],
            out_specs=pl.BlockSpec((b_blk, Op), lambda b, s: (b, 0)),
            scratch_shapes=[
                pltpu.VMEM((S_pad, b_blk, 4 * Hp), jnp.float32),   # gates_x
                pltpu.VMEM((b_blk, Hp), jnp.float32),              # h carry
                pltpu.VMEM((b_blk, Hp), jnp.float32),              # c carry
            ],
        )
        return pl.pallas_call(
            kernel,
            out_shape=jax.ShapeDtypeStruct((Bp, Op), jnp.float32),
            grid_spec=grid_spec,
            compiler_params=pltpu.CompilerParams(
                dimension_semantics=("parallel", "arbitrary"),
                vmem_limit_bytes=vmem_limit),
        )(x_p, w_ih_p, w_hh_p, b_p, w_lab_p, b_lab_p)

    try:
        out_p = call(True)                 # single-buffered constant weights
    except Exception:
        out_p = call(False)                # fallback: default double-buffer

    return out_p[:B, :O]


def _reference_forward(tokens, params):
    emb = jnp.take(params["embedding"], tokens, axis=0).astype(jnp.float32)
    x = jnp.transpose(emb, (1, 0, 2))                     # (S, B, E)
    B = x.shape[1]
    H = params["w_hh"].shape[0]

    def step(carry, x_t):
        h, c = carry
        gates = x_t @ params["w_ih"] + h @ params["w_hh"] + params["b"]
        i = jax.nn.sigmoid(gates[:, 0 * H:1 * H])
        f = jax.nn.sigmoid(gates[:, 1 * H:2 * H])
        g = jnp.tanh(gates[:, 2 * H:3 * H])
        o = jax.nn.sigmoid(gates[:, 3 * H:4 * H])
        c = f * c + i * g
        h = o * jnp.tanh(c)
        return (h, c), None

    h0 = jnp.zeros((B, H), jnp.float32)
    (h, _), _ = jax.lax.scan(step, (h0, h0), x)
    logits = h @ params["w_lab"] + params["b_lab"]
    return jax.nn.softmax(logits, axis=-1)


def init_params(key, vocab_size, embedding_length, hidden_size, output_size):
    ks = jax.random.split(key, 6)
    s = 1.0 / jnp.sqrt(hidden_size)
    return {
        "embedding": jax.random.normal(ks[0], (vocab_size, embedding_length),
                                       jnp.float32),
        # stored pre-transposed: (E, 4H) / (H, 4H); gate order i, f, g, o
        "w_ih": jax.random.uniform(ks[1], (embedding_length, 4 * hidden_size),
                                   jnp.float32, -s, s),
        "w_hh": jax.random.uniform(ks[2], (hidden_size, 4 * hidden_size),
                                   jnp.float32, -s, s),
        "b": jax.random.uniform(ks[3], (1, 4 * hidden_size),
                                jnp.float32, -s, s),   # b_ih + b_hh combined
        "w_lab": jax.random.uniform(ks[4], (hidden_size, output_size),
                                    jnp.float32, -s, s),
        "b_lab": jax.random.uniform(ks[5], (1, output_size),
                                    jnp.float32, -s, s),
    }


if __name__ == "__main__":
    batch_size = 2
    seq_len = 8
    hidden_size = 32
    vocab_size = 100
    embedding_length = 128   # small stand-in for the module default 2752
    output_size = 4

    key = jax.random.PRNGKey(0)
    k_tok, k_par = jax.random.split(key)
    tokens = jax.random.randint(k_tok, (batch_size, seq_len), 0, vocab_size,
                                dtype=jnp.int32)
    params = init_params(k_par, vocab_size, embedding_length, hidden_size,
                         output_size)

    ref = jax.block_until_ready(_reference_forward(tokens, params))

    # Exact path: f32 matmul operands, tight tolerance vs the JAX reference.
    out_f32 = jax.block_until_ready(
        lstm_classifier_forward(tokens, params, matmul_dtype=jnp.float32))
    assert out_f32.shape == (batch_size, output_size)
    assert jnp.allclose(out_f32, ref, atol=1e-5, rtol=1e-5), (
        f"f32 max abs err {jnp.max(jnp.abs(out_f32 - ref))}")

    # Fast path: bf16 matmul operands (full-rate MXU, half weight DMA bytes);
    # gates / carries / softmax stay f32 — tolerance loosened accordingly.
    out_bf16 = jax.block_until_ready(
        lstm_classifier_forward(tokens, params, matmul_dtype=jnp.bfloat16))
    assert out_bf16.shape == (batch_size, output_size)
    assert jnp.allclose(out_bf16, ref, atol=5e-2), (
        f"bf16 max abs err {jnp.max(jnp.abs(out_bf16 - ref))}")

    print("KERNEL_OK")
</pallas_src>

<mosaic_0001>
module attributes {stable_mosaic.version = 11 : i64} {
  func.func @lstm_classifier_kernel(%arg0: i32, %arg1: i32, %arg2: memref<8x8x128xf32, #tpu.memory_space<vmem>>, %arg3: memref<128x512xf32, #tpu.memory_space<vmem>>, %arg4: memref<128x512xf32, #tpu.memory_space<vmem>>, %arg5: memref<1x512xf32, #tpu.memory_space<vmem>>, %arg6: memref<128x128xf32, #tpu.memory_space<vmem>>, %arg7: memref<1x128xf32, #tpu.memory_space<vmem>>, %arg8: memref<8x128xf32, #tpu.memory_space<vmem>>, %arg9: memref<8x8x512xf32, #tpu.memory_space<vmem>>, %arg10: memref<8x128xf32, #tpu.memory_space<vmem>>, %arg11: memref<8x128xf32, #tpu.memory_space<vmem>>) attributes {dimension_semantics = [#tpu.dimension_semantics<parallel>, #tpu.dimension_semantics<arbitrary>], iteration_bounds = array<i64: 1, 1>, scalar_prefetch = 0 : i64, scratch_operands = 3 : i64, tpu.core_type = #tpu.core_type<tc>, window_params = [{transform_indices = @transform_0, window_bounds = array<i64: 8, 8, 128>}, {pipeline_mode = #tpu.pipeline_mode<synchronous>, transform_indices = @transform_1, window_bounds = array<i64: 128, 512>}, {pipeline_mode = #tpu.pipeline_mode<synchronous>, transform_indices = @transform_2, window_bounds = array<i64: 128, 512>}, {pipeline_mode = #tpu.pipeline_mode<synchronous>, transform_indices = @transform_3, window_bounds = array<i64: 1, 512>}, {pipeline_mode = #tpu.pipeline_mode<synchronous>, transform_indices = @transform_4, window_bounds = array<i64: 128, 128>}, {pipeline_mode = #tpu.pipeline_mode<synchronous>, transform_indices = @transform_5, window_bounds = array<i64: 1, 128>}, {transform_indices = @transform_6, window_bounds = array<i64: 8, 128>}]} {
    %c0 = arith.constant 0 : index
    %c0_0 = arith.constant 0 : index
    %c0_1 = arith.constant 0 : index
    %0 = vector.load %arg2[%c0, %c0_0, %c0_1] : memref<8x8x128xf32, #tpu.memory_space<vmem>>, vector<8x8x128xf32>
    %1 = vector.shape_cast %0 : vector<8x8x128xf32> to vector<64x128xf32>
    %c0_2 = arith.constant 0 : index
    %c0_3 = arith.constant 0 : index
    %2 = vector.load %arg3[%c0_2, %c0_3] : memref<128x512xf32, #tpu.memory_space<vmem>>, vector<128x512xf32>
    %cst = arith.constant dense<0.000000e+00> : vector<64x512xf32>
    %3 = tpu.matmul %1, %2, %cst {dimension_numbers = #tpu.dot_dimension_numbers<[1], [0], [0], [1], [0, 0, 1, 1], [], []>} : vector<64x128xf32>, vector<128x512xf32>, vector<64x512xf32> -> vector<64x512xf32>
    %c0_4 = arith.constant 0 : index
    %c0_5 = arith.constant 0 : index
    %4 = vector.load %arg5[%c0_4, %c0_5] : memref<1x512xf32, #tpu.memory_space<vmem>>, vector<1x512xf32>
    %5 = vector.broadcast %4 : vector<1x512xf32> to vector<64x512xf32>
    %6 = arith.addf %3, %5 : vector<64x512xf32>
    %c8_i32 = arith.constant 8 : i32
    %7 = arith.muli %arg1, %c8_i32 : i32
    %8 = tpu.assume_multiple %7, 8 : i32
    %9 = vector.shape_cast %6 : vector<64x512xf32> to vector<8x8x512xf32>
    %10 = arith.index_cast %8 : i32 to index
    %c0_6 = arith.constant 0 : index
    %c0_7 = arith.constant 0 : index
    %11 = vector.load %arg9[%10, %c0_6, %c0_7] : memref<8x8x512xf32, #tpu.memory_space<vmem>>, vector<8x8x512xf32>
    tpu.vector_store %arg9[%10, %c0_6, %c0_7], %9 {strides = array<i32>} : memref<8x8x512xf32, #tpu.memory_space<vmem>>, vector<8x8x512xf32>,
    %c0_i32 = arith.constant 0 : i32
    %12 = arith.cmpi eq, %arg1, %c0_i32 : i32
    %13 = arith.extui %12 : i1 to i32
    %c0_i32_8 = arith.constant 0 : i32
    %14 = arith.cmpi ne, %13, %c0_i32_8 : i32
    scf.if %14 {
      %cst_9 = arith.constant 0.000000e+00 : f32
      %15 = vector.broadcast %cst_9 : f32 to vector<8x128xf32>
      %c0_10 = arith.constant 0 : index
      %c0_11 = arith.constant 0 : index
      %16 = vector.load %arg10[%c0_10, %c0_11] : memref<8x128xf32, #tpu.memory_space<vmem>>, vector<8x128xf32>
      tpu.vector_store %arg10[%c0_10, %c0_11], %15 {strides = array<i32>} : memref<8x128xf32, #tpu.memory_space<vmem>>, vector<8x128xf32>,
      %cst_12 = arith.constant 0.000000e+00 : f32
      %17 = vector.broadcast %cst_12 : f32 to vector<8x128xf32>
      %c0_13 = arith.constant 0 : index
      %c0_14 = arith.constant 0 : index
      %18 = vector.load %arg11[%c0_13, %c0_14] : memref<8x128xf32, #tpu.memory_space<vmem>>, vector<8x128xf32>
      tpu.vector_store %arg11[%c0_13, %c0_14], %17 {strides = array<i32>} : memref<8x128xf32, #tpu.memory_space<vmem>>, vector<8x128xf32>,
      %c0_i32_15 = arith.constant 0 : i32
      %c0_16 = arith.constant 0 : index
      %c0_17 = arith.constant 0 : index
      %19 = vector.load %arg10[%c0_16, %c0_17] : memref<8x128xf32, #tpu.memory_space<vmem>>, vector<8x128xf32>
      %c0_18 = arith.constant 0 : index
      %c0_19 = arith.constant 0 : index
      %20 = vector.load %arg11[%c0_18, %c0_19] : memref<8x128xf32, #tpu.memory_space<vmem>>, vector<8x128xf32>
      %21 = arith.index_cast %c0_i32_15 : i32 to index
      %c0_20 = arith.constant 0 : index
      %c0_21 = arith.constant 0 : index
      %22 = vector.load %arg9[%21, %c0_20, %c0_21] : memref<8x8x512xf32, #tpu.memory_space<vmem>>, vector<1x8x512xf32>
      %23 = vector.shape_cast %22 : vector<1x8x512xf32> to vector<8x512xf32>
      %24 = vector.extract_strided_slice %23 {offsets = [0, 0], sizes = [8, 128], strides = [1, 1]} : vector<8x512xf32> to vector<8x128xf32>
      %c0_22 = arith.constant 0 : index
      %c0_23 = arith.constant 0 : index
      %25 = vector.load %arg4[%c0_22, %c0_23] : memref<128x512xf32, #tpu.memory_space<vmem>>, vector<128x128xf32>
      %cst_24 = arith.constant dense<0.000000e+00> : vector<8x128xf32>
      %26 = tpu.matmul %19, %25, %cst_24 {dimension_numbers = #tpu.dot_dimension_numbers<[1], [0], [0], [1], [0, 0, 1, 1], [], []>} : vector<8x128xf32>, vector<128x128xf32>, vector<8x128xf32> -> vector<8x128xf32>
      %27 = arith.addf %24, %26 : vector<8x128xf32>
      %28 = arith.negf %27 : vector<8x128xf32>
      %29 = math.exp %28 : vector<8x128xf32>
      %cst_25 = arith.constant 1.000000e+00 : f32
      %30 = vector.broadcast %cst_25 : f32 to vector<8x128xf32>
      %31 = arith.addf %30, %29 : vector<8x128xf32>
      %32 = arith.divf %30, %31 : vector<8x128xf32>
      %33 = vector.extract_strided_slice %23 {offsets = [0, 128], sizes = [8, 128], strides = [1, 1]} : vector<8x512xf32> to vector<8x128xf32>
      %c0_26 = arith.constant 0 : index
      %c128 = arith.constant 128 : index
      %34 = vector.load %arg4[%c0_26, %c128] : memref<128x512xf32, #tpu.memory_space<vmem>>, vector<128x128xf32>
      %cst_27 = arith.constant dense<0.000000e+00> : vector<8x128xf32>
      %35 = tpu.matmul %19, %34, %cst_27 {dimension_numbers = #tpu.dot_dimension_numbers<[1], [0], [0], [1], [0, 0, 1, 1], [], []>} : vector<8x128xf32>, vector<128x128xf32>, vector<8x128xf32> -> vector<8x128xf32>
      %36 = arith.addf %33, %35 : vector<8x128xf32>
      %37 = arith.negf %36 : vector<8x128xf32>
      %38 = math.exp %37 : vector<8x128xf32>
      %cst_28 = arith.constant 1.000000e+00 : f32
      %39 = vector.broadcast %cst_28 : f32 to vector<8x128xf32>
      %40 = arith.addf %39, %38 : vector<8x128xf32>
      %41 = arith.divf %39, %40 : vector<8x128xf32>
      %42 = vector.extract_strided_slice %23 {offsets = [0, 256], sizes = [8, 128], strides = [1, 1]} : vector<8x512xf32> to vector<8x128xf32>
      %c0_29 = arith.constant 0 : index
      %c256 = arith.constant 256 : index
      %43 = vector.load %arg4[%c0_29, %c256] : memref<128x512xf32, #tpu.memory_space<vmem>>, vector<128x128xf32>
      %cst_30 = arith.constant dense<0.000000e+00> : vector<8x128xf32>
      %44 = tpu.matmul %19, %43, %cst_30 {dimension_numbers = #tpu.dot_dimension_numbers<[1], [0], [0], [1], [0, 0, 1, 1], [], []>} : vector<8x128xf32>, vector<128x128xf32>, vector<8x128xf32> -> vector<8x128xf32>
      %45 = arith.addf %42, %44 : vector<8x128xf32>
      %46 = math.tanh %45 : vector<8x128xf32>
      %47 = vector.extract_strided_slice %23 {offsets = [0, 384], sizes = [8, 128], strides = [1, 1]} : vector<8x512xf32> to vector<8x128xf32>
      %c0_31 = arith.constant 0 : index
      %c384 = arith.constant 384 : index
      %48 = vector.load %arg4[%c0_31, %c384] : memref<128x512xf32, #tpu.memory_space<vmem>>, vector<128x128xf32>
      %cst_32 = arith.constant dense<0.000000e+00> : vector<8x128xf32>
      %49 = tpu.matmul %19, %48, %cst_32 {dimension_numbers = #tpu.dot_dimension_numbers<[1], [0], [0], [1], [0, 0, 1, 1], [], []>} : vector<8x128xf32>, vector<128x128xf32>, vector<8x128xf32> -> vector<8x128xf32>
      %50 = arith.addf %47, %49 : vector<8x128xf32>
      %51 = arith.negf %50 : vector<8x128xf32>
      %52 = math.exp %51 : vector<8x128xf32>
      %cst_33 = arith.constant 1.000000e+00 : f32
      %53 = vector.broadcast %cst_33 : f32 to vector<8x128xf32>
      %54 = arith.addf %53, %52 : vector<8x128xf32>
      %55 = arith.divf %53, %54 : vector<8x128xf32>
      %56 = arith.mulf %41, %20 : vector<8x128xf32>
      %57 = arith.mulf %32, %46 : vector<8x128xf32>
      %58 = arith.addf %56, %57 : vector<8x128xf32>
      %59 = math.tanh %58 : vector<8x128xf32>
      %60 = arith.mulf %55, %59 : vector<8x128xf32>
      %c0_34 = arith.constant 0 : index
      %c0_35 = arith.constant 0 : index
      %61 = vector.load %arg10[%c0_34, %c0_35] : memref<8x128xf32, #tpu.memory_space<vmem>>, vector<8x128xf32>
      tpu.vector_store %arg10[%c0_34, %c0_35], %60 {strides = array<i32>} : memref<8x128xf32, #tpu.memory_space<vmem>>, vector<8x128xf32>,
      %c0_36 = arith.constant 0 : index
      %c0_37 = arith.constant 0 : index
      %62 = vector.load %arg11[%c0_36, %c0_37] : memref<8x128xf32, #tpu.memory_space<vmem>>, vector<8x128xf32>
      tpu.vector_store %arg11[%c0_36, %c0_37], %58 {strides = array<i32>} : memref<8x128xf32, #tpu.memory_space<vmem>>, vector<8x128xf32>,
      %c1_i32 = arith.constant 1 : i32
      %c0_38 = arith.constant 0 : index
      %c0_39 = arith.constant 0 : index
      %63 = vector.load %arg10[%c0_38, %c0_39] : memref<8x128xf32, #tpu.memory_space<vmem>>, vector<8x128xf32>
      %c0_40 = arith.constant 0 : index
      %c0_41 = arith.constant 0 : index
      %64 = vector.load %arg11[%c0_40, %c0_41] : memref<8x128xf32, #tpu.memory_space<vmem>>, vector<8x128xf32>
      %65 = arith.index_cast %c1_i32 : i32 to index
      %c0_42 = arith.constant 0 : index
      %c0_43 = arith.constant 0 : index
      %66 = vector.load %arg9[%65, %c0_42, %c0_43] : memref<8x8x512xf32, #tpu.memory_space<vmem>>, vector<1x8x512xf32>
      %67 = vector.shape_cast %66 : vector<1x8x512xf32> to vector<8x512xf32>
      %68 = vector.extract_strided_slice %67 {offsets = [0, 0], sizes = [8, 128], strides = [1, 1]} : vector<8x512xf32> to vector<8x128xf32>
      %c0_44 = arith.constant 0 : index
      %c0_45 = arith.constant 0 : index
      %69 = vector.load %arg4[%c0_44, %c0_45] : memref<128x512xf32, #tpu.memory_space<vmem>>, vector<128x128xf32>
      %cst_46 = arith.constant dense<0.000000e+00> : vector<8x128xf32>
      %70 = tpu.matmul %63, %69, %cst_46 {dimension_numbers = #tpu.dot_dimension_numbers<[1], [0], [0], [1], [0, 0, 1, 1], [], []>} : vector<8x128xf32>, vector<128x128xf32>, vector<8x128xf32> -> vector<8x128xf32>
      %71 = arith.addf %68, %70 : vector<8x128xf32>
      %72 = arith.negf %71 : vector<8x128xf32>
      %73 = math.exp %72 : vector<8x128xf32>
      %cst_47 = arith.constant 1.000000e+00 : f32
      %74 = vector.broadcast %cst_47 : f32 to vector<8x128xf32>
      %75 = arith.addf %74, %73 : vector<8x128xf32>
      %76 = arith.divf %74, %75 : vector<8x128xf32>
      %77 = vector.extract_strided_slice %67 {offsets = [0, 128], sizes = [8, 128], strides = [1, 1]} : vector<8x512xf32> to vector<8x128xf32>
      %c0_48 = arith.constant 0 : index
      %c128_49 = arith.constant 128 : index
      %78 = vector.load %arg4[%c0_48, %c128_49] : memref<128x512xf32, #tpu.memory_space<vmem>>, vector<128x128xf32>
      %cst_50 = arith.constant dense<0.000000e+00> : vector<8x128xf32>
      %79 = tpu.matmul %63, %78, %cst_50 {dimension_numbers = #tpu.dot_dimension_numbers<[1], [0], [0], [1], [0, 0, 1, 1], [], []>} : vector<8x128xf32>, vector<128x128xf32>, vector<8x128xf32> -> vector<8x128xf32>
      %80 = arith.addf %77, %79 : vector<8x128xf32>
      %81 = arith.negf %80 : vector<8x128xf32>
      %82 = math.exp %81 : vector<8x128xf32>
      %cst_51 = arith.constant 1.000000e+00 : f32
      %83 = vector.broadcast %cst_51 : f32 to vector<8x128xf32>
      %84 = arith.addf %83, %82 : vector<8x128xf32>
      %85 = arith.divf %83, %84 : vector<8x128xf32>
      %86 = vector.extract_strided_slice %67 {offsets = [0, 256], sizes = [8, 128], strides = [1, 1]} : vector<8x512xf32> to vector<8x128xf32>
      %c0_52 = arith.constant 0 : index
      %c256_53 = arith.constant 256 : index
      %87 = vector.load %arg4[%c0_52, %c256_53] : memref<128x512xf32, #tpu.memory_space<vmem>>, vector<128x128xf32>
      %cst_54 = arith.constant dense<0.000000e+00> : vector<8x128xf32>
      %88 = tpu.matmul %63, %87, %cst_54 {dimension_numbers = #tpu.dot_dimension_numbers<[1], [0], [0], [1], [0, 0, 1, 1], [], []>} : vector<8x128xf32>, vector<128x128xf32>, vector<8x128xf32> -> vector<8x128xf32>
      %89 = arith.addf %86, %88 : vector<8x128xf32>
      %90 = math.tanh %89 : vector<8x128xf32>
      %91 = vector.extract_strided_slice %67 {offsets = [0, 384], sizes = [8, 128], strides = [1, 1]} : vector<8x512xf32> to vector<8x128xf32>
      %c0_55 = arith.constant 0 : index
      %c384_56 = arith.constant 384 : index
      %92 = vector.load %arg4[%c0_55, %c384_56] : memref<128x512xf32, #tpu.memory_space<vmem>>, vector<128x128xf32>
      %cst_57 = arith.constant dense<0.000000e+00> : vector<8x128xf32>
      %93 = tpu.matmul %63, %92, %cst_57 {dimension_numbers = #tpu.dot_dimension_numbers<[1], [0], [0], [1], [0, 0, 1, 1], [], []>} : vector<8x128xf32>, vector<128x128xf32>, vector<8x128xf32> -> vector<8x128xf32>
      %94 = arith.addf %91, %93 : vector<8x128xf32>
      %95 = arith.negf %94 : vector<8x128xf32>
      %96 = math.exp %95 : vector<8x128xf32>
      %cst_58 = arith.constant 1.000000e+00 : f32
      %97 = vector.broadcast %cst_58 : f32 to vector<8x128xf32>
      %98 = arith.addf %97, %96 : vector<8x128xf32>
      %99 = arith.divf %97, %98 : vector<8x128xf32>
      %100 = arith.mulf %85, %64 : vector<8x128xf32>
      %101 = arith.mulf %76, %90 : vector<8x128xf32>
      %102 = arith.addf %100, %101 : vector<8x128xf32>
      %103 = math.tanh %102 : vector<8x128xf32>
      %104 = arith.mulf %99, %103 : vector<8x128xf32>
      %c0_59 = arith.constant 0 : index
      %c0_60 = arith.constant 0 : index
      %105 = vector.load %arg10[%c0_59, %c0_60] : memref<8x128xf32, #tpu.memory_space<vmem>>, vector<8x128xf32>
      tpu.vector_store %arg10[%c0_59, %c0_60], %104 {strides = array<i32>} : memref<8x128xf32, #tpu.memory_space<vmem>>, vector<8x128xf32>,
      %c0_61 = arith.constant 0 : index
      %c0_62 = arith.constant 0 : index
      %106 = vector.load %arg11[%c0_61, %c0_62] : memref<8x128xf32, #tpu.memory_space<vmem>>, vector<8x128xf32>
      tpu.vector_store %arg11[%c0_61, %c0_62], %102 {strides = array<i32>} : memref<8x128xf32, #tpu.memory_space<vmem>>, vector<8x128xf32>,
      %c2_i32 = arith.constant 2 : i32
      %c0_63 = arith.constant 0 : index
      %c0_64 = arith.constant 0 : index
      %107 = vector.load %arg10[%c0_63, %c0_64] : memref<8x128xf32, #tpu.memory_space<vmem>>, vector<8x128xf32>
      %c0_65 = arith.constant 0 : index
      %c0_66 = arith.constant 0 : index
      %108 = vector.load %arg11[%c0_65, %c0_66] : memref<8x128xf32, #tpu.memory_space<vmem>>, vector<8x128xf32>
      %109 = arith.index_cast %c2_i32 : i32 to index
      %c0_67 = arith.constant 0 : index
      %c0_68 = arith.constant 0 : index
      %110 = vector.load %arg9[%109, %c0_67, %c0_68] : memref<8x8x512xf32, #tpu.memory_space<vmem>>, vector<1x8x512xf32>
      %111 = vector.shape_cast %110 : vector<1x8x512xf32> to vector<8x512xf32>
      %112 = vector.extract_strided_slice %111 {offsets = [0, 0], sizes = [8, 128], strides = [1, 1]} : vector<8x512xf32> to vector<8x128xf32>
      %c0_69 = arith.constant 0 : index
      %c0_70 = arith.constant 0 : index
      %113 = vector.load %arg4[%c0_69, %c0_70] : memref<128x512xf32, #tpu.memory_space<vmem>>, vector<128x128xf32>
      %cst_71 = arith.constant dense<0.000000e+00> : vector<8x128xf32>
      %114 = tpu.matmul %107, %113, %cst_71 {dimension_numbers = #tpu.dot_dimension_numbers<[1], [0], [0], [1], [0, 0, 1, 1], [], []>} : vector<8x128xf32>, vector<128x128xf32>, vector<8x128xf32> -> vector<8x128xf32>
      %115 = arith.addf %112, %114 : vector<8x128xf32>
      %116 = arith.negf %115 : vector<8x128xf32>
      %117 = math.exp %116 : vector<8x128xf32>
      %cst_72 = arith.constant 1.000000e+00 : f32
      %118 = vector.broadcast %cst_72 : f32 to vector<8x128xf32>
      %119 = arith.addf %118, %117 : vector<8x128xf32>
      %120 = arith.divf %118, %119 : vector<8x128xf32>
      %121 = vector.extract_strided_slice %111 {offsets = [0, 128], sizes = [8, 128], strides = [1, 1]} : vector<8x512xf32> to vector<8x128xf32>
      %c0_73 = arith.constant 0 : index
      %c128_74 = arith.constant 128 : index
      %122 = vector.load %arg4[%c0_73, %c128_74] : memref<128x512xf32, #tpu.memory_space<vmem>>, vector<128x128xf32>
      %cst_75 = arith.constant dense<0.000000e+00> : vector<8x128xf32>
      %123 = tpu.matmul %107, %122, %cst_75 {dimension_numbers = #tpu.dot_dimension_numbers<[1], [0], [0], [1], [0, 0, 1, 1], [], []>} : vector<8x128xf32>, vector<128x128xf32>, vector<8x128xf32> -> vector<8x128xf32>
      %124 = arith.addf %121, %123 : vector<8x128xf32>
      %125 = arith.negf %124 : vector<8x128xf32>
      %126 = math.exp %125 : vector<8x128xf32>
      %cst_76 = arith.constant 1.000000e+00 : f32
      %127 = vector.broadcast %cst_76 : f32 to vector<8x128xf32>
      %128 = arith.addf %127, %126 : vector<8x128xf32>
      %129 = arith.divf %127, %128 : vector<8x128xf32>
      %130 = vector.extract_strided_slice %111 {offsets = [0, 256], sizes = [8, 128], strides = [1, 1]} : vector<8x512xf32> to vector<8x128xf32>
      %c0_77 = arith.constant 0 : index
      %c256_78 = arith.constant 256 : index
      %131 = vector.load %arg4[%c0_77, %c256_78] : memref<128x512xf32, #tpu.memory_space<vmem>>, vector<128x128xf32>
      %cst_79 = arith.constant dense<0.000000e+00> : vector<8x128xf32>
      %132 = tpu.matmul %107, %131, %cst_79 {dimension_numbers = #tpu.dot_dimension_numbers<[1], [0], [0], [1], [0, 0, 1, 1], [], []>} : vector<8x128xf32>, vector<128x128xf32>, vector<8x128xf32> -> vector<8x128xf32>
      %133 = arith.addf %130, %132 : vector<8x128xf32>
      %134 = math.tanh %133 : vector<8x128xf32>
      %135 = vector.extract_strided_slice %111 {offsets = [0, 384], sizes = [8, 128], strides = [1, 1]} : vector<8x512xf32> to vector<8x128xf32>
      %c0_80 = arith.constant 0 : index
      %c384_81 = arith.constant 384 : index
      %136 = vector.load %arg4[%c0_80, %c384_81] : memref<128x512xf32, #tpu.memory_space<vmem>>, vector<128x128xf32>
      %cst_82 = arith.constant dense<0.000000e+00> : vector<8x128xf32>
      %137 = tpu.matmul %107, %136, %cst_82 {dimension_numbers = #tpu.dot_dimension_numbers<[1], [0], [0], [1], [0, 0, 1, 1], [], []>} : vector<8x128xf32>, vector<128x128xf32>, vector<8x128xf32> -> vector<8x128xf32>
      %138 = arith.addf %135, %137 : vector<8x128xf32>
      %139 = arith.negf %138 : vector<8x128xf32>
      %140 = math.exp %139 : vector<8x128xf32>
      %cst_83 = arith.constant 1.000000e+00 : f32
      %141 = vector.broadcast %cst_83 : f32 to vector<8x128xf32>
      %142 = arith.addf %141, %140 : vector<8x128xf32>
      %143 = arith.divf %141, %142 : vector<8x128xf32>
      %144 = arith.mulf %129, %108 : vector<8x128xf32>
      %145 = arith.mulf %120, %134 : vector<8x128xf32>
      %146 = arith.addf %144, %145 : vector<8x128xf32>
      %147 = math.tanh %146 : vector<8x128xf32>
      %148 = arith.mulf %143, %147 : vector<8x128xf32>
      %c0_84 = arith.constant 0 : index
      %c0_85 = arith.constant 0 : index
      %149 = vector.load %arg10[%c0_84, %c0_85] : memref<8x128xf32, #tpu.memory_space<vmem>>, vector<8x128xf32>
      tpu.vector_store %arg10[%c0_84, %c0_85], %148 {strides = array<i32>} : memref<8x128xf32, #tpu.memory_space<vmem>>, vector<8x128xf32>,
      %c0_86 = arith.constant 0 : index
      %c0_87 = arith.constant 0 : index
      %150 = vector.load %arg11[%c0_86, %c0_87] : memref<8x128xf32, #tpu.memory_space<vmem>>, vector<8x128xf32>
      tpu.vector_store %arg11[%c0_86, %c0_87], %146 {strides = array<i32>} : memref<8x128xf32, #tpu.memory_space<vmem>>, vector<8x128xf32>,
      %c3_i32 = arith.constant 3 : i32
      %c0_88 = arith.constant 0 : index
      %c0_89 = arith.constant 0 : index
      %151 = vector.load %arg10[%c0_88, %c0_89] : memref<8x128xf32, #tpu.memory_space<vmem>>, vector<8x128xf32>
      %c0_90 = arith.constant 0 : index
      %c0_91 = arith.constant 0 : index
      %152 = vector.load %arg11[%c0_90, %c0_91] : memref<8x128xf32, #tpu.memory_space<vmem>>, vector<8x128xf32>
      %153 = arith.index_cast %c3_i32 : i32 to index
      %c0_92 = arith.constant 0 : index
      %c0_93 = arith.constant 0 : index
      %154 = vector.load %arg9[%153, %c0_92, %c0_93] : memref<8x8x512xf32, #tpu.memory_space<vmem>>, vector<1x8x512xf32>
      %155 = vector.shape_cast %154 : vector<1x8x512xf32> to vector<8x512xf32>
      %156 = vector.extract_strided_slice %155 {offsets = [0, 0], sizes = [8, 128], strides = [1, 1]} : vector<8x512xf32> to vector<8x128xf32>
      %c0_94 = arith.constant 0 : index
      %c0_95 = arith.constant 0 : index
      %157 = vector.load %arg4[%c0_94, %c0_95] : memref<128x512xf32, #tpu.memory_space<vmem>>, vector<128x128xf32>
      %cst_96 = arith.constant dense<0.000000e+00> : vector<8x128xf32>
      %158 = tpu.matmul %151, %157, %cst_96 {dimension_numbers = #tpu.dot_dimension_numbers<[1], [0], [0], [1], [0, 0, 1, 1], [], []>} : vector<8x128xf32>, vector<128x128xf32>, vector<8x128xf32> -> vector<8x128xf32>
      %159 = arith.addf %156, %158 : vector<8x128xf32>
      %160 = arith.negf %159 : vector<8x128xf32>
      %161 = math.exp %160 : vector<8x128xf32>
      %cst_97 = arith.constant 1.000000e+00 : f32
      %162 = vector.broadcast %cst_97 : f32 to vector<8x128xf32>
      %163 = arith.addf %162, %161 : vector<8x128xf32>
      %164 = arith.divf %162, %163 : vector<8x128xf32>
      %165 = vector.extract_strided_slice %155 {offsets = [0, 128], sizes = [8, 128], strides = [1, 1]} : vector<8x512xf32> to vector<8x128xf32>
      %c0_98 = arith.constant 0 : index
      %c128_99 = arith.constant 128 : index
      %166 = vector.load %arg4[%c0_98, %c128_99] : memref<128x512xf32, #tpu.memory_space<vmem>>, vector<128x128xf32>
      %cst_100 = arith.constant dense<0.000000e+00> : vector<8x128xf32>
      %167 = tpu.matmul %151, %166, %cst_100 {dimension_numbers = #tpu.dot_dimension_numbers<[1], [0], [0], [1], [0, 0, 1, 1], [], []>} : vector<8x128xf32>, vector<128x128xf32>, vector<8x128xf32> -> vector<8x128xf32>
      %168 = arith.addf %165, %167 : vector<8x128xf32>
      %169 = arith.negf %168 : vector<8x128xf32>
      %170 = math.exp %169 : vector<8x128xf32>
      %cst_101 = arith.constant 1.000000e+00 : f32
      %171 = vector.broadcast %cst_101 : f32 to vector<8x128xf32>
      %172 = arith.addf %171, %170 : vector<8x128xf32>
      %173 = arith.divf %171, %172 : vector<8x128xf32>
      %174 = vector.extract_strided_slice %155 {offsets = [0, 256], sizes = [8, 128], strides = [1, 1]} : vector<8x512xf32> to vector<8x128xf32>
      %c0_102 = arith.constant 0 : index
      %c256_103 = arith.constant 256 : index
      %175 = vector.load %arg4[%c0_102, %c256_103] : memref<128x512xf32, #tpu.memory_space<vmem>>, vector<128x128xf32>
      %cst_104 = arith.constant dense<0.000000e+00> : vector<8x128xf32>
      %176 = tpu.matmul %151, %175, %cst_104 {dimension_numbers = #tpu.dot_dimension_numbers<[1], [0], [0], [1], [0, 0, 1, 1], [], []>} : vector<8x128xf32>, vector<128x128xf32>, vector<8x128xf32> -> vector<8x128xf32>
      %177 = arith.addf %174, %176 : vector<8x128xf32>
      %178 = math.tanh %177 : vector<8x128xf32>
      %179 = vector.extract_strided_slice %155 {offsets = [0, 384], sizes = [8, 128], strides = [1, 1]} : vector<8x512xf32> to vector<8x128xf32>
      %c0_105 = arith.constant 0 : index
      %c384_106 = arith.constant 384 : index
      %180 = vector.load %arg4[%c0_105, %c384_106] : memref<128x512xf32, #tpu.memory_space<vmem>>, vector<128x128xf32>
      %cst_107 = arith.constant dense<0.000000e+00> : vector<8x128xf32>
      %181 = tpu.matmul %151, %180, %cst_107 {dimension_numbers = #tpu.dot_dimension_numbers<[1], [0], [0], [1], [0, 0, 1, 1], [], []>} : vector<8x128xf32>, vector<128x128xf32>, vector<8x128xf32> -> vector<8x128xf32>
      %182 = arith.addf %179, %181 : vector<8x128xf32>
      %183 = arith.negf %182 : vector<8x128xf32>
      %184 = math.exp %183 : vector<8x128xf32>
      %cst_108 = arith.constant 1.000000e+00 : f32
      %185 = vector.broadcast %cst_108 : f32 to vector<8x128xf32>
      %186 = arith.addf %185, %184 : vector<8x128xf32>
      %187 = arith.divf %185, %186 : vector<8x128xf32>
      %188 = arith.mulf %173, %152 : vector<8x128xf32>
      %189 = arith.mulf %164, %178 : vector<8x128xf32>
      %190 = arith.addf %188, %189 : vector<8x128xf32>
      %191 = math.tanh %190 : vector<8x128xf32>
      %192 = arith.mulf %187, %191 : vector<8x128xf32>
      %c0_109 = arith.constant 0 : index
      %c0_110 = arith.constant 0 : index
      %193 = vector.load %arg10[%c0_109, %c0_110] : memref<8x128xf32, #tpu.memory_space<vmem>>, vector<8x128xf32>
      tpu.vector_store %arg10[%c0_109, %c0_110], %192 {strides = array<i32>} : memref<8x128xf32, #tpu.memory_space<vmem>>, vector<8x128xf32>,
      %c0_111 = arith.constant 0 : index
      %c0_112 = arith.constant 0 : index
      %194 = vector.load %arg11[%c0_111, %c0_112] : memref<8x128xf32, #tpu.memory_space<vmem>>, vector<8x128xf32>
      tpu.vector_store %arg11[%c0_111, %c0_112], %190 {strides = array<i32>} : memref<8x128xf32, #tpu.memory_space<vmem>>, vector<8x128xf32>,
      %c4_i32 = arith.constant 4 : i32
      %c0_113 = arith.constant 0 : index
      %c0_114 = arith.constant 0 : index
      %195 = vector.load %arg10[%c0_113, %c0_114] : memref<8x128xf32, #tpu.memory_space<vmem>>, vector<8x128xf32>
      %c0_115 = arith.constant 0 : index
      %c0_116 = arith.constant 0 : index
      %196 = vector.load %arg11[%c0_115, %c0_116] : memref<8x128xf32, #tpu.memory_space<vmem>>, vector<8x128xf32>
      %197 = arith.index_cast %c4_i32 : i32 to index
      %c0_117 = arith.constant 0 : index
      %c0_118 = arith.constant 0 : index
      %198 = vector.load %arg9[%197, %c0_117, %c0_118] : memref<8x8x512xf32, #tpu.memory_space<vmem>>, vector<1x8x512xf32>
      %199 = vector.shape_cast %198 : vector<1x8x512xf32> to vector<8x512xf32>
      %200 = vector.extract_strided_slice %199 {offsets = [0, 0], sizes = [8, 128], strides = [1, 1]} : vector<8x512xf32> to vector<8x128xf32>
      %c0_119 = arith.constant 0 : index
      %c0_120 = arith.constant 0 : index
      %201 = vector.load %arg4[%c0_119, %c0_120] : memref<128x512xf32, #tpu.memory_space<vmem>>, vector<128x128xf32>
      %cst_121 = arith.constant dense<0.000000e+00> : vector<8x128xf32>
      %202 = tpu.matmul %195, %201, %cst_121 {dimension_numbers = #tpu.dot_dimension_numbers<[1], [0], [0], [1], [0, 0, 1, 1], [], []>} : vector<8x128xf32>, vector<128x128xf32>, vector<8x128xf32> -> vector<8x128xf32>
      %203 = arith.addf %200, %202 : vector<8x128xf32>
      %204 = arith.negf %203 : vector<8x128xf32>
      %205 = math.exp %204 : vector<8x128xf32>
      %cst_122 = arith.constant 1.000000e+00 : f32
      %206 = vector.broadcast %cst_122 : f32 to vector<8x128xf32>
      %207 = arith.addf %206, %205 : vector<8x128xf32>
      %208 = arith.divf %206, %207 : vector<8x128xf32>
      %209 = vector.extract_strided_slice %199 {offsets = [0, 128], sizes = [8, 128], strides = [1, 1]} : vector<8x512xf32> to vector<8x128xf32>
      %c0_123 = arith.constant 0 : index
      %c128_124 = arith.constant 128 : index
      %210 = vector.load %arg4[%c0_123, %c128_124] : memref<128x512xf32, #tpu.memory_space<vmem>>, vector<128x128xf32>
      %cst_125 = arith.constant dense<0.000000e+00> : vector<8x128xf32>
      %211 = tpu.matmul %195, %210, %cst_125 {dimension_numbers = #tpu.dot_dimension_numbers<[1], [0], [0], [1], [0, 0, 1, 1], [], []>} : vector<8x128xf32>, vector<128x128xf32>, vector<8x128xf32> -> vector<8x128xf32>
      %212 = arith.addf %209, %211 : vector<8x128xf32>
      %213 = arith.negf %212 : vector<8x128xf32>
      %214 = math.exp %213 : vector<8x128xf32>
      %cst_126 = arith.constant 1.000000e+00 : f32
      %215 = vector.broadcast %cst_126 : f32 to vector<8x128xf32>
      %216 = arith.addf %215, %214 : vector<8x128xf32>
      %217 = arith.divf %215, %216 : vector<8x128xf32>
      %218 = vector.extract_strided_slice %199 {offsets = [0, 256], sizes = [8, 128], strides = [1, 1]} : vector<8x512xf32> to vector<8x128xf32>
      %c0_127 = arith.constant 0 : index
      %c256_128 = arith.constant 256 : index
      %219 = vector.load %arg4[%c0_127, %c256_128] : memref<128x512xf32, #tpu.memory_space<vmem>>, vector<128x128xf32>
      %cst_129 = arith.constant dense<0.000000e+00> : vector<8x128xf32>
      %220 = tpu.matmul %195, %219, %cst_129 {dimension_numbers = #tpu.dot_dimension_numbers<[1], [0], [0], [1], [0, 0, 1, 1], [], []>} : vector<8x128xf32>, vector<128x128xf32>, vector<8x128xf32> -> vector<8x128xf32>
      %221 = arith.addf %218, %220 : vector<8x128xf32>
      %222 = math.tanh %221 : vector<8x128xf32>
      %223 = vector.extract_strided_slice %199 {offsets = [0, 384], sizes = [8, 128], strides = [1, 1]} : vector<8x512xf32> to vector<8x128xf32>
      %c0_130 = arith.constant 0 : index
      %c384_131 = arith.constant 384 : index
      %224 = vector.load %arg4[%c0_130, %c384_131] : memref<128x512xf32, #tpu.memory_space<vmem>>, vector<128x128xf32>
      %cst_132 = arith.constant dense<0.000000e+00> : vector<8x128xf32>
      %225 = tpu.matmul %195, %224, %cst_132 {dimension_numbers = #tpu.dot_dimension_numbers<[1], [0], [0], [1], [0, 0, 1, 1], [], []>} : vector<8x128xf32>, vector<128x128xf32>, vector<8x128xf32> -> vector<8x128xf32>
      %226 = arith.addf %223, %225 : vector<8x128xf32>
      %227 = arith.negf %226 : vector<8x128xf32>
      %228 = math.exp %227 : vector<8x128xf32>
      %cst_133 = arith.constant 1.000000e+00 : f32
      %229 = vector.broadcast %cst_133 : f32 to vector<8x128xf32>
      %230 = arith.addf %229, %228 : vector<8x128xf32>
      %231 = arith.divf %229, %230 : vector<8x128xf32>
      %232 = arith.mulf %217, %196 : vector<8x128xf32>
      %233 = arith.mulf %208, %222 : vector<8x128xf32>
      %234 = arith.addf %232, %233 : vector<8x128xf32>
      %235 = math.tanh %234 : vector<8x128xf32>
      %236 = arith.mulf %231, %235 : vector<8x128xf32>
      %c0_134 = arith.constant 0 : index
      %c0_135 = arith.constant 0 : index
      %237 = vector.load %arg10[%c0_134, %c0_135] : memref<8x128xf32, #tpu.memory_space<vmem>>, vector<8x128xf32>
      tpu.vector_store %arg10[%c0_134, %c0_135], %236 {strides = array<i32>} : memref<8x128xf32, #tpu.memory_space<vmem>>, vector<8x128xf32>,
      %c0_136 = arith.constant 0 : index
      %c0_137 = arith.constant 0 : index
      %238 = vector.load %arg11[%c0_136, %c0_137] : memref<8x128xf32, #tpu.memory_space<vmem>>, vector<8x128xf32>
      tpu.vector_store %arg11[%c0_136, %c0_137], %234 {strides = array<i32>} : memref<8x128xf32, #tpu.memory_space<vmem>>, vector<8x128xf32>,
      %c5_i32 = arith.constant 5 : i32
      %c0_138 = arith.constant 0 : index
      %c0_139 = arith.constant 0 : index
      %239 = vector.load %arg10[%c0_138, %c0_139] : memref<8x128xf32, #tpu.memory_space<vmem>>, vector<8x128xf32>
      %c0_140 = arith.constant 0 : index
      %c0_141 = arith.constant 0 : index
      %240 = vector.load %arg11[%c0_140, %c0_141] : memref<8x128xf32, #tpu.memory_space<vmem>>, vector<8x128xf32>
      %241 = arith.index_cast %c5_i32 : i32 to index
      %c0_142 = arith.constant 0 : index
      %c0_143 = arith.constant 0 : index
      %242 = vector.load %arg9[%241, %c0_142, %c0_143] : memref<8x8x512xf32, #tpu.memory_space<vmem>>, vector<1x8x512xf32>
      %243 = vector.shape_cast %242 : vector<1x8x512xf32> to vector<8x512xf32>
      %244 = vector.extract_strided_slice %243 {offsets = [0, 0], sizes = [8, 128], strides = [1, 1]} : vector<8x512xf32> to vector<8x128xf32>
      %c0_144 = arith.constant 0 : index
      %c0_145 = arith.constant 0 : index
      %245 = vector.load %arg4[%c0_144, %c0_145] : memref<128x512xf32, #tpu.memory_space<vmem>>, vector<128x128xf32>
      %cst_146 = arith.constant dense<0.000000e+00> : vector<8x128xf32>
      %246 = tpu.matmul %239, %245, %cst_146 {dimension_numbers = #tpu.dot_dimension_numbers<[1], [0], [0], [1], [0, 0, 1, 1], [], []>} : vector<8x128xf32>, vector<128x128xf32>, vector<8x128xf32> -> vector<8x128xf32>
      %247 = arith.addf %244, %246 : vector<8x128xf32>
      %248 = arith.negf %247 : vector<8x128xf32>
      %249 = math.exp %248 : vector<8x128xf32>
      %cst_147 = arith.constant 1.000000e+00 : f32
      %250 = vector.broadcast %cst_147 : f32 to vector<8x128xf32>
      %251 = arith.addf %250, %249 : vector<8x128xf32>
      %252 = arith.divf %250, %251 : vector<8x128xf32>
      %253 = vector.extract_strided_slice %243 {offsets = [0, 128], sizes = [8, 128], strides = [1, 1]} : vector<8x512xf32> to vector<8x128xf32>
      %c0_148 = arith.constant 0 : index
      %c128_149 = arith.constant 128 : index
      %254 = vector.load %arg4[%c0_148, %c128_149] : memref<128x512xf32, #tpu.memory_space<vmem>>, vector<128x128xf32>
      %cst_150 = arith.constant dense<0.000000e+00> : vector<8x128xf32>
      %255 = tpu.matmul %239, %254, %cst_150 {dimension_numbers = #tpu.dot_dimension_numbers<[1], [0], [0], [1], [0, 0, 1, 1], [], []>} : vector<8x128xf32>, vector<128x128xf32>, vector<8x128xf32> -> vector<8x128xf32>
      %256 = arith.addf %253, %255 : vector<8x128xf32>
      %257 = arith.negf %256 : vector<8x128xf32>
      %258 = math.exp %257 : vector<8x128xf32>
      %cst_151 = arith.constant 1.000000e+00 : f32
      %259 = vector.broadcast %cst_151 : f32 to vector<8x128xf32>
      %260 = arith.addf %259, %258 : vector<8x128xf32>
      %261 = arith.divf %259, %260 : vector<8x128xf32>
      %262 = vector.extract_strided_slice %243 {offsets = [0, 256], sizes = [8, 128], strides = [1, 1]} : vector<8x512xf32> to vector<8x128xf32>
      %c0_152 = arith.constant 0 : index
      %c256_153 = arith.constant 256 : index
      %263 = vector.load %arg4[%c0_152, %c256_153] : memref<128x512xf32, #tpu.memory_space<vmem>>, vector<128x128xf32>
      %cst_154 = arith.constant dense<0.000000e+00> : vector<8x128xf32>
      %264 = tpu.matmul %239, %263, %cst_154 {dimension_numbers = #tpu.dot_dimension_numbers<[1], [0], [0], [1], [0, 0, 1, 1], [], []>} : vector<8x128xf32>, vector<128x128xf32>, vector<8x128xf32> -> vector<8x128xf32>
      %265 = arith.addf %262, %264 : vector<8x128xf32>
      %266 = math.tanh %265 : vector<8x128xf32>
      %267 = vector.extract_strided_slice %243 {offsets = [0, 384], sizes = [8, 128], strides = [1, 1]} : vector<8x512xf32> to vector<8x128xf32>
      %c0_155 = arith.constant 0 : index
      %c384_156 = arith.constant 384 : index
      %268 = vector.load %arg4[%c0_155, %c384_156] : memref<128x512xf32, #tpu.memory_space<vmem>>, vector<128x128xf32>
      %cst_157 = arith.constant dense<0.000000e+00> : vector<8x128xf32>
      %269 = tpu.matmul %239, %268, %cst_157 {dimension_numbers = #tpu.dot_dimension_numbers<[1], [0], [0], [1], [0, 0, 1, 1], [], []>} : vector<8x128xf32>, vector<128x128xf32>, vector<8x128xf32> -> vector<8x128xf32>
      %270 = arith.addf %267, %269 : vector<8x128xf32>
      %271 = arith.negf %270 : vector<8x128xf32>
      %272 = math.exp %271 : vector<8x128xf32>
      %cst_158 = arith.constant 1.000000e+00 : f32
      %273 = vector.broadcast %cst_158 : f32 to vector<8x128xf32>
      %274 = arith.addf %273, %272 : vector<8x128xf32>
      %275 = arith.divf %273, %274 : vector<8x128xf32>
      %276 = arith.mulf %261, %240 : vector<8x128xf32>
      %277 = arith.mulf %252, %266 : vector<8x128xf32>
      %278 = arith.addf %276, %277 : vector<8x128xf32>
      %279 = math.tanh %278 : vector<8x128xf32>
      %280 = arith.mulf %275, %279 : vector<8x128xf32>
      %c0_159 = arith.constant 0 : index
      %c0_160 = arith.constant 0 : index
      %281 = vector.load %arg10[%c0_159, %c0_160] : memref<8x128xf32, #tpu.memory_space<vmem>>, vector<8x128xf32>
      tpu.vector_store %arg10[%c0_159, %c0_160], %280 {strides = array<i32>} : memref<8x128xf32, #tpu.memory_space<vmem>>, vector<8x128xf32>,
      %c0_161 = arith.constant 0 : index
      %c0_162 = arith.constant 0 : index
      %282 = vector.load %arg11[%c0_161, %c0_162] : memref<8x128xf32, #tpu.memory_space<vmem>>, vector<8x128xf32>
      tpu.vector_store %arg11[%c0_161, %c0_162], %278 {strides = array<i32>} : memref<8x128xf32, #tpu.memory_space<vmem>>, vector<8x128xf32>,
      %c6_i32 = arith.constant 6 : i32
      %c0_163 = arith.constant 0 : index
      %c0_164 = arith.constant 0 : index
      %283 = vector.load %arg10[%c0_163, %c0_164] : memref<8x128xf32, #tpu.memory_space<vmem>>, vector<8x128xf32>
      %c0_165 = arith.constant 0 : index
      %c0_166 = arith.constant 0 : index
      %284 = vector.load %arg11[%c0_165, %c0_166] : memref<8x128xf32, #tpu.memory_space<vmem>>, vector<8x128xf32>
      %285 = arith.index_cast %c6_i32 : i32 to index
      %c0_167 = arith.constant 0 : index
      %c0_168 = arith.constant 0 : index
      %286 = vector.load %arg9[%285, %c0_167, %c0_168] : memref<8x8x512xf32, #tpu.memory_space<vmem>>, vector<1x8x512xf32>
      %287 = vector.shape_cast %286 : vector<1x8x512xf32> to vector<8x512xf32>
      %288 = vector.extract_strided_slice %287 {offsets = [0, 0], sizes = [8, 128], strides = [1, 1]} : vector<8x512xf32> to vector<8x128xf32>
      %c0_169 = arith.constant 0 : index
      %c0_170 = arith.constant 0 : index
      %289 = vector.load %arg4[%c0_169, %c0_170] : memref<128x512xf32, #tpu.memory_space<vmem>>, vector<128x128xf32>
      %cst_171 = arith.constant dense<0.000000e+00> : vector<8x128xf32>
      %290 = tpu.matmul %283, %289, %cst_171 {dimension_numbers = #tpu.dot_dimension_numbers<[1], [0], [0], [1], [0, 0, 1, 1], [], []>} : vector<8x128xf32>, vector<128x128xf32>, vector<8x128xf32> -> vector<8x128xf32>
      %291 = arith.addf %288, %290 : vector<8x128xf32>
      %292 = arith.negf %291 : vector<8x128xf32>
      %293 = math.exp %292 : vector<8x128xf32>
      %cst_172 = arith.constant 1.000000e+00 : f32
      %294 = vector.broadcast %cst_172 : f32 to vector<8x128xf32>
      %295 = arith.addf %294, %293 : vector<8x128xf32>
      %296 = arith.divf %294, %295 : vector<8x128xf32>
      %297 = vector.extract_strided_slice %287 {offsets = [0, 128], sizes = [8, 128], strides = [1, 1]} : vector<8x512xf32> to vector<8x128xf32>
      %c0_173 = arith.constant 0 : index
      %c128_174 = arith.constant 128 : index
      %298 = vector.load %arg4[%c0_173, %c128_174] : memref<128x512xf32, #tpu.memory_space<vmem>>, vector<128x128xf32>
      %cst_175 = arith.constant dense<0.000000e+00> : vector<8x128xf32>
      %299 = tpu.matmul %283, %298, %cst_175 {dimension_numbers = #tpu.dot_dimension_numbers<[1], [0], [0], [1], [0, 0, 1, 1], [], []>} : vector<8x128xf32>, vector<128x128xf32>, vector<8x128xf32> -> vector<8x128xf32>
      %300 = arith.addf %297, %299 : vector<8x128xf32>
      %301 = arith.negf %300 : vector<8x128xf32>
      %302 = math.exp %301 : vector<8x128xf32>
      %cst_176 = arith.constant 1.000000e+00 : f32
      %303 = vector.broadcast %cst_176 : f32 to vector<8x128xf32>
      %304 = arith.addf %303, %302 : vector<8x128xf32>
      %305 = arith.divf %303, %304 : vector<8x128xf32>
      %306 = vector.extract_strided_slice %287 {offsets = [0, 256], sizes = [8, 128], strides = [1, 1]} : vector<8x512xf32> to vector<8x128xf32>
      %c0_177 = arith.constant 0 : index
      %c256_178 = arith.constant 256 : index
      %307 = vector.load %arg4[%c0_177, %c256_178] : memref<128x512xf32, #tpu.memory_space<vmem>>, vector<128x128xf32>
      %cst_179 = arith.constant dense<0.000000e+00> : vector<8x128xf32>
      %308 = tpu.matmul %283, %307, %cst_179 {dimension_numbers = #tpu.dot_dimension_numbers<[1], [0], [0], [1], [0, 0, 1, 1], [], []>} : vector<8x128xf32>, vector<128x128xf32>, vector<8x128xf32> -> vector<8x128xf32>
      %309 = arith.addf %306, %308 : vector<8x128xf32>
      %310 = math.tanh %309 : vector<8x128xf32>
      %311 = vector.extract_strided_slice %287 {offsets = [0, 384], sizes = [8, 128], strides = [1, 1]} : vector<8x512xf32> to vector<8x128xf32>
      %c0_180 = arith.constant 0 : index
      %c384_181 = arith.constant 384 : index
      %312 = vector.load %arg4[%c0_180, %c384_181] : memref<128x512xf32, #tpu.memory_space<vmem>>, vector<128x128xf32>
      %cst_182 = arith.constant dense<0.000000e+00> : vector<8x128xf32>
      %313 = tpu.matmul %283, %312, %cst_182 {dimension_numbers = #tpu.dot_dimension_numbers<[1], [0], [0], [1], [0, 0, 1, 1], [], []>} : vector<8x128xf32>, vector<128x128xf32>, vector<8x128xf32> -> vector<8x128xf32>
      %314 = arith.addf %311, %313 : vector<8x128xf32>
      %315 = arith.negf %314 : vector<8x128xf32>
      %316 = math.exp %315 : vector<8x128xf32>
      %cst_183 = arith.constant 1.000000e+00 : f32
      %317 = vector.broadcast %cst_183 : f32 to vector<8x128xf32>
      %318 = arith.addf %317, %316 : vector<8x128xf32>
      %319 = arith.divf %317, %318 : vector<8x128xf32>
      %320 = arith.mulf %305, %284 : vector<8x128xf32>
      %321 = arith.mulf %296, %310 : vector<8x128xf32>
      %322 = arith.addf %320, %321 : vector<8x128xf32>
      %323 = math.tanh %322 : vector<8x128xf32>
      %324 = arith.mulf %319, %323 : vector<8x128xf32>
      %c0_184 = arith.constant 0 : index
      %c0_185 = arith.constant 0 : index
      %325 = vector.load %arg10[%c0_184, %c0_185] : memref<8x128xf32, #tpu.memory_space<vmem>>, vector<8x128xf32>
      tpu.vector_store %arg10[%c0_184, %c0_185], %324 {strides = array<i32>} : memref<8x128xf32, #tpu.memory_space<vmem>>, vector<8x128xf32>,
      %c0_186 = arith.constant 0 : index
      %c0_187 = arith.constant 0 : index
      %326 = vector.load %arg11[%c0_186, %c0_187] : memref<8x128xf32, #tpu.memory_space<vmem>>, vector<8x128xf32>
      tpu.vector_store %arg11[%c0_186, %c0_187], %322 {strides = array<i32>} : memref<8x128xf32, #tpu.memory_space<vmem>>, vector<8x128xf32>,
      %c7_i32 = arith.constant 7 : i32
      %c0_188 = arith.constant 0 : index
      %c0_189 = arith.constant 0 : index
      %327 = vector.load %arg10[%c0_188, %c0_189] : memref<8x128xf32, #tpu.memory_space<vmem>>, vector<8x128xf32>
      %c0_190 = arith.constant 0 : index
      %c0_191 = arith.constant 0 : index
      %328 = vector.load %arg11[%c0_190, %c0_191] : memref<8x128xf32, #tpu.memory_space<vmem>>, vector<8x128xf32>
      %329 = arith.index_cast %c7_i32 : i32 to index
      %c0_192 = arith.constant 0 : index
      %c0_193 = arith.constant 0 : index
      %330 = vector.load %arg9[%329, %c0_192, %c0_193] : memref<8x8x512xf32, #tpu.memory_space<vmem>>, vector<1x8x512xf32>
      %331 = vector.shape_cast %330 : vector<1x8x512xf32> to vector<8x512xf32>
      %332 = vector.extract_strided_slice %331 {offsets = [0, 0], sizes = [8, 128], strides = [1, 1]} : vector<8x512xf32> to vector<8x128xf32>
      %c0_194 = arith.constant 0 : index
      %c0_195 = arith.constant 0 : index
      %333 = vector.load %arg4[%c0_194, %c0_195] : memref<128x512xf32, #tpu.memory_space<vmem>>, vector<128x128xf32>
      %cst_196 = arith.constant dense<0.000000e+00> : vector<8x128xf32>
      %334 = tpu.matmul %327, %333, %cst_196 {dimension_numbers = #tpu.dot_dimension_numbers<[1], [0], [0], [1], [0, 0, 1, 1], [], []>} : vector<8x128xf32>, vector<128x128xf32>, vector<8x128xf32> -> vector<8x128xf32>
      %335 = arith.addf %332, %334 : vector<8x128xf32>
      %336 = arith.negf %335 : vector<8x128xf32>
      %337 = math.exp %336 : vector<8x128xf32>
      %cst_197 = arith.constant 1.000000e+00 : f32
      %338 = vector.broadcast %cst_197 : f32 to vector<8x128xf32>
      %339 = arith.addf %338, %337 : vector<8x128xf32>
      %340 = arith.divf %338, %339 : vector<8x128xf32>
      %341 = vector.extract_strided_slice %331 {offsets = [0, 128], sizes = [8, 128], strides = [1, 1]} : vector<8x512xf32> to vector<8x128xf32>
      %c0_198 = arith.constant 0 : index
      %c128_199 = arith.constant 128 : index
      %342 = vector.load %arg4[%c0_198, %c128_199] : memref<128x512xf32, #tpu.memory_space<vmem>>, vector<128x128xf32>
      %cst_200 = arith.constant dense<0.000000e+00> : vector<8x128xf32>
      %343 = tpu.matmul %327, %342, %cst_200 {dimension_numbers = #tpu.dot_dimension_numbers<[1], [0], [0], [1], [0, 0, 1, 1], [], []>} : vector<8x128xf32>, vector<128x128xf32>, vector<8x128xf32> -> vector<8x128xf32>
      %344 = arith.addf %341, %343 : vector<8x128xf32>
      %345 = arith.negf %344 : vector<8x128xf32>
      %346 = math.exp %345 : vector<8x128xf32>
      %cst_201 = arith.constant 1.000000e+00 : f32
      %347 = vector.broadcast %cst_201 : f32 to vector<8x128xf32>
      %348 = arith.addf %347, %346 : vector<8x128xf32>
      %349 = arith.divf %347, %348 : vector<8x128xf32>
      %350 = vector.extract_strided_slice %331 {offsets = [0, 256], sizes = [8, 128], strides = [1, 1]} : vector<8x512xf32> to vector<8x128xf32>
      %c0_202 = arith.constant 0 : index
      %c256_203 = arith.constant 256 : index
      %351 = vector.load %arg4[%c0_202, %c256_203] : memref<128x512xf32, #tpu.memory_space<vmem>>, vector<128x128xf32>
      %cst_204 = arith.constant dense<0.000000e+00> : vector<8x128xf32>
      %352 = tpu.matmul %327, %351, %cst_204 {dimension_numbers = #tpu.dot_dimension_numbers<[1], [0], [0], [1], [0, 0, 1, 1], [], []>} : vector<8x128xf32>, vector<128x128xf32>, vector<8x128xf32> -> vector<8x128xf32>
      %353 = arith.addf %350, %352 : vector<8x128xf32>
      %354 = math.tanh %353 : vector<8x128xf32>
      %355 = vector.extract_strided_slice %331 {offsets = [0, 384], sizes = [8, 128], strides = [1, 1]} : vector<8x512xf32> to vector<8x128xf32>
      %c0_205 = arith.constant 0 : index
      %c384_206 = arith.constant 384 : index
      %356 = vector.load %arg4[%c0_205, %c384_206] : memref<128x512xf32, #tpu.memory_space<vmem>>, vector<128x128xf32>
      %cst_207 = arith.constant dense<0.000000e+00> : vector<8x128xf32>
      %357 = tpu.matmul %327, %356, %cst_207 {dimension_numbers = #tpu.dot_dimension_numbers<[1], [0], [0], [1], [0, 0, 1, 1], [], []>} : vector<8x128xf32>, vector<128x128xf32>, vector<8x128xf32> -> vector<8x128xf32>
      %358 = arith.addf %355, %357 : vector<8x128xf32>
      %359 = arith.negf %358 : vector<8x128xf32>
      %360 = math.exp %359 : vector<8x128xf32>
      %cst_208 = arith.constant 1.000000e+00 : f32
      %361 = vector.broadcast %cst_208 : f32 to vector<8x128xf32>
      %362 = arith.addf %361, %360 : vector<8x128xf32>
      %363 = arith.divf %361, %362 : vector<8x128xf32>
      %364 = arith.mulf %349, %328 : vector<8x128xf32>
      %365 = arith.mulf %340, %354 : vector<8x128xf32>
      %366 = arith.addf %364, %365 : vector<8x128xf32>
      %367 = math.tanh %366 : vector<8x128xf32>
      %368 = arith.mulf %363, %367 : vector<8x128xf32>
      %c0_209 = arith.constant 0 : index
      %c0_210 = arith.constant 0 : index
      %369 = vector.load %arg10[%c0_209, %c0_210] : memref<8x128xf32, #tpu.memory_space<vmem>>, vector<8x128xf32>
      tpu.vector_store %arg10[%c0_209, %c0_210], %368 {strides = array<i32>} : memref<8x128xf32, #tpu.memory_space<vmem>>, vector<8x128xf32>,
      %c0_211 = arith.constant 0 : index
      %c0_212 = arith.constant 0 : index
      %370 = vector.load %arg11[%c0_211, %c0_212] : memref<8x128xf32, #tpu.memory_space<vmem>>, vector<8x128xf32>
      tpu.vector_store %arg11[%c0_211, %c0_212], %366 {strides = array<i32>} : memref<8x128xf32, #tpu.memory_space<vmem>>, vector<8x128xf32>,
      %c8_i32_213 = arith.constant 8 : i32
      %c0_214 = arith.constant 0 : index
      %c0_215 = arith.constant 0 : index
      %371 = vector.load %arg10[%c0_214, %c0_215] : memref<8x128xf32, #tpu.memory_space<vmem>>, vector<8x128xf32>
      %c0_216 = arith.constant 0 : index
      %c0_217 = arith.constant 0 : index
      %372 = vector.load %arg6[%c0_216, %c0_217] : memref<128x128xf32, #tpu.memory_space<vmem>>, vector<128x128xf32>
      %cst_218 = arith.constant dense<0.000000e+00> : vector<8x128xf32>
      %373 = tpu.matmul %371, %372, %cst_218 {dimension_numbers = #tpu.dot_dimension_numbers<[1], [0], [0], [1], [0, 0, 1, 1], [], []>} : vector<8x128xf32>, vector<128x128xf32>, vector<8x128xf32> -> vector<8x128xf32>
      %c0_219 = arith.constant 0 : index
      %c0_220 = arith.constant 0 : index
      %374 = vector.load %arg7[%c0_219, %c0_220] : memref<1x128xf32, #tpu.memory_space<vmem>>, vector<1x128xf32>
      %375 = vector.broadcast %374 : vector<1x128xf32> to vector<8x128xf32>
      %376 = arith.addf %373, %375 : vector<8x128xf32>
      %377 = tpu.iota {dimensions = array<i32: 1>} : vector<8x128xi32>
      %c4_i32_221 = arith.constant 4 : i32
      %378 = vector.broadcast %c4_i32_221 : i32 to vector<8x128xi32>
      %379 = arith.cmpi slt, %377, %378 : vector<8x128xi32>
      %cst_222 = arith.constant -1.000000e+30 : f32
      %380 = vector.broadcast %cst_222 : f32 to vector<8x128xf32>
      %381 = arith.select %379, %376, %380 : vector<8x128xi1>, vector<8x128xf32>
      %cst_223 = arith.constant dense<0xFF800000> : vector<8xf32>
      %382 = vector.multi_reduction <maximumf>, %381, %cst_223 [1] : vector<8x128xf32> to vector<8xf32>
      %383 = vector.shape_cast %382 : vector<8xf32> to vector<8x1xf32>
      %384 = vector.broadcast %383 : vector<8x1xf32> to vector<8x128xf32>
      %385 = arith.subf %381, %384 : vector<8x128xf32>
      %386 = math.exp %385 : vector<8x128xf32>
      %cst_224 = arith.constant dense<0.000000e+00> : vector<8xf32>
      %387 = vector.multi_reduction <add>, %386, %cst_224 [1] : vector<8x128xf32> to vector<8xf32>
      %388 = vector.shape_cast %387 : vector<8xf32> to vector<8x1xf32>
      %389 = vector.broadcast %388 : vector<8x1xf32> to vector<8x128xf32>
      %390 = arith.divf %386, %389 : vector<8x128xf32>
      %c0_225 = arith.constant 0 : index
      %c0_226 = arith.constant 0 : index
      %391 = vector.load %arg8[%c0_225, %c0_226] : memref<8x128xf32, #tpu.memory_space<vmem>>, vector<8x128xf32>
      tpu.vector_store %arg8[%c0_225, %c0_226], %390 {strides = array<i32>} : memref<8x128xf32, #tpu.memory_space<vmem>>, vector<8x128xf32>,
    } else {
    }
    return
  }
  func.func @transform_0(%arg0: i32, %arg1: i32) -> (i32, i32, i32) {
    %c0_i32 = arith.constant 0 : i32
    %c0_i32_0 = arith.constant 0 : i32
    return %arg1, %arg0, %c0_i32 : i32, i32, i32
  }
  func.func @transform_1(%arg0: i32, %arg1: i32) -> (i32, i32) {
    %c0_i32 = arith.constant 0 : i32
    %c0_i32_0 = arith.constant 0 : i32
    %c0_i32_1 = arith.constant 0 : i32
    return %c0_i32, %c0_i32_0 : i32, i32
  }
  func.func @transform_2(%arg0: i32, %arg1: i32) -> (i32, i32) {
    %c0_i32 = arith.constant 0 : i32
    %c0_i32_0 = arith.constant 0 : i32
    %c0_i32_1 = arith.constant 0 : i32
    return %c0_i32, %c0_i32_0 : i32, i32
  }
  func.func @transform_3(%arg0: i32, %arg1: i32) -> (i32, i32) {
    %c0_i32 = arith.constant 0 : i32
    %c0_i32_0 = arith.constant 0 : i32
    %c0_i32_1 = arith.constant 0 : i32
    return %c0_i32, %c0_i32_0 : i32, i32
  }
  func.func @transform_4(%arg0: i32, %arg1: i32) -> (i32, i32) {
    %c0_i32 = arith.constant 0 : i32
    %c0_i32_0 = arith.constant 0 : i32
    %c0_i32_1 = arith.constant 0 : i32
    return %c0_i32, %c0_i32_0 : i32, i32
  }
  func.func @transform_5(%arg0: i32, %arg1: i32) -> (i32, i32) {
    %c0_i32 = arith.constant 0 : i32
    %c0_i32_0 = arith.constant 0 : i32
    %c0_i32_1 = arith.constant 0 : i32
    return %c0_i32, %c0_i32_0 : i32, i32
  }
  func.func @transform_6(%arg0: i32, %arg1: i32) -> (i32, i32) {
    %c0_i32 = arith.constant 0 : i32
    %c0_i32_0 = arith.constant 0 : i32
    return %arg0, %c0_i32 : i32, i32
  }
}

module attributes {stable_mosaic.version = 11 : i64} {
  func.func @lstm_classifier_kernel(%arg0: i32, %arg1: i32, %arg2: memref<8x8x128xf32, #tpu.memory_space<vmem>>, %arg3: memref<128x512xf32, #tpu.memory_space<vmem>>, %arg4: memref<128x512xf32, #tpu.memory_space<vmem>>, %arg5: memref<1x512xf32, #tpu.memory_space<vmem>>, %arg6: memref<128x128xf32, #tpu.memory_space<vmem>>, %arg7: memref<1x128xf32, #tpu.memory_space<vmem>>, %arg8: memref<8x128xf32, #tpu.memory_space<vmem>>, %arg9: memref<8x8x512xf32, #tpu.memory_space<vmem>>, %arg10: memref<8x128xf32, #tpu.memory_space<vmem>>, %arg11: memref<8x128xf32, #tpu.memory_space<vmem>>) attributes {dimension_semantics = [#tpu.dimension_semantics<parallel>, #tpu.dimension_semantics<arbitrary>], iteration_bounds = array<i64: 1, 1>, scalar_prefetch = 0 : i64, scratch_operands = 3 : i64, tpu.core_type = #tpu.core_type<tc>, window_params = [{transform_indices = @transform_0, window_bounds = array<i64: 8, 8, 128>}, {pipeline_mode = #tpu.pipeline_mode<synchronous>, transform_indices = @transform_1, window_bounds = array<i64: 128, 512>}, {pipeline_mode = #tpu.pipeline_mode<synchronous>, transform_indices = @transform_2, window_bounds = array<i64: 128, 512>}, {pipeline_mode = #tpu.pipeline_mode<synchronous>, transform_indices = @transform_3, window_bounds = array<i64: 1, 512>}, {pipeline_mode = #tpu.pipeline_mode<synchronous>, transform_indices = @transform_4, window_bounds = array<i64: 128, 128>}, {pipeline_mode = #tpu.pipeline_mode<synchronous>, transform_indices = @transform_5, window_bounds = array<i64: 1, 128>}, {transform_indices = @transform_6, window_bounds = array<i64: 8, 128>}]} {
    %c0 = arith.constant 0 : index
    %c0_0 = arith.constant 0 : index
    %c0_1 = arith.constant 0 : index
    %0 = vector.load %arg2[%c0, %c0_0, %c0_1] : memref<8x8x128xf32, #tpu.memory_space<vmem>>, vector<8x8x128xf32>
    %1 = vector.shape_cast %0 : vector<8x8x128xf32> to vector<64x128xf32>
    %c0_2 = arith.constant 0 : index
    %c0_3 = arith.constant 0 : index
    %2 = vector.load %arg3[%c0_2, %c0_3] : memref<128x512xf32, #tpu.memory_space<vmem>>, vector<128x512xf32>
    %cst = arith.constant dense<0.000000e+00> : vector<64x512xf32>
    %3 = tpu.matmul %1, %2, %cst {dimension_numbers = #tpu.dot_dimension_numbers<[1], [0], [0], [1], [0, 0, 1, 1], [], []>} : vector<64x128xf32>, vector<128x512xf32>, vector<64x512xf32> -> vector<64x512xf32>
    %c0_4 = arith.constant 0 : index
    %c0_5 = arith.constant 0 : index
    %4 = vector.load %arg5[%c0_4, %c0_5] : memref<1x512xf32, #tpu.memory_space<vmem>>, vector<1x512xf32>
    %5 = vector.broadcast %4 : vector<1x512xf32> to vector<64x512xf32>
    %6 = arith.addf %3, %5 : vector<64x512xf32>
    %c8_i32 = arith.constant 8 : i32
    %7 = arith.muli %arg1, %c8_i32 : i32
    %8 = tpu.assume_multiple %7, 8 : i32
    %9 = vector.shape_cast %6 : vector<64x512xf32> to vector<8x8x512xf32>
    %10 = arith.index_cast %8 : i32 to index
    %c0_6 = arith.constant 0 : index
    %c0_7 = arith.constant 0 : index
    %11 = vector.load %arg9[%10, %c0_6, %c0_7] : memref<8x8x512xf32, #tpu.memory_space<vmem>>, vector<8x8x512xf32>
    tpu.vector_store %arg9[%10, %c0_6, %c0_7], %9 {strides = array<i32>} : memref<8x8x512xf32, #tpu.memory_space<vmem>>, vector<8x8x512xf32>,
    %c0_i32 = arith.constant 0 : i32
    %12 = arith.cmpi eq, %arg1, %c0_i32 : i32
    %13 = arith.extui %12 : i1 to i32
    %c0_i32_8 = arith.constant 0 : i32
    %14 = arith.cmpi ne, %13, %c0_i32_8 : i32
    scf.if %14 {
      %cst_9 = arith.constant 0.000000e+00 : f32
      %15 = vector.broadcast %cst_9 : f32 to vector<8x128xf32>
      %c0_10 = arith.constant 0 : index
      %c0_11 = arith.constant 0 : index
      %16 = vector.load %arg10[%c0_10, %c0_11] : memref<8x128xf32, #tpu.memory_space<vmem>>, vector<8x128xf32>
      tpu.vector_store %arg10[%c0_10, %c0_11], %15 {strides = array<i32>} : memref<8x128xf32, #tpu.memory_space<vmem>>, vector<8x128xf32>,
      %cst_12 = arith.constant 0.000000e+00 : f32
      %17 = vector.broadcast %cst_12 : f32 to vector<8x128xf32>
      %c0_13 = arith.constant 0 : index
      %c0_14 = arith.constant 0 : index
      %18 = vector.load %arg11[%c0_13, %c0_14] : memref<8x128xf32, #tpu.memory_space<vmem>>, vector<8x128xf32>
      tpu.vector_store %arg11[%c0_13, %c0_14], %17 {strides = array<i32>} : memref<8x128xf32, #tpu.memory_space<vmem>>, vector<8x128xf32>,
      %c0_i32_15 = arith.constant 0 : i32
      %c0_16 = arith.constant 0 : index
      %c0_17 = arith.constant 0 : index
      %19 = vector.load %arg10[%c0_16, %c0_17] : memref<8x128xf32, #tpu.memory_space<vmem>>, vector<8x128xf32>
      %c0_18 = arith.constant 0 : index
      %c0_19 = arith.constant 0 : index
      %20 = vector.load %arg11[%c0_18, %c0_19] : memref<8x128xf32, #tpu.memory_space<vmem>>, vector<8x128xf32>
      %21 = arith.index_cast %c0_i32_15 : i32 to index
      %c0_20 = arith.constant 0 : index
      %c0_21 = arith.constant 0 : index
      %22 = vector.load %arg9[%21, %c0_20, %c0_21] : memref<8x8x512xf32, #tpu.memory_space<vmem>>, vector<1x8x512xf32>
      %23 = vector.shape_cast %22 : vector<1x8x512xf32> to vector<8x512xf32>
      %24 = vector.extract_strided_slice %23 {offsets = [0, 0], sizes = [8, 128], strides = [1, 1]} : vector<8x512xf32> to vector<8x128xf32>
      %c0_22 = arith.constant 0 : index
      %c0_23 = arith.constant 0 : index
      %25 = vector.load %arg4[%c0_22, %c0_23] : memref<128x512xf32, #tpu.memory_space<vmem>>, vector<128x128xf32>
      %cst_24 = arith.constant dense<0.000000e+00> : vector<8x128xf32>
      %26 = tpu.matmul %19, %25, %cst_24 {dimension_numbers = #tpu.dot_dimension_numbers<[1], [0], [0], [1], [0, 0, 1, 1], [], []>} : vector<8x128xf32>, vector<128x128xf32>, vector<8x128xf32> -> vector<8x128xf32>
      %27 = arith.addf %24, %26 : vector<8x128xf32>
      %28 = arith.negf %27 : vector<8x128xf32>
      %29 = math.exp %28 : vector<8x128xf32>
      %cst_25 = arith.constant 1.000000e+00 : f32
      %30 = vector.broadcast %cst_25 : f32 to vector<8x128xf32>
      %31 = arith.addf %30, %29 : vector<8x128xf32>
      %32 = arith.divf %30, %31 : vector<8x128xf32>
      %33 = vector.extract_strided_slice %23 {offsets = [0, 128], sizes = [8, 128], strides = [1, 1]} : vector<8x512xf32> to vector<8x128xf32>
      %c0_26 = arith.constant 0 : index
      %c128 = arith.constant 128 : index
      %34 = vector.load %arg4[%c0_26, %c128] : memref<128x512xf32, #tpu.memory_space<vmem>>, vector<128x128xf32>
      %cst_27 = arith.constant dense<0.000000e+00> : vector<8x128xf32>
      %35 = tpu.matmul %19, %34, %cst_27 {dimension_numbers = #tpu.dot_dimension_numbers<[1], [0], [0], [1], [0, 0, 1, 1], [], []>} : vector<8x128xf32>, vector<128x128xf32>, vector<8x128xf32> -> vector<8x128xf32>
      %36 = arith.addf %33, %35 : vector<8x128xf32>
      %37 = arith.negf %36 : vector<8x128xf32>
      %38 = math.exp %37 : vector<8x128xf32>
      %cst_28 = arith.constant 1.000000e+00 : f32
      %39 = vector.broadcast %cst_28 : f32 to vector<8x128xf32>
      %40 = arith.addf %39, %38 : vector<8x128xf32>
      %41 = arith.divf %39, %40 : vector<8x128xf32>
      %42 = vector.extract_strided_slice %23 {offsets = [0, 256], sizes = [8, 128], strides = [1, 1]} : vector<8x512xf32> to vector<8x128xf32>
      %c0_29 = arith.constant 0 : index
      %c256 = arith.constant 256 : index
      %43 = vector.load %arg4[%c0_29, %c256] : memref<128x512xf32, #tpu.memory_space<vmem>>, vector<128x128xf32>
      %cst_30 = arith.constant dense<0.000000e+00> : vector<8x128xf32>
      %44 = tpu.matmul %19, %43, %cst_30 {dimension_numbers = #tpu.dot_dimension_numbers<[1], [0], [0], [1], [0, 0, 1, 1], [], []>} : vector<8x128xf32>, vector<128x128xf32>, vector<8x128xf32> -> vector<8x128xf32>
      %45 = arith.addf %42, %44 : vector<8x128xf32>
      %46 = math.tanh %45 : vector<8x128xf32>
      %47 = vector.extract_strided_slice %23 {offsets = [0, 384], sizes = [8, 128], strides = [1, 1]} : vector<8x512xf32> to vector<8x128xf32>
      %c0_31 = arith.constant 0 : index
      %c384 = arith.constant 384 : index
      %48 = vector.load %arg4[%c0_31, %c384] : memref<128x512xf32, #tpu.memory_space<vmem>>, vector<128x128xf32>
      %cst_32 = arith.constant dense<0.000000e+00> : vector<8x128xf32>
      %49 = tpu.matmul %19, %48, %cst_32 {dimension_numbers = #tpu.dot_dimension_numbers<[1], [0], [0], [1], [0, 0, 1, 1], [], []>} : vector<8x128xf32>, vector<128x128xf32>, vector<8x128xf32> -> vector<8x128xf32>
      %50 = arith.addf %47, %49 : vector<8x128xf32>
      %51 = arith.negf %50 : vector<8x128xf32>
      %52 = math.exp %51 : vector<8x128xf32>
      %cst_33 = arith.constant 1.000000e+00 : f32
      %53 = vector.broadcast %cst_33 : f32 to vector<8x128xf32>
      %54 = arith.addf %53, %52 : vector<8x128xf32>
      %55 = arith.divf %53, %54 : vector<8x128xf32>
      %56 = arith.mulf %41, %20 : vector<8x128xf32>
      %57 = arith.mulf %32, %46 : vector<8x128xf32>
      %58 = arith.addf %56, %57 : vector<8x128xf32>
      %59 = math.tanh %58 : vector<8x128xf32>
      %60 = arith.mulf %55, %59 : vector<8x128xf32>
      %c0_34 = arith.constant 0 : index
      %c0_35 = arith.constant 0 : index
      %61 = vector.load %arg10[%c0_34, %c0_35] : memref<8x128xf32, #tpu.memory_space<vmem>>, vector<8x128xf32>
      tpu.vector_store %arg10[%c0_34, %c0_35], %60 {strides = array<i32>} : memref<8x128xf32, #tpu.memory_space<vmem>>, vector<8x128xf32>,
      %c0_36 = arith.constant 0 : index
      %c0_37 = arith.constant 0 : index
      %62 = vector.load %arg11[%c0_36, %c0_37] : memref<8x128xf32, #tpu.memory_space<vmem>>, vector<8x128xf32>
      tpu.vector_store %arg11[%c0_36, %c0_37], %58 {strides = array<i32>} : memref<8x128xf32, #tpu.memory_space<vmem>>, vector<8x128xf32>,
      %c1_i32 = arith.constant 1 : i32
      %c0_38 = arith.constant 0 : index
      %c0_39 = arith.constant 0 : index
      %63 = vector.load %arg10[%c0_38, %c0_39] : memref<8x128xf32, #tpu.memory_space<vmem>>, vector<8x128xf32>
      %c0_40 = arith.constant 0 : index
      %c0_41 = arith.constant 0 : index
      %64 = vector.load %arg11[%c0_40, %c0_41] : memref<8x128xf32, #tpu.memory_space<vmem>>, vector<8x128xf32>
      %65 = arith.index_cast %c1_i32 : i32 to index
      %c0_42 = arith.constant 0 : index
      %c0_43 = arith.constant 0 : index
      %66 = vector.load %arg9[%65, %c0_42, %c0_43] : memref<8x8x512xf32, #tpu.memory_space<vmem>>, vector<1x8x512xf32>
      %67 = vector.shape_cast %66 : vector<1x8x512xf32> to vector<8x512xf32>
      %68 = vector.extract_strided_slice %67 {offsets = [0, 0], sizes = [8, 128], strides = [1, 1]} : vector<8x512xf32> to vector<8x128xf32>
      %c0_44 = arith.constant 0 : index
      %c0_45 = arith.constant 0 : index
      %69 = vector.load %arg4[%c0_44, %c0_45] : memref<128x512xf32, #tpu.memory_space<vmem>>, vector<128x128xf32>
      %cst_46 = arith.constant dense<0.000000e+00> : vector<8x128xf32>
      %70 = tpu.matmul %63, %69, %cst_46 {dimension_numbers = #tpu.dot_dimension_numbers<[1], [0], [0], [1], [0, 0, 1, 1], [], []>} : vector<8x128xf32>, vector<128x128xf32>, vector<8x128xf32> -> vector<8x128xf32>
      %71 = arith.addf %68, %70 : vector<8x128xf32>
      %72 = arith.negf %71 : vector<8x128xf32>
      %73 = math.exp %72 : vector<8x128xf32>
      %cst_47 = arith.constant 1.000000e+00 : f32
      %74 = vector.broadcast %cst_47 : f32 to vector<8x128xf32>
      %75 = arith.addf %74, %73 : vector<8x128xf32>
      %76 = arith.divf %74, %75 : vector<8x128xf32>
      %77 = vector.extract_strided_slice %67 {offsets = [0, 128], sizes = [8, 128], strides = [1, 1]} : vector<8x512xf32> to vector<8x128xf32>
      %c0_48 = arith.constant 0 : index
      %c128_49 = arith.constant 128 : index
      %78 = vector.load %arg4[%c0_48, %c128_49] : memref<128x512xf32, #tpu.memory_space<vmem>>, vector<128x128xf32>
      %cst_50 = arith.constant dense<0.000000e+00> : vector<8x128xf32>
      %79 = tpu.matmul %63, %78, %cst_50 {dimension_numbers = #tpu.dot_dimension_numbers<[1], [0], [0], [1], [0, 0, 1, 1], [], []>} : vector<8x128xf32>, vector<128x128xf32>, vector<8x128xf32> -> vector<8x128xf32>
      %80 = arith.addf %77, %79 : vector<8x128xf32>
      %81 = arith.negf %80 : vector<8x128xf32>
      %82 = math.exp %81 : vector<8x128xf32>
      %cst_51 = arith.constant 1.000000e+00 : f32
      %83 = vector.broadcast %cst_51 : f32 to vector<8x128xf32>
      %84 = arith.addf %83, %82 : vector<8x128xf32>
      %85 = arith.divf %83, %84 : vector<8x128xf32>
      %86 = vector.extract_strided_slice %67 {offsets = [0, 256], sizes = [8, 128], strides = [1, 1]} : vector<8x512xf32> to vector<8x128xf32>
      %c0_52 = arith.constant 0 : index
      %c256_53 = arith.constant 256 : index
      %87 = vector.load %arg4[%c0_52, %c256_53] : memref<128x512xf32, #tpu.memory_space<vmem>>, vector<128x128xf32>
      %cst_54 = arith.constant dense<0.000000e+00> : vector<8x128xf32>
      %88 = tpu.matmul %63, %87, %cst_54 {dimension_numbers = #tpu.dot_dimension_numbers<[1], [0], [0], [1], [0, 0, 1, 1], [], []>} : vector<8x128xf32>, vector<128x128xf32>, vector<8x128xf32> -> vector<8x128xf32>
      %89 = arith.addf %86, %88 : vector<8x128xf32>
      %90 = math.tanh %89 : vector<8x128xf32>
      %91 = vector.extract_strided_slice %67 {offsets = [0, 384], sizes = [8, 128], strides = [1, 1]} : vector<8x512xf32> to vector<8x128xf32>
      %c0_55 = arith.constant 0 : index
      %c384_56 = arith.constant 384 : index
      %92 = vector.load %arg4[%c0_55, %c384_56] : memref<128x512xf32, #tpu.memory_space<vmem>>, vector<128x128xf32>
      %cst_57 = arith.constant dense<0.000000e+00> : vector<8x128xf32>
      %93 = tpu.matmul %63, %92, %cst_57 {dimension_numbers = #tpu.dot_dimension_numbers<[1], [0], [0], [1], [0, 0, 1, 1], [], []>} : vector<8x128xf32>, vector<128x128xf32>, vector<8x128xf32> -> vector<8x128xf32>
      %94 = arith.addf %91, %93 : vector<8x128xf32>
      %95 = arith.negf %94 : vector<8x128xf32>
      %96 = math.exp %95 : vector<8x128xf32>
      %cst_58 = arith.constant 1.000000e+00 : f32
      %97 = vector.broadcast %cst_58 : f32 to vector<8x128xf32>
      %98 = arith.addf %97, %96 : vector<8x128xf32>
      %99 = arith.divf %97, %98 : vector<8x128xf32>
      %100 = arith.mulf %85, %64 : vector<8x128xf32>
      %101 = arith.mulf %76, %90 : vector<8x128xf32>
      %102 = arith.addf %100, %101 : vector<8x128xf32>
      %103 = math.tanh %102 : vector<8x128xf32>
      %104 = arith.mulf %99, %103 : vector<8x128xf32>
      %c0_59 = arith.constant 0 : index
      %c0_60 = arith.constant 0 : index
      %105 = vector.load %arg10[%c0_59, %c0_60] : memref<8x128xf32, #tpu.memory_space<vmem>>, vector<8x128xf32>
      tpu.vector_store %arg10[%c0_59, %c0_60], %104 {strides = array<i32>} : memref<8x128xf32, #tpu.memory_space<vmem>>, vector<8x128xf32>,
      %c0_61 = arith.constant 0 : index
      %c0_62 = arith.constant 0 : index
      %106 = vector.load %arg11[%c0_61, %c0_62] : memref<8x128xf32, #tpu.memory_space<vmem>>, vector<8x128xf32>
      tpu.vector_store %arg11[%c0_61, %c0_62], %102 {strides = array<i32>} : memref<8x128xf32, #tpu.memory_space<vmem>>, vector<8x128xf32>,
      %c2_i32 = arith.constant 2 : i32
      %c0_63 = arith.constant 0 : index
      %c0_64 = arith.constant 0 : index
      %107 = vector.load %arg10[%c0_63, %c0_64] : memref<8x128xf32, #tpu.memory_space<vmem>>, vector<8x128xf32>
      %c0_65 = arith.constant 0 : index
      %c0_66 = arith.constant 0 : index
      %108 = vector.load %arg11[%c0_65, %c0_66] : memref<8x128xf32, #tpu.memory_space<vmem>>, vector<8x128xf32>
      %109 = arith.index_cast %c2_i32 : i32 to index
      %c0_67 = arith.constant 0 : index
      %c0_68 = arith.constant 0 : index
      %110 = vector.load %arg9[%109, %c0_67, %c0_68] : memref<8x8x512xf32, #tpu.memory_space<vmem>>, vector<1x8x512xf32>
      %111 = vector.shape_cast %110 : vector<1x8x512xf32> to vector<8x512xf32>
      %112 = vector.extract_strided_slice %111 {offsets = [0, 0], sizes = [8, 128], strides = [1, 1]} : vector<8x512xf32> to vector<8x128xf32>
      %c0_69 = arith.constant 0 : index
      %c0_70 = arith.constant 0 : index
      %113 = vector.load %arg4[%c0_69, %c0_70] : memref<128x512xf32, #tpu.memory_space<vmem>>, vector<128x128xf32>
      %cst_71 = arith.constant dense<0.000000e+00> : vector<8x128xf32>
      %114 = tpu.matmul %107, %113, %cst_71 {dimension_numbers = #tpu.dot_dimension_numbers<[1], [0], [0], [1], [0, 0, 1, 1], [], []>} : vector<8x128xf32>, vector<128x128xf32>, vector<8x128xf32> -> vector<8x128xf32>
      %115 = arith.addf %112, %114 : vector<8x128xf32>
      %116 = arith.negf %115 : vector<8x128xf32>
      %117 = math.exp %116 : vector<8x128xf32>
      %cst_72 = arith.constant 1.000000e+00 : f32
      %118 = vector.broadcast %cst_72 : f32 to vector<8x128xf32>
      %119 = arith.addf %118, %117 : vector<8x128xf32>
      %120 = arith.divf %118, %119 : vector<8x128xf32>
      %121 = vector.extract_strided_slice %111 {offsets = [0, 128], sizes = [8, 128], strides = [1, 1]} : vector<8x512xf32> to vector<8x128xf32>
      %c0_73 = arith.constant 0 : index
      %c128_74 = arith.constant 128 : index
      %122 = vector.load %arg4[%c0_73, %c128_74] : memref<128x512xf32, #tpu.memory_space<vmem>>, vector<128x128xf32>
      %cst_75 = arith.constant dense<0.000000e+00> : vector<8x128xf32>
      %123 = tpu.matmul %107, %122, %cst_75 {dimension_numbers = #tpu.dot_dimension_numbers<[1], [0], [0], [1], [0, 0, 1, 1], [], []>} : vector<8x128xf32>, vector<128x128xf32>, vector<8x128xf32> -> vector<8x128xf32>
      %124 = arith.addf %121, %123 : vector<8x128xf32>
      %125 = arith.negf %124 : vector<8x128xf32>
      %126 = math.exp %125 : vector<8x128xf32>
      %cst_76 = arith.constant 1.000000e+00 : f32
      %127 = vector.broadcast %cst_76 : f32 to vector<8x128xf32>
      %128 = arith.addf %127, %126 : vector<8x128xf32>
      %129 = arith.divf %127, %128 : vector<8x128xf32>
      %130 = vector.extract_strided_slice %111 {offsets = [0, 256], sizes = [8, 128], strides = [1, 1]} : vector<8x512xf32> to vector<8x128xf32>
      %c0_77 = arith.constant 0 : index
      %c256_78 = arith.constant 256 : index
      %131 = vector.load %arg4[%c0_77, %c256_78] : memref<128x512xf32, #tpu.memory_space<vmem>>, vector<128x128xf32>
      %cst_79 = arith.constant dense<0.000000e+00> : vector<8x128xf32>
      %132 = tpu.matmul %107, %131, %cst_79 {dimension_numbers = #tpu.dot_dimension_numbers<[1], [0], [0], [1], [0, 0, 1, 1], [], []>} : vector<8x128xf32>, vector<128x128xf32>, vector<8x128xf32> -> vector<8x128xf32>
      %133 = arith.addf %130, %132 : vector<8x128xf32>
      %134 = math.tanh %133 : vector<8x128xf32>
      %135 = vector.extract_strided_slice %111 {offsets = [0, 384], sizes = [8, 128], strides = [1, 1]} : vector<8x512xf32> to vector<8x128xf32>
      %c0_80 = arith.constant 0 : index
      %c384_81 = arith.constant 384 : index
      %136 = vector.load %arg4[%c0_80, %c384_81] : memref<128x512xf32, #tpu.memory_space<vmem>>, vector<128x128xf32>
      %cst_82 = arith.constant dense<0.000000e+00> : vector<8x128xf32>
      %137 = tpu.matmul %107, %136, %cst_82 {dimension_numbers = #tpu.dot_dimension_numbers<[1], [0], [0], [1], [0, 0, 1, 1], [], []>} : vector<8x128xf32>, vector<128x128xf32>, vector<8x128xf32> -> vector<8x128xf32>
      %138 = arith.addf %135, %137 : vector<8x128xf32>
      %139 = arith.negf %138 : vector<8x128xf32>
      %140 = math.exp %139 : vector<8x128xf32>
      %cst_83 = arith.constant 1.000000e+00 : f32
      %141 = vector.broadcast %cst_83 : f32 to vector<8x128xf32>
      %142 = arith.addf %141, %140 : vector<8x128xf32>
      %143 = arith.divf %141, %142 : vector<8x128xf32>
      %144 = arith.mulf %129, %108 : vector<8x128xf32>
      %145 = arith.mulf %120, %134 : vector<8x128xf32>
      %146 = arith.addf %144, %145 : vector<8x128xf32>
      %147 = math.tanh %146 : vector<8x128xf32>
      %148 = arith.mulf %143, %147 : vector<8x128xf32>
      %c0_84 = arith.constant 0 : index
      %c0_85 = arith.constant 0 : index
      %149 = vector.load %arg10[%c0_84, %c0_85] : memref<8x128xf32, #tpu.memory_space<vmem>>, vector<8x128xf32>
      tpu.vector_store %arg10[%c0_84, %c0_85], %148 {strides = array<i32>} : memref<8x128xf32, #tpu.memory_space<vmem>>, vector<8x128xf32>,
      %c0_86 = arith.constant 0 : index
      %c0_87 = arith.constant 0 : index
      %150 = vector.load %arg11[%c0_86, %c0_87] : memref<8x128xf32, #tpu.memory_space<vmem>>, vector<8x128xf32>
      tpu.vector_store %arg11[%c0_86, %c0_87], %146 {strides = array<i32>} : memref<8x128xf32, #tpu.memory_space<vmem>>, vector<8x128xf32>,
      %c3_i32 = arith.constant 3 : i32
      %c0_88 = arith.constant 0 : index
      %c0_89 = arith.constant 0 : index
      %151 = vector.load %arg10[%c0_88, %c0_89] : memref<8x128xf32, #tpu.memory_space<vmem>>, vector<8x128xf32>
      %c0_90 = arith.constant 0 : index
      %c0_91 = arith.constant 0 : index
      %152 = vector.load %arg11[%c0_90, %c0_91] : memref<8x128xf32, #tpu.memory_space<vmem>>, vector<8x128xf32>
      %153 = arith.index_cast %c3_i32 : i32 to index
      %c0_92 = arith.constant 0 : index
      %c0_93 = arith.constant 0 : index
      %154 = vector.load %arg9[%153, %c0_92, %c0_93] : memref<8x8x512xf32, #tpu.memory_space<vmem>>, vector<1x8x512xf32>
      %155 = vector.shape_cast %154 : vector<1x8x512xf32> to vector<8x512xf32>
      %156 = vector.extract_strided_slice %155 {offsets = [0, 0], sizes = [8, 128], strides = [1, 1]} : vector<8x512xf32> to vector<8x128xf32>
      %c0_94 = arith.constant 0 : index
      %c0_95 = arith.constant 0 : index
      %157 = vector.load %arg4[%c0_94, %c0_95] : memref<128x512xf32, #tpu.memory_space<vmem>>, vector<128x128xf32>
      %cst_96 = arith.constant dense<0.000000e+00> : vector<8x128xf32>
      %158 = tpu.matmul %151, %157, %cst_96 {dimension_numbers = #tpu.dot_dimension_numbers<[1], [0], [0], [1], [0, 0, 1, 1], [], []>} : vector<8x128xf32>, vector<128x128xf32>, vector<8x128xf32> -> vector<8x128xf32>
      %159 = arith.addf %156, %158 : vector<8x128xf32>
      %160 = arith.negf %159 : vector<8x128xf32>
      %161 = math.exp %160 : vector<8x128xf32>
      %cst_97 = arith.constant 1.000000e+00 : f32
      %162 = vector.broadcast %cst_97 : f32 to vector<8x128xf32>
      %163 = arith.addf %162, %161 : vector<8x128xf32>
      %164 = arith.divf %162, %163 : vector<8x128xf32>
      %165 = vector.extract_strided_slice %155 {offsets = [0, 128], sizes = [8, 128], strides = [1, 1]} : vector<8x512xf32> to vector<8x128xf32>
      %c0_98 = arith.constant 0 : index
      %c128_99 = arith.constant 128 : index
      %166 = vector.load %arg4[%c0_98, %c128_99] : memref<128x512xf32, #tpu.memory_space<vmem>>, vector<128x128xf32>
      %cst_100 = arith.constant dense<0.000000e+00> : vector<8x128xf32>
      %167 = tpu.matmul %151, %166, %cst_100 {dimension_numbers = #tpu.dot_dimension_numbers<[1], [0], [0], [1], [0, 0, 1, 1], [], []>} : vector<8x128xf32>, vector<128x128xf32>, vector<8x128xf32> -> vector<8x128xf32>
      %168 = arith.addf %165, %167 : vector<8x128xf32>
      %169 = arith.negf %168 : vector<8x128xf32>
      %170 = math.exp %169 : vector<8x128xf32>
      %cst_101 = arith.constant 1.000000e+00 : f32
      %171 = vector.broadcast %cst_101 : f32 to vector<8x128xf32>
      %172 = arith.addf %171, %170 : vector<8x128xf32>
      %173 = arith.divf %171, %172 : vector<8x128xf32>
      %174 = vector.extract_strided_slice %155 {offsets = [0, 256], sizes = [8, 128], strides = [1, 1]} : vector<8x512xf32> to vector<8x128xf32>
      %c0_102 = arith.constant 0 : index
      %c256_103 = arith.constant 256 : index
      %175 = vector.load %arg4[%c0_102, %c256_103] : memref<128x512xf32, #tpu.memory_space<vmem>>, vector<128x128xf32>
      %cst_104 = arith.constant dense<0.000000e+00> : vector<8x128xf32>
      %176 = tpu.matmul %151, %175, %cst_104 {dimension_numbers = #tpu.dot_dimension_numbers<[1], [0], [0], [1], [0, 0, 1, 1], [], []>} : vector<8x128xf32>, vector<128x128xf32>, vector<8x128xf32> -> vector<8x128xf32>
      %177 = arith.addf %174, %176 : vector<8x128xf32>
      %178 = math.tanh %177 : vector<8x128xf32>
      %179 = vector.extract_strided_slice %155 {offsets = [0, 384], sizes = [8, 128], strides = [1, 1]} : vector<8x512xf32> to vector<8x128xf32>
      %c0_105 = arith.constant 0 : index
      %c384_106 = arith.constant 384 : index
      %180 = vector.load %arg4[%c0_105, %c384_106] : memref<128x512xf32, #tpu.memory_space<vmem>>, vector<128x128xf32>
      %cst_107 = arith.constant dense<0.000000e+00> : vector<8x128xf32>
      %181 = tpu.matmul %151, %180, %cst_107 {dimension_numbers = #tpu.dot_dimension_numbers<[1], [0], [0], [1], [0, 0, 1, 1], [], []>} : vector<8x128xf32>, vector<128x128xf32>, vector<8x128xf32> -> vector<8x128xf32>
      %182 = arith.addf %179, %181 : vector<8x128xf32>
      %183 = arith.negf %182 : vector<8x128xf32>
      %184 = math.exp %183 : vector<8x128xf32>
      %cst_108 = arith.constant 1.000000e+00 : f32
      %185 = vector.broadcast %cst_108 : f32 to vector<8x128xf32>
      %186 = arith.addf %185, %184 : vector<8x128xf32>
      %187 = arith.divf %185, %186 : vector<8x128xf32>
      %188 = arith.mulf %173, %152 : vector<8x128xf32>
      %189 = arith.mulf %164, %178 : vector<8x128xf32>
      %190 = arith.addf %188, %189 : vector<8x128xf32>
      %191 = math.tanh %190 : vector<8x128xf32>
      %192 = arith.mulf %187, %191 : vector<8x128xf32>
      %c0_109 = arith.constant 0 : index
      %c0_110 = arith.constant 0 : index
      %193 = vector.load %arg10[%c0_109, %c0_110] : memref<8x128xf32, #tpu.memory_space<vmem>>, vector<8x128xf32>
      tpu.vector_store %arg10[%c0_109, %c0_110], %192 {strides = array<i32>} : memref<8x128xf32, #tpu.memory_space<vmem>>, vector<8x128xf32>,
      %c0_111 = arith.constant 0 : index
      %c0_112 = arith.constant 0 : index
      %194 = vector.load %arg11[%c0_111, %c0_112] : memref<8x128xf32, #tpu.memory_space<vmem>>, vector<8x128xf32>
      tpu.vector_store %arg11[%c0_111, %c0_112], %190 {strides = array<i32>} : memref<8x128xf32, #tpu.memory_space<vmem>>, vector<8x128xf32>,
      %c4_i32 = arith.constant 4 : i32
      %c0_113 = arith.constant 0 : index
      %c0_114 = arith.constant 0 : index
      %195 = vector.load %arg10[%c0_113, %c0_114] : memref<8x128xf32, #tpu.memory_space<vmem>>, vector<8x128xf32>
      %c0_115 = arith.constant 0 : index
      %c0_116 = arith.constant 0 : index
      %196 = vector.load %arg11[%c0_115, %c0_116] : memref<8x128xf32, #tpu.memory_space<vmem>>, vector<8x128xf32>
      %197 = arith.index_cast %c4_i32 : i32 to index
      %c0_117 = arith.constant 0 : index
      %c0_118 = arith.constant 0 : index
      %198 = vector.load %arg9[%197, %c0_117, %c0_118] : memref<8x8x512xf32, #tpu.memory_space<vmem>>, vector<1x8x512xf32>
      %199 = vector.shape_cast %198 : vector<1x8x512xf32> to vector<8x512xf32>
      %200 = vector.extract_strided_slice %199 {offsets = [0, 0], sizes = [8, 128], strides = [1, 1]} : vector<8x512xf32> to vector<8x128xf32>
      %c0_119 = arith.constant 0 : index
      %c0_120 = arith.constant 0 : index
      %201 = vector.load %arg4[%c0_119, %c0_120] : memref<128x512xf32, #tpu.memory_space<vmem>>, vector<128x128xf32>
      %cst_121 = arith.constant dense<0.000000e+00> : vector<8x128xf32>
      %202 = tpu.matmul %195, %201, %cst_121 {dimension_numbers = #tpu.dot_dimension_numbers<[1], [0], [0], [1], [0, 0, 1, 1], [], []>} : vector<8x128xf32>, vector<128x128xf32>, vector<8x128xf32> -> vector<8x128xf32>
      %203 = arith.addf %200, %202 : vector<8x128xf32>
      %204 = arith.negf %203 : vector<8x128xf32>
      %205 = math.exp %204 : vector<8x128xf32>
      %cst_122 = arith.constant 1.000000e+00 : f32
      %206 = vector.broadcast %cst_122 : f32 to vector<8x128xf32>
      %207 = arith.addf %206, %205 : vector<8x128xf32>
      %208 = arith.divf %206, %207 : vector<8x128xf32>
      %209 = vector.extract_strided_slice %199 {offsets = [0, 128], sizes = [8, 128], strides = [1, 1]} : vector<8x512xf32> to vector<8x128xf32>
      %c0_123 = arith.constant 0 : index
      %c128_124 = arith.constant 128 : index
      %210 = vector.load %arg4[%c0_123, %c128_124] : memref<128x512xf32, #tpu.memory_space<vmem>>, vector<128x128xf32>
      %cst_125 = arith.constant dense<0.000000e+00> : vector<8x128xf32>
      %211 = tpu.matmul %195, %210, %cst_125 {dimension_numbers = #tpu.dot_dimension_numbers<[1], [0], [0], [1], [0, 0, 1, 1], [], []>} : vector<8x128xf32>, vector<128x128xf32>, vector<8x128xf32> -> vector<8x128xf32>
      %212 = arith.addf %209, %211 : vector<8x128xf32>
      %213 = arith.negf %212 : vector<8x128xf32>
      %214 = math.exp %213 : vector<8x128xf32>
      %cst_126 = arith.constant 1.000000e+00 : f32
      %215 = vector.broadcast %cst_126 : f32 to vector<8x128xf32>
      %216 = arith.addf %215, %214 : vector<8x128xf32>
      %217 = arith.divf %215, %216 : vector<8x128xf32>
      %218 = vector.extract_strided_slice %199 {offsets = [0, 256], sizes = [8, 128], strides = [1, 1]} : vector<8x512xf32> to vector<8x128xf32>
      %c0_127 = arith.constant 0 : index
      %c256_128 = arith.constant 256 : index
      %219 = vector.load %arg4[%c0_127, %c256_128] : memref<128x512xf32, #tpu.memory_space<vmem>>, vector<128x128xf32>
      %cst_129 = arith.constant dense<0.000000e+00> : vector<8x128xf32>
      %220 = tpu.matmul %195, %219, %cst_129 {dimension_numbers = #tpu.dot_dimension_numbers<[1], [0], [0], [1], [0, 0, 1, 1], [], []>} : vector<8x128xf32>, vector<128x128xf32>, vector<8x128xf32> -> vector<8x128xf32>
      %221 = arith.addf %218, %220 : vector<8x128xf32>
      %222 = math.tanh %221 : vector<8x128xf32>
      %223 = vector.extract_strided_slice %199 {offsets = [0, 384], sizes = [8, 128], strides = [1, 1]} : vector<8x512xf32> to vector<8x128xf32>
      %c0_130 = arith.constant 0 : index
      %c384_131 = arith.constant 384 : index
      %224 = vector.load %arg4[%c0_130, %c384_131] : memref<128x512xf32, #tpu.memory_space<vmem>>, vector<128x128xf32>
      %cst_132 = arith.constant dense<0.000000e+00> : vector<8x128xf32>
      %225 = tpu.matmul %195, %224, %cst_132 {dimension_numbers = #tpu.dot_dimension_numbers<[1], [0], [0], [1], [0, 0, 1, 1], [], []>} : vector<8x128xf32>, vector<128x128xf32>, vector<8x128xf32> -> vector<8x128xf32>
      %226 = arith.addf %223, %225 : vector<8x128xf32>
      %227 = arith.negf %226 : vector<8x128xf32>
      %228 = math.exp %227 : vector<8x128xf32>
      %cst_133 = arith.constant 1.000000e+00 : f32
      %229 = vector.broadcast %cst_133 : f32 to vector<8x128xf32>
      %230 = arith.addf %229, %228 : vector<8x128xf32>
      %231 = arith.divf %229, %230 : vector<8x128xf32>
      %232 = arith.mulf %217, %196 : vector<8x128xf32>
      %233 = arith.mulf %208, %222 : vector<8x128xf32>
      %234 = arith.addf %232, %233 : vector<8x128xf32>
      %235 = math.tanh %234 : vector<8x128xf32>
      %236 = arith.mulf %231, %235 : vector<8x128xf32>
      %c0_134 = arith.constant 0 : index
      %c0_135 = arith.constant 0 : index
      %237 = vector.load %arg10[%c0_134, %c0_135] : memref<8x128xf32, #tpu.memory_space<vmem>>, vector<8x128xf32>
      tpu.vector_store %arg10[%c0_134, %c0_135], %236 {strides = array<i32>} : memref<8x128xf32, #tpu.memory_space<vmem>>, vector<8x128xf32>,
      %c0_136 = arith.constant 0 : index
      %c0_137 = arith.constant 0 : index
      %238 = vector.load %arg11[%c0_136, %c0_137] : memref<8x128xf32, #tpu.memory_space<vmem>>, vector<8x128xf32>
      tpu.vector_store %arg11[%c0_136, %c0_137], %234 {strides = array<i32>} : memref<8x128xf32, #tpu.memory_space<vmem>>, vector<8x128xf32>,
      %c5_i32 = arith.constant 5 : i32
      %c0_138 = arith.constant 0 : index
      %c0_139 = arith.constant 0 : index
      %239 = vector.load %arg10[%c0_138, %c0_139] : memref<8x128xf32, #tpu.memory_space<vmem>>, vector<8x128xf32>
      %c0_140 = arith.constant 0 : index
      %c0_141 = arith.constant 0 : index
      %240 = vector.load %arg11[%c0_140, %c0_141] : memref<8x128xf32, #tpu.memory_space<vmem>>, vector<8x128xf32>
      %241 = arith.index_cast %c5_i32 : i32 to index
      %c0_142 = arith.constant 0 : index
      %c0_143 = arith.constant 0 : index
      %242 = vector.load %arg9[%241, %c0_142, %c0_143] : memref<8x8x512xf32, #tpu.memory_space<vmem>>, vector<1x8x512xf32>
      %243 = vector.shape_cast %242 : vector<1x8x512xf32> to vector<8x512xf32>
      %244 = vector.extract_strided_slice %243 {offsets = [0, 0], sizes = [8, 128], strides = [1, 1]} : vector<8x512xf32> to vector<8x128xf32>
      %c0_144 = arith.constant 0 : index
      %c0_145 = arith.constant 0 : index
      %245 = vector.load %arg4[%c0_144, %c0_145] : memref<128x512xf32, #tpu.memory_space<vmem>>, vector<128x128xf32>
      %cst_146 = arith.constant dense<0.000000e+00> : vector<8x128xf32>
      %246 = tpu.matmul %239, %245, %cst_146 {dimension_numbers = #tpu.dot_dimension_numbers<[1], [0], [0], [1], [0, 0, 1, 1], [], []>} : vector<8x128xf32>, vector<128x128xf32>, vector<8x128xf32> -> vector<8x128xf32>
      %247 = arith.addf %244, %246 : vector<8x128xf32>
      %248 = arith.negf %247 : vector<8x128xf32>
      %249 = math.exp %248 : vector<8x128xf32>
      %cst_147 = arith.constant 1.000000e+00 : f32
      %250 = vector.broadcast %cst_147 : f32 to vector<8x128xf32>
      %251 = arith.addf %250, %249 : vector<8x128xf32>
      %252 = arith.divf %250, %251 : vector<8x128xf32>
      %253 = vector.extract_strided_slice %243 {offsets = [0, 128], sizes = [8, 128], strides = [1, 1]} : vector<8x512xf32> to vector<8x128xf32>
      %c0_148 = arith.constant 0 : index
      %c128_149 = arith.constant 128 : index
      %254 = vector.load %arg4[%c0_148, %c128_149] : memref<128x512xf32, #tpu.memory_space<vmem>>, vector<128x128xf32>
      %cst_150 = arith.constant dense<0.000000e+00> : vector<8x128xf32>
      %255 = tpu.matmul %239, %254, %cst_150 {dimension_numbers = #tpu.dot_dimension_numbers<[1], [0], [0], [1], [0, 0, 1, 1], [], []>} : vector<8x128xf32>, vector<128x128xf32>, vector<8x128xf32> -> vector<8x128xf32>
      %256 = arith.addf %253, %255 : vector<8x128xf32>
      %257 = arith.negf %256 : vector<8x128xf32>
      %258 = math.exp %257 : vector<8x128xf32>
      %cst_151 = arith.constant 1.000000e+00 : f32
      %259 = vector.broadcast %cst_151 : f32 to vector<8x128xf32>
      %260 = arith.addf %259, %258 : vector<8x128xf32>
      %261 = arith.divf %259, %260 : vector<8x128xf32>
      %262 = vector.extract_strided_slice %243 {offsets = [0, 256], sizes = [8, 128], strides = [1, 1]} : vector<8x512xf32> to vector<8x128xf32>
      %c0_152 = arith.constant 0 : index
      %c256_153 = arith.constant 256 : index
      %263 = vector.load %arg4[%c0_152, %c256_153] : memref<128x512xf32, #tpu.memory_space<vmem>>, vector<128x128xf32>
      %cst_154 = arith.constant dense<0.000000e+00> : vector<8x128xf32>
      %264 = tpu.matmul %239, %263, %cst_154 {dimension_numbers = #tpu.dot_dimension_numbers<[1], [0], [0], [1], [0, 0, 1, 1], [], []>} : vector<8x128xf32>, vector<128x128xf32>, vector<8x128xf32> -> vector<8x128xf32>
      %265 = arith.addf %262, %264 : vector<8x128xf32>
      %266 = math.tanh %265 : vector<8x128xf32>
      %267 = vector.extract_strided_slice %243 {offsets = [0, 384], sizes = [8, 128], strides = [1, 1]} : vector<8x512xf32> to vector<8x128xf32>
      %c0_155 = arith.constant 0 : index
      %c384_156 = arith.constant 384 : index
      %268 = vector.load %arg4[%c0_155, %c384_156] : memref<128x512xf32, #tpu.memory_space<vmem>>, vector<128x128xf32>
      %cst_157 = arith.constant dense<0.000000e+00> : vector<8x128xf32>
      %269 = tpu.matmul %239, %268, %cst_157 {dimension_numbers = #tpu.dot_dimension_numbers<[1], [0], [0], [1], [0, 0, 1, 1], [], []>} : vector<8x128xf32>, vector<128x128xf32>, vector<8x128xf32> -> vector<8x128xf32>
      %270 = arith.addf %267, %269 : vector<8x128xf32>
      %271 = arith.negf %270 : vector<8x128xf32>
      %272 = math.exp %271 : vector<8x128xf32>
      %cst_158 = arith.constant 1.000000e+00 : f32
      %273 = vector.broadcast %cst_158 : f32 to vector<8x128xf32>
      %274 = arith.addf %273, %272 : vector<8x128xf32>
      %275 = arith.divf %273, %274 : vector<8x128xf32>
      %276 = arith.mulf %261, %240 : vector<8x128xf32>
      %277 = arith.mulf %252, %266 : vector<8x128xf32>
      %278 = arith.addf %276, %277 : vector<8x128xf32>
      %279 = math.tanh %278 : vector<8x128xf32>
      %280 = arith.mulf %275, %279 : vector<8x128xf32>
      %c0_159 = arith.constant 0 : index
      %c0_160 = arith.constant 0 : index
      %281 = vector.load %arg10[%c0_159, %c0_160] : memref<8x128xf32, #tpu.memory_space<vmem>>, vector<8x128xf32>
      tpu.vector_store %arg10[%c0_159, %c0_160], %280 {strides = array<i32>} : memref<8x128xf32, #tpu.memory_space<vmem>>, vector<8x128xf32>,
      %c0_161 = arith.constant 0 : index
      %c0_162 = arith.constant 0 : index
      %282 = vector.load %arg11[%c0_161, %c0_162] : memref<8x128xf32, #tpu.memory_space<vmem>>, vector<8x128xf32>
      tpu.vector_store %arg11[%c0_161, %c0_162], %278 {strides = array<i32>} : memref<8x128xf32, #tpu.memory_space<vmem>>, vector<8x128xf32>,
      %c6_i32 = arith.constant 6 : i32
      %c0_163 = arith.constant 0 : index
      %c0_164 = arith.constant 0 : index
      %283 = vector.load %arg10[%c0_163, %c0_164] : memref<8x128xf32, #tpu.memory_space<vmem>>, vector<8x128xf32>
      %c0_165 = arith.constant 0 : index
      %c0_166 = arith.constant 0 : index
      %284 = vector.load %arg11[%c0_165, %c0_166] : memref<8x128xf32, #tpu.memory_space<vmem>>, vector<8x128xf32>
      %285 = arith.index_cast %c6_i32 : i32 to index
      %c0_167 = arith.constant 0 : index
      %c0_168 = arith.constant 0 : index
      %286 = vector.load %arg9[%285, %c0_167, %c0_168] : memref<8x8x512xf32, #tpu.memory_space<vmem>>, vector<1x8x512xf32>
      %287 = vector.shape_cast %286 : vector<1x8x512xf32> to vector<8x512xf32>
      %288 = vector.extract_strided_slice %287 {offsets = [0, 0], sizes = [8, 128], strides = [1, 1]} : vector<8x512xf32> to vector<8x128xf32>
      %c0_169 = arith.constant 0 : index
      %c0_170 = arith.constant 0 : index
      %289 = vector.load %arg4[%c0_169, %c0_170] : memref<128x512xf32, #tpu.memory_space<vmem>>, vector<128x128xf32>
      %cst_171 = arith.constant dense<0.000000e+00> : vector<8x128xf32>
      %290 = tpu.matmul %283, %289, %cst_171 {dimension_numbers = #tpu.dot_dimension_numbers<[1], [0], [0], [1], [0, 0, 1, 1], [], []>} : vector<8x128xf32>, vector<128x128xf32>, vector<8x128xf32> -> vector<8x128xf32>
      %291 = arith.addf %288, %290 : vector<8x128xf32>
      %292 = arith.negf %291 : vector<8x128xf32>
      %293 = math.exp %292 : vector<8x128xf32>
      %cst_172 = arith.constant 1.000000e+00 : f32
      %294 = vector.broadcast %cst_172 : f32 to vector<8x128xf32>
      %295 = arith.addf %294, %293 : vector<8x128xf32>
      %296 = arith.divf %294, %295 : vector<8x128xf32>
      %297 = vector.extract_strided_slice %287 {offsets = [0, 128], sizes = [8, 128], strides = [1, 1]} : vector<8x512xf32> to vector<8x128xf32>
      %c0_173 = arith.constant 0 : index
      %c128_174 = arith.constant 128 : index
      %298 = vector.load %arg4[%c0_173, %c128_174] : memref<128x512xf32, #tpu.memory_space<vmem>>, vector<128x128xf32>
      %cst_175 = arith.constant dense<0.000000e+00> : vector<8x128xf32>
      %299 = tpu.matmul %283, %298, %cst_175 {dimension_numbers = #tpu.dot_dimension_numbers<[1], [0], [0], [1], [0, 0, 1, 1], [], []>} : vector<8x128xf32>, vector<128x128xf32>, vector<8x128xf32> -> vector<8x128xf32>
      %300 = arith.addf %297, %299 : vector<8x128xf32>
      %301 = arith.negf %300 : vector<8x128xf32>
      %302 = math.exp %301 : vector<8x128xf32>
      %cst_176 = arith.constant 1.000000e+00 : f32
      %303 = vector.broadcast %cst_176 : f32 to vector<8x128xf32>
      %304 = arith.addf %303, %302 : vector<8x128xf32>
      %305 = arith.divf %303, %304 : vector<8x128xf32>
      %306 = vector.extract_strided_slice %287 {offsets = [0, 256], sizes = [8, 128], strides = [1, 1]} : vector<8x512xf32> to vector<8x128xf32>
      %c0_177 = arith.constant 0 : index
      %c256_178 = arith.constant 256 : index
      %307 = vector.load %arg4[%c0_177, %c256_178] : memref<128x512xf32, #tpu.memory_space<vmem>>, vector<128x128xf32>
      %cst_179 = arith.constant dense<0.000000e+00> : vector<8x128xf32>
      %308 = tpu.matmul %283, %307, %cst_179 {dimension_numbers = #tpu.dot_dimension_numbers<[1], [0], [0], [1], [0, 0, 1, 1], [], []>} : vector<8x128xf32>, vector<128x128xf32>, vector<8x128xf32> -> vector<8x128xf32>
      %309 = arith.addf %306, %308 : vector<8x128xf32>
      %310 = math.tanh %309 : vector<8x128xf32>
      %311 = vector.extract_strided_slice %287 {offsets = [0, 384], sizes = [8, 128], strides = [1, 1]} : vector<8x512xf32> to vector<8x128xf32>
      %c0_180 = arith.constant 0 : index
      %c384_181 = arith.constant 384 : index
      %312 = vector.load %arg4[%c0_180, %c384_181] : memref<128x512xf32, #tpu.memory_space<vmem>>, vector<128x128xf32>
      %cst_182 = arith.constant dense<0.000000e+00> : vector<8x128xf32>
      %313 = tpu.matmul %283, %312, %cst_182 {dimension_numbers = #tpu.dot_dimension_numbers<[1], [0], [0], [1], [0, 0, 1, 1], [], []>} : vector<8x128xf32>, vector<128x128xf32>, vector<8x128xf32> -> vector<8x128xf32>
      %314 = arith.addf %311, %313 : vector<8x128xf32>
      %315 = arith.negf %314 : vector<8x128xf32>
      %316 = math.exp %315 : vector<8x128xf32>
      %cst_183 = arith.constant 1.000000e+00 : f32
      %317 = vector.broadcast %cst_183 : f32 to vector<8x128xf32>
      %318 = arith.addf %317, %316 : vector<8x128xf32>
      %319 = arith.divf %317, %318 : vector<8x128xf32>
      %320 = arith.mulf %305, %284 : vector<8x128xf32>
      %321 = arith.mulf %296, %310 : vector<8x128xf32>
      %322 = arith.addf %320, %321 : vector<8x128xf32>
      %323 = math.tanh %322 : vector<8x128xf32>
      %324 = arith.mulf %319, %323 : vector<8x128xf32>
      %c0_184 = arith.constant 0 : index
      %c0_185 = arith.constant 0 : index
      %325 = vector.load %arg10[%c0_184, %c0_185] : memref<8x128xf32, #tpu.memory_space<vmem>>, vector<8x128xf32>
      tpu.vector_store %arg10[%c0_184, %c0_185], %324 {strides = array<i32>} : memref<8x128xf32, #tpu.memory_space<vmem>>, vector<8x128xf32>,
      %c0_186 = arith.constant 0 : index
      %c0_187 = arith.constant 0 : index
      %326 = vector.load %arg11[%c0_186, %c0_187] : memref<8x128xf32, #tpu.memory_space<vmem>>, vector<8x128xf32>
      tpu.vector_store %arg11[%c0_186, %c0_187], %322 {strides = array<i32>} : memref<8x128xf32, #tpu.memory_space<vmem>>, vector<8x128xf32>,
      %c7_i32 = arith.constant 7 : i32
      %c0_188 = arith.constant 0 : index
      %c0_189 = arith.constant 0 : index
      %327 = vector.load %arg10[%c0_188, %c0_189] : memref<8x128xf32, #tpu.memory_space<vmem>>, vector<8x128xf32>
      %c0_190 = arith.constant 0 : index
      %c0_191 = arith.constant 0 : index
      %328 = vector.load %arg11[%c0_190, %c0_191] : memref<8x128xf32, #tpu.memory_space<vmem>>, vector<8x128xf32>
      %329 = arith.index_cast %c7_i32 : i32 to index
      %c0_192 = arith.constant 0 : index
      %c0_193 = arith.constant 0 : index
      %330 = vector.load %arg9[%329, %c0_192, %c0_193] : memref<8x8x512xf32, #tpu.memory_space<vmem>>, vector<1x8x512xf32>
      %331 = vector.shape_cast %330 : vector<1x8x512xf32> to vector<8x512xf32>
      %332 = vector.extract_strided_slice %331 {offsets = [0, 0], sizes = [8, 128], strides = [1, 1]} : vector<8x512xf32> to vector<8x128xf32>
      %c0_194 = arith.constant 0 : index
      %c0_195 = arith.constant 0 : index
      %333 = vector.load %arg4[%c0_194, %c0_195] : memref<128x512xf32, #tpu.memory_space<vmem>>, vector<128x128xf32>
      %cst_196 = arith.constant dense<0.000000e+00> : vector<8x128xf32>
      %334 = tpu.matmul %327, %333, %cst_196 {dimension_numbers = #tpu.dot_dimension_numbers<[1], [0], [0], [1], [0, 0, 1, 1], [], []>} : vector<8x128xf32>, vector<128x128xf32>, vector<8x128xf32> -> vector<8x128xf32>
      %335 = arith.addf %332, %334 : vector<8x128xf32>
      %336 = arith.negf %335 : vector<8x128xf32>
      %337 = math.exp %336 : vector<8x128xf32>
      %cst_197 = arith.constant 1.000000e+00 : f32
      %338 = vector.broadcast %cst_197 : f32 to vector<8x128xf32>
      %339 = arith.addf %338, %337 : vector<8x128xf32>
      %340 = arith.divf %338, %339 : vector<8x128xf32>
      %341 = vector.extract_strided_slice %331 {offsets = [0, 128], sizes = [8, 128], strides = [1, 1]} : vector<8x512xf32> to vector<8x128xf32>
      %c0_198 = arith.constant 0 : index
      %c128_199 = arith.constant 128 : index
      %342 = vector.load %arg4[%c0_198, %c128_199] : memref<128x512xf32, #tpu.memory_space<vmem>>, vector<128x128xf32>
      %cst_200 = arith.constant dense<0.000000e+00> : vector<8x128xf32>
      %343 = tpu.matmul %327, %342, %cst_200 {dimension_numbers = #tpu.dot_dimension_numbers<[1], [0], [0], [1], [0, 0, 1, 1], [], []>} : vector<8x128xf32>, vector<128x128xf32>, vector<8x128xf32> -> vector<8x128xf32>
      %344 = arith.addf %341, %343 : vector<8x128xf32>
      %345 = arith.negf %344 : vector<8x128xf32>
      %346 = math.exp %345 : vector<8x128xf32>
      %cst_201 = arith.constant 1.000000e+00 : f32
      %347 = vector.broadcast %cst_201 : f32 to vector<8x128xf32>
      %348 = arith.addf %347, %346 : vector<8x128xf32>
      %349 = arith.divf %347, %348 : vector<8x128xf32>
      %350 = vector.extract_strided_slice %331 {offsets = [0, 256], sizes = [8, 128], strides = [1, 1]} : vector<8x512xf32> to vector<8x128xf32>
      %c0_202 = arith.constant 0 : index
      %c256_203 = arith.constant 256 : index
      %351 = vector.load %arg4[%c0_202, %c256_203] : memref<128x512xf32, #tpu.memory_space<vmem>>, vector<128x128xf32>
      %cst_204 = arith.constant dense<0.000000e+00> : vector<8x128xf32>
      %352 = tpu.matmul %327, %351, %cst_204 {dimension_numbers = #tpu.dot_dimension_numbers<[1], [0], [0], [1], [0, 0, 1, 1], [], []>} : vector<8x128xf32>, vector<128x128xf32>, vector<8x128xf32> -> vector<8x128xf32>
      %353 = arith.addf %350, %352 : vector<8x128xf32>
      %354 = math.tanh %353 : vector<8x128xf32>
      %355 = vector.extract_strided_slice %331 {offsets = [0, 384], sizes = [8, 128], strides = [1, 1]} : vector<8x512xf32> to vector<8x128xf32>
      %c0_205 = arith.constant 0 : index
      %c384_206 = arith.constant 384 : index
      %356 = vector.load %arg4[%c0_205, %c384_206] : memref<128x512xf32, #tpu.memory_space<vmem>>, vector<128x128xf32>
      %cst_207 = arith.constant dense<0.000000e+00> : vector<8x128xf32>
      %357 = tpu.matmul %327, %356, %cst_207 {dimension_numbers = #tpu.dot_dimension_numbers<[1], [0], [0], [1], [0, 0, 1, 1], [], []>} : vector<8x128xf32>, vector<128x128xf32>, vector<8x128xf32> -> vector<8x128xf32>
      %358 = arith.addf %355, %357 : vector<8x128xf32>
      %359 = arith.negf %358 : vector<8x128xf32>
      %360 = math.exp %359 : vector<8x128xf32>
      %cst_208 = arith.constant 1.000000e+00 : f32
      %361 = vector.broadcast %cst_208 : f32 to vector<8x128xf32>
      %362 = arith.addf %361, %360 : vector<8x128xf32>
      %363 = arith.divf %361, %362 : vector<8x128xf32>
      %364 = arith.mulf %349, %328 : vector<8x128xf32>
      %365 = arith.mulf %340, %354 : vector<8x128xf32>
      %366 = arith.addf %364, %365 : vector<8x128xf32>
      %367 = math.tanh %366 : vector<8x128xf32>
      %368 = arith.mulf %363, %367 : vector<8x128xf32>
      %c0_209 = arith.constant 0 : index
      %c0_210 = arith.constant 0 : index
      %369 = vector.load %arg10[%c0_209, %c0_210] : memref<8x128xf32, #tpu.memory_space<vmem>>, vector<8x128xf32>
      tpu.vector_store %arg10[%c0_209, %c0_210], %368 {strides = array<i32>} : memref<8x128xf32, #tpu.memory_space<vmem>>, vector<8x128xf32>,
      %c0_211 = arith.constant 0 : index
      %c0_212 = arith.constant 0 : index
      %370 = vector.load %arg11[%c0_211, %c0_212] : memref<8x128xf32, #tpu.memory_space<vmem>>, vector<8x128xf32>
      tpu.vector_store %arg11[%c0_211, %c0_212], %366 {strides = array<i32>} : memref<8x128xf32, #tpu.memory_space<vmem>>, vector<8x128xf32>,
      %c8_i32_213 = arith.constant 8 : i32
      %c0_214 = arith.constant 0 : index
      %c0_215 = arith.constant 0 : index
      %371 = vector.load %arg10[%c0_214, %c0_215] : memref<8x128xf32, #tpu.memory_space<vmem>>, vector<8x128xf32>
      %c0_216 = arith.constant 0 : index
      %c0_217 = arith.constant 0 : index
      %372 = vector.load %arg6[%c0_216, %c0_217] : memref<128x128xf32, #tpu.memory_space<vmem>>, vector<128x128xf32>
      %cst_218 = arith.constant dense<0.000000e+00> : vector<8x128xf32>
      %373 = tpu.matmul %371, %372, %cst_218 {dimension_numbers = #tpu.dot_dimension_numbers<[1], [0], [0], [1], [0, 0, 1, 1], [], []>} : vector<8x128xf32>, vector<128x128xf32>, vector<8x128xf32> -> vector<8x128xf32>
      %c0_219 = arith.constant 0 : index
      %c0_220 = arith.constant 0 : index
      %374 = vector.load %arg7[%c0_219, %c0_220] : memref<1x128xf32, #tpu.memory_space<vmem>>, vector<1x128xf32>
      %375 = vector.broadcast %374 : vector<1x128xf32> to vector<8x128xf32>
      %376 = arith.addf %373, %375 : vector<8x128xf32>
      %377 = tpu.iota {dimensions = array<i32: 1>} : vector<8x128xi32>
      %c4_i32_221 = arith.constant 4 : i32
      %378 = vector.broadcast %c4_i32_221 : i32 to vector<8x128xi32>
      %379 = arith.cmpi slt, %377, %378 : vector<8x128xi32>
      %cst_222 = arith.constant -1.000000e+30 : f32
      %380 = vector.broadcast %cst_222 : f32 to vector<8x128xf32>
      %381 = arith.select %379, %376, %380 : vector<8x128xi1>, vector<8x128xf32>
      %cst_223 = arith.constant dense<0xFF800000> : vector<8xf32>
      %382 = vector.multi_reduction <maximumf>, %381, %cst_223 [1] : vector<8x128xf32> to vector<8xf32>
      %383 = vector.shape_cast %382 : vector<8xf32> to vector<8x1xf32>
      %384 = vector.broadcast %383 : vector<8x1xf32> to vector<8x128xf32>
      %385 = arith.subf %381, %384 : vector<8x128xf32>
      %386 = math.exp %385 : vector<8x128xf32>
      %cst_224 = arith.constant dense<0.000000e+00> : vector<8xf32>
      %387 = vector.multi_reduction <add>, %386, %cst_224 [1] : vector<8x128xf32> to vector<8xf32>
      %388 = vector.shape_cast %387 : vector<8xf32> to vector<8x1xf32>
      %389 = vector.broadcast %388 : vector<8x1xf32> to vector<8x128xf32>
      %390 = arith.divf %386, %389 : vector<8x128xf32>
      %c0_225 = arith.constant 0 : index
      %c0_226 = arith.constant 0 : index
      %391 = vector.load %arg8[%c0_225, %c0_226] : memref<8x128xf32, #tpu.memory_space<vmem>>, vector<8x128xf32>
      tpu.vector_store %arg8[%c0_225, %c0_226], %390 {strides = array<i32>} : memref<8x128xf32, #tpu.memory_space<vmem>>, vector<8x128xf32>,
    } else {
    }
    return
  }
  func.func @transform_0(%arg0: i32, %arg1: i32) -> (i32, i32, i32) {
    %c0_i32 = arith.constant 0 : i32
    %c0_i32_0 = arith.constant 0 : i32
    return %arg1, %arg0, %c0_i32 : i32, i32, i32
  }
  func.func @transform_1(%arg0: i32, %arg1: i32) -> (i32, i32) {
    %c0_i32 = arith.constant 0 : i32
    %c0_i32_0 = arith.constant 0 : i32
    %c0_i32_1 = arith.constant 0 : i32
    return %c0_i32, %c0_i32_0 : i32, i32
  }
  func.func @transform_2(%arg0: i32, %arg1: i32) -> (i32, i32) {
    %c0_i32 = arith.constant 0 : i32
    %c0_i32_0 = arith.constant 0 : i32
    %c0_i32_1 = arith.constant 0 : i32
    return %c0_i32, %c0_i32_0 : i32, i32
  }
  func.func @transform_3(%arg0: i32, %arg1: i32) -> (i32, i32) {
    %c0_i32 = arith.constant 0 : i32
    %c0_i32_0 = arith.constant 0 : i32
    %c0_i32_1 = arith.constant 0 : i32
    return %c0_i32, %c0_i32_0 : i32, i32
  }
  func.func @transform_4(%arg0: i32, %arg1: i32) -> (i32, i32) {
    %c0_i32 = arith.constant 0 : i32
    %c0_i32_0 = arith.constant 0 : i32
    %c0_i32_1 = arith.constant 0 : i32
    return %c0_i32, %c0_i32_0 : i32, i32
  }
  func.func @transform_5(%arg0: i32, %arg1: i32) -> (i32, i32) {
    %c0_i32 = arith.constant 0 : i32
    %c0_i32_0 = arith.constant 0 : i32
    %c0_i32_1 = arith.constant 0 : i32
    return %c0_i32, %c0_i32_0 : i32, i32
  }
  func.func @transform_6(%arg0: i32, %arg1: i32) -> (i32, i32) {
    %c0_i32 = arith.constant 0 : i32
    %c0_i32_0 = arith.constant 0 : i32
    return %arg0, %c0_i32 : i32, i32
  }
}

</mosaic_0001>

<bundles_post_ra>
// kernel: tpu_custom_call.1
= control target key start
LH: loop header
LB: loop body
LE: loop exit
PB: predicated region body
PF: predicated region fallthrough
CT: control target
= control target key end

     0   :  { %11 = vsyncpa [#allocation6], 0  ;;  %s7386_s0 = inlined_call_operand.hbm [shape: f32[8,8,128], index: 0, kind: input, shape index: {}]   ;;  %s7387_s1 = inlined_call_operand.hbm [shape: f32[128,512], index: 1, kind: input, shape index: {}]   ;;  %s7388_s2 = inlined_call_operand.hbm [shape: f32[128,512], index: 2, kind: input, shape index: {}]   ;;  %s7389_s3 = inlined_call_operand.vmem [shape: f32[1,512], index: 3, kind: input, shape index: {}]   ;;  %s7390_s4 = inlined_call_operand.hbm [shape: f32[128,128], index: 4, kind: input, shape index: {}]   ;;  %s7391_s5 = inlined_call_operand.vmem [shape: f32[1,128], index: 5, kind: input, shape index: {}]   ;;  %s7392_s6 = inlined_call_operand.hbm [shape: f32[8,128], index: 6, kind: output, shape index: {}]  }
   0x1   :  { %12 = vsyncpa [#allocation9], 0 }
   0x2   :  { %13 = vsyncpa [#allocation12], 0 }
   0x3   :  { %14 = vsyncpa [#allocation7], 0  ;;  %s5605_s21 = smov [#allocation8]  }
   0x4   :  { %s32_s22 = sshll.u32 %s5605_s21, 4  ;;  %s33_s22 = int_to_ptr.vmem [resolvable:$true] %s32_s22 }
   0x5   :  { %s5505_s23 = scalar_lea.vmem %s33_s22, 8192  ;;  %p5510_p1 = scmp.lt.s32.totalorder %s33_s22, %s33_s22 }
   0x6   :  { %p5506_p0 = scmp.ne.s32.totalorder %s33_s22, %s5505_s23  ;;  %p5511_p2 = scmp.lt.s32.totalorder %s5505_s23, %s5505_s23 }
   0x8   :  { %p5512_p3 = por %p5511_p2, %p5510_p1 }
   0xa   :  { %p5513_p4 = pnand %p5512_p3, %p5506_p0 }
   0xc   :  { %5516 = shalt.err (!%p5513_p4)
}
   0xd   :  { %s5606_s24 = smov 512   ;;  %s5607_s25 = smov 32  }
   0xe   :  { %38 = dma.hbm_to_vmem [thread:$0]  %s7387_s1, 8192, %s33_s22, [#allocation9], %s5606_s24, %s5606_s24, %s5607_s25  }
   0xf   :  { %s5608_s28 = smov [#allocation5]  }
  0x10   :  { %s20_s29 = sshll.u32 %s5608_s28, 4  ;;  %s21_s29 = int_to_ptr.vmem [resolvable:$true] %s20_s29 }
  0x11   :  { %s5525_s30 = scalar_lea.vmem %s21_s29, 1024  ;;  %p5530_p6 = scmp.lt.s32.totalorder %s21_s29, %s21_s29 }
  0x12   :  { %p5526_p5 = scmp.ne.s32.totalorder %s21_s29, %s5525_s30  ;;  %p5531_p7 = scmp.lt.s32.totalorder %s5525_s30, %s5525_s30 }
  0x14   :  { %p5532_p8 = por %p5531_p7, %p5530_p6 }
  0x16   :  { %p5533_p9 = pnand %p5532_p8, %p5526_p5 }
  0x18   :  { %5536 = shalt.err (!%p5533_p9)
}
  0x19   :  { %s5609_s7 = smov 128   ;;  %s5610_s8 = smov 8  }
  0x1a   :  { %26 = dma.hbm_to_vmem [thread:$0]  %s7386_s0, 1024, %s21_s29, [#allocation6], %s5609_s7, %s5609_s7, %s5610_s8  }
  0x1b   :  { %s5611_s11 = smov [#allocation10]   ;;  %s5612_s13 = smov [#allocation11]  }
  0x1c   :  { %s44_s12 = sshll.u32 %s5611_s11, 4  ;;  %s58_s1 = sshll.u32 %s5612_s13, 4  ;;  %s45_s12 = int_to_ptr.vmem [resolvable:$true] %s44_s12  ;;  %s59_s1 = int_to_ptr.vmem [resolvable:$true] %s58_s1 }
  0x1d   :  { %s5545_s14 = scalar_lea.vmem %s45_s12, 8192  ;;  %p5550_p11 = scmp.lt.s32.totalorder %s45_s12, %s45_s12 }
  0x1e   :  { %p5546_p10 = scmp.ne.s32.totalorder %s45_s12, %s5545_s14  ;;  %p5551_p12 = scmp.lt.s32.totalorder %s5545_s14, %s5545_s14 }
  0x20   :  { %p5552_p13 = por %p5551_p12, %p5550_p11 }
  0x22   :  { %p5553_p0 = pnand %p5552_p13, %p5546_p10 }
  0x24   :  { %5556 = shalt.err (!%p5553_p0)
}
  0x25   :  { %50 = dma.hbm_to_vmem [thread:$0]  %s7388_s2, 8192, %s45_s12, [#allocation9], %s5606_s24, %s5606_s24, %s5607_s25  }
  0x26   :  { %s5565_s0 = scalar_lea.vmem %s59_s1, 2048  ;;  %p5570_p2 = scmp.lt.s32.totalorder %s59_s1, %s59_s1 }
  0x27   :  { %p5566_p1 = scmp.ne.s32.totalorder %s59_s1, %s5565_s0  ;;  %p5571_p3 = scmp.lt.s32.totalorder %s5565_s0, %s5565_s0 }
  0x29   :  { %p5572_p4 = por %p5571_p3, %p5570_p2 }
  0x2b   :  { %p5573_p5 = pnand %p5572_p4, %p5566_p1 }
  0x2d   :  { %5576 = shalt.err (!%p5573_p5)
}
  0x2e   :  { %64 = dma.hbm_to_vmem [thread:$0]  %s7390_s4, 2048, %s59_s1, [#allocation12], %s5609_s7, %s5609_s7, %s5610_s8  }
  0x2f   :  { %5597 = dma.done.wait [#allocation6], 1024  }
  0x30   :  { %5598 = vsyncadd [#allocation6], 4294966272 }
  0x31   :  { %5599 = dma.done.wait [#allocation9], 16384  }
  0x32   :  { %5600 = vsyncadd [#allocation9], 4294950912 }
  0x33   :  { %5601 = dma.done.wait [#allocation12], 2048  }
  0x34   :  { %5602 = vsyncadd [#allocation12], 4294965248  ;;  %v7395_v0 = vmov 0.0   ;;  %v148_v1 = vld [vmem:[#allocation8 + $0x1e8] sm:$0xff]  ;;  %v150_v2 = vld [vmem:[#allocation8 + $0x1f8] sm:$0xff]  ;;  %vm5614_vm0 = vmmov 0  }
  0x35   :  { %237 = vmatprep.mubr.f32.mxu0 %v7395_v0  ;;  %350 = vmatprep.mubr.f32.mxu1 %v7395_v0  ;;  %v147_v3 = vld [vmem:[#allocation8 + $0x1e0] sm:$0xff]  ;;  %v149_v4 = vld [vmem:[#allocation8 + $0x1f0] sm:$0xff]  ;;  %v144_v5 = vld [vmem:[#allocation8 + $0x1c8] sm:$0xff]  ;;  %s5615_s20 = smov [#allocation13]  }
  0x36   :  { %173 = vmatprep.subr.mxu0 %v148_v1  ;;  %286 = vmatprep.subr.mxu1 %v150_v2  ;;  %v146_v6 = vld [vmem:[#allocation8 + $0x1d8] sm:$0xff]  ;;  %v143_v7 = vld [vmem:[#allocation8 + $0x1c0] sm:$0xff]  ;;  %v145_v8 = vld [vmem:[#allocation8 + $0x1d0] sm:$0xff]  ;;  %s3602_s21 = sshll.u32 %s5615_s20, 4  ;;  %s3603_s21 = int_to_ptr.vmem [resolvable:$true] %s3602_s21 }
  0x37   :  { %174 = vmatpush1.msra.mxu0 %v147_v3  ;;  %287 = vmatpush1.msra.mxu1 %v149_v4  ;;  %v140_v9 = vld [vmem:[#allocation8 + $0x1a8] sm:$0xff]  ;;  %v142_v10 = vld [vmem:[#allocation8 + $0x1b8] sm:$0xff]  ;;  %v139_v11 = vld [vmem:[#allocation8 + $0x1a0] sm:$0xff]  ;;  %p5582_p7 = scmp.lt.s32.totalorder %s3603_s21, %s3603_s21 }
  0x38   :  { %175 = vmatprep.subr.mxu0 %v144_v5  ;;  %288 = vmatprep.subr.mxu1 %v146_v6  ;;  %v141_v12 = vld [vmem:[#allocation8 + $0x1b0] sm:$0xff]  ;;  %v136_v13 = vld [vmem:[#allocation8 + $0x188] sm:$0xff]  ;;  %v138_v14 = vld [vmem:[#allocation8 + $0x198] sm:$0xff] }
  0x39   :  { %176 = vmatpush1.msra.mxu0 %v143_v7  ;;  %289 = vmatpush1.msra.mxu1 %v145_v8  ;;  %v135_v15 = vld [vmem:[#allocation8 + $0x180] sm:$0xff]  ;;  %v137_v16 = vld [vmem:[#allocation8 + $0x190] sm:$0xff]  ;;  %v132_v17 = vld [vmem:[#allocation8 + $0x168] sm:$0xff] }
  0x3a   :  { %177 = vmatprep.subr.mxu0 %v140_v9  ;;  %290 = vmatprep.subr.mxu1 %v142_v10  ;;  %v134_v18 = vld [vmem:[#allocation8 + $0x178] sm:$0xff]  ;;  %v131_v19 = vld [vmem:[#allocation8 + $0x160] sm:$0xff]  ;;  %v133_v20 = vld [vmem:[#allocation8 + $0x170] sm:$0xff] }
  0x3b   :  { %178 = vmatpush1.msra.mxu0 %v139_v11  ;;  %291 = vmatpush1.msra.mxu1 %v141_v12  ;;  %v128_v21 = vld [vmem:[#allocation8 + $0x148] sm:$0xff]  ;;  %v130_v22 = vld [vmem:[#allocation8 + $0x158] sm:$0xff]  ;;  %v127_v23 = vld [vmem:[#allocation8 + $0x140] sm:$0xff] }
  0x3c   :  { %179 = vmatprep.subr.mxu0 %v136_v13  ;;  %292 = vmatprep.subr.mxu1 %v138_v14  ;;  %v129_v24 = vld [vmem:[#allocation8 + $0x150] sm:$0xff]  ;;  %v124_v25 = vld [vmem:[#allocation8 + $0x128] sm:$0xff]  ;;  %v126_v26 = vld [vmem:[#allocation8 + $0x138] sm:$0xff] }
  0x3d   :  { %180 = vmatpush1.msra.mxu0 %v135_v15  ;;  %293 = vmatpush1.msra.mxu1 %v137_v16  ;;  %v123_v27 = vld [vmem:[#allocation8 + $0x120] sm:$0xff]  ;;  %v125_v28 = vld [vmem:[#allocation8 + $0x130] sm:$0xff]  ;;  %v120_v29 = vld [vmem:[#allocation8 + $0x108] sm:$0xff] }
  0x3e   :  { %181 = vmatprep.subr.mxu0 %v132_v17  ;;  %294 = vmatprep.subr.mxu1 %v134_v18  ;;  %v122_v30 = vld [vmem:[#allocation8 + $0x118] sm:$0xff]  ;;  %v119_v31 = vld [vmem:[#allocation8 + $0x100] sm:$0xff]  ;;  %v121_v32 = vld [vmem:[#allocation8 + $0x110] sm:$0xff] }
  0x3f   :  { %182 = vmatpush1.msra.mxu0 %v131_v19  ;;  %295 = vmatpush1.msra.mxu1 %v133_v20  ;;  %v116_v33 = vld [vmem:[#allocation8 + $0xe8] sm:$0xff]  ;;  %v118_v34 = vld [vmem:[#allocation8 + $0xf8] sm:$0xff]  ;;  %v115_v35 = vld [vmem:[#allocation8 + $0xe0] sm:$0xff] }
  0x40   :  { %183 = vmatprep.subr.mxu0 %v128_v21  ;;  %296 = vmatprep.subr.mxu1 %v130_v22  ;;  %v117_v36 = vld [vmem:[#allocation8 + $0xf0] sm:$0xff]  ;;  %v112_v37 = vld [vmem:[#allocation8 + $0xc8] sm:$0xff]  ;;  %v114_v38 = vld [vmem:[#allocation8 + $0xd8] sm:$0xff] }
  0x41   :  { %184 = vmatpush1.msra.mxu0 %v127_v23  ;;  %297 = vmatpush1.msra.mxu1 %v129_v24  ;;  %v111_v39 = vld [vmem:[#allocation8 + $0xc0] sm:$0xff]  ;;  %v113_v40 = vld [vmem:[#allocation8 + $0xd0] sm:$0xff]  ;;  %v108_v41 = vld [vmem:[#allocation8 + $0xa8] sm:$0xff] }
  0x42   :  { %185 = vmatprep.subr.mxu0 %v124_v25  ;;  %298 = vmatprep.subr.mxu1 %v126_v26  ;;  %v110_v42 = vld [vmem:[#allocation8 + $0xb8] sm:$0xff]  ;;  %v107_v43 = vld [vmem:[#allocation8 + $0xa0] sm:$0xff]  ;;  %v109_v44 = vld [vmem:[#allocation8 + $0xb0] sm:$0xff] }
  0x43   :  { %186 = vmatpush1.msra.mxu0 %v123_v27  ;;  %299 = vmatpush1.msra.mxu1 %v125_v28  ;;  %v104_v45 = vld [vmem:[#allocation8 + $0x88] sm:$0xff]  ;;  %v106_v46 = vld [vmem:[#allocation8 + $0x98] sm:$0xff]  ;;  %v103_v47 = vld [vmem:[#allocation8 + $0x80] sm:$0xff] }
  0x44   :  { %187 = vmatprep.subr.mxu0 %v120_v29  ;;  %300 = vmatprep.subr.mxu1 %v122_v30  ;;  %v105_v48 = vld [vmem:[#allocation8 + $0x90] sm:$0xff]  ;;  %v100_v49 = vld [vmem:[#allocation8 + $0x68] sm:$0xff]  ;;  %v102_v50 = vld [vmem:[#allocation8 + $0x78] sm:$0xff] }
  0x45   :  { %188 = vmatpush1.msra.mxu0 %v119_v31  ;;  %301 = vmatpush1.msra.mxu1 %v121_v32  ;;  %v99_v51 = vld [vmem:[#allocation8 + $0x60] sm:$0xff]  ;;  %v101_v52 = vld [vmem:[#allocation8 + $0x70] sm:$0xff]  ;;  %v96_v53 = vld [vmem:[#allocation8 + $0x48] sm:$0xff] }
  0x46   :  { %189 = vmatprep.subr.mxu0 %v116_v33  ;;  %302 = vmatprep.subr.mxu1 %v118_v34  ;;  %v98_v54 = vld [vmem:[#allocation8 + $0x58] sm:$0xff]  ;;  %v95_v55 = vld [vmem:[#allocation8 + $0x40] sm:$0xff]  ;;  %v97_v56 = vld [vmem:[#allocation8 + $0x50] sm:$0xff] }
  0x47   :  { %190 = vmatpush1.msra.mxu0 %v115_v35  ;;  %303 = vmatpush1.msra.mxu1 %v117_v36  ;;  %v92_v57 = vld [vmem:[#allocation8 + $0x28] sm:$0xff]  ;;  %v94_v58 = vld [vmem:[#allocation8 + $0x38] sm:$0xff]  ;;  %v91_v59 = vld [vmem:[#allocation8 + $0x20] sm:$0xff] }
  0x48   :  { %191 = vmatprep.subr.mxu0 %v112_v37  ;;  %304 = vmatprep.subr.mxu1 %v114_v38  ;;  %v93_v60 = vld [vmem:[#allocation8 + $0x30] sm:$0xff]  ;;  %v88_v61 = vld [vmem:[#allocation8 + $0x8] sm:$0xff]  ;;  %v90_v62 = vld [vmem:[#allocation8 + $0x18] sm:$0xff] }
  0x49   :  { %192 = vmatpush1.msra.mxu0 %v111_v39  ;;  %305 = vmatpush1.msra.mxu1 %v113_v40  ;;  %v87_v63 = vld [vmem:[#allocation8] sm:$0xff]  ;;  %v89_v1 = vld [vmem:[#allocation8 + $0x10] sm:$0xff]  ;;  %v5673_v4 = vld [vmem:[#allocation10 + $0x1e8] sm:$0xff] }
  0x4a   :  { %193 = vmatprep.subr.mxu0 %v108_v41  ;;  %306 = vmatprep.subr.mxu1 %v110_v42  ;;  %v79_v2 = vld [vmem:[#allocation5] sm:$0xff]  ;;  %v5681_v6 = vld [vmem:[#allocation10 + $0x1c8] sm:$0xff]  ;;  %v81_v12 = vld [vmem:[#allocation5 + $0x10] sm:$0xff] }
  0x4b   :  { %194 = vmatpush1.msra.mxu0 %v107_v43  ;;  %307 = vmatpush1.msra.mxu1 %v109_v44  ;;  %v5671_v3 = vld [vmem:[#allocation10 + $0x1e0] sm:$0xff]  ;;  %v80_v7 = vld [vmem:[#allocation5 + $0x8] sm:$0xff]  ;;  %v82_v17 = vld [vmem:[#allocation5 + $0x18] sm:$0xff] }
  0x4c   :  { %195 = vmatprep.subr.mxu0 %v104_v45  ;;  %308 = vmatprep.subr.mxu1 %v106_v46  ;;  %v5679_v5 = vld [vmem:[#allocation10 + $0x1c0] sm:$0xff]  ;;  %v5691_v9 = vld [vmem:[#allocation10 + $0x1a8] sm:$0xff]  ;;  %v85_v32 = vld [vmem:[#allocation5 + $0x30] sm:$0xff] }
  0x4d   :  { %196 = vmatpush1.msra.mxu0 %v103_v47  ;;  %309 = vmatpush1.msra.mxu1 %v105_v48  ;;  %v5689_v8 = vld [vmem:[#allocation10 + $0x1a0] sm:$0xff]  ;;  %v5699_v11 = vld [vmem:[#allocation10 + $0x188] sm:$0xff]  ;;  %v86_v37 = vld [vmem:[#allocation5 + $0x38] sm:$0xff] }
  0x4e   :  { %197 = vmatprep.subr.mxu0 %v100_v49  ;;  %310 = vmatprep.subr.mxu1 %v102_v50  ;;  %v5697_v10 = vld [vmem:[#allocation10 + $0x180] sm:$0xff]  ;;  %v5709_v14 = vld [vmem:[#allocation10 + $0x168] sm:$0xff]  ;;  %v5817_v42 = vld [vmem:[#allocation10 + $0x1f0] sm:$0xff] }
  0x4f   :  { %198 = vmatpush1.msra.mxu0 %v99_v51  ;;  %311 = vmatpush1.msra.mxu1 %v101_v52  ;;  %v5707_v13 = vld [vmem:[#allocation10 + $0x160] sm:$0xff]  ;;  %v5717_v16 = vld [vmem:[#allocation10 + $0x148] sm:$0xff]  ;;  %v5819_v43 = vld [vmem:[#allocation10 + $0x1f8] sm:$0xff] }
  0x50   :  { %199 = vmatprep.subr.mxu0 %v96_v53  ;;  %312 = vmatprep.subr.mxu1 %v98_v54  ;;  %v5715_v15 = vld [vmem:[#allocation10 + $0x140] sm:$0xff]  ;;  %v5727_v19 = vld [vmem:[#allocation10 + $0x128] sm:$0xff]  ;;  %v5825_v44 = vld [vmem:[#allocation10 + $0x1d0] sm:$0xff] }
  0x51   :  { %200 = vmatpush1.msra.mxu0 %v95_v55  ;;  %313 = vmatpush1.msra.mxu1 %v97_v56  ;;  %v5725_v18 = vld [vmem:[#allocation10 + $0x120] sm:$0xff]  ;;  %v5735_v21 = vld [vmem:[#allocation10 + $0x108] sm:$0xff]  ;;  %v5827_v45 = vld [vmem:[#allocation10 + $0x1d8] sm:$0xff] }
  0x52   :  { %201 = vmatprep.subr.mxu0 %v92_v57  ;;  %314 = vmatprep.subr.mxu1 %v94_v58  ;;  %v5733_v20 = vld [vmem:[#allocation10 + $0x100] sm:$0xff]  ;;  %v5745_v24 = vld [vmem:[#allocation10 + $0xe8] sm:$0xff]  ;;  %v5833_v46 = vld [vmem:[#allocation10 + $0x1b0] sm:$0xff] }
  0x53   :  { %202 = vmatpush1.msra.mxu0 %v91_v59  ;;  %315 = vmatpush1.msra.mxu1 %v93_v60  ;;  %v83_v22 = vld [vmem:[#allocation5 + $0x20] sm:$0xff]  ;;  %v5753_v26 = vld [vmem:[#allocation10 + $0xc8] sm:$0xff]  ;;  %v5835_v47 = vld [vmem:[#allocation10 + $0x1b8] sm:$0xff] }
  0x54   :  { %203 = vmatprep.subr.mxu0 %v88_v61  ;;  %316 = vmatprep.subr.mxu1 %v90_v62  ;;  %v5743_v23 = vld [vmem:[#allocation10 + $0xe0] sm:$0xff]  ;;  %v84_v27 = vld [vmem:[#allocation5 + $0x28] sm:$0xff]  ;;  %v5841_v48 = vld [vmem:[#allocation10 + $0x190] sm:$0xff] }
  0x55   :  { %204 = vmatpush1.msra.mxu0 %v87_v63  ;;  %317 = vmatpush1.msra.mxu1 %v89_v1  ;;  %v5751_v25 = vld [vmem:[#allocation10 + $0xc0] sm:$0xff]  ;;  %v5763_v29 = vld [vmem:[#allocation10 + $0xa8] sm:$0xff]  ;;  %v5843_v49 = vld [vmem:[#allocation10 + $0x198] sm:$0xff] }
  0x56   :  { %238 = vmatmul.mubr.f32.vlgmr.msra.gmra.mxu0 %v79_v2  ;;  %351 = vmatmul.mubr.f32.vlgmr.msra.gmra.mxu1 %v79_v2  ;;  %v5761_v28 = vld [vmem:[#allocation10 + $0xa0] sm:$0xff]  ;;  %v5771_v31 = vld [vmem:[#allocation10 + $0x88] sm:$0xff]  ;;  %v5849_v50 = vld [vmem:[#allocation10 + $0x170] sm:$0xff] }
  0x57   :  { %4199 = vmatprep.subr.mxu0 %v7395_v0  ;;  %4234 = vmatprep.subr.mxu1 %v7395_v0  ;;  %v5769_v30 = vld [vmem:[#allocation10 + $0x80] sm:$0xff]  ;;  %v5781_v34 = vld [vmem:[#allocation10 + $0x68] sm:$0xff]  ;;  %v5851_v51 = vld [vmem:[#allocation10 + $0x178] sm:$0xff] }
  0x58   :  { %4200 = vmatpush3.msra.mxu0 %v5671_v3  ;;  %4235 = vmatpush3.msra.mxu1 %v5673_v4  ;;  %v5779_v33 = vld [vmem:[#allocation10 + $0x60] sm:$0xff]  ;;  %v5789_v36 = vld [vmem:[#allocation10 + $0x48] sm:$0xff]  ;;  %v5857_v52 = vld [vmem:[#allocation10 + $0x150] sm:$0xff] }
  0x59   :  { %4201 = vmatprep.subr.mxu0 %v7395_v0  ;;  %4236 = vmatprep.subr.mxu1 %v7395_v0  ;;  %v5787_v35 = vld [vmem:[#allocation10 + $0x40] sm:$0xff]  ;;  %v5799_v39 = vld [vmem:[#allocation10 + $0x28] sm:$0xff]  ;;  %v5859_v53 = vld [vmem:[#allocation10 + $0x158] sm:$0xff] }
  0x5a   :  { %243 = vmatprep.mubr.f32.mxu0 %v7395_v0  ;;  %356 = vmatprep.mubr.f32.mxu1 %v7395_v0  ;;  %v5797_v38 = vld [vmem:[#allocation10 + $0x20] sm:$0xff]  ;;  %v5807_v41 = vld [vmem:[#allocation10 + $0x8] sm:$0xff]  ;;  %v5865_v54 = vld [vmem:[#allocation10 + $0x130] sm:$0xff] }
  0x5b   :  { %4202 = vmatpush3.msra.mxu0 %v5679_v5  ;;  %4237 = vmatpush3.msra.mxu1 %v5681_v6  ;;  %v5803_v40 = vld [vmem:[#allocation10] sm:$0xff]  ;;  %v5867_v55 = vld [vmem:[#allocation10 + $0x138] sm:$0xff]  ;;  %v5873_v56 = vld [vmem:[#allocation10 + $0x110] sm:$0xff] }
  0x5c   :  { %244 = vmatmul.mubr.f32.gmra.mxu0 %v80_v7  ;;  %357 = vmatmul.mubr.f32.gmra.mxu1 %v80_v7  ;;  %v5875_v57 = vld [vmem:[#allocation10 + $0x118] sm:$0xff]  ;;  %v5881_v58 = vld [vmem:[#allocation10 + $0xf0] sm:$0xff] }
  0x5d   :  { %4203 = vmatprep.subr.mxu0 %v7395_v0  ;;  %4238 = vmatprep.subr.mxu1 %v7395_v0  ;;  %v5883_v59 = vld [vmem:[#allocation10 + $0xf8] sm:$0xff]  ;;  %v5889_v60 = vld [vmem:[#allocation10 + $0xd0] sm:$0xff] }
  0x5e   :  { %4204 = vmatpush3.msra.mxu0 %v5689_v8  ;;  %4239 = vmatpush3.msra.mxu1 %v5691_v9  ;;  %v5891_v61 = vld [vmem:[#allocation10 + $0xd8] sm:$0xff]  ;;  %v5897_v62 = vld [vmem:[#allocation10 + $0xb0] sm:$0xff] }
  0x5f   :  { %4205 = vmatprep.subr.mxu0 %v7395_v0  ;;  %4240 = vmatprep.subr.mxu1 %v7395_v0  ;;  %v5899_v63 = vld [vmem:[#allocation10 + $0xb8] sm:$0xff]  ;;  %v5905_v1 = vld [vmem:[#allocation10 + $0x90] sm:$0xff] }
  0x60   :  { %249 = vmatprep.mubr.f32.mxu0 %v7395_v0  ;;  %362 = vmatprep.mubr.f32.mxu1 %v7395_v0  ;;  %v5907_v2 = vld [vmem:[#allocation10 + $0x98] sm:$0xff]  ;;  %v5913_v7 = vld [vmem:[#allocation10 + $0x70] sm:$0xff] }
  0x61   :  { %4206 = vmatpush3.msra.mxu0 %v5697_v10  ;;  %4241 = vmatpush3.msra.mxu1 %v5699_v11 }
  0x62   :  { %250 = vmatmul.mubr.f32.gmra.mxu0 %v81_v12  ;;  %363 = vmatmul.mubr.f32.gmra.mxu1 %v81_v12  ;;  %v5915_v12 = vld [vmem:[#allocation10 + $0x78] sm:$0xff] }
  0x63   :  { %4207 = vmatprep.subr.mxu0 %v7395_v0  ;;  %4242 = vmatprep.subr.mxu1 %v7395_v0  ;;  %7449 = vst [vmem:[#allocation18_spill] sm:$0xff] %v5915_v12 }
  0x64   :  { %4208 = vmatpush3.msra.mxu0 %v5707_v13  ;;  %4243 = vmatpush3.msra.mxu1 %v5709_v14 }
  0x65   :  { %4209 = vmatprep.subr.mxu0 %v7395_v0  ;;  %4244 = vmatprep.subr.mxu1 %v7395_v0 }
  0x66   :  { %255 = vmatprep.mubr.f32.mxu0 %v7395_v0  ;;  %368 = vmatprep.mubr.f32.mxu1 %v7395_v0 }
  0x67   :  { %4210 = vmatpush3.msra.mxu0 %v5715_v15  ;;  %4245 = vmatpush3.msra.mxu1 %v5717_v16 }
  0x68   :  { %256 = vmatmul.mubr.f32.gmra.mxu0 %v82_v17  ;;  %369 = vmatmul.mubr.f32.gmra.mxu1 %v82_v17  ;;  %v5921_v17 = vld [vmem:[#allocation10 + $0x50] sm:$0xff] }
  0x69   :  { %4211 = vmatprep.subr.mxu0 %v7395_v0  ;;  %4246 = vmatprep.subr.mxu1 %v7395_v0 }
  0x6a   :  { %4212 = vmatpush3.msra.mxu0 %v5725_v18  ;;  %4247 = vmatpush3.msra.mxu1 %v5727_v19 }
  0x6b   :  { %4213 = vmatprep.subr.mxu0 %v7395_v0  ;;  %4248 = vmatprep.subr.mxu1 %v7395_v0 }
  0x6c   :  { %261 = vmatprep.mubr.f32.mxu0 %v7395_v0  ;;  %374 = vmatprep.mubr.f32.mxu1 %v7395_v0 }
  0x6d   :  { %4214 = vmatpush3.msra.mxu0 %v5733_v20  ;;  %4249 = vmatpush3.msra.mxu1 %v5735_v21 }
  0x6e   :  { %262 = vmatmul.mubr.f32.gmra.mxu0 %v83_v22  ;;  %375 = vmatmul.mubr.f32.gmra.mxu1 %v83_v22  ;;  %v5923_v22 = vld [vmem:[#allocation10 + $0x58] sm:$0xff] }
  0x6f   :  { %4215 = vmatprep.subr.mxu0 %v7395_v0  ;;  %4250 = vmatprep.subr.mxu1 %v7395_v0 }
  0x70   :  { %4216 = vmatpush3.msra.mxu0 %v5743_v23  ;;  %4251 = vmatpush3.msra.mxu1 %v5745_v24 }
  0x71   :  { %4217 = vmatprep.subr.mxu0 %v7395_v0  ;;  %4252 = vmatprep.subr.mxu1 %v7395_v0 }
  0x72   :  { %267 = vmatprep.mubr.f32.mxu0 %v7395_v0  ;;  %380 = vmatprep.mubr.f32.mxu1 %v7395_v0 }
  0x73   :  { %4218 = vmatpush3.msra.mxu0 %v5751_v25  ;;  %4253 = vmatpush3.msra.mxu1 %v5753_v26 }
  0x74   :  { %268 = vmatmul.mubr.f32.gmra.mxu0 %v84_v27  ;;  %381 = vmatmul.mubr.f32.gmra.mxu1 %v84_v27  ;;  %v5929_v27 = vld [vmem:[#allocation10 + $0x30] sm:$0xff] }
  0x75   :  { %4219 = vmatprep.subr.mxu0 %v7395_v0  ;;  %4254 = vmatprep.subr.mxu1 %v7395_v0 }
  0x76   :  { %4220 = vmatpush3.msra.mxu0 %v5761_v28  ;;  %4255 = vmatpush3.msra.mxu1 %v5763_v29 }
  0x77   :  { %4221 = vmatprep.subr.mxu0 %v7395_v0  ;;  %4256 = vmatprep.subr.mxu1 %v7395_v0 }
  0x78   :  { %273 = vmatprep.mubr.f32.mxu0 %v7395_v0  ;;  %386 = vmatprep.mubr.f32.mxu1 %v7395_v0 }
  0x79   :  { %4222 = vmatpush3.msra.mxu0 %v5769_v30  ;;  %4257 = vmatpush3.msra.mxu1 %v5771_v31 }
  0x7a   :  { %274 = vmatmul.mubr.f32.gmra.mxu0 %v85_v32  ;;  %387 = vmatmul.mubr.f32.gmra.mxu1 %v85_v32  ;;  %v5931_v32 = vld [vmem:[#allocation10 + $0x38] sm:$0xff] }
  0x7b   :  { %4223 = vmatprep.subr.mxu0 %v7395_v0  ;;  %4258 = vmatprep.subr.mxu1 %v7395_v0 }
  0x7c   :  { %4224 = vmatpush3.msra.mxu0 %v5779_v33  ;;  %4259 = vmatpush3.msra.mxu1 %v5781_v34 }
  0x7d   :  { %4225 = vmatprep.subr.mxu0 %v7395_v0  ;;  %4260 = vmatprep.subr.mxu1 %v7395_v0 }
  0x7e   :  { %279 = vmatprep.mubr.f32.mxu0 %v7395_v0  ;;  %392 = vmatprep.mubr.f32.mxu1 %v7395_v0 }
  0x7f   :  { %4226 = vmatpush3.msra.mxu0 %v5787_v35  ;;  %4261 = vmatpush3.msra.mxu1 %v5789_v36 }
  0x80   :  { %280 = vmatmul.mubr.f32.gmra.mxu0 %v86_v37  ;;  %393 = vmatmul.mubr.f32.gmra.mxu1 %v86_v37  ;;  %v5937_v37 = vld [vmem:[#allocation10 + $0x10] sm:$0xff] }
  0x81   :  { %4227 = vmatprep.subr.mxu0 %v7395_v0  ;;  %4262 = vmatprep.subr.mxu1 %v7395_v0 }
  0x82   :  { %4228 = vmatpush3.msra.mxu0 %v5797_v38  ;;  %4263 = vmatpush3.msra.mxu1 %v5799_v39 }
  0x83   :  { %4229 = vmatprep.subr.mxu0 %v7395_v0  ;;  %4264 = vmatprep.subr.mxu1 %v7395_v0 }
  0x84   :  { %4230 = vmatpush3.msra.mxu0 %v5803_v40  ;;  %4231 = vmatprep.mubr.msk.f32.mxu0 %vm5614_vm0, %v7395_v0 }
  0x85   :  { %4265 = vmatpush3.msra.mxu1 %v5807_v41  ;;  %4266 = vmatprep.mubr.msk.f32.mxu1 %vm5614_vm0, %v7395_v0 }
  0x86   :  { %4232 = vmatmul.mubr.f32.vlgmr.msra.gmra.mxu0 %v7395_v0  ;;  %4267 = vmatmul.mubr.f32.vlgmr.msra.gmra.mxu1 %v7395_v0 }
  0x87   :  { %4269 = vmatprep.subr.mxu0 %v7395_v0  ;;  %4304 = vmatprep.subr.mxu1 %v7395_v0 }
  0x88   :  { %4270 = vmatpush3.msra.mxu0 %v5817_v42  ;;  %4305 = vmatpush3.msra.mxu1 %v5819_v43 }
  0x89   :  { %4271 = vmatprep.subr.mxu0 %v7395_v0  ;;  %4306 = vmatprep.subr.mxu1 %v7395_v0 }
  0x8a   :  { %4272 = vmatpush3.msra.mxu0 %v5825_v44  ;;  %4307 = vmatpush3.msra.mxu1 %v5827_v45 }
  0x8b   :  { %4273 = vmatprep.subr.mxu0 %v7395_v0  ;;  %4308 = vmatprep.subr.mxu1 %v7395_v0 }
  0x8c   :  { %4274 = vmatpush3.msra.mxu0 %v5833_v46  ;;  %4309 = vmatpush3.msra.mxu1 %v5835_v47 }
  0x8d   :  { %4275 = vmatprep.subr.mxu0 %v7395_v0  ;;  %4310 = vmatprep.subr.mxu1 %v7395_v0 }
  0x8e   :  { %4276 = vmatpush3.msra.mxu0 %v5841_v48  ;;  %4311 = vmatpush3.msra.mxu1 %v5843_v49 }
  0x8f   :  { %4277 = vmatprep.subr.mxu0 %v7395_v0  ;;  %4312 = vmatprep.subr.mxu1 %v7395_v0 }
  0x90   :  { %4278 = vmatpush3.msra.mxu0 %v5849_v50  ;;  %4313 = vmatpush3.msra.mxu1 %v5851_v51 }
  0x91   :  { %4279 = vmatprep.subr.mxu0 %v7395_v0  ;;  %4314 = vmatprep.subr.mxu1 %v7395_v0 }
  0x92   :  { %4280 = vmatpush3.msra.mxu0 %v5857_v52  ;;  %4315 = vmatpush3.msra.mxu1 %v5859_v53 }
  0x93   :  { %4281 = vmatprep.subr.mxu0 %v7395_v0  ;;  %4316 = vmatprep.subr.mxu1 %v7395_v0 }
  0x94   :  { %4282 = vmatpush3.msra.mxu0 %v5865_v54  ;;  %4317 = vmatpush3.msra.mxu1 %v5867_v55 }
  0x95   :  { %4283 = vmatprep.subr.mxu0 %v7395_v0  ;;  %4318 = vmatprep.subr.mxu1 %v7395_v0 }
  0x96   :  { %4284 = vmatpush3.msra.mxu0 %v5873_v56  ;;  %4319 = vmatpush3.msra.mxu1 %v5875_v57 }
  0x97   :  { %4285 = vmatprep.subr.mxu0 %v7395_v0  ;;  %4320 = vmatprep.subr.mxu1 %v7395_v0 }
  0x98   :  { %4286 = vmatpush3.msra.mxu0 %v5881_v58  ;;  %4321 = vmatpush3.msra.mxu1 %v5883_v59 }
  0x99   :  { %4287 = vmatprep.subr.mxu0 %v7395_v0  ;;  %4322 = vmatprep.subr.mxu1 %v7395_v0 }
  0x9a   :  { %4288 = vmatpush3.msra.mxu0 %v5889_v60  ;;  %4323 = vmatpush3.msra.mxu1 %v5891_v61 }
  0x9b   :  { %4289 = vmatprep.subr.mxu0 %v7395_v0  ;;  %4324 = vmatprep.subr.mxu1 %v7395_v0 }
  0x9c   :  { %4290 = vmatpush3.msra.mxu0 %v5897_v62  ;;  %4325 = vmatpush3.msra.mxu1 %v5899_v63 }
  0x9d   :  { %4291 = vmatprep.subr.mxu0 %v7395_v0  ;;  %4326 = vmatprep.subr.mxu1 %v7395_v0 }
  0x9e   :  { %4292 = vmatpush3.msra.mxu0 %v5905_v1  ;;  %4327 = vmatpush3.msra.mxu1 %v5907_v2 }
  0x9f   :  { %4293 = vmatprep.subr.mxu0 %v7395_v0  ;;  %4328 = vmatprep.subr.mxu1 %v7395_v0 }
  0xa0   :  { %4294 = vmatpush3.msra.mxu0 %v5913_v7  ;;  %4329 = vmatpush3.msra.mxu1 %v5915_v12  ;;  %v5941_v12 = vld [vmem:[#allocation10 + $0x18] sm:$0xff] }
  0xa1   :  { %4295 = vmatprep.subr.mxu0 %v7395_v0  ;;  %4330 = vmatprep.subr.mxu1 %v7395_v0 }
  0xa2   :  { %4296 = vmatpush3.msra.mxu0 %v5921_v17  ;;  %4331 = vmatpush3.msra.mxu1 %v5923_v22 }
  0xa3   :  { %4297 = vmatprep.subr.mxu0 %v7395_v0  ;;  %4332 = vmatprep.subr.mxu1 %v7395_v0 }
  0xa4   :  { %4298 = vmatpush3.msra.mxu0 %v5929_v27  ;;  %4333 = vmatpush3.msra.mxu1 %v5931_v32 }
  0xa5   :  { %4299 = vmatprep.subr.mxu0 %v7395_v0  ;;  %4334 = vmatprep.subr.mxu1 %v7395_v0 }
  0xa6   :  { %4300 = vmatpush3.msra.mxu0 %v5937_v37  ;;  %4301 = vmatprep.mubr.msk.f32.mxu0 %vm5614_vm0, %v7395_v0 }
  0xa7   :  { %4335 = vmatpush3.msra.mxu1 %v5941_v12  ;;  %4336 = vmatprep.mubr.msk.f32.mxu1 %vm5614_vm0, %v7395_v0 }
  0xa8   :  { %4302 = vmatmul.mubr.f32.vlgmr.msra.gmra.mxu0 %v7395_v0  ;;  %4337 = vmatmul.mubr.f32.vlgmr.msra.gmra.mxu1 %v7395_v0 }
  0xa9   :  { %4339 = vmatprep.subr.mxu0 %v7395_v0  ;;  %4374 = vmatprep.subr.mxu1 %v7395_v0 }
  0xaa   :  { %4340 = vmatpush3.msra.mxu0 %v5671_v3  ;;  %4375 = vmatpush3.msra.mxu1 %v5673_v4  ;;  %v7394_v3 = vlaneseq }
  0xab   :  { %4341 = vmatprep.subr.mxu0 %v7395_v0  ;;  %4376 = vmatprep.subr.mxu1 %v7395_v0 }
  0xac   :  { %4342 = vmatpush3.msra.mxu0 %v5679_v5  ;;  %4377 = vmatpush3.msra.mxu1 %v5681_v6  ;;  %v154_v4 = vshrl.u32 %v7394_v3, 7 }
  0xad   :  { %4343 = vmatprep.subr.mxu0 %v7395_v0  ;;  %4378 = vmatprep.subr.mxu1 %v7395_v0 }
  0xae   :  { %4344 = vmatpush3.msra.mxu0 %v5689_v8  ;;  %4379 = vmatpush3.msra.mxu1 %v5691_v9  ;;  %v155_v8 = vsub.s32 0, %v154_v4  ;;  %v163_v9 = vsub.s32 2, %v154_v4 }
  0xaf   :  { %4345 = vmatprep.subr.mxu0 %v7395_v0  ;;  %4380 = vmatprep.subr.mxu1 %v7395_v0 }
  0xb0   :  { %4346 = vmatpush3.msra.mxu0 %v5697_v10  ;;  %4381 = vmatpush3.msra.mxu1 %v5699_v11  ;;  %v151_v10 = vld [vmem:[%s7389_s3] sm:$0xf] }
  0xb1   :  { %4347 = vmatprep.subr.mxu0 %v7395_v0  ;;  %4382 = vmatprep.subr.mxu1 %v7395_v0 }
  0xb2   :  { %4348 = vmatpush3.msra.mxu0 %v5707_v13  ;;  %4383 = vmatpush3.msra.mxu1 %v5709_v14  ;;  %v159_v14 = vsub.s32 1, %v154_v4 }
  0xb3   :  { %4349 = vmatprep.subr.mxu0 %v7395_v0  ;;  %4384 = vmatprep.subr.mxu1 %v7395_v0 }
  0xb4   :  { %4350 = vmatpush3.msra.mxu0 %v5715_v15  ;;  %4385 = vmatpush3.msra.mxu1 %v5717_v16  ;;  %v167_v15 = vsub.s32 3, %v154_v4  ;;  %v6035_v16 = vrot.slane %v151_v10, %v155_v8 }
  0xb5   :  { %4351 = vmatprep.subr.mxu0 %v7395_v0  ;;  %4386 = vmatprep.subr.mxu1 %v7395_v0 }
  0xb6   :  { %4352 = vmatpush3.msra.mxu0 %v5725_v18  ;;  %4387 = vmatpush3.msra.mxu1 %v5727_v19  ;;  %v6037_v18 = vrot.slane %v151_v10, %v163_v9 }
  0xb7   :  { %4353 = vmatprep.subr.mxu0 %v7395_v0  ;;  %4388 = vmatprep.subr.mxu1 %v7395_v0 }
  0xb8   :  { %4354 = vmatpush3.msra.mxu0 %v5733_v20  ;;  %4389 = vmatpush3.msra.mxu1 %v5735_v21  ;;  %v160_v21 = vrot.slane %v151_v10, %v159_v14 }
  0xb9   :  { %4355 = vmatprep.subr.mxu0 %v7395_v0  ;;  %4390 = vmatprep.subr.mxu1 %v7395_v0 }
  0xba   :  { %4356 = vmatpush3.msra.mxu0 %v5743_v23  ;;  %4391 = vmatpush3.msra.mxu1 %v5745_v24  ;;  %v6039_v23 = vrot.slane %v151_v10, %v167_v15 }
  0xbb   :  { %4357 = vmatprep.subr.mxu0 %v7395_v0  ;;  %4392 = vmatprep.subr.mxu1 %v7395_v0 }
  0xbc   :  { %4358 = vmatpush3.msra.mxu0 %v5751_v25  ;;  %4393 = vmatpush3.msra.mxu1 %v5753_v26 }
  0xbd   :  { %4359 = vmatprep.subr.mxu0 %v7395_v0  ;;  %4394 = vmatprep.subr.mxu1 %v7395_v0 }
  0xbe   :  { %4360 = vmatpush3.msra.mxu0 %v5761_v28  ;;  %4395 = vmatpush3.msra.mxu1 %v5763_v29 }
  0xbf   :  { %4361 = vmatprep.subr.mxu0 %v7395_v0  ;;  %4396 = vmatprep.subr.mxu1 %v7395_v0 }
  0xc0   :  { %4362 = vmatpush3.msra.mxu0 %v5769_v30  ;;  %4397 = vmatpush3.msra.mxu1 %v5771_v31 }
  0xc1   :  { %4363 = vmatprep.subr.mxu0 %v7395_v0  ;;  %4398 = vmatprep.subr.mxu1 %v7395_v0 }
  0xc2   :  { %4364 = vmatpush3.msra.mxu0 %v5779_v33  ;;  %4399 = vmatpush3.msra.mxu1 %v5781_v34 }
  0xc3   :  { %4365 = vmatprep.subr.mxu0 %v7395_v0  ;;  %4400 = vmatprep.subr.mxu1 %v7395_v0 }
  0xc4   :  { %4366 = vmatpush3.msra.mxu0 %v5787_v35  ;;  %4401 = vmatpush3.msra.mxu1 %v5789_v36 }
  0xc5   :  { %4367 = vmatprep.subr.mxu0 %v7395_v0  ;;  %4402 = vmatprep.subr.mxu1 %v7395_v0 }
  0xc6   :  { %4368 = vmatpush3.msra.mxu0 %v5797_v38  ;;  %4403 = vmatpush3.msra.mxu1 %v5799_v39 }
  0xc7   :  { %4369 = vmatprep.subr.mxu0 %v7395_v0  ;;  %4404 = vmatprep.subr.mxu1 %v7395_v0 }
  0xc8   :  { %4370 = vmatpush3.msra.mxu0 %v5803_v40  ;;  %4405 = vmatpush3.msra.mxu1 %v5807_v41 }
  0xc9   :  { %4371 = vmatprep.mubr.msk.f32.mxu0 %vm5614_vm0, %v7395_v0  ;;  %4406 = vmatprep.mubr.msk.f32.mxu1 %vm5614_vm0, %v7395_v0 }
  0xca   :  { %4409 = vmatprep.subr.mxu0 %v7395_v0  ;;  %4444 = vmatprep.subr.mxu1 %v7395_v0 }
 0x116   :  { %v6024_v5 = vpop.f32.mrf.mxu0  ;;  %v6026_v6 = vpop.f32.mrf.mxu1 }
 0x118   :  { %v6031_v11 = vpop.f32.mrf.mxu0  ;;  %v6033_v13 = vpop.f32.mrf.mxu1 }
 0x11c   :  { %v245_v19 = vpop.f32.mrf.mxu0  ;;  %v358_v20 = vpop.f32.mrf.mxu1 }
 0x11d   :  { %v6042_v24 = vadd.f32 %v245_v19, %v6035_v16  ;;  %v6045_v25 = vadd.f32 %v358_v20, %v6037_v18 }
 0x11e   :  { %v247_v26 = vpop.f32.mrf.mxu0  ;;  %v360_v28 = vpop.f32.mrf.mxu1 }
 0x11f   :  { %v6047_v29 = vadd.f32 %v247_v26, %v160_v21  ;;  %v6050_v30 = vadd.f32 %v360_v28, %v6039_v23 }
 0x122   :  { %v251_v31 = vpop.f32.mrf.mxu0  ;;  %v364_v33 = vpop.f32.mrf.mxu1 }
 0x123   :  { %v6053_v34 = vadd.f32 %v251_v31, %v6035_v16  ;;  %v6056_v35 = vadd.f32 %v364_v33, %v6037_v18 }
 0x124   :  { %v253_v36 = vpop.f32.mrf.mxu0  ;;  %v366_v38 = vpop.f32.mrf.mxu1 }
 0x125   :  { %v6058_v39 = vadd.f32 %v253_v36, %v160_v21  ;;  %v6061_v40 = vadd.f32 %v366_v38, %v6039_v23 }
 0x128   :  { %v257_v41 = vpop.f32.mrf.mxu0  ;;  %v370_v4 = vpop.f32.mrf.mxu1 }
 0x129   :  { %v6064_v8 = vadd.f32 %v257_v41, %v6035_v16  ;;  %v6067_v9 = vadd.f32 %v370_v4, %v6037_v18 }
 0x12a   :  { %v259_v10 = vpop.f32.mrf.mxu0  ;;  %v372_v14 = vpop.f32.mrf.mxu1 }
 0x12b   :  { %7450 = vst [vmem:[#allocation19_spill] sm:$0xff] %v6064_v8  ;;  %7451 = vst [vmem:[#allocation20_spill] sm:$0xff] %v6067_v9  ;;  %v6069_v15 = vadd.f32 %v259_v10, %v160_v21  ;;  %v6072_v19 = vadd.f32 %v372_v14, %v6039_v23  ;;  %v6432_v8 = vld [vmem:[#allocation10 + $0x98] sm:$0xff] }
 0x12c   :  { %7491 = vst [vmem:[#allocation57_spill] sm:$0xff] %v6432_v8 }
 0x12d   :  { %7452 = vst [vmem:[#allocation21_spill] sm:$0xff] %v6069_v15  ;;  %7453 = vst [vmem:[#allocation22_spill] sm:$0xff] %v6072_v19  ;;  %v6438_v15 = vld [vmem:[#allocation10 + $0x70] sm:$0xff] }
 0x12e   :  { %v263_v20 = vpop.f32.mrf.mxu0  ;;  %v376_v26 = vpop.f32.mrf.mxu1 }
 0x12f   :  { %v6075_v28 = vadd.f32 %v263_v20, %v6035_v16  ;;  %v6078_v31 = vadd.f32 %v376_v26, %v6037_v18 }
 0x130   :  { %v265_v33 = vpop.f32.mrf.mxu0  ;;  %v378_v36 = vpop.f32.mrf.mxu1 }
 0x131   :  { %7454 = vst [vmem:[#allocation23_spill] sm:$0xff] %v6075_v28  ;;  %7455 = vst [vmem:[#allocation24_spill] sm:$0xff] %v6078_v31  ;;  %v6080_v38 = vadd.f32 %v265_v33, %v160_v21  ;;  %v6083_v41 = vadd.f32 %v378_v36, %v6039_v23 }
 0x133   :  { %7456 = vst [vmem:[#allocation25_spill] sm:$0xff] %v6080_v38  ;;  %7457 = vst [vmem:[#allocation26_spill] sm:$0xff] %v6083_v41 }
 0x134   :  { %v269_v4 = vpop.f32.mrf.mxu0  ;;  %v382_v10 = vpop.f32.mrf.mxu1 }
 0x135   :  { %v6086_v14 = vadd.f32 %v269_v4, %v6035_v16  ;;  %v6089_v3 = vadd.f32 %v382_v10, %v6037_v18 }
 0x136   :  { %v271_v20 = vpop.f32.mrf.mxu0  ;;  %v384_v0 = vpop.f32.mrf.mxu1 }
 0x137   :  { %7458 = vst [vmem:[#allocation27_spill] sm:$0xff] %v6086_v14  ;;  %7459 = vst [vmem:[#allocation28_spill] sm:$0xff] %v6089_v3  ;;  %v6091_v28 = vadd.f32 %v271_v20, %v160_v21  ;;  %v6094_v26 = vadd.f32 %v384_v0, %v6039_v23 }
 0x139   :  { %7460 = vst [vmem:[#allocation29_spill] sm:$0xff] %v6091_v28  ;;  %7461 = vst [vmem:[#allocation30_spill] sm:$0xff] %v6094_v26 }
 0x13a   :  { %v275_v33 = vpop.f32.mrf.mxu0  ;;  %v388_v31 = vpop.f32.mrf.mxu1 }
 0x13b   :  { %v6097_v36 = vadd.f32 %v275_v33, %v6035_v16  ;;  %v6100_v41 = vadd.f32 %v388_v31, %v6037_v18 }
 0x13c   :  { %v277_v4 = vpop.f32.mrf.mxu0  ;;  %v390_v14 = vpop.f32.mrf.mxu1 }
 0x13d   :  { %7462 = vst [vmem:[#allocation31_spill] sm:$0xff] %v6097_v36  ;;  %7463 = vst [vmem:[#allocation32_spill] sm:$0xff] %v6100_v41  ;;  %v6102_v38 = vadd.f32 %v277_v4, %v160_v21  ;;  %v6105_v10 = vadd.f32 %v390_v14, %v6039_v23 }
 0x13f   :  { %7464 = vst [vmem:[#allocation33_spill] sm:$0xff] %v6102_v38  ;;  %7465 = vst [vmem:[#allocation34_spill] sm:$0xff] %v6105_v10  ;;  %v242_v10 = vadd.f32 %v6031_v11, %v160_v21 }
 0x140   :  { %v281_v20 = vpop.f32.mrf.mxu0  ;;  %v394_v3 = vpop.f32.mrf.mxu1 }
 0x141   :  { %v6108_v0 = vadd.f32 %v281_v20, %v6035_v16  ;;  %v6111_v26 = vadd.f32 %v394_v3, %v6037_v18  ;;  %v240_v20 = vadd.f32 %v6024_v5, %v6035_v16 }
 0x142   :  { %v283_v33 = vpop.f32.mrf.mxu0  ;;  %v396_v36 = vpop.f32.mrf.mxu1 }
 0x143   :  { %7466 = vst [vmem:[#allocation35_spill] sm:$0xff] %v6108_v0  ;;  %7467 = vst [vmem:[#allocation36_spill] sm:$0xff] %v6111_v26  ;;  %v6113_v28 = vadd.f32 %v283_v33, %v160_v21  ;;  %v6116_v31 = vadd.f32 %v396_v36, %v6039_v23 }
 0x145   :  { %7468 = vst [vmem:[#allocation37_spill] sm:$0xff] %v6113_v28  ;;  %7469 = vst [vmem:[#allocation38_spill] sm:$0xff] %v6116_v31  ;;  %v353_v31 = vadd.f32 %v6026_v6, %v6037_v18 }
 0x146   :  { %v529_v4 = vpop.f32.mrf.mxu0  ;;  %v622_v41 = vpop.f32.mrf.mxu1 }
 0x147   :  { %v626_v0 = vadd.f32 %v622_v41, %v242_v10  ;;  %v533_v19 = vadd.f32 %v529_v4, %v240_v20  ;;  %v7470_v20 = vmov 0.0  }
 0x148   :  { %v4233_v38 = vpop.f32.mrf.mxu0  ;;  %v4268_v14 = vpop.f32.mrf.mxu1 }
 0x149   :  { %v3614_v3 = vmul.f32 -1.442695, %v626_v0  ;;  %v3613_v26 = vmul.f32 -1.442695, %v533_v19  ;;  %v355_v38 = vadd.f32 %v6033_v13, %v6039_v23 }
 0x14b   :  { %5365 = vpow2.f32 %v3614_v3  ;;  %v6322_v3 = vld [vmem:[#allocation10] sm:$0xff] }
 0x14c   :  { %5367 = vpow2.f32 %v3613_v26  ;;  %7484 = vst [vmem:[#allocation50_spill] sm:$0xff] %v6322_v3 }
 0x158   :  { %v5366_v33 = vpop.eup %5365 }
 0x159   :  { %v5368_v28 = vpop.eup %5367  ;;  %v630_v9 = vadd.f32 1.0, %v5366_v33  ;;  %v6324_v33 = vld [vmem:[#allocation10 + $0x8] sm:$0xff] }
 0x15a   :  { %v537_v36 = vadd.f32 1.0, %v5368_v28  ;;  %7485 = vst [vmem:[#allocation51_spill] sm:$0xff] %v6324_v33 }
 0x15b   :  { %5369 = vrcp.f32 %v630_v9 }
 0x15c   :  { %5371 = vrcp.f32 %v537_v36 }
 0x168   :  { %v715_v11 = vpop.f32.mrf.mxu0  ;;  %v803_v21 = vpop.f32.mrf.mxu1 }
 0x169   :  { %v719_v5 = vadd.f32 %v715_v11, %v353_v31  ;;  %v807_v16 = vadd.f32 %v803_v21, %v355_v38  ;;  %v5370_v10 = vpop.eup %5369 }
 0x16a   :  { %v4303_v41 = vpop.f32.mrf.mxu0  ;;  %v4338_v19 = vpop.f32.mrf.mxu1  ;;  %v814_v4 = vmul.f32 0.0, %v5370_v10 }
 0x16b   :  { %5373 = vtanh.f32 %v719_v5  ;;  %v3615_v26 = vmul.f32 -1.442695, %v807_v16  ;;  %v5372_v0 = vpop.eup %5371 }
 0x16d   :  { %5375 = vpow2.f32 %v3615_v26 }
 0x178   :  { %v5374_v28 = vpop.eup %5373 }
 0x179   :  { %v815_v14 = vmul.f32 %v5374_v28, %v5372_v0 }
 0x17a   :  { %v5376_v6 = vpop.eup %5375 }
 0x17b   :  { %v6125_v18 = vadd.f32 %v815_v14, %v814_v4  ;;  %v811_v13 = vadd.f32 1.0, %v5376_v6 }
 0x17d   :  { %5377 = vtanh.f32 %v6125_v18 }
 0x17e   :  { %5379 = vrcp.f32 %v811_v13 }
 0x18a   :  { %v5378_v23 = vpop.eup %5377 }
 0x18b   :  { %v5380_v9 = vpop.eup %5379 }
 0x18c   :  { %v6128_v31 = vmul.f32 %v5380_v9, %v5378_v23 }
 0x18e   :  { %4372 = vmatmul.mubr.f32.vlgmr.msra.gmra.mxu0 %v6128_v31  ;;  %4407 = vmatmul.mubr.f32.vlgmr.msra.gmra.mxu1 %v6128_v31 }
 0x18f   :  { %4410 = vmatpush3.msra.mxu0 %v5817_v42  ;;  %4445 = vmatpush3.msra.mxu1 %v5819_v43  ;;  %v7471_v42 = vld [vmem:[#allocation18_spill] sm:$0xff]  ;;  %v6206_v43 = vld [vmem:[#allocation10 + $0x1e0] sm:$0xff] }
 0x190   :  { %4411 = vmatprep.subr.mxu0 %v7470_v20  ;;  %4446 = vmatprep.subr.mxu1 %v7470_v20 }
 0x191   :  { %4412 = vmatpush3.msra.mxu0 %v5825_v44  ;;  %4447 = vmatpush3.msra.mxu1 %v5827_v45  ;;  %v6208_v44 = vld [vmem:[#allocation10 + $0x1e8] sm:$0xff]  ;;  %v6214_v45 = vld [vmem:[#allocation10 + $0x1c0] sm:$0xff] }
 0x192   :  { %4413 = vmatprep.subr.mxu0 %v7470_v20  ;;  %4448 = vmatprep.subr.mxu1 %v7470_v20 }
 0x193   :  { %4414 = vmatpush3.msra.mxu0 %v5833_v46  ;;  %4449 = vmatpush3.msra.mxu1 %v5835_v47  ;;  %v6216_v46 = vld [vmem:[#allocation10 + $0x1c8] sm:$0xff]  ;;  %v6222_v47 = vld [vmem:[#allocation10 + $0x1a0] sm:$0xff] }
 0x194   :  { %4415 = vmatprep.subr.mxu0 %v7470_v20  ;;  %4450 = vmatprep.subr.mxu1 %v7470_v20 }
 0x195   :  { %4416 = vmatpush3.msra.mxu0 %v5841_v48  ;;  %4451 = vmatpush3.msra.mxu1 %v5843_v49  ;;  %v6224_v48 = vld [vmem:[#allocation10 + $0x1a8] sm:$0xff]  ;;  %v6230_v49 = vld [vmem:[#allocation10 + $0x180] sm:$0xff] }
 0x196   :  { %4417 = vmatprep.subr.mxu0 %v7470_v20  ;;  %4452 = vmatprep.subr.mxu1 %v7470_v20 }
 0x197   :  { %4418 = vmatpush3.msra.mxu0 %v5849_v50  ;;  %4453 = vmatpush3.msra.mxu1 %v5851_v51  ;;  %v6232_v50 = vld [vmem:[#allocation10 + $0x188] sm:$0xff]  ;;  %v6238_v51 = vld [vmem:[#allocation10 + $0x160] sm:$0xff] }
 0x198   :  { %4419 = vmatprep.subr.mxu0 %v7470_v20  ;;  %4454 = vmatprep.subr.mxu1 %v7470_v20 }
 0x199   :  { %4420 = vmatpush3.msra.mxu0 %v5857_v52  ;;  %4455 = vmatpush3.msra.mxu1 %v5859_v53  ;;  %v6240_v52 = vld [vmem:[#allocation10 + $0x168] sm:$0xff]  ;;  %v6246_v53 = vld [vmem:[#allocation10 + $0x140] sm:$0xff] }
 0x19a   :  { %4421 = vmatprep.subr.mxu0 %v7470_v20  ;;  %4456 = vmatprep.subr.mxu1 %v7470_v20 }
 0x19b   :  { %4422 = vmatpush3.msra.mxu0 %v5865_v54  ;;  %4457 = vmatpush3.msra.mxu1 %v5867_v55  ;;  %v6248_v54 = vld [vmem:[#allocation10 + $0x148] sm:$0xff]  ;;  %v6254_v55 = vld [vmem:[#allocation10 + $0x120] sm:$0xff] }
 0x19c   :  { %4423 = vmatprep.subr.mxu0 %v7470_v20  ;;  %4458 = vmatprep.subr.mxu1 %v7470_v20 }
 0x19d   :  { %4424 = vmatpush3.msra.mxu0 %v5873_v56  ;;  %4459 = vmatpush3.msra.mxu1 %v5875_v57  ;;  %v6256_v56 = vld [vmem:[#allocation10 + $0x128] sm:$0xff]  ;;  %v6262_v57 = vld [vmem:[#allocation10 + $0x100] sm:$0xff] }
 0x19e   :  { %4425 = vmatprep.subr.mxu0 %v7470_v20  ;;  %4460 = vmatprep.subr.mxu1 %v7470_v20 }
 0x19f   :  { %4426 = vmatpush3.msra.mxu0 %v5881_v58  ;;  %4461 = vmatpush3.msra.mxu1 %v5883_v59  ;;  %v6264_v58 = vld [vmem:[#allocation10 + $0x108] sm:$0xff]  ;;  %v6270_v59 = vld [vmem:[#allocation10 + $0xe0] sm:$0xff] }
 0x1a0   :  { %4427 = vmatprep.subr.mxu0 %v7470_v20  ;;  %4462 = vmatprep.subr.mxu1 %v7470_v20 }
 0x1a1   :  { %4428 = vmatpush3.msra.mxu0 %v5889_v60  ;;  %4463 = vmatpush3.msra.mxu1 %v5891_v61  ;;  %v6272_v60 = vld [vmem:[#allocation10 + $0xe8] sm:$0xff]  ;;  %v6276_v61 = vld [vmem:[#allocation10 + $0xc0] sm:$0xff] }
 0x1a2   :  { %4429 = vmatprep.subr.mxu0 %v7470_v20  ;;  %4464 = vmatprep.subr.mxu1 %v7470_v20  ;;  %7472 = vst [vmem:[#allocation18_spill] sm:$0xff] %v6276_v61 }
 0x1a3   :  { %4430 = vmatpush3.msra.mxu0 %v5897_v62  ;;  %4465 = vmatpush3.msra.mxu1 %v5899_v63  ;;  %v6278_v62 = vld [vmem:[#allocation10 + $0xc8] sm:$0xff]  ;;  %v6282_v63 = vld [vmem:[#allocation10 + $0xa0] sm:$0xff] }
 0x1a4   :  { %4431 = vmatprep.subr.mxu0 %v7470_v20  ;;  %4466 = vmatprep.subr.mxu1 %v7470_v20  ;;  %7473 = vst [vmem:[#allocation39_spill] sm:$0xff] %v6278_v62  ;;  %7474 = vst [vmem:[#allocation40_spill] sm:$0xff] %v6282_v63 }
 0x1a5   :  { %4432 = vmatpush3.msra.mxu0 %v5905_v1  ;;  %4467 = vmatpush3.msra.mxu1 %v5907_v2  ;;  %v6284_v1 = vld [vmem:[#allocation10 + $0xa8] sm:$0xff]  ;;  %v6290_v2 = vld [vmem:[#allocation10 + $0x80] sm:$0xff] }
 0x1a6   :  { %4433 = vmatprep.subr.mxu0 %v7470_v20  ;;  %4468 = vmatprep.subr.mxu1 %v7470_v20  ;;  %7475 = vst [vmem:[#allocation41_spill] sm:$0xff] %v6284_v1  ;;  %7476 = vst [vmem:[#allocation42_spill] sm:$0xff] %v6290_v2 }
 0x1a7   :  { %4434 = vmatpush3.msra.mxu0 %v5913_v7  ;;  %4469 = vmatpush3.msra.mxu1 %v7471_v42  ;;  %v6292_v7 = vld [vmem:[#allocation10 + $0x88] sm:$0xff] }
 0x1a8   :  { %4435 = vmatprep.subr.mxu0 %v7470_v20  ;;  %4470 = vmatprep.subr.mxu1 %v7470_v20  ;;  %7477 = vst [vmem:[#allocation43_spill] sm:$0xff] %v6292_v7 }
 0x1a9   :  { %4436 = vmatpush3.msra.mxu0 %v5921_v17  ;;  %4471 = vmatpush3.msra.mxu1 %v5923_v22  ;;  %v6300_v17 = vld [vmem:[#allocation10 + $0x68] sm:$0xff]  ;;  %v6306_v22 = vld [vmem:[#allocation10 + $0x40] sm:$0xff] }
 0x1aa   :  { %4437 = vmatprep.subr.mxu0 %v7470_v20  ;;  %4472 = vmatprep.subr.mxu1 %v7470_v20  ;;  %7479 = vst [vmem:[#allocation45_spill] sm:$0xff] %v6300_v17  ;;  %7480 = vst [vmem:[#allocation46_spill] sm:$0xff] %v6306_v22 }
 0x1ab   :  { %4438 = vmatpush3.msra.mxu0 %v5929_v27  ;;  %4473 = vmatpush3.msra.mxu1 %v5931_v32  ;;  %v6308_v27 = vld [vmem:[#allocation10 + $0x48] sm:$0xff]  ;;  %v6314_v32 = vld [vmem:[#allocation10 + $0x20] sm:$0xff] }
 0x1ac   :  { %4439 = vmatprep.subr.mxu0 %v7470_v20  ;;  %4474 = vmatprep.subr.mxu1 %v7470_v20  ;;  %7481 = vst [vmem:[#allocation47_spill] sm:$0xff] %v6308_v27  ;;  %7482 = vst [vmem:[#allocation48_spill] sm:$0xff] %v6314_v32 }
 0x1ad   :  { %4440 = vmatpush3.msra.mxu0 %v5937_v37  ;;  %4441 = vmatprep.mubr.msk.f32.mxu0 %vm5614_vm0, %v7470_v20  ;;  %v6316_v37 = vld [vmem:[#allocation10 + $0x28] sm:$0xff] }
 0x1ae   :  { %4475 = vmatpush3.msra.mxu1 %v5941_v12  ;;  %4476 = vmatprep.mubr.msk.f32.mxu1 %vm5614_vm0, %v7470_v20  ;;  %v6298_v12 = vld [vmem:[#allocation10 + $0x60] sm:$0xff]  ;;  %7483 = vst [vmem:[#allocation49_spill] sm:$0xff] %v6316_v37 }
 0x1af   :  { %4442 = vmatmul.mubr.f32.vlgmr.msra.gmra.mxu0 %v6128_v31  ;;  %4477 = vmatmul.mubr.f32.vlgmr.msra.gmra.mxu1 %v6128_v31  ;;  %7478 = vst [vmem:[#allocation44_spill] sm:$0xff] %v6298_v12 }
 0x1b0   :  { %4479 = vmatprep.subr.mxu0 %v7470_v20  ;;  %4514 = vmatprep.subr.mxu1 %v7470_v20 }
 0x1b1   :  { %4511 = vmatprep.mubr.msk.f32.mxu0 %vm5614_vm0, %v7470_v20  ;;  %4546 = vmatprep.mubr.msk.f32.mxu1 %vm5614_vm0, %v7470_v20 }
 0x1b2   :  { %4480 = vmatpush3.msra.mxu0 %v6206_v43  ;;  %4515 = vmatpush3.msra.mxu1 %v6208_v44 }
 0x1b3   :  { %4481 = vmatprep.subr.mxu0 %v7470_v20  ;;  %4516 = vmatprep.subr.mxu1 %v7470_v20 }
 0x1b4   :  { %4482 = vmatpush3.msra.mxu0 %v6214_v45  ;;  %4517 = vmatpush3.msra.mxu1 %v6216_v46 }
 0x1b5   :  { %4483 = vmatprep.subr.mxu0 %v7470_v20  ;;  %4518 = vmatprep.subr.mxu1 %v7470_v20 }
 0x1b6   :  { %4484 = vmatpush3.msra.mxu0 %v6222_v47  ;;  %4519 = vmatpush3.msra.mxu1 %v6224_v48 }
 0x1b7   :  { %4485 = vmatprep.subr.mxu0 %v7470_v20  ;;  %4520 = vmatprep.subr.mxu1 %v7470_v20 }
 0x1b8   :  { %4486 = vmatpush3.msra.mxu0 %v6230_v49  ;;  %4521 = vmatpush3.msra.mxu1 %v6232_v50 }
 0x1b9   :  { %4487 = vmatprep.subr.mxu0 %v7470_v20  ;;  %4522 = vmatprep.subr.mxu1 %v7470_v20 }
 0x1ba   :  { %4488 = vmatpush3.msra.mxu0 %v6238_v51  ;;  %4523 = vmatpush3.msra.mxu1 %v6240_v52 }
 0x1bb   :  { %4489 = vmatprep.subr.mxu0 %v7470_v20  ;;  %4524 = vmatprep.subr.mxu1 %v7470_v20 }
 0x1bc   :  { %4490 = vmatpush3.msra.mxu0 %v6246_v53  ;;  %4525 = vmatpush3.msra.mxu1 %v6248_v54 }
 0x1bd   :  { %4491 = vmatprep.subr.mxu0 %v7470_v20  ;;  %4526 = vmatprep.subr.mxu1 %v7470_v20 }
 0x1be   :  { %4492 = vmatpush3.msra.mxu0 %v6254_v55  ;;  %4527 = vmatpush3.msra.mxu1 %v6256_v56 }
 0x1bf   :  { %4493 = vmatprep.subr.mxu0 %v7470_v20  ;;  %4528 = vmatprep.subr.mxu1 %v7470_v20 }
 0x1c0   :  { %4494 = vmatpush3.msra.mxu0 %v6262_v57  ;;  %4529 = vmatpush3.msra.mxu1 %v6264_v58 }
 0x1c1   :  { %4495 = vmatprep.subr.mxu0 %v7470_v20  ;;  %4530 = vmatprep.subr.mxu1 %v7470_v20 }
 0x1c2   :  { %4496 = vmatpush3.msra.mxu0 %v6270_v59  ;;  %4531 = vmatpush3.msra.mxu1 %v6272_v60 }
 0x1c3   :  { %4497 = vmatprep.subr.mxu0 %v7470_v20  ;;  %4532 = vmatprep.subr.mxu1 %v7470_v20 }
 0x1c4   :  { %4498 = vmatpush3.msra.mxu0 %v6276_v61  ;;  %4533 = vmatpush3.msra.mxu1 %v6278_v62 }
 0x1c5   :  { %4499 = vmatprep.subr.mxu0 %v7470_v20  ;;  %4534 = vmatprep.subr.mxu1 %v7470_v20 }
 0x1c6   :  { %4500 = vmatpush3.msra.mxu0 %v6282_v63  ;;  %4535 = vmatpush3.msra.mxu1 %v6284_v1 }
 0x1c7   :  { %4501 = vmatprep.subr.mxu0 %v7470_v20  ;;  %4536 = vmatprep.subr.mxu1 %v7470_v20 }
 0x1c8   :  { %4502 = vmatpush3.msra.mxu0 %v6290_v2  ;;  %4537 = vmatpush3.msra.mxu1 %v6292_v7 }
 0x1c9   :  { %4503 = vmatprep.subr.mxu0 %v7470_v20  ;;  %4538 = vmatprep.subr.mxu1 %v7470_v20 }
 0x1ca   :  { %4504 = vmatpush3.msra.mxu0 %v6298_v12  ;;  %4539 = vmatpush3.msra.mxu1 %v6300_v17 }
 0x1cb   :  { %4505 = vmatprep.subr.mxu0 %v7470_v20  ;;  %4540 = vmatprep.subr.mxu1 %v7470_v20 }
 0x1cc   :  { %4506 = vmatpush3.msra.mxu0 %v6306_v22  ;;  %4541 = vmatpush3.msra.mxu1 %v6308_v27 }
 0x1cd   :  { %4507 = vmatprep.subr.mxu0 %v7470_v20  ;;  %4542 = vmatprep.subr.mxu1 %v7470_v20 }
 0x1ce   :  { %4508 = vmatpush3.msra.mxu0 %v6314_v32  ;;  %4543 = vmatpush3.msra.mxu1 %v6316_v37 }
 0x1cf   :  { %4509 = vmatprep.subr.mxu0 %v7470_v20  ;;  %4544 = vmatprep.subr.mxu1 %v7470_v20 }
 0x1d0   :  { %4510 = vmatpush3.msra.mxu0 %v6322_v3  ;;  %4545 = vmatpush3.msra.mxu1 %v6324_v33 }
 0x1d1   :  { %4549 = vmatprep.subr.mxu0 %v7470_v20  ;;  %4584 = vmatprep.subr.mxu1 %v7470_v20 }
 0x24e   :  { %v910_v36 = vpop.f32.mrf.mxu0  ;;  %v1003_v38 = vpop.f32.mrf.mxu1 }
 0x24f   :  { %v1007_v5 = vadd.f32 %v1003_v38, %v6047_v29  ;;  %v914_v16 = vadd.f32 %v910_v36, %v6042_v24 }
 0x250   :  { %v4373_v11 = vpop.f32.mrf.mxu0  ;;  %v4408_v21 = vpop.f32.mrf.mxu1 }
 0x251   :  { %v3617_v41 = vmul.f32 -1.442695, %v1007_v5  ;;  %v3616_v19 = vmul.f32 -1.442695, %v914_v16 }
 0x253   :  { %5381 = vpow2.f32 %v3617_v41  ;;  %v6344_v41 = vld [vmem:[#allocation10 + $0x1f0] sm:$0xff] }
 0x254   :  { %5383 = vpow2.f32 %v3616_v19  ;;  %v6346_v19 = vld [vmem:[#allocation10 + $0x1f8] sm:$0xff] }
 0x260   :  { %v5382_v26 = vpop.eup %5381 }
 0x261   :  { %v5384_v10 = vpop.eup %5383  ;;  %v1011_v0 = vadd.f32 1.0, %v5382_v26  ;;  %v6352_v26 = vld [vmem:[#allocation10 + $0x1d8] sm:$0xff] }
 0x262   :  { %v918_v28 = vadd.f32 1.0, %v5384_v10  ;;  %v6358_v10 = vld [vmem:[#allocation10 + $0x1b0] sm:$0xff] }
 0x263   :  { %5385 = vrcp.f32 %v1011_v0  ;;  %v6360_v0 = vld [vmem:[#allocation10 + $0x1b8] sm:$0xff] }
 0x264   :  { %5387 = vrcp.f32 %v918_v28  ;;  %v6366_v28 = vld [vmem:[#allocation10 + $0x190] sm:$0xff] }
 0x26f   :  { %v1096_v4 = vpop.f32.mrf.mxu0  ;;  %v1184_v14 = vpop.f32.mrf.mxu1 }
 0x270   :  { %v1100_v6 = vadd.f32 %v1096_v4, %v6045_v25  ;;  %v1188_v13 = vadd.f32 %v1184_v14, %v6050_v30  ;;  %v5386_v9 = vpop.eup %5385  ;;  %v6368_v4 = vld [vmem:[#allocation10 + $0x198] sm:$0xff]  ;;  %v6374_v14 = vld [vmem:[#allocation10 + $0x170] sm:$0xff] }
 0x271   :  { %v4443_v23 = vpop.f32.mrf.mxu0  ;;  %v4478_v29 = vpop.f32.mrf.mxu1  ;;  %v1195_v36 = vmul.f32 %v5386_v9, %v6125_v18  ;;  %v6350_v18 = vld [vmem:[#allocation10 + $0x1d0] sm:$0xff] }
 0x272   :  { %5389 = vtanh.f32 %v1100_v6  ;;  %v3618_v24 = vmul.f32 -1.442695, %v1188_v13  ;;  %v5388_v31 = vpop.eup %5387  ;;  %v6376_v6 = vld [vmem:[#allocation10 + $0x178] sm:$0xff]  ;;  %v6382_v13 = vld [vmem:[#allocation10 + $0x150] sm:$0xff] }
 0x273   :  { %v6384_v23 = vld [vmem:[#allocation10 + $0x158] sm:$0xff]  ;;  %v6390_v29 = vld [vmem:[#allocation10 + $0x130] sm:$0xff] }
 0x274   :  { %5391 = vpow2.f32 %v3618_v24  ;;  %v6392_v24 = vld [vmem:[#allocation10 + $0x138] sm:$0xff]  ;;  %v6398_v9 = vld [vmem:[#allocation10 + $0x110] sm:$0xff] }
 0x27f   :  { %v5390_v42 = vpop.eup %5389 }
 0x280   :  { %v1196_v38 = vmul.f32 %v5390_v42, %v5388_v31  ;;  %v6400_v31 = vld [vmem:[#allocation10 + $0x118] sm:$0xff]  ;;  %v6406_v42 = vld [vmem:[#allocation10 + $0xf0] sm:$0xff] }
 0x281   :  { %v5392_v11 = vpop.eup %5391 }
 0x282   :  { %v6339_v21 = vadd.f32 %v1196_v38, %v1195_v36  ;;  %v1192_v5 = vadd.f32 1.0, %v5392_v11  ;;  %v6408_v36 = vld [vmem:[#allocation10 + $0xf8] sm:$0xff]  ;;  %v6414_v38 = vld [vmem:[#allocation10 + $0xd0] sm:$0xff] }
 0x283   :  { %7486 = vst [vmem:[#allocation52_spill] sm:$0xff] %v6414_v38  ;;  %v6416_v11 = vld [vmem:[#allocation10 + $0xd8] sm:$0xff] }
 0x284   :  { %5393 = vtanh.f32 %v6339_v21  ;;  %7487 = vst [vmem:[#allocation53_spill] sm:$0xff] %v6416_v11 }
 0x285   :  { %5395 = vrcp.f32 %v1192_v5  ;;  %v6422_v5 = vld [vmem:[#allocation10 + $0xb0] sm:$0xff] }
 0x286   :  { %7488 = vst [vmem:[#allocation54_spill] sm:$0xff] %v6422_v5 }
 0x291   :  { %v5394_v25 = vpop.eup %5393 }
 0x292   :  { %v5396_v30 = vpop.eup %5395 }
 0x293   :  { %v6342_v16 = vmul.f32 %v5396_v30, %v5394_v25  ;;  %v6424_v25 = vld [vmem:[#allocation10 + $0xb8] sm:$0xff]  ;;  %v6430_v30 = vld [vmem:[#allocation10 + $0x90] sm:$0xff] }
 0x294   :  { %7489 = vst [vmem:[#allocation55_spill] sm:$0xff] %v6424_v25  ;;  %7490 = vst [vmem:[#allocation56_spill] sm:$0xff] %v6430_v30 }
 0x295   :  { %4512 = vmatmul.mubr.f32.vlgmr.msra.gmra.mxu0 %v6342_v16  ;;  %4547 = vmatmul.mubr.f32.vlgmr.msra.gmra.mxu1 %v6342_v16 }
 0x296   :  { %4550 = vmatpush3.msra.mxu0 %v6344_v41  ;;  %4585 = vmatpush3.msra.mxu1 %v6346_v19 }
 0x297   :  { %4551 = vmatprep.subr.mxu0 %v7470_v20  ;;  %4586 = vmatprep.subr.mxu1 %v7470_v20 }
 0x298   :  { %4552 = vmatpush3.msra.mxu0 %v6350_v18  ;;  %4587 = vmatpush3.msra.mxu1 %v6352_v26 }
 0x299   :  { %4553 = vmatprep.subr.mxu0 %v7470_v20  ;;  %4588 = vmatprep.subr.mxu1 %v7470_v20 }
 0x29a   :  { %4554 = vmatpush3.msra.mxu0 %v6358_v10  ;;  %4589 = vmatpush3.msra.mxu1 %v6360_v0 }
 0x29b   :  { %4555 = vmatprep.subr.mxu0 %v7470_v20  ;;  %4590 = vmatprep.subr.mxu1 %v7470_v20 }
 0x29c   :  { %4556 = vmatpush3.msra.mxu0 %v6366_v28  ;;  %4591 = vmatpush3.msra.mxu1 %v6368_v4 }
 0x29d   :  { %4557 = vmatprep.subr.mxu0 %v7470_v20  ;;  %4592 = vmatprep.subr.mxu1 %v7470_v20 }
 0x29e   :  { %4558 = vmatpush3.msra.mxu0 %v6374_v14  ;;  %4593 = vmatpush3.msra.mxu1 %v6376_v6 }
 0x29f   :  { %4559 = vmatprep.subr.mxu0 %v7470_v20  ;;  %4594 = vmatprep.subr.mxu1 %v7470_v20 }
 0x2a0   :  { %4560 = vmatpush3.msra.mxu0 %v6382_v13  ;;  %4595 = vmatpush3.msra.mxu1 %v6384_v23 }
 0x2a1   :  { %4561 = vmatprep.subr.mxu0 %v7470_v20  ;;  %4596 = vmatprep.subr.mxu1 %v7470_v20 }
 0x2a2   :  { %4562 = vmatpush3.msra.mxu0 %v6390_v29  ;;  %4597 = vmatpush3.msra.mxu1 %v6392_v24 }
 0x2a3   :  { %4563 = vmatprep.subr.mxu0 %v7470_v20  ;;  %4598 = vmatprep.subr.mxu1 %v7470_v20 }
 0x2a4   :  { %4564 = vmatpush3.msra.mxu0 %v6398_v9  ;;  %4599 = vmatpush3.msra.mxu1 %v6400_v31 }
 0x2a5   :  { %4565 = vmatprep.subr.mxu0 %v7470_v20  ;;  %4600 = vmatprep.subr.mxu1 %v7470_v20 }
 0x2a6   :  { %4566 = vmatpush3.msra.mxu0 %v6406_v42  ;;  %4601 = vmatpush3.msra.mxu1 %v6408_v36 }
 0x2a7   :  { %4567 = vmatprep.subr.mxu0 %v7470_v20  ;;  %4602 = vmatprep.subr.mxu1 %v7470_v20 }
 0x2a8   :  { %4568 = vmatpush3.msra.mxu0 %v6414_v38  ;;  %4603 = vmatpush3.msra.mxu1 %v6416_v11  ;;  %v6440_v38 = vld [vmem:[#allocation10 + $0x78] sm:$0xff]  ;;  %v6446_v11 = vld [vmem:[#allocation10 + $0x50] sm:$0xff] }
 0x2a9   :  { %4569 = vmatprep.subr.mxu0 %v7470_v20  ;;  %4604 = vmatprep.subr.mxu1 %v7470_v20  ;;  %7492 = vst [vmem:[#allocation58_spill] sm:$0xff] %v6440_v38 }
 0x2aa   :  { %4570 = vmatpush3.msra.mxu0 %v6422_v5  ;;  %4605 = vmatpush3.msra.mxu1 %v6424_v25  ;;  %v6448_v5 = vld [vmem:[#allocation10 + $0x58] sm:$0xff]  ;;  %v6454_v25 = vld [vmem:[#allocation10 + $0x30] sm:$0xff] }
 0x2ab   :  { %4571 = vmatprep.subr.mxu0 %v7470_v20  ;;  %4606 = vmatprep.subr.mxu1 %v7470_v20 }
 0x2ac   :  { %4572 = vmatpush3.msra.mxu0 %v6430_v30  ;;  %4607 = vmatpush3.msra.mxu1 %v6432_v8  ;;  %v6456_v30 = vld [vmem:[#allocation10 + $0x38] sm:$0xff]  ;;  %v6462_v8 = vld [vmem:[#allocation10 + $0x10] sm:$0xff] }
 0x2ad   :  { %4573 = vmatprep.subr.mxu0 %v7470_v20  ;;  %4608 = vmatprep.subr.mxu1 %v7470_v20 }
 0x2ae   :  { %4574 = vmatpush3.msra.mxu0 %v6438_v15  ;;  %4609 = vmatpush3.msra.mxu1 %v6440_v38  ;;  %v6466_v38 = vld [vmem:[#allocation10 + $0x18] sm:$0xff] }
 0x2af   :  { %4575 = vmatprep.subr.mxu0 %v7470_v20  ;;  %4610 = vmatprep.subr.mxu1 %v7470_v20 }
 0x2b0   :  { %4576 = vmatpush3.msra.mxu0 %v6446_v11  ;;  %4611 = vmatpush3.msra.mxu1 %v6448_v5 }
 0x2b1   :  { %4577 = vmatprep.subr.mxu0 %v7470_v20  ;;  %4612 = vmatprep.subr.mxu1 %v7470_v20 }
 0x2b2   :  { %4578 = vmatpush3.msra.mxu0 %v6454_v25  ;;  %4613 = vmatpush3.msra.mxu1 %v6456_v30 }
 0x2b3   :  { %4579 = vmatprep.subr.mxu0 %v7470_v20  ;;  %4614 = vmatprep.subr.mxu1 %v7470_v20 }
 0x2b4   :  { %4580 = vmatpush3.msra.mxu0 %v6462_v8  ;;  %4581 = vmatprep.mubr.msk.f32.mxu0 %vm5614_vm0, %v7470_v20 }
 0x2b5   :  { %4615 = vmatpush3.msra.mxu1 %v6466_v38  ;;  %4616 = vmatprep.mubr.msk.f32.mxu1 %vm5614_vm0, %v7470_v20 }
 0x2b6   :  { %4582 = vmatmul.mubr.f32.vlgmr.msra.gmra.mxu0 %v6342_v16  ;;  %4617 = vmatmul.mubr.f32.vlgmr.msra.gmra.mxu1 %v6342_v16 }
 0x2b7   :  { %4619 = vmatprep.subr.mxu0 %v7470_v20  ;;  %4654 = vmatprep.subr.mxu1 %v7470_v20 }
 0x2b8   :  { %4620 = vmatpush3.msra.mxu0 %v6206_v43  ;;  %4655 = vmatpush3.msra.mxu1 %v6208_v44 }
 0x2b9   :  { %4621 = vmatprep.subr.mxu0 %v7470_v20  ;;  %4656 = vmatprep.subr.mxu1 %v7470_v20 }
 0x2ba   :  { %4622 = vmatpush3.msra.mxu0 %v6214_v45  ;;  %4657 = vmatpush3.msra.mxu1 %v6216_v46 }
 0x2bb   :  { %4623 = vmatprep.subr.mxu0 %v7470_v20  ;;  %4658 = vmatprep.subr.mxu1 %v7470_v20 }
 0x2bc   :  { %4624 = vmatpush3.msra.mxu0 %v6222_v47  ;;  %4659 = vmatpush3.msra.mxu1 %v6224_v48 }
 0x2bd   :  { %4625 = vmatprep.subr.mxu0 %v7470_v20  ;;  %4660 = vmatprep.subr.mxu1 %v7470_v20 }
 0x2be   :  { %4626 = vmatpush3.msra.mxu0 %v6230_v49  ;;  %4661 = vmatpush3.msra.mxu1 %v6232_v50 }
 0x2bf   :  { %4627 = vmatprep.subr.mxu0 %v7470_v20  ;;  %4662 = vmatprep.subr.mxu1 %v7470_v20 }
 0x2c0   :  { %4628 = vmatpush3.msra.mxu0 %v6238_v51  ;;  %4663 = vmatpush3.msra.mxu1 %v6240_v52 }
 0x2c1   :  { %4629 = vmatprep.subr.mxu0 %v7470_v20  ;;  %4664 = vmatprep.subr.mxu1 %v7470_v20 }
 0x2c2   :  { %4630 = vmatpush3.msra.mxu0 %v6246_v53  ;;  %4665 = vmatpush3.msra.mxu1 %v6248_v54 }
 0x2c3   :  { %4631 = vmatprep.subr.mxu0 %v7470_v20  ;;  %4666 = vmatprep.subr.mxu1 %v7470_v20 }
 0x2c4   :  { %4632 = vmatpush3.msra.mxu0 %v6254_v55  ;;  %4667 = vmatpush3.msra.mxu1 %v6256_v56 }
 0x2c5   :  { %4633 = vmatprep.subr.mxu0 %v7470_v20  ;;  %4668 = vmatprep.subr.mxu1 %v7470_v20 }
 0x2c6   :  { %4634 = vmatpush3.msra.mxu0 %v6262_v57  ;;  %4669 = vmatpush3.msra.mxu1 %v6264_v58 }
 0x2c7   :  { %4635 = vmatprep.subr.mxu0 %v7470_v20  ;;  %4670 = vmatprep.subr.mxu1 %v7470_v20 }
 0x2c8   :  { %4636 = vmatpush3.msra.mxu0 %v6270_v59  ;;  %4671 = vmatpush3.msra.mxu1 %v6272_v60 }
 0x2c9   :  { %4637 = vmatprep.subr.mxu0 %v7470_v20  ;;  %4672 = vmatprep.subr.mxu1 %v7470_v20 }
 0x2ca   :  { %4638 = vmatpush3.msra.mxu0 %v6276_v61  ;;  %4673 = vmatpush3.msra.mxu1 %v6278_v62 }
 0x2cb   :  { %4639 = vmatprep.subr.mxu0 %v7470_v20  ;;  %4674 = vmatprep.subr.mxu1 %v7470_v20 }
 0x2cc   :  { %4640 = vmatpush3.msra.mxu0 %v6282_v63  ;;  %4675 = vmatpush3.msra.mxu1 %v6284_v1 }
 0x2cd   :  { %4641 = vmatprep.subr.mxu0 %v7470_v20  ;;  %4676 = vmatprep.subr.mxu1 %v7470_v20 }
 0x2ce   :  { %4642 = vmatpush3.msra.mxu0 %v6290_v2  ;;  %4677 = vmatpush3.msra.mxu1 %v6292_v7 }
 0x2cf   :  { %4643 = vmatprep.subr.mxu0 %v7470_v20  ;;  %4678 = vmatprep.subr.mxu1 %v7470_v20 }
 0x2d0   :  { %4644 = vmatpush3.msra.mxu0 %v6298_v12  ;;  %4679 = vmatpush3.msra.mxu1 %v6300_v17 }
 0x2d1   :  { %4645 = vmatprep.subr.mxu0 %v7470_v20  ;;  %4680 = vmatprep.subr.mxu1 %v7470_v20 }
 0x2d2   :  { %4646 = vmatpush3.msra.mxu0 %v6306_v22  ;;  %4681 = vmatpush3.msra.mxu1 %v6308_v27 }
 0x2d3   :  { %4647 = vmatprep.subr.mxu0 %v7470_v20  ;;  %4682 = vmatprep.subr.mxu1 %v7470_v20 }
 0x2d4   :  { %4648 = vmatpush3.msra.mxu0 %v6314_v32  ;;  %4683 = vmatpush3.msra.mxu1 %v6316_v37 }
 0x2d5   :  { %4649 = vmatprep.subr.mxu0 %v7470_v20  ;;  %4684 = vmatprep.subr.mxu1 %v7470_v20 }
 0x2d6   :  { %4650 = vmatpush3.msra.mxu0 %v6322_v3  ;;  %4685 = vmatpush3.msra.mxu1 %v6324_v33 }
 0x2d7   :  { %4651 = vmatprep.mubr.msk.f32.mxu0 %vm5614_vm0, %v7470_v20  ;;  %4686 = vmatprep.mubr.msk.f32.mxu1 %vm5614_vm0, %v7470_v20 }
 0x2d8   :  { %4689 = vmatprep.subr.mxu0 %v7470_v20  ;;  %4724 = vmatprep.subr.mxu1 %v7470_v20 }
 0x355   :  { %v1291_v16 = vpop.f32.mrf.mxu0  ;;  %v1384_v37 = vpop.f32.mrf.mxu1 }
 0x356   :  { %v1388_v22 = vadd.f32 %v1384_v37, %v6058_v39  ;;  %v1295_v3 = vadd.f32 %v1291_v16, %v6053_v34  ;;  %v7497_v16 = vld [vmem:[#allocation56_spill] sm:$0xff] }
 0x357   :  { %v4513_v32 = vpop.f32.mrf.mxu0  ;;  %v4548_v27 = vpop.f32.mrf.mxu1 }
 0x358   :  { %v3620_v17 = vmul.f32 -1.442695, %v1388_v22  ;;  %v3619_v33 = vmul.f32 -1.442695, %v1295_v3 }
 0x35a   :  { %5397 = vpow2.f32 %v3620_v17 }
 0x35b   :  { %5399 = vpow2.f32 %v3619_v33 }
 0x367   :  { %v5398_v12 = vpop.eup %5397 }
 0x368   :  { %v5400_v7 = vpop.eup %5399  ;;  %v1392_v2 = vadd.f32 1.0, %v5398_v12 }
 0x369   :  { %v1299_v1 = vadd.f32 1.0, %v5400_v7 }
 0x36a   :  { %5401 = vrcp.f32 %v1392_v2 }
 0x36b   :  { %5403 = vrcp.f32 %v1299_v1  ;;  %v7495_v1 = vld [vmem:[#allocation54_spill] sm:$0xff] }
 0x376   :  { %v1477_v63 = vpop.f32.mrf.mxu0  ;;  %v1565_v62 = vpop.f32.mrf.mxu1 }
 0x377   :  { %v1481_v61 = vadd.f32 %v1477_v63, %v6056_v35  ;;  %v1569_v32 = vadd.f32 %v1565_v62, %v6061_v40  ;;  %v5402_v22 = vpop.eup %5401  ;;  %v7494_v63 = vld [vmem:[#allocation53_spill] sm:$0xff] }
 0x378   :  { %v4583_v27 = vpop.f32.mrf.mxu0  ;;  %v4618_v39 = vpop.f32.mrf.mxu1  ;;  %v1576_v3 = vmul.f32 %v5402_v22, %v6339_v21  ;;  %v7496_v21 = vld [vmem:[#allocation55_spill] sm:$0xff] }
 0x379   :  { %5405 = vtanh.f32 %v1481_v61  ;;  %v3621_v34 = vmul.f32 -1.442695, %v1569_v32  ;;  %v5404_v17 = vpop.eup %5403  ;;  %v7493_v61 = vld [vmem:[#allocation52_spill] sm:$0xff]  ;;  %v7498_v32 = vld [vmem:[#allocation57_spill] sm:$0xff]  ;;  %v7499_v27 = vld [vmem:[#allocation58_spill] sm:$0xff] }
 0x37a   :  { %v7514_v39 = vld [vmem:[#allocation21_spill] sm:$0xff]  ;;  %v7515_v22 = vld [vmem:[#allocation19_spill] sm:$0xff] }
 0x37b   :  { %5407 = vpow2.f32 %v3621_v34 }
 0x386   :  { %v5406_v37 = vpop.eup %5405 }
 0x387   :  { %v1577_v12 = vmul.f32 %v5406_v37, %v5404_v17 }
 0x388   :  { %v5408_v7 = vpop.eup %5407 }
 0x389   :  { %v6553_v33 = vadd.f32 %v1577_v12, %v1576_v3  ;;  %v1573_v2 = vadd.f32 1.0, %v5408_v7 }
 0x38b   :  { %5409 = vtanh.f32 %v6553_v33 }
 0x38c   :  { %5411 = vrcp.f32 %v1573_v2 }
 0x398   :  { %v5410_v35 = vpop.eup %5409 }
 0x399   :  { %v5412_v40 = vpop.eup %5411 }
 0x39a   :  { %v6556_v62 = vmul.f32 %v5412_v40, %v5410_v35 }
 0x39c   :  { %4652 = vmatmul.mubr.f32.vlgmr.msra.gmra.mxu0 %v6556_v62  ;;  %4687 = vmatmul.mubr.f32.vlgmr.msra.gmra.mxu1 %v6556_v62 }
 0x39d   :  { %4690 = vmatpush3.msra.mxu0 %v6344_v41  ;;  %4725 = vmatpush3.msra.mxu1 %v6346_v19 }
 0x39e   :  { %4691 = vmatprep.subr.mxu0 %v7470_v20  ;;  %4726 = vmatprep.subr.mxu1 %v7470_v20 }
 0x39f   :  { %4692 = vmatpush3.msra.mxu0 %v6350_v18  ;;  %4727 = vmatpush3.msra.mxu1 %v6352_v26 }
 0x3a0   :  { %4693 = vmatprep.subr.mxu0 %v7470_v20  ;;  %4728 = vmatprep.subr.mxu1 %v7470_v20 }
 0x3a1   :  { %4694 = vmatpush3.msra.mxu0 %v6358_v10  ;;  %4729 = vmatpush3.msra.mxu1 %v6360_v0 }
 0x3a2   :  { %4695 = vmatprep.subr.mxu0 %v7470_v20  ;;  %4730 = vmatprep.subr.mxu1 %v7470_v20 }
 0x3a3   :  { %4696 = vmatpush3.msra.mxu0 %v6366_v28  ;;  %4731 = vmatpush3.msra.mxu1 %v6368_v4 }
 0x3a4   :  { %4697 = vmatprep.subr.mxu0 %v7470_v20  ;;  %4732 = vmatprep.subr.mxu1 %v7470_v20 }
 0x3a5   :  { %4698 = vmatpush3.msra.mxu0 %v6374_v14  ;;  %4733 = vmatpush3.msra.mxu1 %v6376_v6 }
 0x3a6   :  { %4699 = vmatprep.subr.mxu0 %v7470_v20  ;;  %4734 = vmatprep.subr.mxu1 %v7470_v20 }
 0x3a7   :  { %4700 = vmatpush3.msra.mxu0 %v6382_v13  ;;  %4735 = vmatpush3.msra.mxu1 %v6384_v23 }
 0x3a8   :  { %4701 = vmatprep.subr.mxu0 %v7470_v20  ;;  %4736 = vmatprep.subr.mxu1 %v7470_v20 }
 0x3a9   :  { %4702 = vmatpush3.msra.mxu0 %v6390_v29  ;;  %4737 = vmatpush3.msra.mxu1 %v6392_v24 }
 0x3aa   :  { %4703 = vmatprep.subr.mxu0 %v7470_v20  ;;  %4738 = vmatprep.subr.mxu1 %v7470_v20 }
 0x3ab   :  { %4704 = vmatpush3.msra.mxu0 %v6398_v9  ;;  %4739 = vmatpush3.msra.mxu1 %v6400_v31 }
 0x3ac   :  { %4705 = vmatprep.subr.mxu0 %v7470_v20  ;;  %4740 = vmatprep.subr.mxu1 %v7470_v20 }
 0x3ad   :  { %4706 = vmatpush3.msra.mxu0 %v6406_v42  ;;  %4741 = vmatpush3.msra.mxu1 %v6408_v36 }
 0x3ae   :  { %4707 = vmatprep.subr.mxu0 %v7470_v20  ;;  %4742 = vmatprep.subr.mxu1 %v7470_v20 }
 0x3af   :  { %4708 = vmatpush3.msra.mxu0 %v7493_v61  ;;  %4743 = vmatpush3.msra.mxu1 %v7494_v63 }
 0x3b0   :  { %4709 = vmatprep.subr.mxu0 %v7470_v20  ;;  %4744 = vmatprep.subr.mxu1 %v7470_v20 }
 0x3b1   :  { %4710 = vmatpush3.msra.mxu0 %v7495_v1  ;;  %4745 = vmatpush3.msra.mxu1 %v7496_v21 }
 0x3b2   :  { %4711 = vmatprep.subr.mxu0 %v7470_v20  ;;  %4746 = vmatprep.subr.mxu1 %v7470_v20 }
 0x3b3   :  { %4712 = vmatpush3.msra.mxu0 %v7497_v16  ;;  %4747 = vmatpush3.msra.mxu1 %v7498_v32 }
 0x3b4   :  { %4713 = vmatprep.subr.mxu0 %v7470_v20  ;;  %4748 = vmatprep.subr.mxu1 %v7470_v20 }
 0x3b5   :  { %4714 = vmatpush3.msra.mxu0 %v6438_v15  ;;  %4749 = vmatpush3.msra.mxu1 %v7499_v27 }
 0x3b6   :  { %4715 = vmatprep.subr.mxu0 %v7470_v20  ;;  %4750 = vmatprep.subr.mxu1 %v7470_v20 }
 0x3b7   :  { %4716 = vmatpush3.msra.mxu0 %v6446_v11  ;;  %4751 = vmatpush3.msra.mxu1 %v6448_v5 }
 0x3b8   :  { %4717 = vmatprep.subr.mxu0 %v7470_v20  ;;  %4752 = vmatprep.subr.mxu1 %v7470_v20 }
 0x3b9   :  { %4718 = vmatpush3.msra.mxu0 %v6454_v25  ;;  %4753 = vmatpush3.msra.mxu1 %v6456_v30 }
 0x3ba   :  { %4719 = vmatprep.subr.mxu0 %v7470_v20  ;;  %4754 = vmatprep.subr.mxu1 %v7470_v20 }
 0x3bb   :  { %4720 = vmatpush3.msra.mxu0 %v6462_v8  ;;  %4721 = vmatprep.mubr.msk.f32.mxu0 %vm5614_vm0, %v7470_v20 }
 0x3bc   :  { %4755 = vmatpush3.msra.mxu1 %v6466_v38  ;;  %4756 = vmatprep.mubr.msk.f32.mxu1 %vm5614_vm0, %v7470_v20 }
 0x3bd   :  { %4722 = vmatmul.mubr.f32.vlgmr.msra.gmra.mxu0 %v6556_v62  ;;  %4757 = vmatmul.mubr.f32.vlgmr.msra.gmra.mxu1 %v6556_v62 }
 0x3be   :  { %4759 = vmatprep.subr.mxu0 %v7470_v20  ;;  %4794 = vmatprep.subr.mxu1 %v7470_v20 }
 0x3bf   :  { %4760 = vmatpush3.msra.mxu0 %v6206_v43  ;;  %4795 = vmatpush3.msra.mxu1 %v6208_v44  ;;  %v7500_v43 = vld [vmem:[#allocation18_spill] sm:$0xff]  ;;  %v7501_v44 = vld [vmem:[#allocation39_spill] sm:$0xff] }
 0x3c0   :  { %4761 = vmatprep.subr.mxu0 %v7470_v20  ;;  %4796 = vmatprep.subr.mxu1 %v7470_v20 }
 0x3c1   :  { %4762 = vmatpush3.msra.mxu0 %v6214_v45  ;;  %4797 = vmatpush3.msra.mxu1 %v6216_v46  ;;  %v7502_v45 = vld [vmem:[#allocation40_spill] sm:$0xff]  ;;  %v7503_v46 = vld [vmem:[#allocation41_spill] sm:$0xff] }
 0x3c2   :  { %4763 = vmatprep.subr.mxu0 %v7470_v20  ;;  %4798 = vmatprep.subr.mxu1 %v7470_v20 }
 0x3c3   :  { %4764 = vmatpush3.msra.mxu0 %v6222_v47  ;;  %4799 = vmatpush3.msra.mxu1 %v6224_v48  ;;  %v7504_v47 = vld [vmem:[#allocation42_spill] sm:$0xff]  ;;  %v7505_v48 = vld [vmem:[#allocation43_spill] sm:$0xff] }
 0x3c4   :  { %4765 = vmatprep.subr.mxu0 %v7470_v20  ;;  %4800 = vmatprep.subr.mxu1 %v7470_v20 }
 0x3c5   :  { %4766 = vmatpush3.msra.mxu0 %v6230_v49  ;;  %4801 = vmatpush3.msra.mxu1 %v6232_v50  ;;  %v7506_v49 = vld [vmem:[#allocation44_spill] sm:$0xff]  ;;  %v7507_v50 = vld [vmem:[#allocation45_spill] sm:$0xff] }
 0x3c6   :  { %4767 = vmatprep.subr.mxu0 %v7470_v20  ;;  %4802 = vmatprep.subr.mxu1 %v7470_v20 }
 0x3c7   :  { %4768 = vmatpush3.msra.mxu0 %v6238_v51  ;;  %4803 = vmatpush3.msra.mxu1 %v6240_v52  ;;  %v7508_v51 = vld [vmem:[#allocation46_spill] sm:$0xff]  ;;  %v7509_v52 = vld [vmem:[#allocation47_spill] sm:$0xff] }
 0x3c8   :  { %4769 = vmatprep.subr.mxu0 %v7470_v20  ;;  %4804 = vmatprep.subr.mxu1 %v7470_v20 }
 0x3c9   :  { %4770 = vmatpush3.msra.mxu0 %v6246_v53  ;;  %4805 = vmatpush3.msra.mxu1 %v6248_v54  ;;  %v7510_v53 = vld [vmem:[#allocation48_spill] sm:$0xff]  ;;  %v7511_v54 = vld [vmem:[#allocation49_spill] sm:$0xff] }
 0x3ca   :  { %4771 = vmatprep.subr.mxu0 %v7470_v20  ;;  %4806 = vmatprep.subr.mxu1 %v7470_v20 }
 0x3cb   :  { %4772 = vmatpush3.msra.mxu0 %v6254_v55  ;;  %4807 = vmatpush3.msra.mxu1 %v6256_v56  ;;  %v7512_v55 = vld [vmem:[#allocation50_spill] sm:$0xff]  ;;  %v7513_v56 = vld [vmem:[#allocation51_spill] sm:$0xff] }
 0x3cc   :  { %4773 = vmatprep.subr.mxu0 %v7470_v20  ;;  %4808 = vmatprep.subr.mxu1 %v7470_v20 }
 0x3cd   :  { %4774 = vmatpush3.msra.mxu0 %v6262_v57  ;;  %4809 = vmatpush3.msra.mxu1 %v6264_v58 }
 0x3ce   :  { %4775 = vmatprep.subr.mxu0 %v7470_v20  ;;  %4810 = vmatprep.subr.mxu1 %v7470_v20 }
 0x3cf   :  { %4776 = vmatpush3.msra.mxu0 %v6270_v59  ;;  %4811 = vmatpush3.msra.mxu1 %v6272_v60 }
 0x3d0   :  { %4777 = vmatprep.subr.mxu0 %v7470_v20  ;;  %4812 = vmatprep.subr.mxu1 %v7470_v20 }
 0x3d1   :  { %4778 = vmatpush3.msra.mxu0 %v7500_v43  ;;  %4813 = vmatpush3.msra.mxu1 %v7501_v44  ;;  %v7516_v43 = vld [vmem:[#allocation20_spill] sm:$0xff] }
 0x3d2   :  { %4779 = vmatprep.subr.mxu0 %v7470_v20  ;;  %4814 = vmatprep.subr.mxu1 %v7470_v20 }
 0x3d3   :  { %4780 = vmatpush3.msra.mxu0 %v7502_v45  ;;  %4815 = vmatpush3.msra.mxu1 %v7503_v46  ;;  %v7517_v45 = vld [vmem:[#allocation22_spill] sm:$0xff] }
 0x3d4   :  { %4781 = vmatprep.subr.mxu0 %v7470_v20  ;;  %4816 = vmatprep.subr.mxu1 %v7470_v20 }
 0x3d5   :  { %4782 = vmatpush3.msra.mxu0 %v7504_v47  ;;  %4817 = vmatpush3.msra.mxu1 %v7505_v48 }
 0x3d6   :  { %4783 = vmatprep.subr.mxu0 %v7470_v20  ;;  %4818 = vmatprep.subr.mxu1 %v7470_v20 }
 0x3d7   :  { %4784 = vmatpush3.msra.mxu0 %v7506_v49  ;;  %4819 = vmatpush3.msra.mxu1 %v7507_v50 }
 0x3d8   :  { %4785 = vmatprep.subr.mxu0 %v7470_v20  ;;  %4820 = vmatprep.subr.mxu1 %v7470_v20 }
 0x3d9   :  { %4786 = vmatpush3.msra.mxu0 %v7508_v51  ;;  %4821 = vmatpush3.msra.mxu1 %v7509_v52 }
 0x3da   :  { %4787 = vmatprep.subr.mxu0 %v7470_v20  ;;  %4822 = vmatprep.subr.mxu1 %v7470_v20 }
 0x3db   :  { %4788 = vmatpush3.msra.mxu0 %v7510_v53  ;;  %4823 = vmatpush3.msra.mxu1 %v7511_v54 }
 0x3dc   :  { %4789 = vmatprep.subr.mxu0 %v7470_v20  ;;  %4824 = vmatprep.subr.mxu1 %v7470_v20 }
 0x3dd   :  { %4790 = vmatpush3.msra.mxu0 %v7512_v55  ;;  %4825 = vmatpush3.msra.mxu1 %v7513_v56 }
 0x3de   :  { %4791 = vmatprep.mubr.msk.f32.mxu0 %vm5614_vm0, %v7470_v20  ;;  %4826 = vmatprep.mubr.msk.f32.mxu1 %vm5614_vm0, %v7470_v20 }
 0x3df   :  { %4829 = vmatprep.subr.mxu0 %v7470_v20  ;;  %4864 = vmatprep.subr.mxu1 %v7470_v20 }
 0x45c   :  { %v1672_v57 = vpop.f32.mrf.mxu0  ;;  %v1765_v58 = vpop.f32.mrf.mxu1 }
 0x45d   :  { %v1769_v34 = vadd.f32 %v1765_v58, %v7514_v39  ;;  %v1676_v17 = vadd.f32 %v1672_v57, %v7515_v22 }
 0x45e   :  { %v4653_v59 = vpop.f32.mrf.mxu0  ;;  %v4688_v60 = vpop.f32.mrf.mxu1 }
 0x45f   :  { %v3623_v37 = vmul.f32 -1.442695, %v1769_v34  ;;  %v3622_v3 = vmul.f32 -1.442695, %v1676_v17  ;;  %v7536_v17 = vld [vmem:[#allocation25_spill] sm:$0xff] }
 0x461   :  { %5413 = vpow2.f32 %v3623_v37 }
 0x462   :  { %5415 = vpow2.f32 %v3622_v3  ;;  %v7537_v3 = vld [vmem:[#allocation23_spill] sm:$0xff] }
 0x46e   :  { %v5414_v12 = vpop.eup %5413 }
 0x46f   :  { %v5416_v7 = vpop.eup %5415  ;;  %v1773_v2 = vadd.f32 1.0, %v5414_v12 }
 0x470   :  { %v1680_v35 = vadd.f32 1.0, %v5416_v7 }
 0x471   :  { %5417 = vrcp.f32 %v1773_v2 }
 0x472   :  { %5419 = vrcp.f32 %v1680_v35 }
 0x47d   :  { %v1858_v40 = vpop.f32.mrf.mxu0  ;;  %v1946_v62 = vpop.f32.mrf.mxu1 }
 0x47e   :  { %v1862_v44 = vadd.f32 %v1858_v40, %v7516_v43  ;;  %v1950_v46 = vadd.f32 %v1946_v62, %v7517_v45  ;;  %v5418_v50 = vpop.eup %5417 }
 0x47f   :  { %v4723_v47 = vpop.f32.mrf.mxu0  ;;  %v4758_v48 = vpop.f32.mrf.mxu1  ;;  %v1957_v53 = vmul.f32 %v5418_v50, %v6553_v33  ;;  %v6878_v33 = vld [vmem:[#allocation10 + $0x68] sm:$0xff] }
 0x480   :  { %5421 = vtanh.f32 %v1862_v44  ;;  %v3624_v49 = vmul.f32 -1.442695, %v1950_v46  ;;  %v5420_v51 = vpop.eup %5419  ;;  %7529 = vst [vmem:[#allocation42_spill] sm:$0xff] %v6878_v33  ;;  %v7538_v46 = vld [vmem:[#allocation24_spill] sm:$0xff]  ;;  %v7539_v48 = vld [vmem:[#allocation26_spill] sm:$0xff] }
 0x482   :  { %5423 = vpow2.f32 %v3624_v49 }
 0x48d   :  { %v5422_v52 = vpop.eup %5421 }
 0x48e   :  { %v1958_v54 = vmul.f32 %v5422_v52, %v5420_v51 }
 0x48f   :  { %v5424_v55 = vpop.eup %5423 }
 0x490   :  { %v6703_v56 = vadd.f32 %v1958_v54, %v1957_v53  ;;  %v1954_v57 = vadd.f32 1.0, %v5424_v55 }
 0x492   :  { %5425 = vtanh.f32 %v6703_v56 }
 0x493   :  { %5427 = vrcp.f32 %v1954_v57 }
 0x49f   :  { %v5426_v58 = vpop.eup %5425 }
 0x4a0   :  { %v5428_v59 = vpop.eup %5427 }
 0x4a1   :  { %v6706_v60 = vmul.f32 %v5428_v59, %v5426_v58 }
 0x4a3   :  { %4792 = vmatmul.mubr.f32.vlgmr.msra.gmra.mxu0 %v6706_v60  ;;  %4827 = vmatmul.mubr.f32.vlgmr.msra.gmra.mxu1 %v6706_v60 }
 0x4a4   :  { %4830 = vmatpush3.msra.mxu0 %v6344_v41  ;;  %4865 = vmatpush3.msra.mxu1 %v6346_v19  ;;  %v6792_v41 = vld [vmem:[#allocation10 + $0x1c0] sm:$0xff]  ;;  %v6794_v19 = vld [vmem:[#allocation10 + $0x1c8] sm:$0xff] }
 0x4a5   :  { %4831 = vmatprep.subr.mxu0 %v7470_v20  ;;  %4866 = vmatprep.subr.mxu1 %v7470_v20 }
 0x4a6   :  { %4832 = vmatpush3.msra.mxu0 %v6350_v18  ;;  %4867 = vmatpush3.msra.mxu1 %v6352_v26  ;;  %v6800_v18 = vld [vmem:[#allocation10 + $0x1a0] sm:$0xff]  ;;  %v6802_v26 = vld [vmem:[#allocation10 + $0x1a8] sm:$0xff] }
 0x4a7   :  { %4833 = vmatprep.subr.mxu0 %v7470_v20  ;;  %4868 = vmatprep.subr.mxu1 %v7470_v20 }
 0x4a8   :  { %4834 = vmatpush3.msra.mxu0 %v6358_v10  ;;  %4869 = vmatpush3.msra.mxu1 %v6360_v0  ;;  %v6808_v10 = vld [vmem:[#allocation10 + $0x180] sm:$0xff]  ;;  %v6810_v0 = vld [vmem:[#allocation10 + $0x188] sm:$0xff] }
 0x4a9   :  { %4835 = vmatprep.subr.mxu0 %v7470_v20  ;;  %4870 = vmatprep.subr.mxu1 %v7470_v20 }
 0x4aa   :  { %4836 = vmatpush3.msra.mxu0 %v6366_v28  ;;  %4871 = vmatpush3.msra.mxu1 %v6368_v4  ;;  %v6816_v28 = vld [vmem:[#allocation10 + $0x160] sm:$0xff]  ;;  %v6818_v4 = vld [vmem:[#allocation10 + $0x168] sm:$0xff] }
 0x4ab   :  { %4837 = vmatprep.subr.mxu0 %v7470_v20  ;;  %4872 = vmatprep.subr.mxu1 %v7470_v20 }
 0x4ac   :  { %4838 = vmatpush3.msra.mxu0 %v6374_v14  ;;  %4873 = vmatpush3.msra.mxu1 %v6376_v6  ;;  %v6824_v14 = vld [vmem:[#allocation10 + $0x140] sm:$0xff]  ;;  %v6826_v6 = vld [vmem:[#allocation10 + $0x148] sm:$0xff] }
 0x4ad   :  { %4839 = vmatprep.subr.mxu0 %v7470_v20  ;;  %4874 = vmatprep.subr.mxu1 %v7470_v20 }
 0x4ae   :  { %4840 = vmatpush3.msra.mxu0 %v6382_v13  ;;  %4875 = vmatpush3.msra.mxu1 %v6384_v23  ;;  %v6832_v13 = vld [vmem:[#allocation10 + $0x120] sm:$0xff]  ;;  %v6834_v23 = vld [vmem:[#allocation10 + $0x128] sm:$0xff] }
 0x4af   :  { %4841 = vmatprep.subr.mxu0 %v7470_v20  ;;  %4876 = vmatprep.subr.mxu1 %v7470_v20 }
 0x4b0   :  { %4842 = vmatpush3.msra.mxu0 %v6390_v29  ;;  %4877 = vmatpush3.msra.mxu1 %v6392_v24  ;;  %v6840_v29 = vld [vmem:[#allocation10 + $0x100] sm:$0xff]  ;;  %v6842_v24 = vld [vmem:[#allocation10 + $0x108] sm:$0xff] }
 0x4b1   :  { %4843 = vmatprep.subr.mxu0 %v7470_v20  ;;  %4878 = vmatprep.subr.mxu1 %v7470_v20  ;;  %7518 = vst [vmem:[#allocation52_spill] sm:$0xff] %v6840_v29  ;;  %7519 = vst [vmem:[#allocation53_spill] sm:$0xff] %v6842_v24 }
 0x4b2   :  { %4844 = vmatpush3.msra.mxu0 %v6398_v9  ;;  %4879 = vmatpush3.msra.mxu1 %v6400_v31  ;;  %v6848_v9 = vld [vmem:[#allocation10 + $0xe0] sm:$0xff]  ;;  %v6850_v31 = vld [vmem:[#allocation10 + $0xe8] sm:$0xff] }
 0x4b3   :  { %4845 = vmatprep.subr.mxu0 %v7470_v20  ;;  %4880 = vmatprep.subr.mxu1 %v7470_v20  ;;  %7520 = vst [vmem:[#allocation54_spill] sm:$0xff] %v6848_v9  ;;  %7521 = vst [vmem:[#allocation55_spill] sm:$0xff] %v6850_v31 }
 0x4b4   :  { %4846 = vmatpush3.msra.mxu0 %v6406_v42  ;;  %4881 = vmatpush3.msra.mxu1 %v6408_v36  ;;  %v6854_v42 = vld [vmem:[#allocation10 + $0xc0] sm:$0xff]  ;;  %v6856_v36 = vld [vmem:[#allocation10 + $0xc8] sm:$0xff] }
 0x4b5   :  { %4847 = vmatprep.subr.mxu0 %v7470_v20  ;;  %4882 = vmatprep.subr.mxu1 %v7470_v20  ;;  %7522 = vst [vmem:[#allocation56_spill] sm:$0xff] %v6854_v42  ;;  %7523 = vst [vmem:[#allocation57_spill] sm:$0xff] %v6856_v36 }
 0x4b6   :  { %4848 = vmatpush3.msra.mxu0 %v7493_v61  ;;  %4883 = vmatpush3.msra.mxu1 %v7494_v63  ;;  %v6884_v61 = vld [vmem:[#allocation10 + $0x40] sm:$0xff]  ;;  %v6886_v63 = vld [vmem:[#allocation10 + $0x48] sm:$0xff] }
 0x4b7   :  { %4849 = vmatprep.subr.mxu0 %v7470_v20  ;;  %4884 = vmatprep.subr.mxu1 %v7470_v20  ;;  %7530 = vst [vmem:[#allocation43_spill] sm:$0xff] %v6884_v61  ;;  %7531 = vst [vmem:[#allocation44_spill] sm:$0xff] %v6886_v63 }
 0x4b8   :  { %4850 = vmatpush3.msra.mxu0 %v7495_v1  ;;  %4885 = vmatpush3.msra.mxu1 %v7496_v21  ;;  %v6892_v1 = vld [vmem:[#allocation10 + $0x20] sm:$0xff]  ;;  %v6894_v21 = vld [vmem:[#allocation10 + $0x28] sm:$0xff] }
 0x4b9   :  { %4851 = vmatprep.subr.mxu0 %v7470_v20  ;;  %4886 = vmatprep.subr.mxu1 %v7470_v20  ;;  %7532 = vst [vmem:[#allocation45_spill] sm:$0xff] %v6892_v1  ;;  %7533 = vst [vmem:[#allocation46_spill] sm:$0xff] %v6894_v21 }
 0x4ba   :  { %4852 = vmatpush3.msra.mxu0 %v7497_v16  ;;  %4887 = vmatpush3.msra.mxu1 %v7498_v32  ;;  %v6900_v16 = vld [vmem:[#allocation10] sm:$0xff]  ;;  %v6902_v32 = vld [vmem:[#allocation10 + $0x8] sm:$0xff] }
 0x4bb   :  { %4853 = vmatprep.subr.mxu0 %v7470_v20  ;;  %4888 = vmatprep.subr.mxu1 %v7470_v20  ;;  %7534 = vst [vmem:[#allocation47_spill] sm:$0xff] %v6900_v16  ;;  %7535 = vst [vmem:[#allocation48_spill] sm:$0xff] %v6902_v32 }
 0x4bc   :  { %4854 = vmatpush3.msra.mxu0 %v6438_v15  ;;  %4889 = vmatpush3.msra.mxu1 %v7499_v27  ;;  %v6786_v15 = vld [vmem:[#allocation10 + $0x1e8] sm:$0xff] }
 0x4bd   :  { %4855 = vmatprep.subr.mxu0 %v7470_v20  ;;  %4890 = vmatprep.subr.mxu1 %v7470_v20 }
 0x4be   :  { %4856 = vmatpush3.msra.mxu0 %v6446_v11  ;;  %4891 = vmatpush3.msra.mxu1 %v6448_v5  ;;  %v6862_v11 = vld [vmem:[#allocation10 + $0xa8] sm:$0xff]  ;;  %v6868_v5 = vld [vmem:[#allocation10 + $0x80] sm:$0xff] }
 0x4bf   :  { %4857 = vmatprep.subr.mxu0 %v7470_v20  ;;  %4892 = vmatprep.subr.mxu1 %v7470_v20  ;;  %7525 = vst [vmem:[#allocation18_spill] sm:$0xff] %v6862_v11  ;;  %7526 = vst [vmem:[#allocation39_spill] sm:$0xff] %v6868_v5 }
 0x4c0   :  { %4858 = vmatpush3.msra.mxu0 %v6454_v25  ;;  %4893 = vmatpush3.msra.mxu1 %v6456_v30  ;;  %v6870_v25 = vld [vmem:[#allocation10 + $0x88] sm:$0xff]  ;;  %v6876_v30 = vld [vmem:[#allocation10 + $0x60] sm:$0xff] }
 0x4c1   :  { %4859 = vmatprep.subr.mxu0 %v7470_v20  ;;  %4894 = vmatprep.subr.mxu1 %v7470_v20  ;;  %7527 = vst [vmem:[#allocation40_spill] sm:$0xff] %v6870_v25  ;;  %7528 = vst [vmem:[#allocation41_spill] sm:$0xff] %v6876_v30 }
 0x4c2   :  { %4860 = vmatpush3.msra.mxu0 %v6462_v8  ;;  %4861 = vmatprep.mubr.msk.f32.mxu0 %vm5614_vm0, %v7470_v20  ;;  %v6784_v8 = vld [vmem:[#allocation10 + $0x1e0] sm:$0xff] }
 0x4c3   :  { %4895 = vmatpush3.msra.mxu1 %v6466_v38  ;;  %4896 = vmatprep.mubr.msk.f32.mxu1 %vm5614_vm0, %v7470_v20  ;;  %v6860_v38 = vld [vmem:[#allocation10 + $0xa0] sm:$0xff] }
 0x4c4   :  { %4862 = vmatmul.mubr.f32.vlgmr.msra.gmra.mxu0 %v6706_v60  ;;  %4897 = vmatmul.mubr.f32.vlgmr.msra.gmra.mxu1 %v6706_v60  ;;  %7524 = vst [vmem:[#allocation58_spill] sm:$0xff] %v6860_v38 }
 0x4c5   :  { %4899 = vmatprep.subr.mxu0 %v7470_v20  ;;  %4934 = vmatprep.subr.mxu1 %v7470_v20 }
 0x4c6   :  { %4931 = vmatprep.mubr.msk.f32.mxu0 %vm5614_vm0, %v7470_v20  ;;  %4966 = vmatprep.mubr.msk.f32.mxu1 %vm5614_vm0, %v7470_v20 }
 0x4c7   :  { %4900 = vmatpush3.msra.mxu0 %v6784_v8  ;;  %4935 = vmatpush3.msra.mxu1 %v6786_v15 }
 0x4c8   :  { %4901 = vmatprep.subr.mxu0 %v7470_v20  ;;  %4936 = vmatprep.subr.mxu1 %v7470_v20 }
 0x4c9   :  { %4902 = vmatpush3.msra.mxu0 %v6792_v41  ;;  %4937 = vmatpush3.msra.mxu1 %v6794_v19 }
 0x4ca   :  { %4903 = vmatprep.subr.mxu0 %v7470_v20  ;;  %4938 = vmatprep.subr.mxu1 %v7470_v20 }
 0x4cb   :  { %4904 = vmatpush3.msra.mxu0 %v6800_v18  ;;  %4939 = vmatpush3.msra.mxu1 %v6802_v26 }
 0x4cc   :  { %4905 = vmatprep.subr.mxu0 %v7470_v20  ;;  %4940 = vmatprep.subr.mxu1 %v7470_v20 }
 0x4cd   :  { %4906 = vmatpush3.msra.mxu0 %v6808_v10  ;;  %4941 = vmatpush3.msra.mxu1 %v6810_v0 }
 0x4ce   :  { %4907 = vmatprep.subr.mxu0 %v7470_v20  ;;  %4942 = vmatprep.subr.mxu1 %v7470_v20 }
 0x4cf   :  { %4908 = vmatpush3.msra.mxu0 %v6816_v28  ;;  %4943 = vmatpush3.msra.mxu1 %v6818_v4 }
 0x4d0   :  { %4909 = vmatprep.subr.mxu0 %v7470_v20  ;;  %4944 = vmatprep.subr.mxu1 %v7470_v20 }
 0x4d1   :  { %4910 = vmatpush3.msra.mxu0 %v6824_v14  ;;  %4945 = vmatpush3.msra.mxu1 %v6826_v6 }
 0x4d2   :  { %4911 = vmatprep.subr.mxu0 %v7470_v20  ;;  %4946 = vmatprep.subr.mxu1 %v7470_v20 }
 0x4d3   :  { %4912 = vmatpush3.msra.mxu0 %v6832_v13  ;;  %4947 = vmatpush3.msra.mxu1 %v6834_v23 }
 0x4d4   :  { %4913 = vmatprep.subr.mxu0 %v7470_v20  ;;  %4948 = vmatprep.subr.mxu1 %v7470_v20 }
 0x4d5   :  { %4914 = vmatpush3.msra.mxu0 %v6840_v29  ;;  %4949 = vmatpush3.msra.mxu1 %v6842_v24 }
 0x4d6   :  { %4915 = vmatprep.subr.mxu0 %v7470_v20  ;;  %4950 = vmatprep.subr.mxu1 %v7470_v20 }
 0x4d7   :  { %4916 = vmatpush3.msra.mxu0 %v6848_v9  ;;  %4951 = vmatpush3.msra.mxu1 %v6850_v31 }
 0x4d8   :  { %4917 = vmatprep.subr.mxu0 %v7470_v20  ;;  %4952 = vmatprep.subr.mxu1 %v7470_v20 }
 0x4d9   :  { %4918 = vmatpush3.msra.mxu0 %v6854_v42  ;;  %4953 = vmatpush3.msra.mxu1 %v6856_v36 }
 0x4da   :  { %4919 = vmatprep.subr.mxu0 %v7470_v20  ;;  %4954 = vmatprep.subr.mxu1 %v7470_v20 }
 0x4db   :  { %4920 = vmatpush3.msra.mxu0 %v6860_v38  ;;  %4955 = vmatpush3.msra.mxu1 %v6862_v11 }
 0x4dc   :  { %4921 = vmatprep.subr.mxu0 %v7470_v20  ;;  %4956 = vmatprep.subr.mxu1 %v7470_v20 }
 0x4dd   :  { %4922 = vmatpush3.msra.mxu0 %v6868_v5  ;;  %4957 = vmatpush3.msra.mxu1 %v6870_v25 }
 0x4de   :  { %4923 = vmatprep.subr.mxu0 %v7470_v20  ;;  %4958 = vmatprep.subr.mxu1 %v7470_v20 }
 0x4df   :  { %4924 = vmatpush3.msra.mxu0 %v6876_v30  ;;  %4959 = vmatpush3.msra.mxu1 %v6878_v33 }
 0x4e0   :  { %4925 = vmatprep.subr.mxu0 %v7470_v20  ;;  %4960 = vmatprep.subr.mxu1 %v7470_v20 }
 0x4e1   :  { %4926 = vmatpush3.msra.mxu0 %v6884_v61  ;;  %4961 = vmatpush3.msra.mxu1 %v6886_v63 }
 0x4e2   :  { %4927 = vmatprep.subr.mxu0 %v7470_v20  ;;  %4962 = vmatprep.subr.mxu1 %v7470_v20 }
 0x4e3   :  { %4928 = vmatpush3.msra.mxu0 %v6892_v1  ;;  %4963 = vmatpush3.msra.mxu1 %v6894_v21 }
 0x4e4   :  { %4929 = vmatprep.subr.mxu0 %v7470_v20  ;;  %4964 = vmatprep.subr.mxu1 %v7470_v20 }
 0x4e5   :  { %4930 = vmatpush3.msra.mxu0 %v6900_v16  ;;  %4965 = vmatpush3.msra.mxu1 %v6902_v32 }
 0x4e6   :  { %4969 = vmatprep.subr.mxu0 %v7470_v20  ;;  %5004 = vmatprep.subr.mxu1 %v7470_v20 }
 0x563   :  { %v2053_v27 = vpop.f32.mrf.mxu0  ;;  %v2146_v39 = vpop.f32.mrf.mxu1 }
 0x564   :  { %v2150_v37 = vadd.f32 %v2146_v39, %v7536_v17  ;;  %v2057_v12 = vadd.f32 %v2053_v27, %v7537_v3  ;;  %v6922_v17 = vld [vmem:[#allocation10 + $0x1f0] sm:$0xff]  ;;  %v6930_v3 = vld [vmem:[#allocation10 + $0x1d8] sm:$0xff] }
 0x565   :  { %v4793_v34 = vpop.f32.mrf.mxu0  ;;  %v4828_v22 = vpop.f32.mrf.mxu1 }
 0x566   :  { %v3626_v7 = vmul.f32 -1.442695, %v2150_v37  ;;  %v3625_v2 = vmul.f32 -1.442695, %v2057_v12  ;;  %v6924_v37 = vld [vmem:[#allocation10 + $0x1f8] sm:$0xff]  ;;  %v6936_v12 = vld [vmem:[#allocation10 + $0x1b0] sm:$0xff] }
 0x568   :  { %5429 = vpow2.f32 %v3626_v7  ;;  %v6938_v7 = vld [vmem:[#allocation10 + $0x1b8] sm:$0xff] }
 0x569   :  { %5431 = vpow2.f32 %v3625_v2  ;;  %v6944_v2 = vld [vmem:[#allocation10 + $0x190] sm:$0xff] }
 0x575   :  { %v5430_v35 = vpop.eup %5429 }
 0x576   :  { %v5432_v40 = vpop.eup %5431  ;;  %v2154_v62 = vadd.f32 1.0, %v5430_v35  ;;  %v6946_v35 = vld [vmem:[#allocation10 + $0x198] sm:$0xff] }
 0x577   :  { %v2061_v43 = vadd.f32 1.0, %v5432_v40  ;;  %v6952_v40 = vld [vmem:[#allocation10 + $0x170] sm:$0xff] }
 0x578   :  { %5433 = vrcp.f32 %v2154_v62  ;;  %v6954_v62 = vld [vmem:[#allocation10 + $0x178] sm:$0xff] }
 0x579   :  { %5435 = vrcp.f32 %v2061_v43  ;;  %v6960_v43 = vld [vmem:[#allocation10 + $0x150] sm:$0xff] }
 0x584   :  { %v2239_v44 = vpop.f32.mrf.mxu0  ;;  %v2327_v45 = vpop.f32.mrf.mxu1 }
 0x585   :  { %v2243_v47 = vadd.f32 %v2239_v44, %v7538_v46  ;;  %v2331_v49 = vadd.f32 %v2327_v45, %v7539_v48  ;;  %v5434_v53 = vpop.eup %5433  ;;  %v6962_v44 = vld [vmem:[#allocation10 + $0x158] sm:$0xff]  ;;  %v6968_v45 = vld [vmem:[#allocation10 + $0x130] sm:$0xff] }
 0x586   :  { %v4863_v50 = vpop.f32.mrf.mxu0  ;;  %v4898_v51 = vpop.f32.mrf.mxu1  ;;  %v2338_v57 = vmul.f32 %v5434_v53, %v6703_v56  ;;  %v6928_v56 = vld [vmem:[#allocation10 + $0x1d0] sm:$0xff]  ;;  %v6970_v46 = vld [vmem:[#allocation10 + $0x138] sm:$0xff] }
 0x587   :  { %5437 = vtanh.f32 %v2243_v47  ;;  %v3627_v52 = vmul.f32 -1.442695, %v2331_v49  ;;  %v5436_v54 = vpop.eup %5435  ;;  %v6976_v47 = vld [vmem:[#allocation10 + $0x110] sm:$0xff]  ;;  %v6978_v48 = vld [vmem:[#allocation10 + $0x118] sm:$0xff] }
 0x588   :  { %v6984_v49 = vld [vmem:[#allocation10 + $0xf0] sm:$0xff]  ;;  %v6986_v50 = vld [vmem:[#allocation10 + $0xf8] sm:$0xff] }
 0x589   :  { %5439 = vpow2.f32 %v3627_v52  ;;  %v6992_v51 = vld [vmem:[#allocation10 + $0xd0] sm:$0xff]  ;;  %v6994_v52 = vld [vmem:[#allocation10 + $0xd8] sm:$0xff] }
 0x58a   :  { %v7000_v53 = vld [vmem:[#allocation10 + $0xb0] sm:$0xff] }
 0x594   :  { %v5438_v55 = vpop.eup %5437 }
 0x595   :  { %v2339_v58 = vmul.f32 %v5438_v55, %v5436_v54  ;;  %v7002_v54 = vld [vmem:[#allocation10 + $0xb8] sm:$0xff]  ;;  %v7008_v55 = vld [vmem:[#allocation10 + $0x90] sm:$0xff] }
 0x596   :  { %v5440_v59 = vpop.eup %5439  ;;  %7540 = vst [vmem:[#allocation49_spill] sm:$0xff] %v7008_v55 }
 0x597   :  { %v6917_v60 = vadd.f32 %v2339_v58, %v2338_v57  ;;  %v2335_v27 = vadd.f32 1.0, %v5440_v59  ;;  %v7010_v57 = vld [vmem:[#allocation10 + $0x98] sm:$0xff]  ;;  %v7016_v58 = vld [vmem:[#allocation10 + $0x70] sm:$0xff] }
 0x598   :  { %7541 = vst [vmem:[#allocation50_spill] sm:$0xff] %v7010_v57  ;;  %v7018_v59 = vld [vmem:[#allocation10 + $0x78] sm:$0xff] }
 0x599   :  { %5441 = vtanh.f32 %v6917_v60  ;;  %7542 = vst [vmem:[#allocation51_spill] sm:$0xff] %v7018_v59 }
 0x59a   :  { %5443 = vrcp.f32 %v2335_v27  ;;  %v7024_v27 = vld [vmem:[#allocation10 + $0x50] sm:$0xff] }
 0x5a6   :  { %v5442_v39 = vpop.eup %5441 }
 0x5a7   :  { %v5444_v34 = vpop.eup %5443 }
 0x5a8   :  { %v6920_v22 = vmul.f32 %v5444_v34, %v5442_v39  ;;  %v7026_v39 = vld [vmem:[#allocation10 + $0x58] sm:$0xff]  ;;  %v7032_v34 = vld [vmem:[#allocation10 + $0x30] sm:$0xff] }
 0x5aa   :  { %4932 = vmatmul.mubr.f32.vlgmr.msra.gmra.mxu0 %v6920_v22  ;;  %4967 = vmatmul.mubr.f32.vlgmr.msra.gmra.mxu1 %v6920_v22 }
 0x5ab   :  { %4970 = vmatpush3.msra.mxu0 %v6922_v17  ;;  %5005 = vmatpush3.msra.mxu1 %v6924_v37 }
 0x5ac   :  { %4971 = vmatprep.subr.mxu0 %v7470_v20  ;;  %5006 = vmatprep.subr.mxu1 %v7470_v20 }
 0x5ad   :  { %4972 = vmatpush3.msra.mxu0 %v6928_v56  ;;  %5007 = vmatpush3.msra.mxu1 %v6930_v3 }
 0x5ae   :  { %4973 = vmatprep.subr.mxu0 %v7470_v20  ;;  %5008 = vmatprep.subr.mxu1 %v7470_v20 }
 0x5af   :  { %4974 = vmatpush3.msra.mxu0 %v6936_v12  ;;  %5009 = vmatpush3.msra.mxu1 %v6938_v7 }
 0x5b0   :  { %4975 = vmatprep.subr.mxu0 %v7470_v20  ;;  %5010 = vmatprep.subr.mxu1 %v7470_v20 }
 0x5b1   :  { %4976 = vmatpush3.msra.mxu0 %v6944_v2  ;;  %5011 = vmatpush3.msra.mxu1 %v6946_v35 }
 0x5b2   :  { %4977 = vmatprep.subr.mxu0 %v7470_v20  ;;  %5012 = vmatprep.subr.mxu1 %v7470_v20 }
 0x5b3   :  { %4978 = vmatpush3.msra.mxu0 %v6952_v40  ;;  %5013 = vmatpush3.msra.mxu1 %v6954_v62 }
 0x5b4   :  { %4979 = vmatprep.subr.mxu0 %v7470_v20  ;;  %5014 = vmatprep.subr.mxu1 %v7470_v20 }
 0x5b5   :  { %4980 = vmatpush3.msra.mxu0 %v6960_v43  ;;  %5015 = vmatpush3.msra.mxu1 %v6962_v44 }
 0x5b6   :  { %4981 = vmatprep.subr.mxu0 %v7470_v20  ;;  %5016 = vmatprep.subr.mxu1 %v7470_v20 }
 0x5b7   :  { %4982 = vmatpush3.msra.mxu0 %v6968_v45  ;;  %5017 = vmatpush3.msra.mxu1 %v6970_v46 }
 0x5b8   :  { %4983 = vmatprep.subr.mxu0 %v7470_v20  ;;  %5018 = vmatprep.subr.mxu1 %v7470_v20 }
 0x5b9   :  { %4984 = vmatpush3.msra.mxu0 %v6976_v47  ;;  %5019 = vmatpush3.msra.mxu1 %v6978_v48 }
 0x5ba   :  { %4985 = vmatprep.subr.mxu0 %v7470_v20  ;;  %5020 = vmatprep.subr.mxu1 %v7470_v20 }
 0x5bb   :  { %4986 = vmatpush3.msra.mxu0 %v6984_v49  ;;  %5021 = vmatpush3.msra.mxu1 %v6986_v50 }
 0x5bc   :  { %4987 = vmatprep.subr.mxu0 %v7470_v20  ;;  %5022 = vmatprep.subr.mxu1 %v7470_v20 }
 0x5bd   :  { %4988 = vmatpush3.msra.mxu0 %v6992_v51  ;;  %5023 = vmatpush3.msra.mxu1 %v6994_v52 }
 0x5be   :  { %4989 = vmatprep.subr.mxu0 %v7470_v20  ;;  %5024 = vmatprep.subr.mxu1 %v7470_v20 }
 0x5bf   :  { %4990 = vmatpush3.msra.mxu0 %v7000_v53  ;;  %5025 = vmatpush3.msra.mxu1 %v7002_v54 }
 0x5c0   :  { %4991 = vmatprep.subr.mxu0 %v7470_v20  ;;  %5026 = vmatprep.subr.mxu1 %v7470_v20 }
 0x5c1   :  { %4992 = vmatpush3.msra.mxu0 %v7008_v55  ;;  %5027 = vmatpush3.msra.mxu1 %v7010_v57  ;;  %v7034_v55 = vld [vmem:[#allocation10 + $0x38] sm:$0xff]  ;;  %v7040_v57 = vld [vmem:[#allocation10 + $0x10] sm:$0xff] }
 0x5c2   :  { %4993 = vmatprep.subr.mxu0 %v7470_v20  ;;  %5028 = vmatprep.subr.mxu1 %v7470_v20 }
 0x5c3   :  { %4994 = vmatpush3.msra.mxu0 %v7016_v58  ;;  %5029 = vmatpush3.msra.mxu1 %v7018_v59  ;;  %v7044_v59 = vld [vmem:[#allocation10 + $0x18] sm:$0xff] }
 0x5c4   :  { %4995 = vmatprep.subr.mxu0 %v7470_v20  ;;  %5030 = vmatprep.subr.mxu1 %v7470_v20 }
 0x5c5   :  { %4996 = vmatpush3.msra.mxu0 %v7024_v27  ;;  %5031 = vmatpush3.msra.mxu1 %v7026_v39 }
 0x5c6   :  { %4997 = vmatprep.subr.mxu0 %v7470_v20  ;;  %5032 = vmatprep.subr.mxu1 %v7470_v20 }
 0x5c7   :  { %4998 = vmatpush3.msra.mxu0 %v7032_v34  ;;  %5033 = vmatpush3.msra.mxu1 %v7034_v55 }
 0x5c8   :  { %4999 = vmatprep.subr.mxu0 %v7470_v20  ;;  %5034 = vmatprep.subr.mxu1 %v7470_v20 }
 0x5c9   :  { %5000 = vmatpush3.msra.mxu0 %v7040_v57  ;;  %5001 = vmatprep.mubr.msk.f32.mxu0 %vm5614_vm0, %v7470_v20 }
 0x5ca   :  { %5035 = vmatpush3.msra.mxu1 %v7044_v59  ;;  %5036 = vmatprep.mubr.msk.f32.mxu1 %vm5614_vm0, %v7470_v20 }
 0x5cb   :  { %5002 = vmatmul.mubr.f32.vlgmr.msra.gmra.mxu0 %v6920_v22  ;;  %5037 = vmatmul.mubr.f32.vlgmr.msra.gmra.mxu1 %v6920_v22 }
 0x5cc   :  { %5039 = vmatprep.subr.mxu0 %v7470_v20  ;;  %5074 = vmatprep.subr.mxu1 %v7470_v20 }
 0x5cd   :  { %5040 = vmatpush3.msra.mxu0 %v6784_v8  ;;  %5075 = vmatpush3.msra.mxu1 %v6786_v15 }
 0x5ce   :  { %5041 = vmatprep.subr.mxu0 %v7470_v20  ;;  %5076 = vmatprep.subr.mxu1 %v7470_v20 }
 0x5cf   :  { %5042 = vmatpush3.msra.mxu0 %v6792_v41  ;;  %5077 = vmatpush3.msra.mxu1 %v6794_v19 }
 0x5d0   :  { %5043 = vmatprep.subr.mxu0 %v7470_v20  ;;  %5078 = vmatprep.subr.mxu1 %v7470_v20 }
 0x5d1   :  { %5044 = vmatpush3.msra.mxu0 %v6800_v18  ;;  %5079 = vmatpush3.msra.mxu1 %v6802_v26 }
 0x5d2   :  { %5045 = vmatprep.subr.mxu0 %v7470_v20  ;;  %5080 = vmatprep.subr.mxu1 %v7470_v20 }
 0x5d3   :  { %5046 = vmatpush3.msra.mxu0 %v6808_v10  ;;  %5081 = vmatpush3.msra.mxu1 %v6810_v0 }
 0x5d4   :  { %5047 = vmatprep.subr.mxu0 %v7470_v20  ;;  %5082 = vmatprep.subr.mxu1 %v7470_v20 }
 0x5d5   :  { %5048 = vmatpush3.msra.mxu0 %v6816_v28  ;;  %5083 = vmatpush3.msra.mxu1 %v6818_v4 }
 0x5d6   :  { %5049 = vmatprep.subr.mxu0 %v7470_v20  ;;  %5084 = vmatprep.subr.mxu1 %v7470_v20 }
 0x5d7   :  { %5050 = vmatpush3.msra.mxu0 %v6824_v14  ;;  %5085 = vmatpush3.msra.mxu1 %v6826_v6 }
 0x5d8   :  { %5051 = vmatprep.subr.mxu0 %v7470_v20  ;;  %5086 = vmatprep.subr.mxu1 %v7470_v20 }
 0x5d9   :  { %5052 = vmatpush3.msra.mxu0 %v6832_v13  ;;  %5087 = vmatpush3.msra.mxu1 %v6834_v23 }
 0x5da   :  { %5053 = vmatprep.subr.mxu0 %v7470_v20  ;;  %5088 = vmatprep.subr.mxu1 %v7470_v20 }
 0x5db   :  { %5054 = vmatpush3.msra.mxu0 %v6840_v29  ;;  %5089 = vmatpush3.msra.mxu1 %v6842_v24  ;;  %v7546_v29 = vld [vmem:[#allocation30_spill] sm:$0xff] }
 0x5dc   :  { %5055 = vmatprep.subr.mxu0 %v7470_v20  ;;  %5090 = vmatprep.subr.mxu1 %v7470_v20 }
 0x5dd   :  { %5056 = vmatpush3.msra.mxu0 %v6848_v9  ;;  %5091 = vmatpush3.msra.mxu1 %v6850_v31  ;;  %v7545_v9 = vld [vmem:[#allocation28_spill] sm:$0xff] }
 0x5de   :  { %5057 = vmatprep.subr.mxu0 %v7470_v20  ;;  %5092 = vmatprep.subr.mxu1 %v7470_v20 }
 0x5df   :  { %5058 = vmatpush3.msra.mxu0 %v6854_v42  ;;  %5093 = vmatpush3.msra.mxu1 %v6856_v36 }
 0x5e0   :  { %5059 = vmatprep.subr.mxu0 %v7470_v20  ;;  %5094 = vmatprep.subr.mxu1 %v7470_v20 }
 0x5e1   :  { %5060 = vmatpush3.msra.mxu0 %v6860_v38  ;;  %5095 = vmatpush3.msra.mxu1 %v6862_v11 }
 0x5e2   :  { %5061 = vmatprep.subr.mxu0 %v7470_v20  ;;  %5096 = vmatprep.subr.mxu1 %v7470_v20 }
 0x5e3   :  { %5062 = vmatpush3.msra.mxu0 %v6868_v5  ;;  %5097 = vmatpush3.msra.mxu1 %v6870_v25 }
 0x5e4   :  { %5063 = vmatprep.subr.mxu0 %v7470_v20  ;;  %5098 = vmatprep.subr.mxu1 %v7470_v20 }
 0x5e5   :  { %5064 = vmatpush3.msra.mxu0 %v6876_v30  ;;  %5099 = vmatpush3.msra.mxu1 %v6878_v33  ;;  %v7544_v30 = vld [vmem:[#allocation27_spill] sm:$0xff] }
 0x5e6   :  { %5065 = vmatprep.subr.mxu0 %v7470_v20  ;;  %5100 = vmatprep.subr.mxu1 %v7470_v20 }
 0x5e7   :  { %5066 = vmatpush3.msra.mxu0 %v6884_v61  ;;  %5101 = vmatpush3.msra.mxu1 %v6886_v63  ;;  %v7543_v61 = vld [vmem:[#allocation29_spill] sm:$0xff] }
 0x5e8   :  { %5067 = vmatprep.subr.mxu0 %v7470_v20  ;;  %5102 = vmatprep.subr.mxu1 %v7470_v20 }
 0x5e9   :  { %5068 = vmatpush3.msra.mxu0 %v6892_v1  ;;  %5103 = vmatpush3.msra.mxu1 %v6894_v21 }
 0x5ea   :  { %5069 = vmatprep.subr.mxu0 %v7470_v20  ;;  %5104 = vmatprep.subr.mxu1 %v7470_v20 }
 0x5eb   :  { %5070 = vmatpush3.msra.mxu0 %v6900_v16  ;;  %5105 = vmatpush3.msra.mxu1 %v6902_v32 }
 0x5ec   :  { %5071 = vmatprep.mubr.msk.f32.mxu0 %vm5614_vm0, %v7470_v20  ;;  %5106 = vmatprep.mubr.msk.f32.mxu1 %vm5614_vm0, %v7470_v20 }
 0x5ed   :  { %5109 = vmatprep.subr.mxu0 %v7470_v20  ;;  %5144 = vmatprep.subr.mxu1 %v7470_v20 }
 0x66a   :  { %v2434_v22 = vpop.f32.mrf.mxu0  ;;  %v2527_v21 = vpop.f32.mrf.mxu1 }
 0x66b   :  { %v2531_v33 = vadd.f32 %v2527_v21, %v7543_v61  ;;  %v2438_v16 = vadd.f32 %v2434_v22, %v7544_v30  ;;  %v7565_v22 = vld [vmem:[#allocation46_spill] sm:$0xff] }
 0x66c   :  { %v4933_v1 = vpop.f32.mrf.mxu0  ;;  %v4968_v63 = vpop.f32.mrf.mxu1 }
 0x66d   :  { %v3629_v25 = vmul.f32 -1.442695, %v2531_v33  ;;  %v3628_v32 = vmul.f32 -1.442695, %v2438_v16 }
 0x66f   :  { %5445 = vpow2.f32 %v3629_v25 }
 0x670   :  { %5447 = vpow2.f32 %v3628_v32 }
 0x67c   :  { %v5446_v5 = vpop.eup %5445 }
 0x67d   :  { %v5448_v11 = vpop.eup %5447  ;;  %v2535_v38 = vadd.f32 1.0, %v5446_v5 }
 0x67e   :  { %v2442_v36 = vadd.f32 1.0, %v5448_v11 }
 0x67f   :  { %5449 = vrcp.f32 %v2535_v38 }
 0x680   :  { %5451 = vrcp.f32 %v2442_v36  ;;  %v7549_v36 = vld [vmem:[#allocation51_spill] sm:$0xff] }
 0x68b   :  { %v2620_v42 = vpop.f32.mrf.mxu0  ;;  %v2708_v31 = vpop.f32.mrf.mxu1 }
 0x68c   :  { %v2624_v24 = vadd.f32 %v2620_v42, %v7545_v9  ;;  %v2712_v1 = vadd.f32 %v2708_v31, %v7546_v29  ;;  %v5450_v33 = vpop.eup %5449  ;;  %v7548_v42 = vld [vmem:[#allocation50_spill] sm:$0xff] }
 0x68d   :  { %v5003_v63 = vpop.f32.mrf.mxu0  ;;  %v5038_v61 = vpop.f32.mrf.mxu1  ;;  %v2719_v16 = vmul.f32 %v5450_v33, %v6917_v60  ;;  %v7564_v60 = vld [vmem:[#allocation45_spill] sm:$0xff] }
 0x68e   :  { %5453 = vtanh.f32 %v2624_v24  ;;  %v3630_v30 = vmul.f32 -1.442695, %v2712_v1  ;;  %v5452_v25 = vpop.eup %5451  ;;  %v7547_v24 = vld [vmem:[#allocation49_spill] sm:$0xff]  ;;  %v7566_v1 = vld [vmem:[#allocation47_spill] sm:$0xff]  ;;  %v7567_v63 = vld [vmem:[#allocation48_spill] sm:$0xff] }
 0x690   :  { %5455 = vpow2.f32 %v3630_v30 }
 0x69b   :  { %v5454_v21 = vpop.eup %5453 }
 0x69c   :  { %v2720_v5 = vmul.f32 %v5454_v21, %v5452_v25  ;;  %v7568_v21 = vld [vmem:[#allocation33_spill] sm:$0xff] }
 0x69d   :  { %v5456_v11 = vpop.eup %5455 }
 0x69e   :  { %v7131_v32 = vadd.f32 %v2720_v5, %v2719_v16  ;;  %v2716_v38 = vadd.f32 1.0, %v5456_v11  ;;  %v7569_v5 = vld [vmem:[#allocation31_spill] sm:$0xff] }
 0x6a0   :  { %5457 = vtanh.f32 %v7131_v32 }
 0x6a1   :  { %5459 = vrcp.f32 %v2716_v38 }
 0x6ad   :  { %v5458_v29 = vpop.eup %5457 }
 0x6ae   :  { %v5460_v9 = vpop.eup %5459 }
 0x6af   :  { %v7134_v31 = vmul.f32 %v5460_v9, %v5458_v29 }
 0x6b1   :  { %5072 = vmatmul.mubr.f32.vlgmr.msra.gmra.mxu0 %v7134_v31  ;;  %5107 = vmatmul.mubr.f32.vlgmr.msra.gmra.mxu1 %v7134_v31 }
 0x6b2   :  { %5110 = vmatpush3.msra.mxu0 %v6922_v17  ;;  %5145 = vmatpush3.msra.mxu1 %v6924_v37 }
 0x6b3   :  { %5111 = vmatprep.subr.mxu0 %v7470_v20  ;;  %5146 = vmatprep.subr.mxu1 %v7470_v20 }
 0x6b4   :  { %5112 = vmatpush3.msra.mxu0 %v6928_v56  ;;  %5147 = vmatpush3.msra.mxu1 %v6930_v3 }
 0x6b5   :  { %5113 = vmatprep.subr.mxu0 %v7470_v20  ;;  %5148 = vmatprep.subr.mxu1 %v7470_v20 }
 0x6b6   :  { %5114 = vmatpush3.msra.mxu0 %v6936_v12  ;;  %5149 = vmatpush3.msra.mxu1 %v6938_v7 }
 0x6b7   :  { %5115 = vmatprep.subr.mxu0 %v7470_v20  ;;  %5150 = vmatprep.subr.mxu1 %v7470_v20 }
 0x6b8   :  { %5116 = vmatpush3.msra.mxu0 %v6944_v2  ;;  %5151 = vmatpush3.msra.mxu1 %v6946_v35 }
 0x6b9   :  { %5117 = vmatprep.subr.mxu0 %v7470_v20  ;;  %5152 = vmatprep.subr.mxu1 %v7470_v20 }
 0x6ba   :  { %5118 = vmatpush3.msra.mxu0 %v6952_v40  ;;  %5153 = vmatpush3.msra.mxu1 %v6954_v62 }
 0x6bb   :  { %5119 = vmatprep.subr.mxu0 %v7470_v20  ;;  %5154 = vmatprep.subr.mxu1 %v7470_v20 }
 0x6bc   :  { %5120 = vmatpush3.msra.mxu0 %v6960_v43  ;;  %5155 = vmatpush3.msra.mxu1 %v6962_v44 }
 0x6bd   :  { %5121 = vmatprep.subr.mxu0 %v7470_v20  ;;  %5156 = vmatprep.subr.mxu1 %v7470_v20 }
 0x6be   :  { %5122 = vmatpush3.msra.mxu0 %v6968_v45  ;;  %5157 = vmatpush3.msra.mxu1 %v6970_v46 }
 0x6bf   :  { %5123 = vmatprep.subr.mxu0 %v7470_v20  ;;  %5158 = vmatprep.subr.mxu1 %v7470_v20 }
 0x6c0   :  { %5124 = vmatpush3.msra.mxu0 %v6976_v47  ;;  %5159 = vmatpush3.msra.mxu1 %v6978_v48 }
 0x6c1   :  { %5125 = vmatprep.subr.mxu0 %v7470_v20  ;;  %5160 = vmatprep.subr.mxu1 %v7470_v20 }
 0x6c2   :  { %5126 = vmatpush3.msra.mxu0 %v6984_v49  ;;  %5161 = vmatpush3.msra.mxu1 %v6986_v50 }
 0x6c3   :  { %5127 = vmatprep.subr.mxu0 %v7470_v20  ;;  %5162 = vmatprep.subr.mxu1 %v7470_v20 }
 0x6c4   :  { %5128 = vmatpush3.msra.mxu0 %v6992_v51  ;;  %5163 = vmatpush3.msra.mxu1 %v6994_v52 }
 0x6c5   :  { %5129 = vmatprep.subr.mxu0 %v7470_v20  ;;  %5164 = vmatprep.subr.mxu1 %v7470_v20 }
 0x6c6   :  { %5130 = vmatpush3.msra.mxu0 %v7000_v53  ;;  %5165 = vmatpush3.msra.mxu1 %v7002_v54 }
 0x6c7   :  { %5131 = vmatprep.subr.mxu0 %v7470_v20  ;;  %5166 = vmatprep.subr.mxu1 %v7470_v20 }
 0x6c8   :  { %5132 = vmatpush3.msra.mxu0 %v7547_v24  ;;  %5167 = vmatpush3.msra.mxu1 %v7548_v42 }
 0x6c9   :  { %5133 = vmatprep.subr.mxu0 %v7470_v20  ;;  %5168 = vmatprep.subr.mxu1 %v7470_v20 }
 0x6ca   :  { %5134 = vmatpush3.msra.mxu0 %v7016_v58  ;;  %5169 = vmatpush3.msra.mxu1 %v7549_v36 }
 0x6cb   :  { %5135 = vmatprep.subr.mxu0 %v7470_v20  ;;  %5170 = vmatprep.subr.mxu1 %v7470_v20 }
 0x6cc   :  { %5136 = vmatpush3.msra.mxu0 %v7024_v27  ;;  %5171 = vmatpush3.msra.mxu1 %v7026_v39 }
 0x6cd   :  { %5137 = vmatprep.subr.mxu0 %v7470_v20  ;;  %5172 = vmatprep.subr.mxu1 %v7470_v20 }
 0x6ce   :  { %5138 = vmatpush3.msra.mxu0 %v7032_v34  ;;  %5173 = vmatpush3.msra.mxu1 %v7034_v55 }
 0x6cf   :  { %5139 = vmatprep.subr.mxu0 %v7470_v20  ;;  %5174 = vmatprep.subr.mxu1 %v7470_v20 }
 0x6d0   :  { %5140 = vmatpush3.msra.mxu0 %v7040_v57  ;;  %5141 = vmatprep.mubr.msk.f32.mxu0 %vm5614_vm0, %v7470_v20 }
 0x6d1   :  { %5175 = vmatpush3.msra.mxu1 %v7044_v59  ;;  %5176 = vmatprep.mubr.msk.f32.mxu1 %vm5614_vm0, %v7470_v20 }
 0x6d2   :  { %5142 = vmatmul.mubr.f32.vlgmr.msra.gmra.mxu0 %v7134_v31  ;;  %5177 = vmatmul.mubr.f32.vlgmr.msra.gmra.mxu1 %v7134_v31 }
 0x6d3   :  { %5179 = vmatprep.subr.mxu0 %v7470_v20  ;;  %5214 = vmatprep.subr.mxu1 %v7470_v20 }
 0x6d4   :  { %5180 = vmatpush3.msra.mxu0 %v6784_v8  ;;  %5215 = vmatpush3.msra.mxu1 %v6786_v15  ;;  %v7550_v8 = vld [vmem:[#allocation52_spill] sm:$0xff]  ;;  %v7551_v15 = vld [vmem:[#allocation53_spill] sm:$0xff] }
 0x6d5   :  { %5181 = vmatprep.subr.mxu0 %v7470_v20  ;;  %5216 = vmatprep.subr.mxu1 %v7470_v20 }
 0x6d6   :  { %5182 = vmatpush3.msra.mxu0 %v6792_v41  ;;  %5217 = vmatpush3.msra.mxu1 %v6794_v19  ;;  %v7552_v41 = vld [vmem:[#allocation54_spill] sm:$0xff]  ;;  %v7553_v19 = vld [vmem:[#allocation55_spill] sm:$0xff] }
 0x6d7   :  { %5183 = vmatprep.subr.mxu0 %v7470_v20  ;;  %5218 = vmatprep.subr.mxu1 %v7470_v20 }
 0x6d8   :  { %5184 = vmatpush3.msra.mxu0 %v6800_v18  ;;  %5219 = vmatpush3.msra.mxu1 %v6802_v26  ;;  %v7554_v18 = vld [vmem:[#allocation56_spill] sm:$0xff]  ;;  %v7555_v26 = vld [vmem:[#allocation57_spill] sm:$0xff] }
 0x6d9   :  { %5185 = vmatprep.subr.mxu0 %v7470_v20  ;;  %5220 = vmatprep.subr.mxu1 %v7470_v20 }
 0x6da   :  { %5186 = vmatpush3.msra.mxu0 %v6808_v10  ;;  %5221 = vmatpush3.msra.mxu1 %v6810_v0  ;;  %v7556_v10 = vld [vmem:[#allocation58_spill] sm:$0xff] }
 0x6db   :  { %5187 = vmatprep.subr.mxu0 %v7470_v20  ;;  %5222 = vmatprep.subr.mxu1 %v7470_v20  ;;  %v7557_v0 = vld [vmem:[#allocation18_spill] sm:$0xff] }
 0x6dc   :  { %5188 = vmatpush3.msra.mxu0 %v6816_v28  ;;  %5223 = vmatpush3.msra.mxu1 %v6818_v4  ;;  %v7558_v28 = vld [vmem:[#allocation39_spill] sm:$0xff]  ;;  %v7559_v4 = vld [vmem:[#allocation40_spill] sm:$0xff] }
 0x6dd   :  { %5189 = vmatprep.subr.mxu0 %v7470_v20  ;;  %5224 = vmatprep.subr.mxu1 %v7470_v20 }
 0x6de   :  { %5190 = vmatpush3.msra.mxu0 %v6824_v14  ;;  %5225 = vmatpush3.msra.mxu1 %v6826_v6  ;;  %v7560_v14 = vld [vmem:[#allocation41_spill] sm:$0xff]  ;;  %v7561_v6 = vld [vmem:[#allocation42_spill] sm:$0xff] }
 0x6df   :  { %5191 = vmatprep.subr.mxu0 %v7470_v20  ;;  %5226 = vmatprep.subr.mxu1 %v7470_v20 }
 0x6e0   :  { %5192 = vmatpush3.msra.mxu0 %v6832_v13  ;;  %5227 = vmatpush3.msra.mxu1 %v6834_v23  ;;  %v7562_v13 = vld [vmem:[#allocation43_spill] sm:$0xff]  ;;  %v7563_v23 = vld [vmem:[#allocation44_spill] sm:$0xff] }
 0x6e1   :  { %5193 = vmatprep.subr.mxu0 %v7470_v20  ;;  %5228 = vmatprep.subr.mxu1 %v7470_v20 }
 0x6e2   :  { %5194 = vmatpush3.msra.mxu0 %v7550_v8  ;;  %5229 = vmatpush3.msra.mxu1 %v7551_v15 }
 0x6e3   :  { %5195 = vmatprep.subr.mxu0 %v7470_v20  ;;  %5230 = vmatprep.subr.mxu1 %v7470_v20 }
 0x6e4   :  { %5196 = vmatpush3.msra.mxu0 %v7552_v41  ;;  %5231 = vmatpush3.msra.mxu1 %v7553_v19 }
 0x6e5   :  { %5197 = vmatprep.subr.mxu0 %v7470_v20  ;;  %5232 = vmatprep.subr.mxu1 %v7470_v20 }
 0x6e6   :  { %5198 = vmatpush3.msra.mxu0 %v7554_v18  ;;  %5233 = vmatpush3.msra.mxu1 %v7555_v26  ;;  %v7570_v18 = vld [vmem:[#allocation32_spill] sm:$0xff] }
 0x6e7   :  { %5199 = vmatprep.subr.mxu0 %v7470_v20  ;;  %5234 = vmatprep.subr.mxu1 %v7470_v20 }
 0x6e8   :  { %5200 = vmatpush3.msra.mxu0 %v7556_v10  ;;  %5235 = vmatpush3.msra.mxu1 %v7557_v0  ;;  %v7571_v10 = vld [vmem:[#allocation34_spill] sm:$0xff] }
 0x6e9   :  { %5201 = vmatprep.subr.mxu0 %v7470_v20  ;;  %5236 = vmatprep.subr.mxu1 %v7470_v20 }
 0x6ea   :  { %5202 = vmatpush3.msra.mxu0 %v7558_v28  ;;  %5237 = vmatpush3.msra.mxu1 %v7559_v4 }
 0x6eb   :  { %5203 = vmatprep.subr.mxu0 %v7470_v20  ;;  %5238 = vmatprep.subr.mxu1 %v7470_v20 }
 0x6ec   :  { %5204 = vmatpush3.msra.mxu0 %v7560_v14  ;;  %5239 = vmatpush3.msra.mxu1 %v7561_v6 }
 0x6ed   :  { %5205 = vmatprep.subr.mxu0 %v7470_v20  ;;  %5240 = vmatprep.subr.mxu1 %v7470_v20 }
 0x6ee   :  { %5206 = vmatpush3.msra.mxu0 %v7562_v13  ;;  %5241 = vmatpush3.msra.mxu1 %v7563_v23 }
 0x6ef   :  { %5207 = vmatprep.subr.mxu0 %v7470_v20  ;;  %5242 = vmatprep.subr.mxu1 %v7470_v20 }
 0x6f0   :  { %5208 = vmatpush3.msra.mxu0 %v7564_v60  ;;  %5243 = vmatpush3.msra.mxu1 %v7565_v22 }
 0x6f1   :  { %5209 = vmatprep.subr.mxu0 %v7470_v20  ;;  %5244 = vmatprep.subr.mxu1 %v7470_v20 }
 0x6f2   :  { %5210 = vmatpush3.msra.mxu0 %v7566_v1  ;;  %5245 = vmatpush3.msra.mxu1 %v7567_v63 }
 0x6f3   :  { %5211 = vmatprep.mubr.msk.f32.mxu0 %vm5614_vm0, %v7470_v20  ;;  %5246 = vmatprep.mubr.msk.f32.mxu1 %vm5614_vm0, %v7470_v20 }
 0x6f4   :  { %5249 = vmatprep.subr.mxu0 %v7470_v20  ;;  %5284 = vmatprep.subr.mxu1 %v7470_v20 }
 0x771   :  { %v2815_v61 = vpop.f32.mrf.mxu0  ;;  %v2908_v30 = vpop.f32.mrf.mxu1 }
 0x772   :  { %v2912_v16 = vadd.f32 %v2908_v30, %v7568_v21  ;;  %v2819_v11 = vadd.f32 %v2815_v61, %v7569_v5  ;;  %v7575_v21 = vld [vmem:[#allocation38_spill] sm:$0xff] }
 0x773   :  { %v5073_v33 = vpop.f32.mrf.mxu0  ;;  %v5108_v25 = vpop.f32.mrf.mxu1 }
 0x774   :  { %v3632_v38 = vmul.f32 -1.442695, %v2912_v16  ;;  %v3631_v29 = vmul.f32 -1.442695, %v2819_v11 }
 0x776   :  { %5461 = vpow2.f32 %v3632_v38 }
 0x777   :  { %5463 = vpow2.f32 %v3631_v29 }
 0x783   :  { %v5462_v9 = vpop.eup %5461 }
 0x784   :  { %v5464_v31 = vpop.eup %5463  ;;  %v2916_v8 = vadd.f32 1.0, %v5462_v9 }
 0x785   :  { %v2823_v15 = vadd.f32 1.0, %v5464_v31 }
 0x786   :  { %5465 = vrcp.f32 %v2916_v8 }
 0x787   :  { %5467 = vrcp.f32 %v2823_v15 }
 0x792   :  { %v3001_v41 = vpop.f32.mrf.mxu0  ;;  %v3089_v19 = vpop.f32.mrf.mxu1 }
 0x793   :  { %v3005_v26 = vadd.f32 %v3001_v41, %v7570_v18  ;;  %v3093_v0 = vadd.f32 %v3089_v19, %v7571_v10  ;;  %v5466_v6 = vpop.eup %5465 }
 0x794   :  { %v5143_v28 = vpop.f32.mrf.mxu0  ;;  %v5178_v4 = vpop.f32.mrf.mxu1  ;;  %v3100_v60 = vmul.f32 %v5466_v6, %v7131_v32 }
 0x795   :  { %5469 = vtanh.f32 %v3005_v26  ;;  %v3633_v14 = vmul.f32 -1.442695, %v3093_v0  ;;  %v5468_v13 = vpop.eup %5467  ;;  %v7576_v28 = vlaneseq }
 0x797   :  { %5471 = vpow2.f32 %v3633_v14  ;;  %v3583_v4 = vand.u32 127, %v7576_v28  ;;  %v3637_v14 = vld [vmem:[%s7391_s5] ss:$0 sm:$0xff]  ;;  %s5577_s5 = scalar_lea.vmem %s3603_s21, 128 }
 0x798   :  { %p5578_p6 = scmp.ne.s32.totalorder %s3603_s21, %s5577_s5  ;;  %p5583_p8 = scmp.lt.s32.totalorder %s5577_s5, %s5577_s5 }
 0x799   :  { %vm3584_vm1 = vcmp.lt.s32.totalorder %v3583_v4, 4 }
 0x79a   :  { %p5584_p9 = por %p5583_p8, %p5582_p7 }
 0x79c   :  { %p5585_p10 = pnand %p5584_p9, %p5578_p6 }
 0x7a2   :  { %v5470_v23 = vpop.eup %5469 }
 0x7a3   :  { %v3101_v22 = vmul.f32 %v5470_v23, %v5468_v13 }
 0x7a4   :  { %v5472_v1 = vpop.eup %5471 }
 0x7a5   :  { %v7281_v63 = vadd.f32 %v3101_v22, %v3100_v60  ;;  %v3097_v61 = vadd.f32 1.0, %v5472_v1 }
 0x7a7   :  { %5473 = vtanh.f32 %v7281_v63 }
 0x7a8   :  { %5475 = vrcp.f32 %v3097_v61 }
 0x7b4   :  { %v5474_v30 = vpop.eup %5473 }
 0x7b5   :  { %v5476_v33 = vpop.eup %5475 }
 0x7b6   :  { %v7284_v25 = vmul.f32 %v5476_v33, %v5474_v30 }
 0x7b8   :  { %5212 = vmatmul.mubr.f32.vlgmr.msra.gmra.mxu0 %v7284_v25  ;;  %5247 = vmatmul.mubr.f32.vlgmr.msra.gmra.mxu1 %v7284_v25 }
 0x7b9   :  { %5250 = vmatpush3.msra.mxu0 %v6922_v17  ;;  %5285 = vmatpush3.msra.mxu1 %v6924_v37  ;;  %v3504_v17 = vld [vmem:[#allocation11 + $0x78] sm:$0xff]  ;;  %v3503_v37 = vld [vmem:[#allocation11 + $0x70] sm:$0xff] }
 0x7ba   :  { %5251 = vmatprep.subr.mxu0 %v7470_v20  ;;  %5286 = vmatprep.subr.mxu1 %v7470_v20 }
 0x7bb   :  { %5252 = vmatpush3.msra.mxu0 %v6928_v56  ;;  %5287 = vmatpush3.msra.mxu1 %v6930_v3  ;;  %v3502_v56 = vld [vmem:[#allocation11 + $0x68] sm:$0xff]  ;;  %v3501_v3 = vld [vmem:[#allocation11 + $0x60] sm:$0xff] }
 0x7bc   :  { %5253 = vmatprep.subr.mxu0 %v7470_v20  ;;  %5288 = vmatprep.subr.mxu1 %v7470_v20 }
 0x7bd   :  { %5254 = vmatpush3.msra.mxu0 %v6936_v12  ;;  %5289 = vmatpush3.msra.mxu1 %v6938_v7  ;;  %v3500_v12 = vld [vmem:[#allocation11 + $0x58] sm:$0xff]  ;;  %v3499_v7 = vld [vmem:[#allocation11 + $0x50] sm:$0xff] }
 0x7be   :  { %5255 = vmatprep.subr.mxu0 %v7470_v20  ;;  %5290 = vmatprep.subr.mxu1 %v7470_v20 }
 0x7bf   :  { %5256 = vmatpush3.msra.mxu0 %v6944_v2  ;;  %5291 = vmatpush3.msra.mxu1 %v6946_v35  ;;  %v3498_v2 = vld [vmem:[#allocation11 + $0x48] sm:$0xff]  ;;  %v3497_v35 = vld [vmem:[#allocation11 + $0x40] sm:$0xff] }
 0x7c0   :  { %5257 = vmatprep.subr.mxu0 %v7470_v20  ;;  %5292 = vmatprep.subr.mxu1 %v7470_v20 }
 0x7c1   :  { %5258 = vmatpush3.msra.mxu0 %v6952_v40  ;;  %5293 = vmatpush3.msra.mxu1 %v6954_v62  ;;  %v3496_v40 = vld [vmem:[#allocation11 + $0x38] sm:$0xff]  ;;  %v3495_v62 = vld [vmem:[#allocation11 + $0x30] sm:$0xff] }
 0x7c2   :  { %5259 = vmatprep.subr.mxu0 %v7470_v20  ;;  %5294 = vmatprep.subr.mxu1 %v7470_v20 }
 0x7c3   :  { %5260 = vmatpush3.msra.mxu0 %v6960_v43  ;;  %5295 = vmatpush3.msra.mxu1 %v6962_v44  ;;  %v3494_v43 = vld [vmem:[#allocation11 + $0x28] sm:$0xff]  ;;  %v3493_v44 = vld [vmem:[#allocation11 + $0x20] sm:$0xff] }
 0x7c4   :  { %5261 = vmatprep.subr.mxu0 %v7470_v20  ;;  %5296 = vmatprep.subr.mxu1 %v7470_v20 }
 0x7c5   :  { %5262 = vmatpush3.msra.mxu0 %v6968_v45  ;;  %5297 = vmatpush3.msra.mxu1 %v6970_v46  ;;  %v3492_v45 = vld [vmem:[#allocation11 + $0x18] sm:$0xff]  ;;  %v3491_v46 = vld [vmem:[#allocation11 + $0x10] sm:$0xff] }
 0x7c6   :  { %5263 = vmatprep.subr.mxu0 %v7470_v20  ;;  %5298 = vmatprep.subr.mxu1 %v7470_v20 }
 0x7c7   :  { %5264 = vmatpush3.msra.mxu0 %v6976_v47  ;;  %5299 = vmatpush3.msra.mxu1 %v6978_v48  ;;  %v3490_v47 = vld [vmem:[#allocation11 + $0x8] sm:$0xff]  ;;  %v3489_v48 = vld [vmem:[#allocation11] sm:$0xff] }
 0x7c8   :  { %5265 = vmatprep.subr.mxu0 %v7470_v20  ;;  %5300 = vmatprep.subr.mxu1 %v7470_v20 }
 0x7c9   :  { %5266 = vmatpush3.msra.mxu0 %v6984_v49  ;;  %5301 = vmatpush3.msra.mxu1 %v6986_v50 }
 0x7ca   :  { %5267 = vmatprep.subr.mxu0 %v7470_v20  ;;  %5302 = vmatprep.subr.mxu1 %v7470_v20 }
 0x7cb   :  { %5268 = vmatpush3.msra.mxu0 %v6992_v51  ;;  %5303 = vmatpush3.msra.mxu1 %v6994_v52 }
 0x7cc   :  { %5269 = vmatprep.subr.mxu0 %v7470_v20  ;;  %5304 = vmatprep.subr.mxu1 %v7470_v20 }
 0x7cd   :  { %5270 = vmatpush3.msra.mxu0 %v7000_v53  ;;  %5305 = vmatpush3.msra.mxu1 %v7002_v54  ;;  %v7572_v53 = vld [vmem:[#allocation37_spill] sm:$0xff] }
 0x7ce   :  { %5271 = vmatprep.subr.mxu0 %v7470_v20  ;;  %5306 = vmatprep.subr.mxu1 %v7470_v20 }
 0x7cf   :  { %5272 = vmatpush3.msra.mxu0 %v7547_v24  ;;  %5307 = vmatpush3.msra.mxu1 %v7548_v42 }
 0x7d0   :  { %5273 = vmatprep.subr.mxu0 %v7470_v20  ;;  %5308 = vmatprep.subr.mxu1 %v7470_v20 }
 0x7d1   :  { %5274 = vmatpush3.msra.mxu0 %v7016_v58  ;;  %5309 = vmatpush3.msra.mxu1 %v7549_v36 }
 0x7d2   :  { %5275 = vmatprep.subr.mxu0 %v7470_v20  ;;  %5310 = vmatprep.subr.mxu1 %v7470_v20 }
 0x7d3   :  { %5276 = vmatpush3.msra.mxu0 %v7024_v27  ;;  %5311 = vmatpush3.msra.mxu1 %v7026_v39 }
 0x7d4   :  { %5277 = vmatprep.subr.mxu0 %v7470_v20  ;;  %5312 = vmatprep.subr.mxu1 %v7470_v20 }
 0x7d5   :  { %5278 = vmatpush3.msra.mxu0 %v7032_v34  ;;  %5313 = vmatpush3.msra.mxu1 %v7034_v55  ;;  %v7573_v55 = vld [vmem:[#allocation35_spill] sm:$0xff] }
 0x7d6   :  { %5279 = vmatprep.subr.mxu0 %v7470_v20  ;;  %5314 = vmatprep.subr.mxu1 %v7470_v20 }
 0x7d7   :  { %5280 = vmatpush3.msra.mxu0 %v7040_v57  ;;  %5281 = vmatprep.mubr.msk.f32.mxu0 %vm5614_vm0, %v7470_v20 }
 0x7d8   :  { %5315 = vmatpush3.msra.mxu1 %v7044_v59  ;;  %5316 = vmatprep.mubr.msk.f32.mxu1 %vm5614_vm0, %v7470_v20 }
 0x7d9   :  { %5282 = vmatmul.mubr.f32.vlgmr.msra.gmra.mxu0 %v7284_v25  ;;  %5317 = vmatmul.mubr.f32.vlgmr.msra.gmra.mxu1 %v7284_v25 }
 0x7da   :  { %5319 = vmatprep.subr.mxu0 %v7470_v20  ;;  %5351 = vmatprep.mubr.msk.f32.mxu0 %vm5614_vm0, %v7470_v20 }
 0x7db   :  { %5320 = vmatpush3.msra.mxu0 %v3504_v17 }
 0x7dc   :  { %5321 = vmatprep.subr.mxu0 %v7470_v20 }
 0x7dd   :  { %5322 = vmatpush3.msra.mxu0 %v3503_v37 }
 0x7de   :  { %5323 = vmatprep.subr.mxu0 %v7470_v20 }
 0x7df   :  { %5324 = vmatpush3.msra.mxu0 %v3502_v56 }
 0x7e0   :  { %5325 = vmatprep.subr.mxu0 %v7470_v20 }
 0x7e1   :  { %5326 = vmatpush3.msra.mxu0 %v3501_v3 }
 0x7e2   :  { %5327 = vmatprep.subr.mxu0 %v7470_v20 }
 0x7e3   :  { %5328 = vmatpush3.msra.mxu0 %v3500_v12 }
 0x7e4   :  { %5329 = vmatprep.subr.mxu0 %v7470_v20 }
 0x7e5   :  { %5330 = vmatpush3.msra.mxu0 %v3499_v7 }
 0x7e6   :  { %5331 = vmatprep.subr.mxu0 %v7470_v20 }
 0x7e7   :  { %5332 = vmatpush3.msra.mxu0 %v3498_v2 }
 0x7e8   :  { %5333 = vmatprep.subr.mxu0 %v7470_v20 }
 0x7e9   :  { %5334 = vmatpush3.msra.mxu0 %v3497_v35 }
 0x7ea   :  { %5335 = vmatprep.subr.mxu0 %v7470_v20 }
 0x7eb   :  { %5336 = vmatpush3.msra.mxu0 %v3496_v40 }
 0x7ec   :  { %5337 = vmatprep.subr.mxu0 %v7470_v20 }
 0x7ed   :  { %5338 = vmatpush3.msra.mxu0 %v3495_v62 }
 0x7ee   :  { %5339 = vmatprep.subr.mxu0 %v7470_v20 }
 0x7ef   :  { %5340 = vmatpush3.msra.mxu0 %v3494_v43 }
 0x7f0   :  { %5341 = vmatprep.subr.mxu0 %v7470_v20 }
 0x7f1   :  { %5342 = vmatpush3.msra.mxu0 %v3493_v44 }
 0x7f2   :  { %5343 = vmatprep.subr.mxu0 %v7470_v20 }
 0x7f3   :  { %5344 = vmatpush3.msra.mxu0 %v3492_v45 }
 0x7f4   :  { %5345 = vmatprep.subr.mxu0 %v7470_v20 }
 0x7f5   :  { %5346 = vmatpush3.msra.mxu0 %v3491_v46 }
 0x7f6   :  { %5347 = vmatprep.subr.mxu0 %v7470_v20 }
 0x7f7   :  { %5348 = vmatpush3.msra.mxu0 %v3490_v47 }
 0x7f8   :  { %5349 = vmatprep.subr.mxu0 %v7470_v20  ;;  %v7574_v20 = vld [vmem:[#allocation36_spill] sm:$0xff] }
 0x7f9   :  { %5350 = vmatpush3.msra.mxu0 %v3489_v48 }
 0x878   :  { %v3196_v49 = vpop.f32.mrf.mxu0  ;;  %v3289_v50 = vpop.f32.mrf.mxu1 }
 0x879   :  { %v3293_v54 = vadd.f32 %v3289_v50, %v7572_v53  ;;  %v3200_v57 = vadd.f32 %v3196_v49, %v7573_v55 }
 0x87a   :  { %v5213_v51 = vpop.f32.mrf.mxu0  ;;  %v5248_v52 = vpop.f32.mrf.mxu1 }
 0x87b   :  { %v3635_v58 = vmul.f32 -1.442695, %v3293_v54  ;;  %v3634_v59 = vmul.f32 -1.442695, %v3200_v57 }
 0x87d   :  { %5477 = vpow2.f32 %v3635_v58 }
 0x87e   :  { %5479 = vpow2.f32 %v3634_v59 }
 0x88a   :  { %v5478_v27 = vpop.eup %5477 }
 0x88b   :  { %v5480_v39 = vpop.eup %5479  ;;  %v3297_v34 = vadd.f32 1.0, %v5478_v27 }
 0x88c   :  { %v3204_v32 = vadd.f32 1.0, %v5480_v39 }
 0x88d   :  { %5481 = vrcp.f32 %v3297_v34 }
 0x88e   :  { %5483 = vrcp.f32 %v3204_v32 }
 0x899   :  { %v3382_v24 = vpop.f32.mrf.mxu0  ;;  %v3470_v42 = vpop.f32.mrf.mxu1 }
 0x89a   :  { %v3386_v36 = vadd.f32 %v3382_v24, %v7574_v20  ;;  %v3474_v16 = vadd.f32 %v3470_v42, %v7575_v21  ;;  %v5482_v29 = vpop.eup %5481 }
 0x89b   :  { %v5283_v5 = vpop.f32.mrf.mxu0  ;;  %v5318_v11 = vpop.f32.mrf.mxu1  ;;  %v3481_v8 = vmul.f32 %v5482_v29, %v7281_v63 }
 0x89c   :  { %5485 = vtanh.f32 %v3386_v36  ;;  %v3636_v38 = vmul.f32 -1.442695, %v3474_v16  ;;  %v5484_v9 = vpop.eup %5483 }
 0x89e   :  { %5487 = vpow2.f32 %v3636_v38 }
 0x8a9   :  { %v5486_v31 = vpop.eup %5485 }
 0x8aa   :  { %v3482_v15 = vmul.f32 %v5486_v31, %v5484_v9 }
 0x8ab   :  { %v5488_v41 = vpop.eup %5487 }
 0x8ac   :  { %v3483_v19 = vadd.f32 %v3482_v15, %v3481_v8  ;;  %v3478_v18 = vadd.f32 1.0, %v5488_v41 }
 0x8ae   :  { %5489 = vtanh.f32 %v3483_v19 }
 0x8af   :  { %5491 = vrcp.f32 %v3478_v18 }
 0x8bb   :  { %v5490_v26 = vpop.eup %5489 }
 0x8bc   :  { %v5492_v10 = vpop.eup %5491 }
 0x8bd   :  { %v3485_v0 = vmul.f32 %v5492_v10, %v5490_v26 }
 0x8bf   :  { %5352 = vmatmul.mubr.f32.vlgmr.msra.gmra.mxu0 %v3485_v0 }
 0x97f   :  { %v3578_v6 = vpop.f32.mrf.mxu0 }
 0x980   :  { %v3579_v13 = vadd.f32 %v3637_v14, %v3578_v6 }
 0x981   :  { %v5353_v23 = vpop.f32.mrf.mxu0 }
 0x982   :  { %v3585_v60 = vsel %vm3584_vm1, %v3579_v13, -1e+30 }
 0x983   :  { %3586 = vmax.xlane.f32.xlu0 %v3585_v60 }
 0xa0c   :  { %v3587_v22 = vpop.xlane.xlu0 %3586 }
 0xa0d   :  { %v3588_v1 = vsub.f32 %v3585_v60, %v3587_v22 }
 0xa0f   :  { %v3589_v63 = vmul.f32 1.442695, %v3588_v1 }
 0xa11   :  { %5493 = vpow2.f32 %v3589_v63 }
 0xa1e   :  { %v5494_v61 = vpop.eup %5493 }
 0xa1f   :  { %3591 = vadd.xlane.f32.xlu0 %v5494_v61 }
 0xaa8   :  { %v3592_v30 = vpop.xlane.xlu0 %3591 }
 0xaa9   :  { %5495 = vrcp.f32 %v3592_v30 }
 0xab6   :  { %v5496_v33 = vpop.eup %5495 }
 0xab7   :  { %v3594_v25 = vmul.f32 %v5496_v33, %v5494_v61 }
 0xab9   :  { %3595 = vst [vmem:[#allocation13] sm:$0xff] %v3594_v25 }
 0xaba   :  { %5588 = shalt.err (!%p5585_p10)
}
 0xabb   :  { %3605 = dma.vmem_to_hbm [thread:$0]  %s3603_s21, 128, %s7392_s6, [#allocation7]  }
 0xabc   :  { %5603 = dma.done.wait [#allocation7], 128  }
 0xabd   :  { %5604 = vsyncadd [#allocation7], 4294967168 }
 0xabe   :  { %3609 = vsyncpa [#allocation6], 1 }
 0xabf   :  { %3610 = vsyncpa [#allocation9], 1 }
 0xac0   :  { %3611 = vsyncpa [#allocation12], 1 }
 0xac1   :  { %3612 = vsyncpa [#allocation7], 1 }

// kernel: tpu_custom_call.1
= control target key start
LH: loop header
LB: loop body
LE: loop exit
PB: predicated region body
PF: predicated region fallthrough
CT: control target
= control target key end

     0   :  { %11 = vsyncpa [#allocation6], 0  ;;  %s7386_s0 = inlined_call_operand.hbm [shape: f32[8,8,128], index: 0, kind: input, shape index: {}]   ;;  %s7387_s1 = inlined_call_operand.hbm [shape: f32[128,512], index: 1, kind: input, shape index: {}]   ;;  %s7388_s2 = inlined_call_operand.hbm [shape: f32[128,512], index: 2, kind: input, shape index: {}]   ;;  %s7389_s3 = inlined_call_operand.vmem [shape: f32[1,512], index: 3, kind: input, shape index: {}]   ;;  %s7390_s4 = inlined_call_operand.hbm [shape: f32[128,128], index: 4, kind: input, shape index: {}]   ;;  %s7391_s5 = inlined_call_operand.vmem [shape: f32[1,128], index: 5, kind: input, shape index: {}]   ;;  %s7392_s6 = inlined_call_operand.hbm [shape: f32[8,128], index: 6, kind: output, shape index: {}]  }
   0x1   :  { %12 = vsyncpa [#allocation9], 0 }
   0x2   :  { %13 = vsyncpa [#allocation12], 0 }
   0x3   :  { %14 = vsyncpa [#allocation7], 0  ;;  %s5605_s21 = smov [#allocation8]  }
   0x4   :  { %s32_s22 = sshll.u32 %s5605_s21, 4  ;;  %s33_s22 = int_to_ptr.vmem [resolvable:$true] %s32_s22 }
   0x5   :  { %s5505_s23 = scalar_lea.vmem %s33_s22, 8192  ;;  %p5510_p1 = scmp.lt.s32.totalorder %s33_s22, %s33_s22 }
   0x6   :  { %p5506_p0 = scmp.ne.s32.totalorder %s33_s22, %s5505_s23  ;;  %p5511_p2 = scmp.lt.s32.totalorder %s5505_s23, %s5505_s23 }
   0x8   :  { %p5512_p3 = por %p5511_p2, %p5510_p1 }
   0xa   :  { %p5513_p4 = pnand %p5512_p3, %p5506_p0 }
   0xc   :  { %5516 = shalt.err (!%p5513_p4)
}
   0xd   :  { %s5606_s24 = smov 512   ;;  %s5607_s25 = smov 32  }
   0xe   :  { %38 = dma.hbm_to_vmem [thread:$0]  %s7387_s1, 8192, %s33_s22, [#allocation9], %s5606_s24, %s5606_s24, %s5607_s25  }
   0xf   :  { %s5608_s28 = smov [#allocation5]  }
  0x10   :  { %s20_s29 = sshll.u32 %s5608_s28, 4  ;;  %s21_s29 = int_to_ptr.vmem [resolvable:$true] %s20_s29 }
  0x11   :  { %s5525_s30 = scalar_lea.vmem %s21_s29, 1024  ;;  %p5530_p6 = scmp.lt.s32.totalorder %s21_s29, %s21_s29 }
  0x12   :  { %p5526_p5 = scmp.ne.s32.totalorder %s21_s29, %s5525_s30  ;;  %p5531_p7 = scmp.lt.s32.totalorder %s5525_s30, %s5525_s30 }
  0x14   :  { %p5532_p8 = por %p5531_p7, %p5530_p6 }
  0x16   :  { %p5533_p9 = pnand %p5532_p8, %p5526_p5 }
  0x18   :  { %5536 = shalt.err (!%p5533_p9)
}
  0x19   :  { %s5609_s7 = smov 128   ;;  %s5610_s8 = smov 8  }
  0x1a   :  { %26 = dma.hbm_to_vmem [thread:$0]  %s7386_s0, 1024, %s21_s29, [#allocation6], %s5609_s7, %s5609_s7, %s5610_s8  }
  0x1b   :  { %s5611_s11 = smov [#allocation10]   ;;  %s5612_s13 = smov [#allocation11]  }
  0x1c   :  { %s44_s12 = sshll.u32 %s5611_s11, 4  ;;  %s58_s1 = sshll.u32 %s5612_s13, 4  ;;  %s45_s12 = int_to_ptr.vmem [resolvable:$true] %s44_s12  ;;  %s59_s1 = int_to_ptr.vmem [resolvable:$true] %s58_s1 }
  0x1d   :  { %s5545_s14 = scalar_lea.vmem %s45_s12, 8192  ;;  %p5550_p11 = scmp.lt.s32.totalorder %s45_s12, %s45_s12 }
  0x1e   :  { %p5546_p10 = scmp.ne.s32.totalorder %s45_s12, %s5545_s14  ;;  %p5551_p12 = scmp.lt.s32.totalorder %s5545_s14, %s5545_s14 }
  0x20   :  { %p5552_p13 = por %p5551_p12, %p5550_p11 }
  0x22   :  { %p5553_p0 = pnand %p5552_p13, %p5546_p10 }
  0x24   :  { %5556 = shalt.err (!%p5553_p0)
}
  0x25   :  { %50 = dma.hbm_to_vmem [thread:$0]  %s7388_s2, 8192, %s45_s12, [#allocation9], %s5606_s24, %s5606_s24, %s5607_s25  }
  0x26   :  { %s5565_s0 = scalar_lea.vmem %s59_s1, 2048  ;;  %p5570_p2 = scmp.lt.s32.totalorder %s59_s1, %s59_s1 }
  0x27   :  { %p5566_p1 = scmp.ne.s32.totalorder %s59_s1, %s5565_s0  ;;  %p5571_p3 = scmp.lt.s32.totalorder %s5565_s0, %s5565_s0 }
  0x29   :  { %p5572_p4 = por %p5571_p3, %p5570_p2 }
  0x2b   :  { %p5573_p5 = pnand %p5572_p4, %p5566_p1 }
  0x2d   :  { %5576 = shalt.err (!%p5573_p5)
}
  0x2e   :  { %64 = dma.hbm_to_vmem [thread:$0]  %s7390_s4, 2048, %s59_s1, [#allocation12], %s5609_s7, %s5609_s7, %s5610_s8  }
  0x2f   :  { %5597 = dma.done.wait [#allocation6], 1024  }
  0x30   :  { %5598 = vsyncadd [#allocation6], 4294966272 }
  0x31   :  { %5599 = dma.done.wait [#allocation9], 16384  }
  0x32   :  { %5600 = vsyncadd [#allocation9], 4294950912 }
  0x33   :  { %5601 = dma.done.wait [#allocation12], 2048  }
  0x34   :  { %5602 = vsyncadd [#allocation12], 4294965248  ;;  %v7395_v0 = vmov 0.0   ;;  %v148_v1 = vld [vmem:[#allocation8 + $0x1e8] sm:$0xff]  ;;  %v150_v2 = vld [vmem:[#allocation8 + $0x1f8] sm:$0xff]  ;;  %vm5614_vm0 = vmmov 0  }
  0x35   :  { %237 = vmatprep.mubr.f32.mxu0 %v7395_v0  ;;  %350 = vmatprep.mubr.f32.mxu1 %v7395_v0  ;;  %v147_v3 = vld [vmem:[#allocation8 + $0x1e0] sm:$0xff]  ;;  %v149_v4 = vld [vmem:[#allocation8 + $0x1f0] sm:$0xff]  ;;  %v144_v5 = vld [vmem:[#allocation8 + $0x1c8] sm:$0xff]  ;;  %s5615_s20 = smov [#allocation13]  }
  0x36   :  { %173 = vmatprep.subr.mxu0 %v148_v1  ;;  %286 = vmatprep.subr.mxu1 %v150_v2  ;;  %v146_v6 = vld [vmem:[#allocation8 + $0x1d8] sm:$0xff]  ;;  %v143_v7 = vld [vmem:[#allocation8 + $0x1c0] sm:$0xff]  ;;  %v145_v8 = vld [vmem:[#allocation8 + $0x1d0] sm:$0xff]  ;;  %s3602_s21 = sshll.u32 %s5615_s20, 4  ;;  %s3603_s21 = int_to_ptr.vmem [resolvable:$true] %s3602_s21 }
  0x37   :  { %174 = vmatpush1.msra.mxu0 %v147_v3  ;;  %287 = vmatpush1.msra.mxu1 %v149_v4  ;;  %v140_v9 = vld [vmem:[#allocation8 + $0x1a8] sm:$0xff]  ;;  %v142_v10 = vld [vmem:[#allocation8 + $0x1b8] sm:$0xff]  ;;  %v139_v11 = vld [vmem:[#allocation8 + $0x1a0] sm:$0xff]  ;;  %p5582_p7 = scmp.lt.s32.totalorder %s3603_s21, %s3603_s21 }
  0x38   :  { %175 = vmatprep.subr.mxu0 %v144_v5  ;;  %288 = vmatprep.subr.mxu1 %v146_v6  ;;  %v141_v12 = vld [vmem:[#allocation8 + $0x1b0] sm:$0xff]  ;;  %v136_v13 = vld [vmem:[#allocation8 + $0x188] sm:$0xff]  ;;  %v138_v14 = vld [vmem:[#allocation8 + $0x198] sm:$0xff] }
  0x39   :  { %176 = vmatpush1.msra.mxu0 %v143_v7  ;;  %289 = vmatpush1.msra.mxu1 %v145_v8  ;;  %v135_v15 = vld [vmem:[#allocation8 + $0x180] sm:$0xff]  ;;  %v137_v16 = vld [vmem:[#allocation8 + $0x190] sm:$0xff]  ;;  %v132_v17 = vld [vmem:[#allocation8 + $0x168] sm:$0xff] }
  0x3a   :  { %177 = vmatprep.subr.mxu0 %v140_v9  ;;  %290 = vmatprep.subr.mxu1 %v142_v10  ;;  %v134_v18 = vld [vmem:[#allocation8 + $0x178] sm:$0xff]  ;;  %v131_v19 = vld [vmem:[#allocation8 + $0x160] sm:$0xff]  ;;  %v133_v20 = vld [vmem:[#allocation8 + $0x170] sm:$0xff] }
  0x3b   :  { %178 = vmatpush1.msra.mxu0 %v139_v11  ;;  %291 = vmatpush1.msra.mxu1 %v141_v12  ;;  %v128_v21 = vld [vmem:[#allocation8 + $0x148] sm:$0xff]  ;;  %v130_v22 = vld [vmem:[#allocation8 + $0x158] sm:$0xff]  ;;  %v127_v23 = vld [vmem:[#allocation8 + $0x140] sm:$0xff] }
  0x3c   :  { %179 = vmatprep.subr.mxu0 %v136_v13  ;;  %292 = vmatprep.subr.mxu1 %v138_v14  ;;  %v129_v24 = vld [vmem:[#allocation8 + $0x150] sm:$0xff]  ;;  %v124_v25 = vld [vmem:[#allocation8 + $0x128] sm:$0xff]  ;;  %v126_v26 = vld [vmem:[#allocation8 + $0x138] sm:$0xff] }
  0x3d   :  { %180 = vmatpush1.msra.mxu0 %v135_v15  ;;  %293 = vmatpush1.msra.mxu1 %v137_v16  ;;  %v123_v27 = vld [vmem:[#allocation8 + $0x120] sm:$0xff]  ;;  %v125_v28 = vld [vmem:[#allocation8 + $0x130] sm:$0xff]  ;;  %v120_v29 = vld [vmem:[#allocation8 + $0x108] sm:$0xff] }
  0x3e   :  { %181 = vmatprep.subr.mxu0 %v132_v17  ;;  %294 = vmatprep.subr.mxu1 %v134_v18  ;;  %v122_v30 = vld [vmem:[#allocation8 + $0x118] sm:$0xff]  ;;  %v119_v31 = vld [vmem:[#allocation8 + $0x100] sm:$0xff]  ;;  %v121_v32 = vld [vmem:[#allocation8 + $0x110] sm:$0xff] }
  0x3f   :  { %182 = vmatpush1.msra.mxu0 %v131_v19  ;;  %295 = vmatpush1.msra.mxu1 %v133_v20  ;;  %v116_v33 = vld [vmem:[#allocation8 + $0xe8] sm:$0xff]  ;;  %v118_v34 = vld [vmem:[#allocation8 + $0xf8] sm:$0xff]  ;;  %v115_v35 = vld [vmem:[#allocation8 + $0xe0] sm:$0xff] }
  0x40   :  { %183 = vmatprep.subr.mxu0 %v128_v21  ;;  %296 = vmatprep.subr.mxu1 %v130_v22  ;;  %v117_v36 = vld [vmem:[#allocation8 + $0xf0] sm:$0xff]  ;;  %v112_v37 = vld [vmem:[#allocation8 + $0xc8] sm:$0xff]  ;;  %v114_v38 = vld [vmem:[#allocation8 + $0xd8] sm:$0xff] }
  0x41   :  { %184 = vmatpush1.msra.mxu0 %v127_v23  ;;  %297 = vmatpush1.msra.mxu1 %v129_v24  ;;  %v111_v39 = vld [vmem:[#allocation8 + $0xc0] sm:$0xff]  ;;  %v113_v40 = vld [vmem:[#allocation8 + $0xd0] sm:$0xff]  ;;  %v108_v41 = vld [vmem:[#allocation8 + $0xa8] sm:$0xff] }
  0x42   :  { %185 = vmatprep.subr.mxu0 %v124_v25  ;;  %298 = vmatprep.subr.mxu1 %v126_v26  ;;  %v110_v42 = vld [vmem:[#allocation8 + $0xb8] sm:$0xff]  ;;  %v107_v43 = vld [vmem:[#allocation8 + $0xa0] sm:$0xff]  ;;  %v109_v44 = vld [vmem:[#allocation8 + $0xb0] sm:$0xff] }
  0x43   :  { %186 = vmatpush1.msra.mxu0 %v123_v27  ;;  %299 = vmatpush1.msra.mxu1 %v125_v28  ;;  %v104_v45 = vld [vmem:[#allocation8 + $0x88] sm:$0xff]  ;;  %v106_v46 = vld [vmem:[#allocation8 + $0x98] sm:$0xff]  ;;  %v103_v47 = vld [vmem:[#allocation8 + $0x80] sm:$0xff] }
  0x44   :  { %187 = vmatprep.subr.mxu0 %v120_v29  ;;  %300 = vmatprep.subr.mxu1 %v122_v30  ;;  %v105_v48 = vld [vmem:[#allocation8 + $0x90] sm:$0xff]  ;;  %v100_v49 = vld [vmem:[#allocation8 + $0x68] sm:$0xff]  ;;  %v102_v50 = vld [vmem:[#allocation8 + $0x78] sm:$0xff] }
  0x45   :  { %188 = vmatpush1.msra.mxu0 %v119_v31  ;;  %301 = vmatpush1.msra.mxu1 %v121_v32  ;;  %v99_v51 = vld [vmem:[#allocation8 + $0x60] sm:$0xff]  ;;  %v101_v52 = vld [vmem:[#allocation8 + $0x70] sm:$0xff]  ;;  %v96_v53 = vld [vmem:[#allocation8 + $0x48] sm:$0xff] }
  0x46   :  { %189 = vmatprep.subr.mxu0 %v116_v33  ;;  %302 = vmatprep.subr.mxu1 %v118_v34  ;;  %v98_v54 = vld [vmem:[#allocation8 + $0x58] sm:$0xff]  ;;  %v95_v55 = vld [vmem:[#allocation8 + $0x40] sm:$0xff]  ;;  %v97_v56 = vld [vmem:[#allocation8 + $0x50] sm:$0xff] }
  0x47   :  { %190 = vmatpush1.msra.mxu0 %v115_v35  ;;  %303 = vmatpush1.msra.mxu1 %v117_v36  ;;  %v92_v57 = vld [vmem:[#allocation8 + $0x28] sm:$0xff]  ;;  %v94_v58 = vld [vmem:[#allocation8 + $0x38] sm:$0xff]  ;;  %v91_v59 = vld [vmem:[#allocation8 + $0x20] sm:$0xff] }
  0x48   :  { %191 = vmatprep.subr.mxu0 %v112_v37  ;;  %304 = vmatprep.subr.mxu1 %v114_v38  ;;  %v93_v60 = vld [vmem:[#allocation8 + $0x30] sm:$0xff]  ;;  %v88_v61 = vld [vmem:[#allocation8 + $0x8] sm:$0xff]  ;;  %v90_v62 = vld [vmem:[#allocation8 + $0x18] sm:$0xff] }
  0x49   :  { %192 = vmatpush1.msra.mxu0 %v111_v39  ;;  %305 = vmatpush1.msra.mxu1 %v113_v40  ;;  %v87_v63 = vld [vmem:[#allocation8] sm:$0xff]  ;;  %v89_v1 = vld [vmem:[#allocation8 + $0x10] sm:$0xff]  ;;  %v5673_v4 = vld [vmem:[#allocation10 + $0x1e8] sm:$0xff] }
  0x4a   :  { %193 = vmatprep.subr.mxu0 %v108_v41  ;;  %306 = vmatprep.subr.mxu1 %v110_v42  ;;  %v79_v2 = vld [vmem:[#allocation5] sm:$0xff]  ;;  %v5681_v6 = vld [vmem:[#allocation10 + $0x1c8] sm:$0xff]  ;;  %v81_v12 = vld [vmem:[#allocation5 + $0x10] sm:$0xff] }
  0x4b   :  { %194 = vmatpush1.msra.mxu0 %v107_v43  ;;  %307 = vmatpush1.msra.mxu1 %v109_v44  ;;  %v5671_v3 = vld [vmem:[#allocation10 + $0x1e0] sm:$0xff]  ;;  %v80_v7 = vld [vmem:[#allocation5 + $0x8] sm:$0xff]  ;;  %v82_v17 = vld [vmem:[#allocation5 + $0x18] sm:$0xff] }
  0x4c   :  { %195 = vmatprep.subr.mxu0 %v104_v45  ;;  %308 = vmatprep.subr.mxu1 %v106_v46  ;;  %v5679_v5 = vld [vmem:[#allocation10 + $0x1c0] sm:$0xff]  ;;  %v5691_v9 = vld [vmem:[#allocation10 + $0x1a8] sm:$0xff]  ;;  %v85_v32 = vld [vmem:[#allocation5 + $0x30] sm:$0xff] }
  0x4d   :  { %196 = vmatpush1.msra.mxu0 %v103_v47  ;;  %309 = vmatpush1.msra.mxu1 %v105_v48  ;;  %v5689_v8 = vld [vmem:[#allocation10 + $0x1a0] sm:$0xff]  ;;  %v5699_v11 = vld [vmem:[#allocation10 + $0x188] sm:$0xff]  ;;  %v86_v37 = vld [vmem:[#allocation5 + $0x38] sm:$0xff] }
  0x4e   :  { %197 = vmatprep.subr.mxu0 %v100_v49  ;;  %310 = vmatprep.subr.mxu1 %v102_v50  ;;  %v5697_v10 = vld [vmem:[#allocation10 + $0x180] sm:$0xff]  ;;  %v5709_v14 = vld [vmem:[#allocation10 + $0x168] sm:$0xff]  ;;  %v5817_v42 = vld [vmem:[#allocation10 + $0x1f0] sm:$0xff] }
  0x4f   :  { %198 = vmatpush1.msra.mxu0 %v99_v51  ;;  %311 = vmatpush1.msra.mxu1 %v101_v52  ;;  %v5707_v13 = vld [vmem:[#allocation10 + $0x160] sm:$0xff]  ;;  %v5717_v16 = vld [vmem:[#allocation10 + $0x148] sm:$0xff]  ;;  %v5819_v43 = vld [vmem:[#allocation10 + $0x1f8] sm:$0xff] }
  0x50   :  { %199 = vmatprep.subr.mxu0 %v96_v53  ;;  %312 = vmatprep.subr.mxu1 %v98_v54  ;;  %v5715_v15 = vld [vmem:[#allocation10 + $0x140] sm:$0xff]  ;;  %v5727_v19 = vld [vmem:[#allocation10 + $0x128] sm:$0xff]  ;;  %v5825_v44 = vld [vmem:[#allocation10 + $0x1d0] sm:$0xff] }
  0x51   :  { %200 = vmatpush1.msra.mxu0 %v95_v55  ;;  %313 = vmatpush1.msra.mxu1 %v97_v56  ;;  %v5725_v18 = vld [vmem:[#allocation10 + $0x120] sm:$0xff]  ;;  %v5735_v21 = vld [vmem:[#allocation10 + $0x108] sm:$0xff]  ;;  %v5827_v45 = vld [vmem:[#allocation10 + $0x1d8] sm:$0xff] }
  0x52   :  { %201 = vmatprep.subr.mxu0 %v92_v57  ;;  %314 = vmatprep.subr.mxu1 %v94_v58  ;;  %v5733_v20 = vld [vmem:[#allocation10 + $0x100] sm:$0xff]  ;;  %v5745_v24 = vld [vmem:[#allocation10 + $0xe8] sm:$0xff]  ;;  %v5833_v46 = vld [vmem:[#allocation10 + $0x1b0] sm:$0xff] }
  0x53   :  { %202 = vmatpush1.msra.mxu0 %v91_v59  ;;  %315 = vmatpush1.msra.mxu1 %v93_v60  ;;  %v83_v22 = vld [vmem:[#allocation5 + $0x20] sm:$0xff]  ;;  %v5753_v26 = vld [vmem:[#allocation10 + $0xc8] sm:$0xff]  ;;  %v5835_v47 = vld [vmem:[#allocation10 + $0x1b8] sm:$0xff] }
  0x54   :  { %203 = vmatprep.subr.mxu0 %v88_v61  ;;  %316 = vmatprep.subr.mxu1 %v90_v62  ;;  %v5743_v23 = vld [vmem:[#allocation10 + $0xe0] sm:$0xff]  ;;  %v84_v27 = vld [vmem:[#allocation5 + $0x28] sm:$0xff]  ;;  %v5841_v48 = vld [vmem:[#allocation10 + $0x190] sm:$0xff] }
  0x55   :  { %204 = vmatpush1.msra.mxu0 %v87_v63  ;;  %317 = vmatpush1.msra.mxu1 %v89_v1  ;;  %v5751_v25 = vld [vmem:[#allocation10 + $0xc0] sm:$0xff]  ;;  %v5763_v29 = vld [vmem:[#allocation10 + $0xa8] sm:$0xff]  ;;  %v5843_v49 = vld [vmem:[#allocation10 + $0x198] sm:$0xff] }
  0x56   :  { %238 = vmatmul.mubr.f32.vlgmr.msra.gmra.mxu0 %v79_v2  ;;  %351 = vmatmul.mubr.f32.vlgmr.msra.gmra.mxu1 %v79_v2  ;;  %v5761_v28 = vld [vmem:[#allocation10 + $0xa0] sm:$0xff]  ;;  %v5771_v31 = vld [vmem:[#allocation10 + $0x88] sm:$0xff]  ;;  %v5849_v50 = vld [vmem:[#allocation10 + $0x170] sm:$0xff] }
  0x57   :  { %4199 = vmatprep.subr.mxu0 %v7395_v0  ;;  %4234 = vmatprep.subr.mxu1 %v7395_v0  ;;  %v5769_v30 = vld [vmem:[#allocation10 + $0x80] sm:$0xff]  ;;  %v5781_v34 = vld [vmem:[#allocation10 + $0x68] sm:$0xff]  ;;  %v5851_v51 = vld [vmem:[#allocation10 + $0x178] sm:$0xff] }
  0x58   :  { %4200 = vmatpush3.msra.mxu0 %v5671_v3  ;;  %4235 = vmatpush3.msra.mxu1 %v5673_v4  ;;  %v5779_v33 = vld [vmem:[#allocation10 + $0x60] sm:$0xff]  ;;  %v5789_v36 = vld [vmem:[#allocation10 + $0x48] sm:$0xff]  ;;  %v5857_v52 = vld [vmem:[#allocation10 + $0x150] sm:$0xff] }
  0x59   :  { %4201 = vmatprep.subr.mxu0 %v7395_v0  ;;  %4236 = vmatprep.subr.mxu1 %v7395_v0  ;;  %v5787_v35 = vld [vmem:[#allocation10 + $0x40] sm:$0xff]  ;;  %v5799_v39 = vld [vmem:[#allocation10 + $0x28] sm:$0xff]  ;;  %v5859_v53 = vld [vmem:[#allocation10 + $0x158] sm:$0xff] }
  0x5a   :  { %243 = vmatprep.mubr.f32.mxu0 %v7395_v0  ;;  %356 = vmatprep.mubr.f32.mxu1 %v7395_v0  ;;  %v5797_v38 = vld [vmem:[#allocation10 + $0x20] sm:$0xff]  ;;  %v5807_v41 = vld [vmem:[#allocation10 + $0x8] sm:$0xff]  ;;  %v5865_v54 = vld [vmem:[#allocation10 + $0x130] sm:$0xff] }
  0x5b   :  { %4202 = vmatpush3.msra.mxu0 %v5679_v5  ;;  %4237 = vmatpush3.msra.mxu1 %v5681_v6  ;;  %v5803_v40 = vld [vmem:[#allocation10] sm:$0xff]  ;;  %v5867_v55 = vld [vmem:[#allocation10 + $0x138] sm:$0xff]  ;;  %v5873_v56 = vld [vmem:[#allocation10 + $0x110] sm:$0xff] }
  0x5c   :  { %244 = vmatmul.mubr.f32.gmra.mxu0 %v80_v7  ;;  %357 = vmatmul.mubr.f32.gmra.mxu1 %v80_v7  ;;  %v5875_v57 = vld [vmem:[#allocation10 + $0x118] sm:$0xff]  ;;  %v5881_v58 = vld [vmem:[#allocation10 + $0xf0] sm:$0xff] }
  0x5d   :  { %4203 = vmatprep.subr.mxu0 %v7395_v0  ;;  %4238 = vmatprep.subr.mxu1 %v7395_v0  ;;  %v5883_v59 = vld [vmem:[#allocation10 + $0xf8] sm:$0xff]  ;;  %v5889_v60 = vld [vmem:[#allocation10 + $0xd0] sm:$0xff] }
  0x5e   :  { %4204 = vmatpush3.msra.mxu0 %v5689_v8  ;;  %4239 = vmatpush3.msra.mxu1 %v5691_v9  ;;  %v5891_v61 = vld [vmem:[#allocation10 + $0xd8] sm:$0xff]  ;;  %v5897_v62 = vld [vmem:[#allocation10 + $0xb0] sm:$0xff] }
  0x5f   :  { %4205 = vmatprep.subr.mxu0 %v7395_v0  ;;  %4240 = vmatprep.subr.mxu1 %v7395_v0  ;;  %v5899_v63 = vld [vmem:[#allocation10 + $0xb8] sm:$0xff]  ;;  %v5905_v1 = vld [vmem:[#allocation10 + $0x90] sm:$0xff] }
  0x60   :  { %249 = vmatprep.mubr.f32.mxu0 %v7395_v0  ;;  %362 = vmatprep.mubr.f32.mxu1 %v7395_v0  ;;  %v5907_v2 = vld [vmem:[#allocation10 + $0x98] sm:$0xff]  ;;  %v5913_v7 = vld [vmem:[#allocation10 + $0x70] sm:$0xff] }
  0x61   :  { %4206 = vmatpush3.msra.mxu0 %v5697_v10  ;;  %4241 = vmatpush3.msra.mxu1 %v5699_v11 }
  0x62   :  { %250 = vmatmul.mubr.f32.gmra.mxu0 %v81_v12  ;;  %363 = vmatmul.mubr.f32.gmra.mxu1 %v81_v12  ;;  %v5915_v12 = vld [vmem:[#allocation10 + $0x78] sm:$0xff] }
  0x63   :  { %4207 = vmatprep.subr.mxu0 %v7395_v0  ;;  %4242 = vmatprep.subr.mxu1 %v7395_v0  ;;  %7449 = vst [vmem:[#allocation18_spill] sm:$0xff] %v5915_v12 }
  0x64   :  { %4208 = vmatpush3.msra.mxu0 %v5707_v13  ;;  %4243 = vmatpush3.msra.mxu1 %v5709_v14 }
  0x65   :  { %4209 = vmatprep.subr.mxu0 %v7395_v0  ;;  %4244 = vmatprep.subr.mxu1 %v7395_v0 }
  0x66   :  { %255 = vmatprep.mubr.f32.mxu0 %v7395_v0  ;;  %368 = vmatprep.mubr.f32.mxu1 %v7395_v0 }
  0x67   :  { %4210 = vmatpush3.msra.mxu0 %v5715_v15  ;;  %4245 = vmatpush3.msra.mxu1 %v5717_v16 }
  0x68   :  { %256 = vmatmul.mubr.f32.gmra.mxu0 %v82_v17  ;;  %369 = vmatmul.mubr.f32.gmra.mxu1 %v82_v17  ;;  %v5921_v17 = vld [vmem:[#allocation10 + $0x50] sm:$0xff] }
  0x69   :  { %4211 = vmatprep.subr.mxu0 %v7395_v0  ;;  %4246 = vmatprep.subr.mxu1 %v7395_v0 }
  0x6a   :  { %4212 = vmatpush3.msra.mxu0 %v5725_v18  ;;  %4247 = vmatpush3.msra.mxu1 %v5727_v19 }
  0x6b   :  { %4213 = vmatprep.subr.mxu0 %v7395_v0  ;;  %4248 = vmatprep.subr.mxu1 %v7395_v0 }
  0x6c   :  { %261 = vmatprep.mubr.f32.mxu0 %v7395_v0  ;;  %374 = vmatprep.mubr.f32.mxu1 %v7395_v0 }
  0x6d   :  { %4214 = vmatpush3.msra.mxu0 %v5733_v20  ;;  %4249 = vmatpush3.msra.mxu1 %v5735_v21 }
  0x6e   :  { %262 = vmatmul.mubr.f32.gmra.mxu0 %v83_v22  ;;  %375 = vmatmul.mubr.f32.gmra.mxu1 %v83_v22  ;;  %v5923_v22 = vld [vmem:[#allocation10 + $0x58] sm:$0xff] }
  0x6f   :  { %4215 = vmatprep.subr.mxu0 %v7395_v0  ;;  %4250 = vmatprep.subr.mxu1 %v7395_v0 }
  0x70   :  { %4216 = vmatpush3.msra.mxu0 %v5743_v23  ;;  %4251 = vmatpush3.msra.mxu1 %v5745_v24 }
  0x71   :  { %4217 = vmatprep.subr.mxu0 %v7395_v0  ;;  %4252 = vmatprep.subr.mxu1 %v7395_v0 }
  0x72   :  { %267 = vmatprep.mubr.f32.mxu0 %v7395_v0  ;;  %380 = vmatprep.mubr.f32.mxu1 %v7395_v0 }
  0x73   :  { %4218 = vmatpush3.msra.mxu0 %v5751_v25  ;;  %4253 = vmatpush3.msra.mxu1 %v5753_v26 }
  0x74   :  { %268 = vmatmul.mubr.f32.gmra.mxu0 %v84_v27  ;;  %381 = vmatmul.mubr.f32.gmra.mxu1 %v84_v27  ;;  %v5929_v27 = vld [vmem:[#allocation10 + $0x30] sm:$0xff] }
  0x75   :  { %4219 = vmatprep.subr.mxu0 %v7395_v0  ;;  %4254 = vmatprep.subr.mxu1 %v7395_v0 }
  0x76   :  { %4220 = vmatpush3.msra.mxu0 %v5761_v28  ;;  %4255 = vmatpush3.msra.mxu1 %v5763_v29 }
  0x77   :  { %4221 = vmatprep.subr.mxu0 %v7395_v0  ;;  %4256 = vmatprep.subr.mxu1 %v7395_v0 }
  0x78   :  { %273 = vmatprep.mubr.f32.mxu0 %v7395_v0  ;;  %386 = vmatprep.mubr.f32.mxu1 %v7395_v0 }
  0x79   :  { %4222 = vmatpush3.msra.mxu0 %v5769_v30  ;;  %4257 = vmatpush3.msra.mxu1 %v5771_v31 }
  0x7a   :  { %274 = vmatmul.mubr.f32.gmra.mxu0 %v85_v32  ;;  %387 = vmatmul.mubr.f32.gmra.mxu1 %v85_v32  ;;  %v5931_v32 = vld [vmem:[#allocation10 + $0x38] sm:$0xff] }
  0x7b   :  { %4223 = vmatprep.subr.mxu0 %v7395_v0  ;;  %4258 = vmatprep.subr.mxu1 %v7395_v0 }
  0x7c   :  { %4224 = vmatpush3.msra.mxu0 %v5779_v33  ;;  %4259 = vmatpush3.msra.mxu1 %v5781_v34 }
  0x7d   :  { %4225 = vmatprep.subr.mxu0 %v7395_v0  ;;  %4260 = vmatprep.subr.mxu1 %v7395_v0 }
  0x7e   :  { %279 = vmatprep.mubr.f32.mxu0 %v7395_v0  ;;  %392 = vmatprep.mubr.f32.mxu1 %v7395_v0 }
  0x7f   :  { %4226 = vmatpush3.msra.mxu0 %v5787_v35  ;;  %4261 = vmatpush3.msra.mxu1 %v5789_v36 }
  0x80   :  { %280 = vmatmul.mubr.f32.gmra.mxu0 %v86_v37  ;;  %393 = vmatmul.mubr.f32.gmra.mxu1 %v86_v37  ;;  %v5937_v37 = vld [vmem:[#allocation10 + $0x10] sm:$0xff] }
  0x81   :  { %4227 = vmatprep.subr.mxu0 %v7395_v0  ;;  %4262 = vmatprep.subr.mxu1 %v7395_v0 }
  0x82   :  { %4228 = vmatpush3.msra.mxu0 %v5797_v38  ;;  %4263 = vmatpush3.msra.mxu1 %v5799_v39 }
  0x83   :  { %4229 = vmatprep.subr.mxu0 %v7395_v0  ;;  %4264 = vmatprep.subr.mxu1 %v7395_v0 }
  0x84   :  { %4230 = vmatpush3.msra.mxu0 %v5803_v40  ;;  %4231 = vmatprep.mubr.msk.f32.mxu0 %vm5614_vm0, %v7395_v0 }
  0x85   :  { %4265 = vmatpush3.msra.mxu1 %v5807_v41  ;;  %4266 = vmatprep.mubr.msk.f32.mxu1 %vm5614_vm0, %v7395_v0 }
  0x86   :  { %4232 = vmatmul.mubr.f32.vlgmr.msra.gmra.mxu0 %v7395_v0  ;;  %4267 = vmatmul.mubr.f32.vlgmr.msra.gmra.mxu1 %v7395_v0 }
  0x87   :  { %4269 = vmatprep.subr.mxu0 %v7395_v0  ;;  %4304 = vmatprep.subr.mxu1 %v7395_v0 }
  0x88   :  { %4270 = vmatpush3.msra.mxu0 %v5817_v42  ;;  %4305 = vmatpush3.msra.mxu1 %v5819_v43 }
  0x89   :  { %4271 = vmatprep.subr.mxu0 %v7395_v0  ;;  %4306 = vmatprep.subr.mxu1 %v7395_v0 }
  0x8a   :  { %4272 = vmatpush3.msra.mxu0 %v5825_v44  ;;  %4307 = vmatpush3.msra.mxu1 %v5827_v45 }
  0x8b   :  { %4273 = vmatprep.subr.mxu0 %v7395_v0  ;;  %4308 = vmatprep.subr.mxu1 %v7395_v0 }
  0x8c   :  { %4274 = vmatpush3.msra.mxu0 %v5833_v46  ;;  %4309 = vmatpush3.msra.mxu1 %v5835_v47 }
  0x8d   :  { %4275 = vmatprep.subr.mxu0 %v7395_v0  ;;  %4310 = vmatprep.subr.mxu1 %v7395_v0 }
  0x8e   :  { %4276 = vmatpush3.msra.mxu0 %v5841_v48  ;;  %4311 = vmatpush3.msra.mxu1 %v5843_v49 }
  0x8f   :  { %4277 = vmatprep.subr.mxu0 %v7395_v0  ;;  %4312 = vmatprep.subr.mxu1 %v7395_v0 }
  0x90   :  { %4278 = vmatpush3.msra.mxu0 %v5849_v50  ;;  %4313 = vmatpush3.msra.mxu1 %v5851_v51 }
  0x91   :  { %4279 = vmatprep.subr.mxu0 %v7395_v0  ;;  %4314 = vmatprep.subr.mxu1 %v7395_v0 }
  0x92   :  { %4280 = vmatpush3.msra.mxu0 %v5857_v52  ;;  %4315 = vmatpush3.msra.mxu1 %v5859_v53 }
  0x93   :  { %4281 = vmatprep.subr.mxu0 %v7395_v0  ;;  %4316 = vmatprep.subr.mxu1 %v7395_v0 }
  0x94   :  { %4282 = vmatpush3.msra.mxu0 %v5865_v54  ;;  %4317 = vmatpush3.msra.mxu1 %v5867_v55 }
  0x95   :  { %4283 = vmatprep.subr.mxu0 %v7395_v0  ;;  %4318 = vmatprep.subr.mxu1 %v7395_v0 }
  0x96   :  { %4284 = vmatpush3.msra.mxu0 %v5873_v56  ;;  %4319 = vmatpush3.msra.mxu1 %v5875_v57 }
  0x97   :  { %4285 = vmatprep.subr.mxu0 %v7395_v0  ;;  %4320 = vmatprep.subr.mxu1 %v7395_v0 }
  0x98   :  { %4286 = vmatpush3.msra.mxu0 %v5881_v58  ;;  %4321 = vmatpush3.msra.mxu1 %v5883_v59 }
  0x99   :  { %4287 = vmatprep.subr.mxu0 %v7395_v0  ;;  %4322 = vmatprep.subr.mxu1 %v7395_v0 }
  0x9a   :  { %4288 = vmatpush3.msra.mxu0 %v5889_v60  ;;  %4323 = vmatpush3.msra.mxu1 %v5891_v61 }
  0x9b   :  { %4289 = vmatprep.subr.mxu0 %v7395_v0  ;;  %4324 = vmatprep.subr.mxu1 %v7395_v0 }
  0x9c   :  { %4290 = vmatpush3.msra.mxu0 %v5897_v62  ;;  %4325 = vmatpush3.msra.mxu1 %v5899_v63 }
  0x9d   :  { %4291 = vmatprep.subr.mxu0 %v7395_v0  ;;  %4326 = vmatprep.subr.mxu1 %v7395_v0 }
  0x9e   :  { %4292 = vmatpush3.msra.mxu0 %v5905_v1  ;;  %4327 = vmatpush3.msra.mxu1 %v5907_v2 }
  0x9f   :  { %4293 = vmatprep.subr.mxu0 %v7395_v0  ;;  %4328 = vmatprep.subr.mxu1 %v7395_v0 }
  0xa0   :  { %4294 = vmatpush3.msra.mxu0 %v5913_v7  ;;  %4329 = vmatpush3.msra.mxu1 %v5915_v12  ;;  %v5941_v12 = vld [vmem:[#allocation10 + $0x18] sm:$0xff] }
  0xa1   :  { %4295 = vmatprep.subr.mxu0 %v7395_v0  ;;  %4330 = vmatprep.subr.mxu1 %v7395_v0 }
  0xa2   :  { %4296 = vmatpush3.msra.mxu0 %v5921_v17  ;;  %4331 = vmatpush3.msra.mxu1 %v5923_v22 }
  0xa3   :  { %4297 = vmatprep.subr.mxu0 %v7395_v0  ;;  %4332 = vmatprep.subr.mxu1 %v7395_v0 }
  0xa4   :  { %4298 = vmatpush3.msra.mxu0 %v5929_v27  ;;  %4333 = vmatpush3.msra.mxu1 %v5931_v32 }
  0xa5   :  { %4299 = vmatprep.subr.mxu0 %v7395_v0  ;;  %4334 = vmatprep.subr.mxu1 %v7395_v0 }
  0xa6   :  { %4300 = vmatpush3.msra.mxu0 %v5937_v37  ;;  %4301 = vmatprep.mubr.msk.f32.mxu0 %vm5614_vm0, %v7395_v0 }
  0xa7   :  { %4335 = vmatpush3.msra.mxu1 %v5941_v12  ;;  %4336 = vmatprep.mubr.msk.f32.mxu1 %vm5614_vm0, %v7395_v0 }
  0xa8   :  { %4302 = vmatmul.mubr.f32.vlgmr.msra.gmra.mxu0 %v7395_v0  ;;  %4337 = vmatmul.mubr.f32.vlgmr.msra.gmra.mxu1 %v7395_v0 }
  0xa9   :  { %4339 = vmatprep.subr.mxu0 %v7395_v0  ;;  %4374 = vmatprep.subr.mxu1 %v7395_v0 }
  0xaa   :  { %4340 = vmatpush3.msra.mxu0 %v5671_v3  ;;  %4375 = vmatpush3.msra.mxu1 %v5673_v4  ;;  %v7394_v3 = vlaneseq }
  0xab   :  { %4341 = vmatprep.subr.mxu0 %v7395_v0  ;;  %4376 = vmatprep.subr.mxu1 %v7395_v0 }
  0xac   :  { %4342 = vmatpush3.msra.mxu0 %v5679_v5  ;;  %4377 = vmatpush3.msra.mxu1 %v5681_v6  ;;  %v154_v4 = vshrl.u32 %v7394_v3, 7 }
  0xad   :  { %4343 = vmatprep.subr.mxu0 %v7395_v0  ;;  %4378 = vmatprep.subr.mxu1 %v7395_v0 }
  0xae   :  { %4344 = vmatpush3.msra.mxu0 %v5689_v8  ;;  %4379 = vmatpush3.msra.mxu1 %v5691_v9  ;;  %v155_v8 = vsub.s32 0, %v154_v4  ;;  %v163_v9 = vsub.s32 2, %v154_v4 }
  0xaf   :  { %4345 = vmatprep.subr.mxu0 %v7395_v0  ;;  %4380 = vmatprep.subr.mxu1 %v7395_v0 }
  0xb0   :  { %4346 = vmatpush3.msra.mxu0 %v5697_v10  ;;  %4381 = vmatpush3.msra.mxu1 %v5699_v11  ;;  %v151_v10 = vld [vmem:[%s7389_s3] sm:$0xf] }
  0xb1   :  { %4347 = vmatprep.subr.mxu0 %v7395_v0  ;;  %4382 = vmatprep.subr.mxu1 %v7395_v0 }
  0xb2   :  { %4348 = vmatpush3.msra.mxu0 %v5707_v13  ;;  %4383 = vmatpush3.msra.mxu1 %v5709_v14  ;;  %v159_v14 = vsub.s32 1, %v154_v4 }
  0xb3   :  { %4349 = vmatprep.subr.mxu0 %v7395_v0  ;;  %4384 = vmatprep.subr.mxu1 %v7395_v0 }
  0xb4   :  { %4350 = vmatpush3.msra.mxu0 %v5715_v15  ;;  %4385 = vmatpush3.msra.mxu1 %v5717_v16  ;;  %v167_v15 = vsub.s32 3, %v154_v4  ;;  %v6035_v16 = vrot.slane %v151_v10, %v155_v8 }
  0xb5   :  { %4351 = vmatprep.subr.mxu0 %v7395_v0  ;;  %4386 = vmatprep.subr.mxu1 %v7395_v0 }
  0xb6   :  { %4352 = vmatpush3.msra.mxu0 %v5725_v18  ;;  %4387 = vmatpush3.msra.mxu1 %v5727_v19  ;;  %v6037_v18 = vrot.slane %v151_v10, %v163_v9 }
  0xb7   :  { %4353 = vmatprep.subr.mxu0 %v7395_v0  ;;  %4388 = vmatprep.subr.mxu1 %v7395_v0 }
  0xb8   :  { %4354 = vmatpush3.msra.mxu0 %v5733_v20  ;;  %4389 = vmatpush3.msra.mxu1 %v5735_v21  ;;  %v160_v21 = vrot.slane %v151_v10, %v159_v14 }
  0xb9   :  { %4355 = vmatprep.subr.mxu0 %v7395_v0  ;;  %4390 = vmatprep.subr.mxu1 %v7395_v0 }
  0xba   :  { %4356 = vmatpush3.msra.mxu0 %v5743_v23  ;;  %4391 = vmatpush3.msra.mxu1 %v5745_v24  ;;  %v6039_v23 = vrot.slane %v151_v10, %v167_v15 }
  0xbb   :  { %4357 = vmatprep.subr.mxu0 %v7395_v0  ;;  %4392 = vmatprep.subr.mxu1 %v7395_v0 }
  0xbc   :  { %4358 = vmatpush3.msra.mxu0 %v5751_v25  ;;  %4393 = vmatpush3.msra.mxu1 %v5753_v26 }
  0xbd   :  { %4359 = vmatprep.subr.mxu0 %v7395_v0  ;;  %4394 = vmatprep.subr.mxu1 %v7395_v0 }
  0xbe   :  { %4360 = vmatpush3.msra.mxu0 %v5761_v28  ;;  %4395 = vmatpush3.msra.mxu1 %v5763_v29 }
  0xbf   :  { %4361 = vmatprep.subr.mxu0 %v7395_v0  ;;  %4396 = vmatprep.subr.mxu1 %v7395_v0 }
  0xc0   :  { %4362 = vmatpush3.msra.mxu0 %v5769_v30  ;;  %4397 = vmatpush3.msra.mxu1 %v5771_v31 }
  0xc1   :  { %4363 = vmatprep.subr.mxu0 %v7395_v0  ;;  %4398 = vmatprep.subr.mxu1 %v7395_v0 }
  0xc2   :  { %4364 = vmatpush3.msra.mxu0 %v5779_v33  ;;  %4399 = vmatpush3.msra.mxu1 %v5781_v34 }
  0xc3   :  { %4365 = vmatprep.subr.mxu0 %v7395_v0  ;;  %4400 = vmatprep.subr.mxu1 %v7395_v0 }
  0xc4   :  { %4366 = vmatpush3.msra.mxu0 %v5787_v35  ;;  %4401 = vmatpush3.msra.mxu1 %v5789_v36 }
  0xc5   :  { %4367 = vmatprep.subr.mxu0 %v7395_v0  ;;  %4402 = vmatprep.subr.mxu1 %v7395_v0 }
  0xc6   :  { %4368 = vmatpush3.msra.mxu0 %v5797_v38  ;;  %4403 = vmatpush3.msra.mxu1 %v5799_v39 }
  0xc7   :  { %4369 = vmatprep.subr.mxu0 %v7395_v0  ;;  %4404 = vmatprep.subr.mxu1 %v7395_v0 }
  0xc8   :  { %4370 = vmatpush3.msra.mxu0 %v5803_v40  ;;  %4405 = vmatpush3.msra.mxu1 %v5807_v41 }
  0xc9   :  { %4371 = vmatprep.mubr.msk.f32.mxu0 %vm5614_vm0, %v7395_v0  ;;  %4406 = vmatprep.mubr.msk.f32.mxu1 %vm5614_vm0, %v7395_v0 }
  0xca   :  { %4409 = vmatprep.subr.mxu0 %v7395_v0  ;;  %4444 = vmatprep.subr.mxu1 %v7395_v0 }
 0x116   :  { %v6024_v5 = vpop.f32.mrf.mxu0  ;;  %v6026_v6 = vpop.f32.mrf.mxu1 }
 0x118   :  { %v6031_v11 = vpop.f32.mrf.mxu0  ;;  %v6033_v13 = vpop.f32.mrf.mxu1 }
 0x11c   :  { %v245_v19 = vpop.f32.mrf.mxu0  ;;  %v358_v20 = vpop.f32.mrf.mxu1 }
 0x11d   :  { %v6042_v24 = vadd.f32 %v245_v19, %v6035_v16  ;;  %v6045_v25 = vadd.f32 %v358_v20, %v6037_v18 }
 0x11e   :  { %v247_v26 = vpop.f32.mrf.mxu0  ;;  %v360_v28 = vpop.f32.mrf.mxu1 }
 0x11f   :  { %v6047_v29 = vadd.f32 %v247_v26, %v160_v21  ;;  %v6050_v30 = vadd.f32 %v360_v28, %v6039_v23 }
 0x122   :  { %v251_v31 = vpop.f32.mrf.mxu0  ;;  %v364_v33 = vpop.f32.mrf.mxu1 }
 0x123   :  { %v6053_v34 = vadd.f32 %v251_v31, %v6035_v16  ;;  %v6056_v35 = vadd.f32 %v364_v33, %v6037_v18 }
 0x124   :  { %v253_v36 = vpop.f32.mrf.mxu0  ;;  %v366_v38 = vpop.f32.mrf.mxu1 }
 0x125   :  { %v6058_v39 = vadd.f32 %v253_v36, %v160_v21  ;;  %v6061_v40 = vadd.f32 %v366_v38, %v6039_v23 }
 0x128   :  { %v257_v41 = vpop.f32.mrf.mxu0  ;;  %v370_v4 = vpop.f32.mrf.mxu1 }
 0x129   :  { %v6064_v8 = vadd.f32 %v257_v41, %v6035_v16  ;;  %v6067_v9 = vadd.f32 %v370_v4, %v6037_v18 }
 0x12a   :  { %v259_v10 = vpop.f32.mrf.mxu0  ;;  %v372_v14 = vpop.f32.mrf.mxu1 }
 0x12b   :  { %7450 = vst [vmem:[#allocation19_spill] sm:$0xff] %v6064_v8  ;;  %7451 = vst [vmem:[#allocation20_spill] sm:$0xff] %v6067_v9  ;;  %v6069_v15 = vadd.f32 %v259_v10, %v160_v21  ;;  %v6072_v19 = vadd.f32 %v372_v14, %v6039_v23  ;;  %v6432_v8 = vld [vmem:[#allocation10 + $0x98] sm:$0xff] }
 0x12c   :  { %7491 = vst [vmem:[#allocation57_spill] sm:$0xff] %v6432_v8 }
 0x12d   :  { %7452 = vst [vmem:[#allocation21_spill] sm:$0xff] %v6069_v15  ;;  %7453 = vst [vmem:[#allocation22_spill] sm:$0xff] %v6072_v19  ;;  %v6438_v15 = vld [vmem:[#allocation10 + $0x70] sm:$0xff] }
 0x12e   :  { %v263_v20 = vpop.f32.mrf.mxu0  ;;  %v376_v26 = vpop.f32.mrf.mxu1 }
 0x12f   :  { %v6075_v28 = vadd.f32 %v263_v20, %v6035_v16  ;;  %v6078_v31 = vadd.f32 %v376_v26, %v6037_v18 }
 0x130   :  { %v265_v33 = vpop.f32.mrf.mxu0  ;;  %v378_v36 = vpop.f32.mrf.mxu1 }
 0x131   :  { %7454 = vst [vmem:[#allocation23_spill] sm:$0xff] %v6075_v28  ;;  %7455 = vst [vmem:[#allocation24_spill] sm:$0xff] %v6078_v31  ;;  %v6080_v38 = vadd.f32 %v265_v33, %v160_v21  ;;  %v6083_v41 = vadd.f32 %v378_v36, %v6039_v23 }
 0x133   :  { %7456 = vst [vmem:[#allocation25_spill] sm:$0xff] %v6080_v38  ;;  %7457 = vst [vmem:[#allocation26_spill] sm:$0xff] %v6083_v41 }
 0x134   :  { %v269_v4 = vpop.f32.mrf.mxu0  ;;  %v382_v10 = vpop.f32.mrf.mxu1 }
 0x135   :  { %v6086_v14 = vadd.f32 %v269_v4, %v6035_v16  ;;  %v6089_v3 = vadd.f32 %v382_v10, %v6037_v18 }
 0x136   :  { %v271_v20 = vpop.f32.mrf.mxu0  ;;  %v384_v0 = vpop.f32.mrf.mxu1 }
 0x137   :  { %7458 = vst [vmem:[#allocation27_spill] sm:$0xff] %v6086_v14  ;;  %7459 = vst [vmem:[#allocation28_spill] sm:$0xff] %v6089_v3  ;;  %v6091_v28 = vadd.f32 %v271_v20, %v160_v21  ;;  %v6094_v26 = vadd.f32 %v384_v0, %v6039_v23 }
 0x139   :  { %7460 = vst [vmem:[#allocation29_spill] sm:$0xff] %v6091_v28  ;;  %7461 = vst [vmem:[#allocation30_spill] sm:$0xff] %v6094_v26 }
 0x13a   :  { %v275_v33 = vpop.f32.mrf.mxu0  ;;  %v388_v31 = vpop.f32.mrf.mxu1 }
 0x13b   :  { %v6097_v36 = vadd.f32 %v275_v33, %v6035_v16  ;;  %v6100_v41 = vadd.f32 %v388_v31, %v6037_v18 }
 0x13c   :  { %v277_v4 = vpop.f32.mrf.mxu0  ;;  %v390_v14 = vpop.f32.mrf.mxu1 }
 0x13d   :  { %7462 = vst [vmem:[#allocation31_spill] sm:$0xff] %v6097_v36  ;;  %7463 = vst [vmem:[#allocation32_spill] sm:$0xff] %v6100_v41  ;;  %v6102_v38 = vadd.f32 %v277_v4, %v160_v21  ;;  %v6105_v10 = vadd.f32 %v390_v14, %v6039_v23 }
 0x13f   :  { %7464 = vst [vmem:[#allocation33_spill] sm:$0xff] %v6102_v38  ;;  %7465 = vst [vmem:[#allocation34_spill] sm:$0xff] %v6105_v10  ;;  %v242_v10 = vadd.f32 %v6031_v11, %v160_v21 }
 0x140   :  { %v281_v20 = vpop.f32.mrf.mxu0  ;;  %v394_v3 = vpop.f32.mrf.mxu1 }
 0x141   :  { %v6108_v0 = vadd.f32 %v281_v20, %v6035_v16  ;;  %v6111_v26 = vadd.f32 %v394_v3, %v6037_v18  ;;  %v240_v20 = vadd.f32 %v6024_v5, %v6035_v16 }
 0x142   :  { %v283_v33 = vpop.f32.mrf.mxu0  ;;  %v396_v36 = vpop.f32.mrf.mxu1 }
 0x143   :  { %7466 = vst [vmem:[#allocation35_spill] sm:$0xff] %v6108_v0  ;;  %7467 = vst [vmem:[#allocation36_spill] sm:$0xff] %v6111_v26  ;;  %v6113_v28 = vadd.f32 %v283_v33, %v160_v21  ;;  %v6116_v31 = vadd.f32 %v396_v36, %v6039_v23 }
 0x145   :  { %7468 = vst [vmem:[#allocation37_spill] sm:$0xff] %v6113_v28  ;;  %7469 = vst [vmem:[#allocation38_spill] sm:$0xff] %v6116_v31  ;;  %v353_v31 = vadd.f32 %v6026_v6, %v6037_v18 }
 0x146   :  { %v529_v4 = vpop.f32.mrf.mxu0  ;;  %v622_v41 = vpop.f32.mrf.mxu1 }
 0x147   :  { %v626_v0 = vadd.f32 %v622_v41, %v242_v10  ;;  %v533_v19 = vadd.f32 %v529_v4, %v240_v20  ;;  %v7470_v20 = vmov 0.0  }
 0x148   :  { %v4233_v38 = vpop.f32.mrf.mxu0  ;;  %v4268_v14 = vpop.f32.mrf.mxu1 }
 0x149   :  { %v3614_v3 = vmul.f32 -1.442695, %v626_v0  ;;  %v3613_v26 = vmul.f32 -1.442695, %v533_v19  ;;  %v355_v38 = vadd.f32 %v6033_v13, %v6039_v23 }
 0x14b   :  { %5365 = vpow2.f32 %v3614_v3  ;;  %v6322_v3 = vld [vmem:[#allocation10] sm:$0xff] }
 0x14c   :  { %5367 = vpow2.f32 %v3613_v26  ;;  %7484 = vst [vmem:[#allocation50_spill] sm:$0xff] %v6322_v3 }
 0x158   :  { %v5366_v33 = vpop.eup %5365 }
 0x159   :  { %v5368_v28 = vpop.eup %5367  ;;  %v630_v9 = vadd.f32 1.0, %v5366_v33  ;;  %v6324_v33 = vld [vmem:[#allocation10 + $0x8] sm:$0xff] }
 0x15a   :  { %v537_v36 = vadd.f32 1.0, %v5368_v28  ;;  %7485 = vst [vmem:[#allocation51_spill] sm:$0xff] %v6324_v33 }
 0x15b   :  { %5369 = vrcp.f32 %v630_v9 }
 0x15c   :  { %5371 = vrcp.f32 %v537_v36 }
 0x168   :  { %v715_v11 = vpop.f32.mrf.mxu0  ;;  %v803_v21 = vpop.f32.mrf.mxu1 }
 0x169   :  { %v719_v5 = vadd.f32 %v715_v11, %v353_v31  ;;  %v807_v16 = vadd.f32 %v803_v21, %v355_v38  ;;  %v5370_v10 = vpop.eup %5369 }
 0x16a   :  { %v4303_v41 = vpop.f32.mrf.mxu0  ;;  %v4338_v19 = vpop.f32.mrf.mxu1  ;;  %v814_v4 = vmul.f32 0.0, %v5370_v10 }
 0x16b   :  { %5373 = vtanh.f32 %v719_v5  ;;  %v3615_v26 = vmul.f32 -1.442695, %v807_v16  ;;  %v5372_v0 = vpop.eup %5371 }
 0x16d   :  { %5375 = vpow2.f32 %v3615_v26 }
 0x178   :  { %v5374_v28 = vpop.eup %5373 }
 0x179   :  { %v815_v14 = vmul.f32 %v5374_v28, %v5372_v0 }
 0x17a   :  { %v5376_v6 = vpop.eup %5375 }
 0x17b   :  { %v6125_v18 = vadd.f32 %v815_v14, %v814_v4  ;;  %v811_v13 = vadd.f32 1.0, %v5376_v6 }
 0x17d   :  { %5377 = vtanh.f32 %v6125_v18 }
 0x17e   :  { %5379 = vrcp.f32 %v811_v13 }
 0x18a   :  { %v5378_v23 = vpop.eup %5377 }
 0x18b   :  { %v5380_v9 = vpop.eup %5379 }
 0x18c   :  { %v6128_v31 = vmul.f32 %v5380_v9, %v5378_v23 }
 0x18e   :  { %4372 = vmatmul.mubr.f32.vlgmr.msra.gmra.mxu0 %v6128_v31  ;;  %4407 = vmatmul.mubr.f32.vlgmr.msra.gmra.mxu1 %v6128_v31 }
 0x18f   :  { %4410 = vmatpush3.msra.mxu0 %v5817_v42  ;;  %4445 = vmatpush3.msra.mxu1 %v5819_v43  ;;  %v7471_v42 = vld [vmem:[#allocation18_spill] sm:$0xff]  ;;  %v6206_v43 = vld [vmem:[#allocation10 + $0x1e0] sm:$0xff] }
 0x190   :  { %4411 = vmatprep.subr.mxu0 %v7470_v20  ;;  %4446 = vmatprep.subr.mxu1 %v7470_v20 }
 0x191   :  { %4412 = vmatpush3.msra.mxu0 %v5825_v44  ;;  %4447 = vmatpush3.msra.mxu1 %v5827_v45  ;;  %v6208_v44 = vld [vmem:[#allocation10 + $0x1e8] sm:$0xff]  ;;  %v6214_v45 = vld [vmem:[#allocation10 + $0x1c0] sm:$0xff] }
 0x192   :  { %4413 = vmatprep.subr.mxu0 %v7470_v20  ;;  %4448 = vmatprep.subr.mxu1 %v7470_v20 }
 0x193   :  { %4414 = vmatpush3.msra.mxu0 %v5833_v46  ;;  %4449 = vmatpush3.msra.mxu1 %v5835_v47  ;;  %v6216_v46 = vld [vmem:[#allocation10 + $0x1c8] sm:$0xff]  ;;  %v6222_v47 = vld [vmem:[#allocation10 + $0x1a0] sm:$0xff] }
 0x194   :  { %4415 = vmatprep.subr.mxu0 %v7470_v20  ;;  %4450 = vmatprep.subr.mxu1 %v7470_v20 }
 0x195   :  { %4416 = vmatpush3.msra.mxu0 %v5841_v48  ;;  %4451 = vmatpush3.msra.mxu1 %v5843_v49  ;;  %v6224_v48 = vld [vmem:[#allocation10 + $0x1a8] sm:$0xff]  ;;  %v6230_v49 = vld [vmem:[#allocation10 + $0x180] sm:$0xff] }
 0x196   :  { %4417 = vmatprep.subr.mxu0 %v7470_v20  ;;  %4452 = vmatprep.subr.mxu1 %v7470_v20 }
 0x197   :  { %4418 = vmatpush3.msra.mxu0 %v5849_v50  ;;  %4453 = vmatpush3.msra.mxu1 %v5851_v51  ;;  %v6232_v50 = vld [vmem:[#allocation10 + $0x188] sm:$0xff]  ;;  %v6238_v51 = vld [vmem:[#allocation10 + $0x160] sm:$0xff] }
 0x198   :  { %4419 = vmatprep.subr.mxu0 %v7470_v20  ;;  %4454 = vmatprep.subr.mxu1 %v7470_v20 }
 0x199   :  { %4420 = vmatpush3.msra.mxu0 %v5857_v52  ;;  %4455 = vmatpush3.msra.mxu1 %v5859_v53  ;;  %v6240_v52 = vld [vmem:[#allocation10 + $0x168] sm:$0xff]  ;;  %v6246_v53 = vld [vmem:[#allocation10 + $0x140] sm:$0xff] }
 0x19a   :  { %4421 = vmatprep.subr.mxu0 %v7470_v20  ;;  %4456 = vmatprep.subr.mxu1 %v7470_v20 }
 0x19b   :  { %4422 = vmatpush3.msra.mxu0 %v5865_v54  ;;  %4457 = vmatpush3.msra.mxu1 %v5867_v55  ;;  %v6248_v54 = vld [vmem:[#allocation10 + $0x148] sm:$0xff]  ;;  %v6254_v55 = vld [vmem:[#allocation10 + $0x120] sm:$0xff] }
 0x19c   :  { %4423 = vmatprep.subr.mxu0 %v7470_v20  ;;  %4458 = vmatprep.subr.mxu1 %v7470_v20 }
 0x19d   :  { %4424 = vmatpush3.msra.mxu0 %v5873_v56  ;;  %4459 = vmatpush3.msra.mxu1 %v5875_v57  ;;  %v6256_v56 = vld [vmem:[#allocation10 + $0x128] sm:$0xff]  ;;  %v6262_v57 = vld [vmem:[#allocation10 + $0x100] sm:$0xff] }
 0x19e   :  { %4425 = vmatprep.subr.mxu0 %v7470_v20  ;;  %4460 = vmatprep.subr.mxu1 %v7470_v20 }
 0x19f   :  { %4426 = vmatpush3.msra.mxu0 %v5881_v58  ;;  %4461 = vmatpush3.msra.mxu1 %v5883_v59  ;;  %v6264_v58 = vld [vmem:[#allocation10 + $0x108] sm:$0xff]  ;;  %v6270_v59 = vld [vmem:[#allocation10 + $0xe0] sm:$0xff] }
 0x1a0   :  { %4427 = vmatprep.subr.mxu0 %v7470_v20  ;;  %4462 = vmatprep.subr.mxu1 %v7470_v20 }
 0x1a1   :  { %4428 = vmatpush3.msra.mxu0 %v5889_v60  ;;  %4463 = vmatpush3.msra.mxu1 %v5891_v61  ;;  %v6272_v60 = vld [vmem:[#allocation10 + $0xe8] sm:$0xff]  ;;  %v6276_v61 = vld [vmem:[#allocation10 + $0xc0] sm:$0xff] }
 0x1a2   :  { %4429 = vmatprep.subr.mxu0 %v7470_v20  ;;  %4464 = vmatprep.subr.mxu1 %v7470_v20  ;;  %7472 = vst [vmem:[#allocation18_spill] sm:$0xff] %v6276_v61 }
 0x1a3   :  { %4430 = vmatpush3.msra.mxu0 %v5897_v62  ;;  %4465 = vmatpush3.msra.mxu1 %v5899_v63  ;;  %v6278_v62 = vld [vmem:[#allocation10 + $0xc8] sm:$0xff]  ;;  %v6282_v63 = vld [vmem:[#allocation10 + $0xa0] sm:$0xff] }
 0x1a4   :  { %4431 = vmatprep.subr.mxu0 %v7470_v20  ;;  %4466 = vmatprep.subr.mxu1 %v7470_v20  ;;  %7473 = vst [vmem:[#allocation39_spill] sm:$0xff] %v6278_v62  ;;  %7474 = vst [vmem:[#allocation40_spill] sm:$0xff] %v6282_v63 }
 0x1a5   :  { %4432 = vmatpush3.msra.mxu0 %v5905_v1  ;;  %4467 = vmatpush3.msra.mxu1 %v5907_v2  ;;  %v6284_v1 = vld [vmem:[#allocation10 + $0xa8] sm:$0xff]  ;;  %v6290_v2 = vld [vmem:[#allocation10 + $0x80] sm:$0xff] }
 0x1a6   :  { %4433 = vmatprep.subr.mxu0 %v7470_v20  ;;  %4468 = vmatprep.subr.mxu1 %v7470_v20  ;;  %7475 = vst [vmem:[#allocation41_spill] sm:$0xff] %v6284_v1  ;;  %7476 = vst [vmem:[#allocation42_spill] sm:$0xff] %v6290_v2 }
 0x1a7   :  { %4434 = vmatpush3.msra.mxu0 %v5913_v7  ;;  %4469 = vmatpush3.msra.mxu1 %v7471_v42  ;;  %v6292_v7 = vld [vmem:[#allocation10 + $0x88] sm:$0xff] }
 0x1a8   :  { %4435 = vmatprep.subr.mxu0 %v7470_v20  ;;  %4470 = vmatprep.subr.mxu1 %v7470_v20  ;;  %7477 = vst [vmem:[#allocation43_spill] sm:$0xff] %v6292_v7 }
 0x1a9   :  { %4436 = vmatpush3.msra.mxu0 %v5921_v17  ;;  %4471 = vmatpush3.msra.mxu1 %v5923_v22  ;;  %v6300_v17 = vld [vmem:[#allocation10 + $0x68] sm:$0xff]  ;;  %v6306_v22 = vld [vmem:[#allocation10 + $0x40] sm:$0xff] }
 0x1aa   :  { %4437 = vmatprep.subr.mxu0 %v7470_v20  ;;  %4472 = vmatprep.subr.mxu1 %v7470_v20  ;;  %7479 = vst [vmem:[#allocation45_spill] sm:$0xff] %v6300_v17  ;;  %7480 = vst [vmem:[#allocation46_spill] sm:$0xff] %v6306_v22 }
 0x1ab   :  { %4438 = vmatpush3.msra.mxu0 %v5929_v27  ;;  %4473 = vmatpush3.msra.mxu1 %v5931_v32  ;;  %v6308_v27 = vld [vmem:[#allocation10 + $0x48] sm:$0xff]  ;;  %v6314_v32 = vld [vmem:[#allocation10 + $0x20] sm:$0xff] }
 0x1ac   :  { %4439 = vmatprep.subr.mxu0 %v7470_v20  ;;  %4474 = vmatprep.subr.mxu1 %v7470_v20  ;;  %7481 = vst [vmem:[#allocation47_spill] sm:$0xff] %v6308_v27  ;;  %7482 = vst [vmem:[#allocation48_spill] sm:$0xff] %v6314_v32 }
 0x1ad   :  { %4440 = vmatpush3.msra.mxu0 %v5937_v37  ;;  %4441 = vmatprep.mubr.msk.f32.mxu0 %vm5614_vm0, %v7470_v20  ;;  %v6316_v37 = vld [vmem:[#allocation10 + $0x28] sm:$0xff] }
 0x1ae   :  { %4475 = vmatpush3.msra.mxu1 %v5941_v12  ;;  %4476 = vmatprep.mubr.msk.f32.mxu1 %vm5614_vm0, %v7470_v20  ;;  %v6298_v12 = vld [vmem:[#allocation10 + $0x60] sm:$0xff]  ;;  %7483 = vst [vmem:[#allocation49_spill] sm:$0xff] %v6316_v37 }
 0x1af   :  { %4442 = vmatmul.mubr.f32.vlgmr.msra.gmra.mxu0 %v6128_v31  ;;  %4477 = vmatmul.mubr.f32.vlgmr.msra.gmra.mxu1 %v6128_v31  ;;  %7478 = vst [vmem:[#allocation44_spill] sm:$0xff] %v6298_v12 }
 0x1b0   :  { %4479 = vmatprep.subr.mxu0 %v7470_v20  ;;  %4514 = vmatprep.subr.mxu1 %v7470_v20 }
 0x1b1   :  { %4511 = vmatprep.mubr.msk.f32.mxu0 %vm5614_vm0, %v7470_v20  ;;  %4546 = vmatprep.mubr.msk.f32.mxu1 %vm5614_vm0, %v7470_v20 }
 0x1b2   :  { %4480 = vmatpush3.msra.mxu0 %v6206_v43  ;;  %4515 = vmatpush3.msra.mxu1 %v6208_v44 }
 0x1b3   :  { %4481 = vmatprep.subr.mxu0 %v7470_v20  ;;  %4516 = vmatprep.subr.mxu1 %v7470_v20 }
 0x1b4   :  { %4482 = vmatpush3.msra.mxu0 %v6214_v45  ;;  %4517 = vmatpush3.msra.mxu1 %v6216_v46 }
 0x1b5   :  { %4483 = vmatprep.subr.mxu0 %v7470_v20  ;;  %4518 = vmatprep.subr.mxu1 %v7470_v20 }
 0x1b6   :  { %4484 = vmatpush3.msra.mxu0 %v6222_v47  ;;  %4519 = vmatpush3.msra.mxu1 %v6224_v48 }
 0x1b7   :  { %4485 = vmatprep.subr.mxu0 %v7470_v20  ;;  %4520 = vmatprep.subr.mxu1 %v7470_v20 }
 0x1b8   :  { %4486 = vmatpush3.msra.mxu0 %v6230_v49  ;;  %4521 = vmatpush3.msra.mxu1 %v6232_v50 }
 0x1b9   :  { %4487 = vmatprep.subr.mxu0 %v7470_v20  ;;  %4522 = vmatprep.subr.mxu1 %v7470_v20 }
 0x1ba   :  { %4488 = vmatpush3.msra.mxu0 %v6238_v51  ;;  %4523 = vmatpush3.msra.mxu1 %v6240_v52 }
 0x1bb   :  { %4489 = vmatprep.subr.mxu0 %v7470_v20  ;;  %4524 = vmatprep.subr.mxu1 %v7470_v20 }
 0x1bc   :  { %4490 = vmatpush3.msra.mxu0 %v6246_v53  ;;  %4525 = vmatpush3.msra.mxu1 %v6248_v54 }
 0x1bd   :  { %4491 = vmatprep.subr.mxu0 %v7470_v20  ;;  %4526 = vmatprep.subr.mxu1 %v7470_v20 }
 0x1be   :  { %4492 = vmatpush3.msra.mxu0 %v6254_v55  ;;  %4527 = vmatpush3.msra.mxu1 %v6256_v56 }
 0x1bf   :  { %4493 = vmatprep.subr.mxu0 %v7470_v20  ;;  %4528 = vmatprep.subr.mxu1 %v7470_v20 }
 0x1c0   :  { %4494 = vmatpush3.msra.mxu0 %v6262_v57  ;;  %4529 = vmatpush3.msra.mxu1 %v6264_v58 }
 0x1c1   :  { %4495 = vmatprep.subr.mxu0 %v7470_v20  ;;  %4530 = vmatprep.subr.mxu1 %v7470_v20 }
 0x1c2   :  { %4496 = vmatpush3.msra.mxu0 %v6270_v59  ;;  %4531 = vmatpush3.msra.mxu1 %v6272_v60 }
 0x1c3   :  { %4497 = vmatprep.subr.mxu0 %v7470_v20  ;;  %4532 = vmatprep.subr.mxu1 %v7470_v20 }
 0x1c4   :  { %4498 = vmatpush3.msra.mxu0 %v6276_v61  ;;  %4533 = vmatpush3.msra.mxu1 %v6278_v62 }
 0x1c5   :  { %4499 = vmatprep.subr.mxu0 %v7470_v20  ;;  %4534 = vmatprep.subr.mxu1 %v7470_v20 }
 0x1c6   :  { %4500 = vmatpush3.msra.mxu0 %v6282_v63  ;;  %4535 = vmatpush3.msra.mxu1 %v6284_v1 }
 0x1c7   :  { %4501 = vmatprep.subr.mxu0 %v7470_v20  ;;  %4536 = vmatprep.subr.mxu1 %v7470_v20 }
 0x1c8   :  { %4502 = vmatpush3.msra.mxu0 %v6290_v2  ;;  %4537 = vmatpush3.msra.mxu1 %v6292_v7 }
 0x1c9   :  { %4503 = vmatprep.subr.mxu0 %v7470_v20  ;;  %4538 = vmatprep.subr.mxu1 %v7470_v20 }
 0x1ca   :  { %4504 = vmatpush3.msra.mxu0 %v6298_v12  ;;  %4539 = vmatpush3.msra.mxu1 %v6300_v17 }
 0x1cb   :  { %4505 = vmatprep.subr.mxu0 %v7470_v20  ;;  %4540 = vmatprep.subr.mxu1 %v7470_v20 }
 0x1cc   :  { %4506 = vmatpush3.msra.mxu0 %v6306_v22  ;;  %4541 = vmatpush3.msra.mxu1 %v6308_v27 }
 0x1cd   :  { %4507 = vmatprep.subr.mxu0 %v7470_v20  ;;  %4542 = vmatprep.subr.mxu1 %v7470_v20 }
 0x1ce   :  { %4508 = vmatpush3.msra.mxu0 %v6314_v32  ;;  %4543 = vmatpush3.msra.mxu1 %v6316_v37 }
 0x1cf   :  { %4509 = vmatprep.subr.mxu0 %v7470_v20  ;;  %4544 = vmatprep.subr.mxu1 %v7470_v20 }
 0x1d0   :  { %4510 = vmatpush3.msra.mxu0 %v6322_v3  ;;  %4545 = vmatpush3.msra.mxu1 %v6324_v33 }
 0x1d1   :  { %4549 = vmatprep.subr.mxu0 %v7470_v20  ;;  %4584 = vmatprep.subr.mxu1 %v7470_v20 }
 0x24e   :  { %v910_v36 = vpop.f32.mrf.mxu0  ;;  %v1003_v38 = vpop.f32.mrf.mxu1 }
 0x24f   :  { %v1007_v5 = vadd.f32 %v1003_v38, %v6047_v29  ;;  %v914_v16 = vadd.f32 %v910_v36, %v6042_v24 }
 0x250   :  { %v4373_v11 = vpop.f32.mrf.mxu0  ;;  %v4408_v21 = vpop.f32.mrf.mxu1 }
 0x251   :  { %v3617_v41 = vmul.f32 -1.442695, %v1007_v5  ;;  %v3616_v19 = vmul.f32 -1.442695, %v914_v16 }
 0x253   :  { %5381 = vpow2.f32 %v3617_v41  ;;  %v6344_v41 = vld [vmem:[#allocation10 + $0x1f0] sm:$0xff] }
 0x254   :  { %5383 = vpow2.f32 %v3616_v19  ;;  %v6346_v19 = vld [vmem:[#allocation10 + $0x1f8] sm:$0xff] }
 0x260   :  { %v5382_v26 = vpop.eup %5381 }
 0x261   :  { %v5384_v10 = vpop.eup %5383  ;;  %v1011_v0 = vadd.f32 1.0, %v5382_v26  ;;  %v6352_v26 = vld [vmem:[#allocation10 + $0x1d8] sm:$0xff] }
 0x262   :  { %v918_v28 = vadd.f32 1.0, %v5384_v10  ;;  %v6358_v10 = vld [vmem:[#allocation10 + $0x1b0] sm:$0xff] }
 0x263   :  { %5385 = vrcp.f32 %v1011_v0  ;;  %v6360_v0 = vld [vmem:[#allocation10 + $0x1b8] sm:$0xff] }
 0x264   :  { %5387 = vrcp.f32 %v918_v28  ;;  %v6366_v28 = vld [vmem:[#allocation10 + $0x190] sm:$0xff] }
 0x26f   :  { %v1096_v4 = vpop.f32.mrf.mxu0  ;;  %v1184_v14 = vpop.f32.mrf.mxu1 }
 0x270   :  { %v1100_v6 = vadd.f32 %v1096_v4, %v6045_v25  ;;  %v1188_v13 = vadd.f32 %v1184_v14, %v6050_v30  ;;  %v5386_v9 = vpop.eup %5385  ;;  %v6368_v4 = vld [vmem:[#allocation10 + $0x198] sm:$0xff]  ;;  %v6374_v14 = vld [vmem:[#allocation10 + $0x170] sm:$0xff] }
 0x271   :  { %v4443_v23 = vpop.f32.mrf.mxu0  ;;  %v4478_v29 = vpop.f32.mrf.mxu1  ;;  %v1195_v36 = vmul.f32 %v5386_v9, %v6125_v18  ;;  %v6350_v18 = vld [vmem:[#allocation10 + $0x1d0] sm:$0xff] }
 0x272   :  { %5389 = vtanh.f32 %v1100_v6  ;;  %v3618_v24 = vmul.f32 -1.442695, %v1188_v13  ;;  %v5388_v31 = vpop.eup %5387  ;;  %v6376_v6 = vld [vmem:[#allocation10 + $0x178] sm:$0xff]  ;;  %v6382_v13 = vld [vmem:[#allocation10 + $0x150] sm:$0xff] }
 0x273   :  { %v6384_v23 = vld [vmem:[#allocation10 + $0x158] sm:$0xff]  ;;  %v6390_v29 = vld [vmem:[#allocation10 + $0x130] sm:$0xff] }
 0x274   :  { %5391 = vpow2.f32 %v3618_v24  ;;  %v6392_v24 = vld [vmem:[#allocation10 + $0x138] sm:$0xff]  ;;  %v6398_v9 = vld [vmem:[#allocation10 + $0x110] sm:$0xff] }
 0x27f   :  { %v5390_v42 = vpop.eup %5389 }
 0x280   :  { %v1196_v38 = vmul.f32 %v5390_v42, %v5388_v31  ;;  %v6400_v31 = vld [vmem:[#allocation10 + $0x118] sm:$0xff]  ;;  %v6406_v42 = vld [vmem:[#allocation10 + $0xf0] sm:$0xff] }
 0x281   :  { %v5392_v11 = vpop.eup %5391 }
 0x282   :  { %v6339_v21 = vadd.f32 %v1196_v38, %v1195_v36  ;;  %v1192_v5 = vadd.f32 1.0, %v5392_v11  ;;  %v6408_v36 = vld [vmem:[#allocation10 + $0xf8] sm:$0xff]  ;;  %v6414_v38 = vld [vmem:[#allocation10 + $0xd0] sm:$0xff] }
 0x283   :  { %7486 = vst [vmem:[#allocation52_spill] sm:$0xff] %v6414_v38  ;;  %v6416_v11 = vld [vmem:[#allocation10 + $0xd8] sm:$0xff] }
 0x284   :  { %5393 = vtanh.f32 %v6339_v21  ;;  %7487 = vst [vmem:[#allocation53_spill] sm:$0xff] %v6416_v11 }
 0x285   :  { %5395 = vrcp.f32 %v1192_v5  ;;  %v6422_v5 = vld [vmem:[#allocation10 + $0xb0] sm:$0xff] }
 0x286   :  { %7488 = vst [vmem:[#allocation54_spill] sm:$0xff] %v6422_v5 }
 0x291   :  { %v5394_v25 = vpop.eup %5393 }
 0x292   :  { %v5396_v30 = vpop.eup %5395 }
 0x293   :  { %v6342_v16 = vmul.f32 %v5396_v30, %v5394_v25  ;;  %v6424_v25 = vld [vmem:[#allocation10 + $0xb8] sm:$0xff]  ;;  %v6430_v30 = vld [vmem:[#allocation10 + $0x90] sm:$0xff] }
 0x294   :  { %7489 = vst [vmem:[#allocation55_spill] sm:$0xff] %v6424_v25  ;;  %7490 = vst [vmem:[#allocation56_spill] sm:$0xff] %v6430_v30 }
 0x295   :  { %4512 = vmatmul.mubr.f32.vlgmr.msra.gmra.mxu0 %v6342_v16  ;;  %4547 = vmatmul.mubr.f32.vlgmr.msra.gmra.mxu1 %v6342_v16 }
 0x296   :  { %4550 = vmatpush3.msra.mxu0 %v6344_v41  ;;  %4585 = vmatpush3.msra.mxu1 %v6346_v19 }
 0x297   :  { %4551 = vmatprep.subr.mxu0 %v7470_v20  ;;  %4586 = vmatprep.subr.mxu1 %v7470_v20 }
 0x298   :  { %4552 = vmatpush3.msra.mxu0 %v6350_v18  ;;  %4587 = vmatpush3.msra.mxu1 %v6352_v26 }
 0x299   :  { %4553 = vmatprep.subr.mxu0 %v7470_v20  ;;  %4588 = vmatprep.subr.mxu1 %v7470_v20 }
 0x29a   :  { %4554 = vmatpush3.msra.mxu0 %v6358_v10  ;;  %4589 = vmatpush3.msra.mxu1 %v6360_v0 }
 0x29b   :  { %4555 = vmatprep.subr.mxu0 %v7470_v20  ;;  %4590 = vmatprep.subr.mxu1 %v7470_v20 }
 0x29c   :  { %4556 = vmatpush3.msra.mxu0 %v6366_v28  ;;  %4591 = vmatpush3.msra.mxu1 %v6368_v4 }
 0x29d   :  { %4557 = vmatprep.subr.mxu0 %v7470_v20  ;;  %4592 = vmatprep.subr.mxu1 %v7470_v20 }
 0x29e   :  { %4558 = vmatpush3.msra.mxu0 %v6374_v14  ;;  %4593 = vmatpush3.msra.mxu1 %v6376_v6 }
 0x29f   :  { %4559 = vmatprep.subr.mxu0 %v7470_v20  ;;  %4594 = vmatprep.subr.mxu1 %v7470_v20 }
 0x2a0   :  { %4560 = vmatpush3.msra.mxu0 %v6382_v13  ;;  %4595 = vmatpush3.msra.mxu1 %v6384_v23 }
 0x2a1   :  { %4561 = vmatprep.subr.mxu0 %v7470_v20  ;;  %4596 = vmatprep.subr.mxu1 %v7470_v20 }
 0x2a2   :  { %4562 = vmatpush3.msra.mxu0 %v6390_v29  ;;  %4597 = vmatpush3.msra.mxu1 %v6392_v24 }
 0x2a3   :  { %4563 = vmatprep.subr.mxu0 %v7470_v20  ;;  %4598 = vmatprep.subr.mxu1 %v7470_v20 }
 0x2a4   :  { %4564 = vmatpush3.msra.mxu0 %v6398_v9  ;;  %4599 = vmatpush3.msra.mxu1 %v6400_v31 }
 0x2a5   :  { %4565 = vmatprep.subr.mxu0 %v7470_v20  ;;  %4600 = vmatprep.subr.mxu1 %v7470_v20 }
 0x2a6   :  { %4566 = vmatpush3.msra.mxu0 %v6406_v42  ;;  %4601 = vmatpush3.msra.mxu1 %v6408_v36 }
 0x2a7   :  { %4567 = vmatprep.subr.mxu0 %v7470_v20  ;;  %4602 = vmatprep.subr.mxu1 %v7470_v20 }
 0x2a8   :  { %4568 = vmatpush3.msra.mxu0 %v6414_v38  ;;  %4603 = vmatpush3.msra.mxu1 %v6416_v11  ;;  %v6440_v38 = vld [vmem:[#allocation10 + $0x78] sm:$0xff]  ;;  %v6446_v11 = vld [vmem:[#allocation10 + $0x50] sm:$0xff] }
 0x2a9   :  { %4569 = vmatprep.subr.mxu0 %v7470_v20  ;;  %4604 = vmatprep.subr.mxu1 %v7470_v20  ;;  %7492 = vst [vmem:[#allocation58_spill] sm:$0xff] %v6440_v38 }
 0x2aa   :  { %4570 = vmatpush3.msra.mxu0 %v6422_v5  ;;  %4605 = vmatpush3.msra.mxu1 %v6424_v25  ;;  %v6448_v5 = vld [vmem:[#allocation10 + $0x58] sm:$0xff]  ;;  %v6454_v25 = vld [vmem:[#allocation10 + $0x30] sm:$0xff] }
 0x2ab   :  { %4571 = vmatprep.subr.mxu0 %v7470_v20  ;;  %4606 = vmatprep.subr.mxu1 %v7470_v20 }
 0x2ac   :  { %4572 = vmatpush3.msra.mxu0 %v6430_v30  ;;  %4607 = vmatpush3.msra.mxu1 %v6432_v8  ;;  %v6456_v30 = vld [vmem:[#allocation10 + $0x38] sm:$0xff]  ;;  %v6462_v8 = vld [vmem:[#allocation10 + $0x10] sm:$0xff] }
 0x2ad   :  { %4573 = vmatprep.subr.mxu0 %v7470_v20  ;;  %4608 = vmatprep.subr.mxu1 %v7470_v20 }
 0x2ae   :  { %4574 = vmatpush3.msra.mxu0 %v6438_v15  ;;  %4609 = vmatpush3.msra.mxu1 %v6440_v38  ;;  %v6466_v38 = vld [vmem:[#allocation10 + $0x18] sm:$0xff] }
 0x2af   :  { %4575 = vmatprep.subr.mxu0 %v7470_v20  ;;  %4610 = vmatprep.subr.mxu1 %v7470_v20 }
 0x2b0   :  { %4576 = vmatpush3.msra.mxu0 %v6446_v11  ;;  %4611 = vmatpush3.msra.mxu1 %v6448_v5 }
 0x2b1   :  { %4577 = vmatprep.subr.mxu0 %v7470_v20  ;;  %4612 = vmatprep.subr.mxu1 %v7470_v20 }
 0x2b2   :  { %4578 = vmatpush3.msra.mxu0 %v6454_v25  ;;  %4613 = vmatpush3.msra.mxu1 %v6456_v30 }
 0x2b3   :  { %4579 = vmatprep.subr.mxu0 %v7470_v20  ;;  %4614 = vmatprep.subr.mxu1 %v7470_v20 }
 0x2b4   :  { %4580 = vmatpush3.msra.mxu0 %v6462_v8  ;;  %4581 = vmatprep.mubr.msk.f32.mxu0 %vm5614_vm0, %v7470_v20 }
 0x2b5   :  { %4615 = vmatpush3.msra.mxu1 %v6466_v38  ;;  %4616 = vmatprep.mubr.msk.f32.mxu1 %vm5614_vm0, %v7470_v20 }
 0x2b6   :  { %4582 = vmatmul.mubr.f32.vlgmr.msra.gmra.mxu0 %v6342_v16  ;;  %4617 = vmatmul.mubr.f32.vlgmr.msra.gmra.mxu1 %v6342_v16 }
 0x2b7   :  { %4619 = vmatprep.subr.mxu0 %v7470_v20  ;;  %4654 = vmatprep.subr.mxu1 %v7470_v20 }
 0x2b8   :  { %4620 = vmatpush3.msra.mxu0 %v6206_v43  ;;  %4655 = vmatpush3.msra.mxu1 %v6208_v44 }
 0x2b9   :  { %4621 = vmatprep.subr.mxu0 %v7470_v20  ;;  %4656 = vmatprep.subr.mxu1 %v7470_v20 }
 0x2ba   :  { %4622 = vmatpush3.msra.mxu0 %v6214_v45  ;;  %4657 = vmatpush3.msra.mxu1 %v6216_v46 }
 0x2bb   :  { %4623 = vmatprep.subr.mxu0 %v7470_v20  ;;  %4658 = vmatprep.subr.mxu1 %v7470_v20 }
 0x2bc   :  { %4624 = vmatpush3.msra.mxu0 %v6222_v47  ;;  %4659 = vmatpush3.msra.mxu1 %v6224_v48 }
 0x2bd   :  { %4625 = vmatprep.subr.mxu0 %v7470_v20  ;;  %4660 = vmatprep.subr.mxu1 %v7470_v20 }
 0x2be   :  { %4626 = vmatpush3.msra.mxu0 %v6230_v49  ;;  %4661 = vmatpush3.msra.mxu1 %v6232_v50 }
 0x2bf   :  { %4627 = vmatprep.subr.mxu0 %v7470_v20  ;;  %4662 = vmatprep.subr.mxu1 %v7470_v20 }
 0x2c0   :  { %4628 = vmatpush3.msra.mxu0 %v6238_v51  ;;  %4663 = vmatpush3.msra.mxu1 %v6240_v52 }
 0x2c1   :  { %4629 = vmatprep.subr.mxu0 %v7470_v20  ;;  %4664 = vmatprep.subr.mxu1 %v7470_v20 }
 0x2c2   :  { %4630 = vmatpush3.msra.mxu0 %v6246_v53  ;;  %4665 = vmatpush3.msra.mxu1 %v6248_v54 }
 0x2c3   :  { %4631 = vmatprep.subr.mxu0 %v7470_v20  ;;  %4666 = vmatprep.subr.mxu1 %v7470_v20 }
 0x2c4   :  { %4632 = vmatpush3.msra.mxu0 %v6254_v55  ;;  %4667 = vmatpush3.msra.mxu1 %v6256_v56 }
 0x2c5   :  { %4633 = vmatprep.subr.mxu0 %v7470_v20  ;;  %4668 = vmatprep.subr.mxu1 %v7470_v20 }
 0x2c6   :  { %4634 = vmatpush3.msra.mxu0 %v6262_v57  ;;  %4669 = vmatpush3.msra.mxu1 %v6264_v58 }
 0x2c7   :  { %4635 = vmatprep.subr.mxu0 %v7470_v20  ;;  %4670 = vmatprep.subr.mxu1 %v7470_v20 }
 0x2c8   :  { %4636 = vmatpush3.msra.mxu0 %v6270_v59  ;;  %4671 = vmatpush3.msra.mxu1 %v6272_v60 }
 0x2c9   :  { %4637 = vmatprep.subr.mxu0 %v7470_v20  ;;  %4672 = vmatprep.subr.mxu1 %v7470_v20 }
 0x2ca   :  { %4638 = vmatpush3.msra.mxu0 %v6276_v61  ;;  %4673 = vmatpush3.msra.mxu1 %v6278_v62 }
 0x2cb   :  { %4639 = vmatprep.subr.mxu0 %v7470_v20  ;;  %4674 = vmatprep.subr.mxu1 %v7470_v20 }
 0x2cc   :  { %4640 = vmatpush3.msra.mxu0 %v6282_v63  ;;  %4675 = vmatpush3.msra.mxu1 %v6284_v1 }
 0x2cd   :  { %4641 = vmatprep.subr.mxu0 %v7470_v20  ;;  %4676 = vmatprep.subr.mxu1 %v7470_v20 }
 0x2ce   :  { %4642 = vmatpush3.msra.mxu0 %v6290_v2  ;;  %4677 = vmatpush3.msra.mxu1 %v6292_v7 }
 0x2cf   :  { %4643 = vmatprep.subr.mxu0 %v7470_v20  ;;  %4678 = vmatprep.subr.mxu1 %v7470_v20 }
 0x2d0   :  { %4644 = vmatpush3.msra.mxu0 %v6298_v12  ;;  %4679 = vmatpush3.msra.mxu1 %v6300_v17 }
 0x2d1   :  { %4645 = vmatprep.subr.mxu0 %v7470_v20  ;;  %4680 = vmatprep.subr.mxu1 %v7470_v20 }
 0x2d2   :  { %4646 = vmatpush3.msra.mxu0 %v6306_v22  ;;  %4681 = vmatpush3.msra.mxu1 %v6308_v27 }
 0x2d3   :  { %4647 = vmatprep.subr.mxu0 %v7470_v20  ;;  %4682 = vmatprep.subr.mxu1 %v7470_v20 }
 0x2d4   :  { %4648 = vmatpush3.msra.mxu0 %v6314_v32  ;;  %4683 = vmatpush3.msra.mxu1 %v6316_v37 }
 0x2d5   :  { %4649 = vmatprep.subr.mxu0 %v7470_v20  ;;  %4684 = vmatprep.subr.mxu1 %v7470_v20 }
 0x2d6   :  { %4650 = vmatpush3.msra.mxu0 %v6322_v3  ;;  %4685 = vmatpush3.msra.mxu1 %v6324_v33 }
 0x2d7   :  { %4651 = vmatprep.mubr.msk.f32.mxu0 %vm5614_vm0, %v7470_v20  ;;  %4686 = vmatprep.mubr.msk.f32.mxu1 %vm5614_vm0, %v7470_v20 }
 0x2d8   :  { %4689 = vmatprep.subr.mxu0 %v7470_v20  ;;  %4724 = vmatprep.subr.mxu1 %v7470_v20 }
 0x355   :  { %v1291_v16 = vpop.f32.mrf.mxu0  ;;  %v1384_v37 = vpop.f32.mrf.mxu1 }
 0x356   :  { %v1388_v22 = vadd.f32 %v1384_v37, %v6058_v39  ;;  %v1295_v3 = vadd.f32 %v1291_v16, %v6053_v34  ;;  %v7497_v16 = vld [vmem:[#allocation56_spill] sm:$0xff] }
 0x357   :  { %v4513_v32 = vpop.f32.mrf.mxu0  ;;  %v4548_v27 = vpop.f32.mrf.mxu1 }
 0x358   :  { %v3620_v17 = vmul.f32 -1.442695, %v1388_v22  ;;  %v3619_v33 = vmul.f32 -1.442695, %v1295_v3 }
 0x35a   :  { %5397 = vpow2.f32 %v3620_v17 }
 0x35b   :  { %5399 = vpow2.f32 %v3619_v33 }
 0x367   :  { %v5398_v12 = vpop.eup %5397 }
 0x368   :  { %v5400_v7 = vpop.eup %5399  ;;  %v1392_v2 = vadd.f32 1.0, %v5398_v12 }
 0x369   :  { %v1299_v1 = vadd.f32 1.0, %v5400_v7 }
 0x36a   :  { %5401 = vrcp.f32 %v1392_v2 }
 0x36b   :  { %5403 = vrcp.f32 %v1299_v1  ;;  %v7495_v1 = vld [vmem:[#allocation54_spill] sm:$0xff] }
 0x376   :  { %v1477_v63 = vpop.f32.mrf.mxu0  ;;  %v1565_v62 = vpop.f32.mrf.mxu1 }
 0x377   :  { %v1481_v61 = vadd.f32 %v1477_v63, %v6056_v35  ;;  %v1569_v32 = vadd.f32 %v1565_v62, %v6061_v40  ;;  %v5402_v22 = vpop.eup %5401  ;;  %v7494_v63 = vld [vmem:[#allocation53_spill] sm:$0xff] }
 0x378   :  { %v4583_v27 = vpop.f32.mrf.mxu0  ;;  %v4618_v39 = vpop.f32.mrf.mxu1  ;;  %v1576_v3 = vmul.f32 %v5402_v22, %v6339_v21  ;;  %v7496_v21 = vld [vmem:[#allocation55_spill] sm:$0xff] }
 0x379   :  { %5405 = vtanh.f32 %v1481_v61  ;;  %v3621_v34 = vmul.f32 -1.442695, %v1569_v32  ;;  %v5404_v17 = vpop.eup %5403  ;;  %v7493_v61 = vld [vmem:[#allocation52_spill] sm:$0xff]  ;;  %v7498_v32 = vld [vmem:[#allocation57_spill] sm:$0xff]  ;;  %v7499_v27 = vld [vmem:[#allocation58_spill] sm:$0xff] }
 0x37a   :  { %v7514_v39 = vld [vmem:[#allocation21_spill] sm:$0xff]  ;;  %v7515_v22 = vld [vmem:[#allocation19_spill] sm:$0xff] }
 0x37b   :  { %5407 = vpow2.f32 %v3621_v34 }
 0x386   :  { %v5406_v37 = vpop.eup %5405 }
 0x387   :  { %v1577_v12 = vmul.f32 %v5406_v37, %v5404_v17 }
 0x388   :  { %v5408_v7 = vpop.eup %5407 }
 0x389   :  { %v6553_v33 = vadd.f32 %v1577_v12, %v1576_v3  ;;  %v1573_v2 = vadd.f32 1.0, %v5408_v7 }
 0x38b   :  { %5409 = vtanh.f32 %v6553_v33 }
 0x38c   :  { %5411 = vrcp.f32 %v1573_v2 }
 0x398   :  { %v5410_v35 = vpop.eup %5409 }
 0x399   :  { %v5412_v40 = vpop.eup %5411 }
 0x39a   :  { %v6556_v62 = vmul.f32 %v5412_v40, %v5410_v35 }
 0x39c   :  { %4652 = vmatmul.mubr.f32.vlgmr.msra.gmra.mxu0 %v6556_v62  ;;  %4687 = vmatmul.mubr.f32.vlgmr.msra.gmra.mxu1 %v6556_v62 }
 0x39d   :  { %4690 = vmatpush3.msra.mxu0 %v6344_v41  ;;  %4725 = vmatpush3.msra.mxu1 %v6346_v19 }
 0x39e   :  { %4691 = vmatprep.subr.mxu0 %v7470_v20  ;;  %4726 = vmatprep.subr.mxu1 %v7470_v20 }
 0x39f   :  { %4692 = vmatpush3.msra.mxu0 %v6350_v18  ;;  %4727 = vmatpush3.msra.mxu1 %v6352_v26 }
 0x3a0   :  { %4693 = vmatprep.subr.mxu0 %v7470_v20  ;;  %4728 = vmatprep.subr.mxu1 %v7470_v20 }
 0x3a1   :  { %4694 = vmatpush3.msra.mxu0 %v6358_v10  ;;  %4729 = vmatpush3.msra.mxu1 %v6360_v0 }
 0x3a2   :  { %4695 = vmatprep.subr.mxu0 %v7470_v20  ;;  %4730 = vmatprep.subr.mxu1 %v7470_v20 }
 0x3a3   :  { %4696 = vmatpush3.msra.mxu0 %v6366_v28  ;;  %4731 = vmatpush3.msra.mxu1 %v6368_v4 }
 0x3a4   :  { %4697 = vmatprep.subr.mxu0 %v7470_v20  ;;  %4732 = vmatprep.subr.mxu1 %v7470_v20 }
 0x3a5   :  { %4698 = vmatpush3.msra.mxu0 %v6374_v14  ;;  %4733 = vmatpush3.msra.mxu1 %v6376_v6 }
 0x3a6   :  { %4699 = vmatprep.subr.mxu0 %v7470_v20  ;;  %4734 = vmatprep.subr.mxu1 %v7470_v20 }
 0x3a7   :  { %4700 = vmatpush3.msra.mxu0 %v6382_v13  ;;  %4735 = vmatpush3.msra.mxu1 %v6384_v23 }
 0x3a8   :  { %4701 = vmatprep.subr.mxu0 %v7470_v20  ;;  %4736 = vmatprep.subr.mxu1 %v7470_v20 }
 0x3a9   :  { %4702 = vmatpush3.msra.mxu0 %v6390_v29  ;;  %4737 = vmatpush3.msra.mxu1 %v6392_v24 }
 0x3aa   :  { %4703 = vmatprep.subr.mxu0 %v7470_v20  ;;  %4738 = vmatprep.subr.mxu1 %v7470_v20 }
 0x3ab   :  { %4704 = vmatpush3.msra.mxu0 %v6398_v9  ;;  %4739 = vmatpush3.msra.mxu1 %v6400_v31 }
 0x3ac   :  { %4705 = vmatprep.subr.mxu0 %v7470_v20  ;;  %4740 = vmatprep.subr.mxu1 %v7470_v20 }
 0x3ad   :  { %4706 = vmatpush3.msra.mxu0 %v6406_v42  ;;  %4741 = vmatpush3.msra.mxu1 %v6408_v36 }
 0x3ae   :  { %4707 = vmatprep.subr.mxu0 %v7470_v20  ;;  %4742 = vmatprep.subr.mxu1 %v7470_v20 }
 0x3af   :  { %4708 = vmatpush3.msra.mxu0 %v7493_v61  ;;  %4743 = vmatpush3.msra.mxu1 %v7494_v63 }
 0x3b0   :  { %4709 = vmatprep.subr.mxu0 %v7470_v20  ;;  %4744 = vmatprep.subr.mxu1 %v7470_v20 }
 0x3b1   :  { %4710 = vmatpush3.msra.mxu0 %v7495_v1  ;;  %4745 = vmatpush3.msra.mxu1 %v7496_v21 }
 0x3b2   :  { %4711 = vmatprep.subr.mxu0 %v7470_v20  ;;  %4746 = vmatprep.subr.mxu1 %v7470_v20 }
 0x3b3   :  { %4712 = vmatpush3.msra.mxu0 %v7497_v16  ;;  %4747 = vmatpush3.msra.mxu1 %v7498_v32 }
 0x3b4   :  { %4713 = vmatprep.subr.mxu0 %v7470_v20  ;;  %4748 = vmatprep.subr.mxu1 %v7470_v20 }
 0x3b5   :  { %4714 = vmatpush3.msra.mxu0 %v6438_v15  ;;  %4749 = vmatpush3.msra.mxu1 %v7499_v27 }
 0x3b6   :  { %4715 = vmatprep.subr.mxu0 %v7470_v20  ;;  %4750 = vmatprep.subr.mxu1 %v7470_v20 }
 0x3b7   :  { %4716 = vmatpush3.msra.mxu0 %v6446_v11  ;;  %4751 = vmatpush3.msra.mxu1 %v6448_v5 }
 0x3b8   :  { %4717 = vmatprep.subr.mxu0 %v7470_v20  ;;  %4752 = vmatprep.subr.mxu1 %v7470_v20 }
 0x3b9   :  { %4718 = vmatpush3.msra.mxu0 %v6454_v25  ;;  %4753 = vmatpush3.msra.mxu1 %v6456_v30 }
 0x3ba   :  { %4719 = vmatprep.subr.mxu0 %v7470_v20  ;;  %4754 = vmatprep.subr.mxu1 %v7470_v20 }
 0x3bb   :  { %4720 = vmatpush3.msra.mxu0 %v6462_v8  ;;  %4721 = vmatprep.mubr.msk.f32.mxu0 %vm5614_vm0, %v7470_v20 }
 0x3bc   :  { %4755 = vmatpush3.msra.mxu1 %v6466_v38  ;;  %4756 = vmatprep.mubr.msk.f32.mxu1 %vm5614_vm0, %v7470_v20 }
 0x3bd   :  { %4722 = vmatmul.mubr.f32.vlgmr.msra.gmra.mxu0 %v6556_v62  ;;  %4757 = vmatmul.mubr.f32.vlgmr.msra.gmra.mxu1 %v6556_v62 }
 0x3be   :  { %4759 = vmatprep.subr.mxu0 %v7470_v20  ;;  %4794 = vmatprep.subr.mxu1 %v7470_v20 }
 0x3bf   :  { %4760 = vmatpush3.msra.mxu0 %v6206_v43  ;;  %4795 = vmatpush3.msra.mxu1 %v6208_v44  ;;  %v7500_v43 = vld [vmem:[#allocation18_spill] sm:$0xff]  ;;  %v7501_v44 = vld [vmem:[#allocation39_spill] sm:$0xff] }
 0x3c0   :  { %4761 = vmatprep.subr.mxu0 %v7470_v20  ;;  %4796 = vmatprep.subr.mxu1 %v7470_v20 }
 0x3c1   :  { %4762 = vmatpush3.msra.mxu0 %v6214_v45  ;;  %4797 = vmatpush3.msra.mxu1 %v6216_v46  ;;  %v7502_v45 = vld [vmem:[#allocation40_spill] sm:$0xff]  ;;  %v7503_v46 = vld [vmem:[#allocation41_spill] sm:$0xff] }
 0x3c2   :  { %4763 = vmatprep.subr.mxu0 %v7470_v20  ;;  %4798 = vmatprep.subr.mxu1 %v7470_v20 }
 0x3c3   :  { %4764 = vmatpush3.msra.mxu0 %v6222_v47  ;;  %4799 = vmatpush3.msra.mxu1 %v6224_v48  ;;  %v7504_v47 = vld [vmem:[#allocation42_spill] sm:$0xff]  ;;  %v7505_v48 = vld [vmem:[#allocation43_spill] sm:$0xff] }
 0x3c4   :  { %4765 = vmatprep.subr.mxu0 %v7470_v20  ;;  %4800 = vmatprep.subr.mxu1 %v7470_v20 }
 0x3c5   :  { %4766 = vmatpush3.msra.mxu0 %v6230_v49  ;;  %4801 = vmatpush3.msra.mxu1 %v6232_v50  ;;  %v7506_v49 = vld [vmem:[#allocation44_spill] sm:$0xff]  ;;  %v7507_v50 = vld [vmem:[#allocation45_spill] sm:$0xff] }
 0x3c6   :  { %4767 = vmatprep.subr.mxu0 %v7470_v20  ;;  %4802 = vmatprep.subr.mxu1 %v7470_v20 }
 0x3c7   :  { %4768 = vmatpush3.msra.mxu0 %v6238_v51  ;;  %4803 = vmatpush3.msra.mxu1 %v6240_v52  ;;  %v7508_v51 = vld [vmem:[#allocation46_spill] sm:$0xff]  ;;  %v7509_v52 = vld [vmem:[#allocation47_spill] sm:$0xff] }
 0x3c8   :  { %4769 = vmatprep.subr.mxu0 %v7470_v20  ;;  %4804 = vmatprep.subr.mxu1 %v7470_v20 }
 0x3c9   :  { %4770 = vmatpush3.msra.mxu0 %v6246_v53  ;;  %4805 = vmatpush3.msra.mxu1 %v6248_v54  ;;  %v7510_v53 = vld [vmem:[#allocation48_spill] sm:$0xff]  ;;  %v7511_v54 = vld [vmem:[#allocation49_spill] sm:$0xff] }
 0x3ca   :  { %4771 = vmatprep.subr.mxu0 %v7470_v20  ;;  %4806 = vmatprep.subr.mxu1 %v7470_v20 }
 0x3cb   :  { %4772 = vmatpush3.msra.mxu0 %v6254_v55  ;;  %4807 = vmatpush3.msra.mxu1 %v6256_v56  ;;  %v7512_v55 = vld [vmem:[#allocation50_spill] sm:$0xff]  ;;  %v7513_v56 = vld [vmem:[#allocation51_spill] sm:$0xff] }
 0x3cc   :  { %4773 = vmatprep.subr.mxu0 %v7470_v20  ;;  %4808 = vmatprep.subr.mxu1 %v7470_v20 }
 0x3cd   :  { %4774 = vmatpush3.msra.mxu0 %v6262_v57  ;;  %4809 = vmatpush3.msra.mxu1 %v6264_v58 }
 0x3ce   :  { %4775 = vmatprep.subr.mxu0 %v7470_v20  ;;  %4810 = vmatprep.subr.mxu1 %v7470_v20 }
 0x3cf   :  { %4776 = vmatpush3.msra.mxu0 %v6270_v59  ;;  %4811 = vmatpush3.msra.mxu1 %v6272_v60 }
 0x3d0   :  { %4777 = vmatprep.subr.mxu0 %v7470_v20  ;;  %4812 = vmatprep.subr.mxu1 %v7470_v20 }
 0x3d1   :  { %4778 = vmatpush3.msra.mxu0 %v7500_v43  ;;  %4813 = vmatpush3.msra.mxu1 %v7501_v44  ;;  %v7516_v43 = vld [vmem:[#allocation20_spill] sm:$0xff] }
 0x3d2   :  { %4779 = vmatprep.subr.mxu0 %v7470_v20  ;;  %4814 = vmatprep.subr.mxu1 %v7470_v20 }
 0x3d3   :  { %4780 = vmatpush3.msra.mxu0 %v7502_v45  ;;  %4815 = vmatpush3.msra.mxu1 %v7503_v46  ;;  %v7517_v45 = vld [vmem:[#allocation22_spill] sm:$0xff] }
 0x3d4   :  { %4781 = vmatprep.subr.mxu0 %v7470_v20  ;;  %4816 = vmatprep.subr.mxu1 %v7470_v20 }
 0x3d5   :  { %4782 = vmatpush3.msra.mxu0 %v7504_v47  ;;  %4817 = vmatpush3.msra.mxu1 %v7505_v48 }
 0x3d6   :  { %4783 = vmatprep.subr.mxu0 %v7470_v20  ;;  %4818 = vmatprep.subr.mxu1 %v7470_v20 }
 0x3d7   :  { %4784 = vmatpush3.msra.mxu0 %v7506_v49  ;;  %4819 = vmatpush3.msra.mxu1 %v7507_v50 }
 0x3d8   :  { %4785 = vmatprep.subr.mxu0 %v7470_v20  ;;  %4820 = vmatprep.subr.mxu1 %v7470_v20 }
 0x3d9   :  { %4786 = vmatpush3.msra.mxu0 %v7508_v51  ;;  %4821 = vmatpush3.msra.mxu1 %v7509_v52 }
 0x3da   :  { %4787 = vmatprep.subr.mxu0 %v7470_v20  ;;  %4822 = vmatprep.subr.mxu1 %v7470_v20 }
 0x3db   :  { %4788 = vmatpush3.msra.mxu0 %v7510_v53  ;;  %4823 = vmatpush3.msra.mxu1 %v7511_v54 }
 0x3dc   :  { %4789 = vmatprep.subr.mxu0 %v7470_v20  ;;  %4824 = vmatprep.subr.mxu1 %v7470_v20 }
 0x3dd   :  { %4790 = vmatpush3.msra.mxu0 %v7512_v55  ;;  %4825 = vmatpush3.msra.mxu1 %v7513_v56 }
 0x3de   :  { %4791 = vmatprep.mubr.msk.f32.mxu0 %vm5614_vm0, %v7470_v20  ;;  %4826 = vmatprep.mubr.msk.f32.mxu1 %vm5614_vm0, %v7470_v20 }
 0x3df   :  { %4829 = vmatprep.subr.mxu0 %v7470_v20  ;;  %4864 = vmatprep.subr.mxu1 %v7470_v20 }
 0x45c   :  { %v1672_v57 = vpop.f32.mrf.mxu0  ;;  %v1765_v58 = vpop.f32.mrf.mxu1 }
 0x45d   :  { %v1769_v34 = vadd.f32 %v1765_v58, %v7514_v39  ;;  %v1676_v17 = vadd.f32 %v1672_v57, %v7515_v22 }
 0x45e   :  { %v4653_v59 = vpop.f32.mrf.mxu0  ;;  %v4688_v60 = vpop.f32.mrf.mxu1 }
 0x45f   :  { %v3623_v37 = vmul.f32 -1.442695, %v1769_v34  ;;  %v3622_v3 = vmul.f32 -1.442695, %v1676_v17  ;;  %v7536_v17 = vld [vmem:[#allocation25_spill] sm:$0xff] }
 0x461   :  { %5413 = vpow2.f32 %v3623_v37 }
 0x462   :  { %5415 = vpow2.f32 %v3622_v3  ;;  %v7537_v3 = vld [vmem:[#allocation23_spill] sm:$0xff] }
 0x46e   :  { %v5414_v12 = vpop.eup %5413 }
 0x46f   :  { %v5416_v7 = vpop.eup %5415  ;;  %v1773_v2 = vadd.f32 1.0, %v5414_v12 }
 0x470   :  { %v1680_v35 = vadd.f32 1.0, %v5416_v7 }
 0x471   :  { %5417 = vrcp.f32 %v1773_v2 }
 0x472   :  { %5419 = vrcp.f32 %v1680_v35 }
 0x47d   :  { %v1858_v40 = vpop.f32.mrf.mxu0  ;;  %v1946_v62 = vpop.f32.mrf.mxu1 }
 0x47e   :  { %v1862_v44 = vadd.f32 %v1858_v40, %v7516_v43  ;;  %v1950_v46 = vadd.f32 %v1946_v62, %v7517_v45  ;;  %v5418_v50 = vpop.eup %5417 }
 0x47f   :  { %v4723_v47 = vpop.f32.mrf.mxu0  ;;  %v4758_v48 = vpop.f32.mrf.mxu1  ;;  %v1957_v53 = vmul.f32 %v5418_v50, %v6553_v33  ;;  %v6878_v33 = vld [vmem:[#allocation10 + $0x68] sm:$0xff] }
 0x480   :  { %5421 = vtanh.f32 %v1862_v44  ;;  %v3624_v49 = vmul.f32 -1.442695, %v1950_v46  ;;  %v5420_v51 = vpop.eup %5419  ;;  %7529 = vst [vmem:[#allocation42_spill] sm:$0xff] %v6878_v33  ;;  %v7538_v46 = vld [vmem:[#allocation24_spill] sm:$0xff]  ;;  %v7539_v48 = vld [vmem:[#allocation26_spill] sm:$0xff] }
 0x482   :  { %5423 = vpow2.f32 %v3624_v49 }
 0x48d   :  { %v5422_v52 = vpop.eup %5421 }
 0x48e   :  { %v1958_v54 = vmul.f32 %v5422_v52, %v5420_v51 }
 0x48f   :  { %v5424_v55 = vpop.eup %5423 }
 0x490   :  { %v6703_v56 = vadd.f32 %v1958_v54, %v1957_v53  ;;  %v1954_v57 = vadd.f32 1.0, %v5424_v55 }
 0x492   :  { %5425 = vtanh.f32 %v6703_v56 }
 0x493   :  { %5427 = vrcp.f32 %v1954_v57 }
 0x49f   :  { %v5426_v58 = vpop.eup %5425 }
 0x4a0   :  { %v5428_v59 = vpop.eup %5427 }
 0x4a1   :  { %v6706_v60 = vmul.f32 %v5428_v59, %v5426_v58 }
 0x4a3   :  { %4792 = vmatmul.mubr.f32.vlgmr.msra.gmra.mxu0 %v6706_v60  ;;  %4827 = vmatmul.mubr.f32.vlgmr.msra.gmra.mxu1 %v6706_v60 }
 0x4a4   :  { %4830 = vmatpush3.msra.mxu0 %v6344_v41  ;;  %4865 = vmatpush3.msra.mxu1 %v6346_v19  ;;  %v6792_v41 = vld [vmem:[#allocation10 + $0x1c0] sm:$0xff]  ;;  %v6794_v19 = vld [vmem:[#allocation10 + $0x1c8] sm:$0xff] }
 0x4a5   :  { %4831 = vmatprep.subr.mxu0 %v7470_v20  ;;  %4866 = vmatprep.subr.mxu1 %v7470_v20 }
 0x4a6   :  { %4832 = vmatpush3.msra.mxu0 %v6350_v18  ;;  %4867 = vmatpush3.msra.mxu1 %v6352_v26  ;;  %v6800_v18 = vld [vmem:[#allocation10 + $0x1a0] sm:$0xff]  ;;  %v6802_v26 = vld [vmem:[#allocation10 + $0x1a8] sm:$0xff] }
 0x4a7   :  { %4833 = vmatprep.subr.mxu0 %v7470_v20  ;;  %4868 = vmatprep.subr.mxu1 %v7470_v20 }
 0x4a8   :  { %4834 = vmatpush3.msra.mxu0 %v6358_v10  ;;  %4869 = vmatpush3.msra.mxu1 %v6360_v0  ;;  %v6808_v10 = vld [vmem:[#allocation10 + $0x180] sm:$0xff]  ;;  %v6810_v0 = vld [vmem:[#allocation10 + $0x188] sm:$0xff] }
 0x4a9   :  { %4835 = vmatprep.subr.mxu0 %v7470_v20  ;;  %4870 = vmatprep.subr.mxu1 %v7470_v20 }
 0x4aa   :  { %4836 = vmatpush3.msra.mxu0 %v6366_v28  ;;  %4871 = vmatpush3.msra.mxu1 %v6368_v4  ;;  %v6816_v28 = vld [vmem:[#allocation10 + $0x160] sm:$0xff]  ;;  %v6818_v4 = vld [vmem:[#allocation10 + $0x168] sm:$0xff] }
 0x4ab   :  { %4837 = vmatprep.subr.mxu0 %v7470_v20  ;;  %4872 = vmatprep.subr.mxu1 %v7470_v20 }
 0x4ac   :  { %4838 = vmatpush3.msra.mxu0 %v6374_v14  ;;  %4873 = vmatpush3.msra.mxu1 %v6376_v6  ;;  %v6824_v14 = vld [vmem:[#allocation10 + $0x140] sm:$0xff]  ;;  %v6826_v6 = vld [vmem:[#allocation10 + $0x148] sm:$0xff] }
 0x4ad   :  { %4839 = vmatprep.subr.mxu0 %v7470_v20  ;;  %4874 = vmatprep.subr.mxu1 %v7470_v20 }
 0x4ae   :  { %4840 = vmatpush3.msra.mxu0 %v6382_v13  ;;  %4875 = vmatpush3.msra.mxu1 %v6384_v23  ;;  %v6832_v13 = vld [vmem:[#allocation10 + $0x120] sm:$0xff]  ;;  %v6834_v23 = vld [vmem:[#allocation10 + $0x128] sm:$0xff] }
 0x4af   :  { %4841 = vmatprep.subr.mxu0 %v7470_v20  ;;  %4876 = vmatprep.subr.mxu1 %v7470_v20 }
 0x4b0   :  { %4842 = vmatpush3.msra.mxu0 %v6390_v29  ;;  %4877 = vmatpush3.msra.mxu1 %v6392_v24  ;;  %v6840_v29 = vld [vmem:[#allocation10 + $0x100] sm:$0xff]  ;;  %v6842_v24 = vld [vmem:[#allocation10 + $0x108] sm:$0xff] }
 0x4b1   :  { %4843 = vmatprep.subr.mxu0 %v7470_v20  ;;  %4878 = vmatprep.subr.mxu1 %v7470_v20  ;;  %7518 = vst [vmem:[#allocation52_spill] sm:$0xff] %v6840_v29  ;;  %7519 = vst [vmem:[#allocation53_spill] sm:$0xff] %v6842_v24 }
 0x4b2   :  { %4844 = vmatpush3.msra.mxu0 %v6398_v9  ;;  %4879 = vmatpush3.msra.mxu1 %v6400_v31  ;;  %v6848_v9 = vld [vmem:[#allocation10 + $0xe0] sm:$0xff]  ;;  %v6850_v31 = vld [vmem:[#allocation10 + $0xe8] sm:$0xff] }
 0x4b3   :  { %4845 = vmatprep.subr.mxu0 %v7470_v20  ;;  %4880 = vmatprep.subr.mxu1 %v7470_v20  ;;  %7520 = vst [vmem:[#allocation54_spill] sm:$0xff] %v6848_v9  ;;  %7521 = vst [vmem:[#allocation55_spill] sm:$0xff] %v6850_v31 }
 0x4b4   :  { %4846 = vmatpush3.msra.mxu0 %v6406_v42  ;;  %4881 = vmatpush3.msra.mxu1 %v6408_v36  ;;  %v6854_v42 = vld [vmem:[#allocation10 + $0xc0] sm:$0xff]  ;;  %v6856_v36 = vld [vmem:[#allocation10 + $0xc8] sm:$0xff] }
 0x4b5   :  { %4847 = vmatprep.subr.mxu0 %v7470_v20  ;;  %4882 = vmatprep.subr.mxu1 %v7470_v20  ;;  %7522 = vst [vmem:[#allocation56_spill] sm:$0xff] %v6854_v42  ;;  %7523 = vst [vmem:[#allocation57_spill] sm:$0xff] %v6856_v36 }
 0x4b6   :  { %4848 = vmatpush3.msra.mxu0 %v7493_v61  ;;  %4883 = vmatpush3.msra.mxu1 %v7494_v63  ;;  %v6884_v61 = vld [vmem:[#allocation10 + $0x40] sm:$0xff]  ;;  %v6886_v63 = vld [vmem:[#allocation10 + $0x48] sm:$0xff] }
 0x4b7   :  { %4849 = vmatprep.subr.mxu0 %v7470_v20  ;;  %4884 = vmatprep.subr.mxu1 %v7470_v20  ;;  %7530 = vst [vmem:[#allocation43_spill] sm:$0xff] %v6884_v61  ;;  %7531 = vst [vmem:[#allocation44_spill] sm:$0xff] %v6886_v63 }
 0x4b8   :  { %4850 = vmatpush3.msra.mxu0 %v7495_v1  ;;  %4885 = vmatpush3.msra.mxu1 %v7496_v21  ;;  %v6892_v1 = vld [vmem:[#allocation10 + $0x20] sm:$0xff]  ;;  %v6894_v21 = vld [vmem:[#allocation10 + $0x28] sm:$0xff] }
 0x4b9   :  { %4851 = vmatprep.subr.mxu0 %v7470_v20  ;;  %4886 = vmatprep.subr.mxu1 %v7470_v20  ;;  %7532 = vst [vmem:[#allocation45_spill] sm:$0xff] %v6892_v1  ;;  %7533 = vst [vmem:[#allocation46_spill] sm:$0xff] %v6894_v21 }
 0x4ba   :  { %4852 = vmatpush3.msra.mxu0 %v7497_v16  ;;  %4887 = vmatpush3.msra.mxu1 %v7498_v32  ;;  %v6900_v16 = vld [vmem:[#allocation10] sm:$0xff]  ;;  %v6902_v32 = vld [vmem:[#allocation10 + $0x8] sm:$0xff] }
 0x4bb   :  { %4853 = vmatprep.subr.mxu0 %v7470_v20  ;;  %4888 = vmatprep.subr.mxu1 %v7470_v20  ;;  %7534 = vst [vmem:[#allocation47_spill] sm:$0xff] %v6900_v16  ;;  %7535 = vst [vmem:[#allocation48_spill] sm:$0xff] %v6902_v32 }
 0x4bc   :  { %4854 = vmatpush3.msra.mxu0 %v6438_v15  ;;  %4889 = vmatpush3.msra.mxu1 %v7499_v27  ;;  %v6786_v15 = vld [vmem:[#allocation10 + $0x1e8] sm:$0xff] }
 0x4bd   :  { %4855 = vmatprep.subr.mxu0 %v7470_v20  ;;  %4890 = vmatprep.subr.mxu1 %v7470_v20 }
 0x4be   :  { %4856 = vmatpush3.msra.mxu0 %v6446_v11  ;;  %4891 = vmatpush3.msra.mxu1 %v6448_v5  ;;  %v6862_v11 = vld [vmem:[#allocation10 + $0xa8] sm:$0xff]  ;;  %v6868_v5 = vld [vmem:[#allocation10 + $0x80] sm:$0xff] }
 0x4bf   :  { %4857 = vmatprep.subr.mxu0 %v7470_v20  ;;  %4892 = vmatprep.subr.mxu1 %v7470_v20  ;;  %7525 = vst [vmem:[#allocation18_spill] sm:$0xff] %v6862_v11  ;;  %7526 = vst [vmem:[#allocation39_spill] sm:$0xff] %v6868_v5 }
 0x4c0   :  { %4858 = vmatpush3.msra.mxu0 %v6454_v25  ;;  %4893 = vmatpush3.msra.mxu1 %v6456_v30  ;;  %v6870_v25 = vld [vmem:[#allocation10 + $0x88] sm:$0xff]  ;;  %v6876_v30 = vld [vmem:[#allocation10 + $0x60] sm:$0xff] }
 0x4c1   :  { %4859 = vmatprep.subr.mxu0 %v7470_v20  ;;  %4894 = vmatprep.subr.mxu1 %v7470_v20  ;;  %7527 = vst [vmem:[#allocation40_spill] sm:$0xff] %v6870_v25  ;;  %7528 = vst [vmem:[#allocation41_spill] sm:$0xff] %v6876_v30 }
 0x4c2   :  { %4860 = vmatpush3.msra.mxu0 %v6462_v8  ;;  %4861 = vmatprep.mubr.msk.f32.mxu0 %vm5614_vm0, %v7470_v20  ;;  %v6784_v8 = vld [vmem:[#allocation10 + $0x1e0] sm:$0xff] }
 0x4c3   :  { %4895 = vmatpush3.msra.mxu1 %v6466_v38  ;;  %4896 = vmatprep.mubr.msk.f32.mxu1 %vm5614_vm0, %v7470_v20  ;;  %v6860_v38 = vld [vmem:[#allocation10 + $0xa0] sm:$0xff] }
 0x4c4   :  { %4862 = vmatmul.mubr.f32.vlgmr.msra.gmra.mxu0 %v6706_v60  ;;  %4897 = vmatmul.mubr.f32.vlgmr.msra.gmra.mxu1 %v6706_v60  ;;  %7524 = vst [vmem:[#allocation58_spill] sm:$0xff] %v6860_v38 }
 0x4c5   :  { %4899 = vmatprep.subr.mxu0 %v7470_v20  ;;  %4934 = vmatprep.subr.mxu1 %v7470_v20 }
 0x4c6   :  { %4931 = vmatprep.mubr.msk.f32.mxu0 %vm5614_vm0, %v7470_v20  ;;  %4966 = vmatprep.mubr.msk.f32.mxu1 %vm5614_vm0, %v7470_v20 }
 0x4c7   :  { %4900 = vmatpush3.msra.mxu0 %v6784_v8  ;;  %4935 = vmatpush3.msra.mxu1 %v6786_v15 }
 0x4c8   :  { %4901 = vmatprep.subr.mxu0 %v7470_v20  ;;  %4936 = vmatprep.subr.mxu1 %v7470_v20 }
 0x4c9   :  { %4902 = vmatpush3.msra.mxu0 %v6792_v41  ;;  %4937 = vmatpush3.msra.mxu1 %v6794_v19 }
 0x4ca   :  { %4903 = vmatprep.subr.mxu0 %v7470_v20  ;;  %4938 = vmatprep.subr.mxu1 %v7470_v20 }
 0x4cb   :  { %4904 = vmatpush3.msra.mxu0 %v6800_v18  ;;  %4939 = vmatpush3.msra.mxu1 %v6802_v26 }
 0x4cc   :  { %4905 = vmatprep.subr.mxu0 %v7470_v20  ;;  %4940 = vmatprep.subr.mxu1 %v7470_v20 }
 0x4cd   :  { %4906 = vmatpush3.msra.mxu0 %v6808_v10  ;;  %4941 = vmatpush3.msra.mxu1 %v6810_v0 }
 0x4ce   :  { %4907 = vmatprep.subr.mxu0 %v7470_v20  ;;  %4942 = vmatprep.subr.mxu1 %v7470_v20 }
 0x4cf   :  { %4908 = vmatpush3.msra.mxu0 %v6816_v28  ;;  %4943 = vmatpush3.msra.mxu1 %v6818_v4 }
 0x4d0   :  { %4909 = vmatprep.subr.mxu0 %v7470_v20  ;;  %4944 = vmatprep.subr.mxu1 %v7470_v20 }
 0x4d1   :  { %4910 = vmatpush3.msra.mxu0 %v6824_v14  ;;  %4945 = vmatpush3.msra.mxu1 %v6826_v6 }
 0x4d2   :  { %4911 = vmatprep.subr.mxu0 %v7470_v20  ;;  %4946 = vmatprep.subr.mxu1 %v7470_v20 }
 0x4d3   :  { %4912 = vmatpush3.msra.mxu0 %v6832_v13  ;;  %4947 = vmatpush3.msra.mxu1 %v6834_v23 }
 0x4d4   :  { %4913 = vmatprep.subr.mxu0 %v7470_v20  ;;  %4948 = vmatprep.subr.mxu1 %v7470_v20 }
 0x4d5   :  { %4914 = vmatpush3.msra.mxu0 %v6840_v29  ;;  %4949 = vmatpush3.msra.mxu1 %v6842_v24 }
 0x4d6   :  { %4915 = vmatprep.subr.mxu0 %v7470_v20  ;;  %4950 = vmatprep.subr.mxu1 %v7470_v20 }
 0x4d7   :  { %4916 = vmatpush3.msra.mxu0 %v6848_v9  ;;  %4951 = vmatpush3.msra.mxu1 %v6850_v31 }
 0x4d8   :  { %4917 = vmatprep.subr.mxu0 %v7470_v20  ;;  %4952 = vmatprep.subr.mxu1 %v7470_v20 }
 0x4d9   :  { %4918 = vmatpush3.msra.mxu0 %v6854_v42  ;;  %4953 = vmatpush3.msra.mxu1 %v6856_v36 }
 0x4da   :  { %4919 = vmatprep.subr.mxu0 %v7470_v20  ;;  %4954 = vmatprep.subr.mxu1 %v7470_v20 }
 0x4db   :  { %4920 = vmatpush3.msra.mxu0 %v6860_v38  ;;  %4955 = vmatpush3.msra.mxu1 %v6862_v11 }
 0x4dc   :  { %4921 = vmatprep.subr.mxu0 %v7470_v20  ;;  %4956 = vmatprep.subr.mxu1 %v7470_v20 }
 0x4dd   :  { %4922 = vmatpush3.msra.mxu0 %v6868_v5  ;;  %4957 = vmatpush3.msra.mxu1 %v6870_v25 }
 0x4de   :  { %4923 = vmatprep.subr.mxu0 %v7470_v20  ;;  %4958 = vmatprep.subr.mxu1 %v7470_v20 }
 0x4df   :  { %4924 = vmatpush3.msra.mxu0 %v6876_v30  ;;  %4959 = vmatpush3.msra.mxu1 %v6878_v33 }
 0x4e0   :  { %4925 = vmatprep.subr.mxu0 %v7470_v20  ;;  %4960 = vmatprep.subr.mxu1 %v7470_v20 }
 0x4e1   :  { %4926 = vmatpush3.msra.mxu0 %v6884_v61  ;;  %4961 = vmatpush3.msra.mxu1 %v6886_v63 }
 0x4e2   :  { %4927 = vmatprep.subr.mxu0 %v7470_v20  ;;  %4962 = vmatprep.subr.mxu1 %v7470_v20 }
 0x4e3   :  { %4928 = vmatpush3.msra.mxu0 %v6892_v1  ;;  %4963 = vmatpush3.msra.mxu1 %v6894_v21 }
 0x4e4   :  { %4929 = vmatprep.subr.mxu0 %v7470_v20  ;;  %4964 = vmatprep.subr.mxu1 %v7470_v20 }
 0x4e5   :  { %4930 = vmatpush3.msra.mxu0 %v6900_v16  ;;  %4965 = vmatpush3.msra.mxu1 %v6902_v32 }
 0x4e6   :  { %4969 = vmatprep.subr.mxu0 %v7470_v20  ;;  %5004 = vmatprep.subr.mxu1 %v7470_v20 }
 0x563   :  { %v2053_v27 = vpop.f32.mrf.mxu0  ;;  %v2146_v39 = vpop.f32.mrf.mxu1 }
 0x564   :  { %v2150_v37 = vadd.f32 %v2146_v39, %v7536_v17  ;;  %v2057_v12 = vadd.f32 %v2053_v27, %v7537_v3  ;;  %v6922_v17 = vld [vmem:[#allocation10 + $0x1f0] sm:$0xff]  ;;  %v6930_v3 = vld [vmem:[#allocation10 + $0x1d8] sm:$0xff] }
 0x565   :  { %v4793_v34 = vpop.f32.mrf.mxu0  ;;  %v4828_v22 = vpop.f32.mrf.mxu1 }
 0x566   :  { %v3626_v7 = vmul.f32 -1.442695, %v2150_v37  ;;  %v3625_v2 = vmul.f32 -1.442695, %v2057_v12  ;;  %v6924_v37 = vld [vmem:[#allocation10 + $0x1f8] sm:$0xff]  ;;  %v6936_v12 = vld [vmem:[#allocation10 + $0x1b0] sm:$0xff] }
 0x568   :  { %5429 = vpow2.f32 %v3626_v7  ;;  %v6938_v7 = vld [vmem:[#allocation10 + $0x1b8] sm:$0xff] }
 0x569   :  { %5431 = vpow2.f32 %v3625_v2  ;;  %v6944_v2 = vld [vmem:[#allocation10 + $0x190] sm:$0xff] }
 0x575   :  { %v5430_v35 = vpop.eup %5429 }
 0x576   :  { %v5432_v40 = vpop.eup %5431  ;;  %v2154_v62 = vadd.f32 1.0, %v5430_v35  ;;  %v6946_v35 = vld [vmem:[#allocation10 + $0x198] sm:$0xff] }
 0x577   :  { %v2061_v43 = vadd.f32 1.0, %v5432_v40  ;;  %v6952_v40 = vld [vmem:[#allocation10 + $0x170] sm:$0xff] }
 0x578   :  { %5433 = vrcp.f32 %v2154_v62  ;;  %v6954_v62 = vld [vmem:[#allocation10 + $0x178] sm:$0xff] }
 0x579   :  { %5435 = vrcp.f32 %v2061_v43  ;;  %v6960_v43 = vld [vmem:[#allocation10 + $0x150] sm:$0xff] }
 0x584   :  { %v2239_v44 = vpop.f32.mrf.mxu0  ;;  %v2327_v45 = vpop.f32.mrf.mxu1 }
 0x585   :  { %v2243_v47 = vadd.f32 %v2239_v44, %v7538_v46  ;;  %v2331_v49 = vadd.f32 %v2327_v45, %v7539_v48  ;;  %v5434_v53 = vpop.eup %5433  ;;  %v6962_v44 = vld [vmem:[#allocation10 + $0x158] sm:$0xff]  ;;  %v6968_v45 = vld [vmem:[#allocation10 + $0x130] sm:$0xff] }
 0x586   :  { %v4863_v50 = vpop.f32.mrf.mxu0  ;;  %v4898_v51 = vpop.f32.mrf.mxu1  ;;  %v2338_v57 = vmul.f32 %v5434_v53, %v6703_v56  ;;  %v6928_v56 = vld [vmem:[#allocation10 + $0x1d0] sm:$0xff]  ;;  %v6970_v46 = vld [vmem:[#allocation10 + $0x138] sm:$0xff] }
 0x587   :  { %5437 = vtanh.f32 %v2243_v47  ;;  %v3627_v52 = vmul.f32 -1.442695, %v2331_v49  ;;  %v5436_v54 = vpop.eup %5435  ;;  %v6976_v47 = vld [vmem:[#allocation10 + $0x110] sm:$0xff]  ;;  %v6978_v48 = vld [vmem:[#allocation10 + $0x118] sm:$0xff] }
 0x588   :  { %v6984_v49 = vld [vmem:[#allocation10 + $0xf0] sm:$0xff]  ;;  %v6986_v50 = vld [vmem:[#allocation10 + $0xf8] sm:$0xff] }
 0x589   :  { %5439 = vpow2.f32 %v3627_v52  ;;  %v6992_v51 = vld [vmem:[#allocation10 + $0xd0] sm:$0xff]  ;;  %v6994_v52 = vld [vmem:[#allocation10 + $0xd8] sm:$0xff] }
 0x58a   :  { %v7000_v53 = vld [vmem:[#allocation10 + $0xb0] sm:$0xff] }
 0x594   :  { %v5438_v55 = vpop.eup %5437 }
 0x595   :  { %v2339_v58 = vmul.f32 %v5438_v55, %v5436_v54  ;;  %v7002_v54 = vld [vmem:[#allocation10 + $0xb8] sm:$0xff]  ;;  %v7008_v55 = vld [vmem:[#allocation10 + $0x90] sm:$0xff] }
 0x596   :  { %v5440_v59 = vpop.eup %5439  ;;  %7540 = vst [vmem:[#allocation49_spill] sm:$0xff] %v7008_v55 }
 0x597   :  { %v6917_v60 = vadd.f32 %v2339_v58, %v2338_v57  ;;  %v2335_v27 = vadd.f32 1.0, %v5440_v59  ;;  %v7010_v57 = vld [vmem:[#allocation10 + $0x98] sm:$0xff]  ;;  %v7016_v58 = vld [vmem:[#allocation10 + $0x70] sm:$0xff] }
 0x598   :  { %7541 = vst [vmem:[#allocation50_spill] sm:$0xff] %v7010_v57  ;;  %v7018_v59 = vld [vmem:[#allocation10 + $0x78] sm:$0xff] }
 0x599   :  { %5441 = vtanh.f32 %v6917_v60  ;;  %7542 = vst [vmem:[#allocation51_spill] sm:$0xff] %v7018_v59 }
 0x59a   :  { %5443 = vrcp.f32 %v2335_v27  ;;  %v7024_v27 = vld [vmem:[#allocation10 + $0x50] sm:$0xff] }
 0x5a6   :  { %v5442_v39 = vpop.eup %5441 }
 0x5a7   :  { %v5444_v34 = vpop.eup %5443 }
 0x5a8   :  { %v6920_v22 = vmul.f32 %v5444_v34, %v5442_v39  ;;  %v7026_v39 = vld [vmem:[#allocation10 + $0x58] sm:$0xff]  ;;  %v7032_v34 = vld [vmem:[#allocation10 + $0x30] sm:$0xff] }
 0x5aa   :  { %4932 = vmatmul.mubr.f32.vlgmr.msra.gmra.mxu0 %v6920_v22  ;;  %4967 = vmatmul.mubr.f32.vlgmr.msra.gmra.mxu1 %v6920_v22 }
 0x5ab   :  { %4970 = vmatpush3.msra.mxu0 %v6922_v17  ;;  %5005 = vmatpush3.msra.mxu1 %v6924_v37 }
 0x5ac   :  { %4971 = vmatprep.subr.mxu0 %v7470_v20  ;;  %5006 = vmatprep.subr.mxu1 %v7470_v20 }
 0x5ad   :  { %4972 = vmatpush3.msra.mxu0 %v6928_v56  ;;  %5007 = vmatpush3.msra.mxu1 %v6930_v3 }
 0x5ae   :  { %4973 = vmatprep.subr.mxu0 %v7470_v20  ;;  %5008 = vmatprep.subr.mxu1 %v7470_v20 }
 0x5af   :  { %4974 = vmatpush3.msra.mxu0 %v6936_v12  ;;  %5009 = vmatpush3.msra.mxu1 %v6938_v7 }
 0x5b0   :  { %4975 = vmatprep.subr.mxu0 %v7470_v20  ;;  %5010 = vmatprep.subr.mxu1 %v7470_v20 }
 0x5b1   :  { %4976 = vmatpush3.msra.mxu0 %v6944_v2  ;;  %5011 = vmatpush3.msra.mxu1 %v6946_v35 }
 0x5b2   :  { %4977 = vmatprep.subr.mxu0 %v7470_v20  ;;  %5012 = vmatprep.subr.mxu1 %v7470_v20 }
 0x5b3   :  { %4978 = vmatpush3.msra.mxu0 %v6952_v40  ;;  %5013 = vmatpush3.msra.mxu1 %v6954_v62 }
 0x5b4   :  { %4979 = vmatprep.subr.mxu0 %v7470_v20  ;;  %5014 = vmatprep.subr.mxu1 %v7470_v20 }
 0x5b5   :  { %4980 = vmatpush3.msra.mxu0 %v6960_v43  ;;  %5015 = vmatpush3.msra.mxu1 %v6962_v44 }
 0x5b6   :  { %4981 = vmatprep.subr.mxu0 %v7470_v20  ;;  %5016 = vmatprep.subr.mxu1 %v7470_v20 }
 0x5b7   :  { %4982 = vmatpush3.msra.mxu0 %v6968_v45  ;;  %5017 = vmatpush3.msra.mxu1 %v6970_v46 }
 0x5b8   :  { %4983 = vmatprep.subr.mxu0 %v7470_v20  ;;  %5018 = vmatprep.subr.mxu1 %v7470_v20 }
 0x5b9   :  { %4984 = vmatpush3.msra.mxu0 %v6976_v47  ;;  %5019 = vmatpush3.msra.mxu1 %v6978_v48 }
 0x5ba   :  { %4985 = vmatprep.subr.mxu0 %v7470_v20  ;;  %5020 = vmatprep.subr.mxu1 %v7470_v20 }
 0x5bb   :  { %4986 = vmatpush3.msra.mxu0 %v6984_v49  ;;  %5021 = vmatpush3.msra.mxu1 %v6986_v50 }
 0x5bc   :  { %4987 = vmatprep.subr.mxu0 %v7470_v20  ;;  %5022 = vmatprep.subr.mxu1 %v7470_v20 }
 0x5bd   :  { %4988 = vmatpush3.msra.mxu0 %v6992_v51  ;;  %5023 = vmatpush3.msra.mxu1 %v6994_v52 }
 0x5be   :  { %4989 = vmatprep.subr.mxu0 %v7470_v20  ;;  %5024 = vmatprep.subr.mxu1 %v7470_v20 }
 0x5bf   :  { %4990 = vmatpush3.msra.mxu0 %v7000_v53  ;;  %5025 = vmatpush3.msra.mxu1 %v7002_v54 }
 0x5c0   :  { %4991 = vmatprep.subr.mxu0 %v7470_v20  ;;  %5026 = vmatprep.subr.mxu1 %v7470_v20 }
 0x5c1   :  { %4992 = vmatpush3.msra.mxu0 %v7008_v55  ;;  %5027 = vmatpush3.msra.mxu1 %v7010_v57  ;;  %v7034_v55 = vld [vmem:[#allocation10 + $0x38] sm:$0xff]  ;;  %v7040_v57 = vld [vmem:[#allocation10 + $0x10] sm:$0xff] }
 0x5c2   :  { %4993 = vmatprep.subr.mxu0 %v7470_v20  ;;  %5028 = vmatprep.subr.mxu1 %v7470_v20 }
 0x5c3   :  { %4994 = vmatpush3.msra.mxu0 %v7016_v58  ;;  %5029 = vmatpush3.msra.mxu1 %v7018_v59  ;;  %v7044_v59 = vld [vmem:[#allocation10 + $0x18] sm:$0xff] }
 0x5c4   :  { %4995 = vmatprep.subr.mxu0 %v7470_v20  ;;  %5030 = vmatprep.subr.mxu1 %v7470_v20 }
 0x5c5   :  { %4996 = vmatpush3.msra.mxu0 %v7024_v27  ;;  %5031 = vmatpush3.msra.mxu1 %v7026_v39 }
 0x5c6   :  { %4997 = vmatprep.subr.mxu0 %v7470_v20  ;;  %5032 = vmatprep.subr.mxu1 %v7470_v20 }
 0x5c7   :  { %4998 = vmatpush3.msra.mxu0 %v7032_v34  ;;  %5033 = vmatpush3.msra.mxu1 %v7034_v55 }
 0x5c8   :  { %4999 = vmatprep.subr.mxu0 %v7470_v20  ;;  %5034 = vmatprep.subr.mxu1 %v7470_v20 }
 0x5c9   :  { %5000 = vmatpush3.msra.mxu0 %v7040_v57  ;;  %5001 = vmatprep.mubr.msk.f32.mxu0 %vm5614_vm0, %v7470_v20 }
 0x5ca   :  { %5035 = vmatpush3.msra.mxu1 %v7044_v59  ;;  %5036 = vmatprep.mubr.msk.f32.mxu1 %vm5614_vm0, %v7470_v20 }
 0x5cb   :  { %5002 = vmatmul.mubr.f32.vlgmr.msra.gmra.mxu0 %v6920_v22  ;;  %5037 = vmatmul.mubr.f32.vlgmr.msra.gmra.mxu1 %v6920_v22 }
 0x5cc   :  { %5039 = vmatprep.subr.mxu0 %v7470_v20  ;;  %5074 = vmatprep.subr.mxu1 %v7470_v20 }
 0x5cd   :  { %5040 = vmatpush3.msra.mxu0 %v6784_v8  ;;  %5075 = vmatpush3.msra.mxu1 %v6786_v15 }
 0x5ce   :  { %5041 = vmatprep.subr.mxu0 %v7470_v20  ;;  %5076 = vmatprep.subr.mxu1 %v7470_v20 }
 0x5cf   :  { %5042 = vmatpush3.msra.mxu0 %v6792_v41  ;;  %5077 = vmatpush3.msra.mxu1 %v6794_v19 }
 0x5d0   :  { %5043 = vmatprep.subr.mxu0 %v7470_v20  ;;  %5078 = vmatprep.subr.mxu1 %v7470_v20 }
 0x5d1   :  { %5044 = vmatpush3.msra.mxu0 %v6800_v18  ;;  %5079 = vmatpush3.msra.mxu1 %v6802_v26 }
 0x5d2   :  { %5045 = vmatprep.subr.mxu0 %v7470_v20  ;;  %5080 = vmatprep.subr.mxu1 %v7470_v20 }
 0x5d3   :  { %5046 = vmatpush3.msra.mxu0 %v6808_v10  ;;  %5081 = vmatpush3.msra.mxu1 %v6810_v0 }
 0x5d4   :  { %5047 = vmatprep.subr.mxu0 %v7470_v20  ;;  %5082 = vmatprep.subr.mxu1 %v7470_v20 }
 0x5d5   :  { %5048 = vmatpush3.msra.mxu0 %v6816_v28  ;;  %5083 = vmatpush3.msra.mxu1 %v6818_v4 }
 0x5d6   :  { %5049 = vmatprep.subr.mxu0 %v7470_v20  ;;  %5084 = vmatprep.subr.mxu1 %v7470_v20 }
 0x5d7   :  { %5050 = vmatpush3.msra.mxu0 %v6824_v14  ;;  %5085 = vmatpush3.msra.mxu1 %v6826_v6 }
 0x5d8   :  { %5051 = vmatprep.subr.mxu0 %v7470_v20  ;;  %5086 = vmatprep.subr.mxu1 %v7470_v20 }
 0x5d9   :  { %5052 = vmatpush3.msra.mxu0 %v6832_v13  ;;  %5087 = vmatpush3.msra.mxu1 %v6834_v23 }
 0x5da   :  { %5053 = vmatprep.subr.mxu0 %v7470_v20  ;;  %5088 = vmatprep.subr.mxu1 %v7470_v20 }
 0x5db   :  { %5054 = vmatpush3.msra.mxu0 %v6840_v29  ;;  %5089 = vmatpush3.msra.mxu1 %v6842_v24  ;;  %v7546_v29 = vld [vmem:[#allocation30_spill] sm:$0xff] }
 0x5dc   :  { %5055 = vmatprep.subr.mxu0 %v7470_v20  ;;  %5090 = vmatprep.subr.mxu1 %v7470_v20 }
 0x5dd   :  { %5056 = vmatpush3.msra.mxu0 %v6848_v9  ;;  %5091 = vmatpush3.msra.mxu1 %v6850_v31  ;;  %v7545_v9 = vld [vmem:[#allocation28_spill] sm:$0xff] }
 0x5de   :  { %5057 = vmatprep.subr.mxu0 %v7470_v20  ;;  %5092 = vmatprep.subr.mxu1 %v7470_v20 }
 0x5df   :  { %5058 = vmatpush3.msra.mxu0 %v6854_v42  ;;  %5093 = vmatpush3.msra.mxu1 %v6856_v36 }
 0x5e0   :  { %5059 = vmatprep.subr.mxu0 %v7470_v20  ;;  %5094 = vmatprep.subr.mxu1 %v7470_v20 }
 0x5e1   :  { %5060 = vmatpush3.msra.mxu0 %v6860_v38  ;;  %5095 = vmatpush3.msra.mxu1 %v6862_v11 }
 0x5e2   :  { %5061 = vmatprep.subr.mxu0 %v7470_v20  ;;  %5096 = vmatprep.subr.mxu1 %v7470_v20 }
 0x5e3   :  { %5062 = vmatpush3.msra.mxu0 %v6868_v5  ;;  %5097 = vmatpush3.msra.mxu1 %v6870_v25 }
 0x5e4   :  { %5063 = vmatprep.subr.mxu0 %v7470_v20  ;;  %5098 = vmatprep.subr.mxu1 %v7470_v20 }
 0x5e5   :  { %5064 = vmatpush3.msra.mxu0 %v6876_v30  ;;  %5099 = vmatpush3.msra.mxu1 %v6878_v33  ;;  %v7544_v30 = vld [vmem:[#allocation27_spill] sm:$0xff] }
 0x5e6   :  { %5065 = vmatprep.subr.mxu0 %v7470_v20  ;;  %5100 = vmatprep.subr.mxu1 %v7470_v20 }
 0x5e7   :  { %5066 = vmatpush3.msra.mxu0 %v6884_v61  ;;  %5101 = vmatpush3.msra.mxu1 %v6886_v63  ;;  %v7543_v61 = vld [vmem:[#allocation29_spill] sm:$0xff] }
 0x5e8   :  { %5067 = vmatprep.subr.mxu0 %v7470_v20  ;;  %5102 = vmatprep.subr.mxu1 %v7470_v20 }
 0x5e9   :  { %5068 = vmatpush3.msra.mxu0 %v6892_v1  ;;  %5103 = vmatpush3.msra.mxu1 %v6894_v21 }
 0x5ea   :  { %5069 = vmatprep.subr.mxu0 %v7470_v20  ;;  %5104 = vmatprep.subr.mxu1 %v7470_v20 }
 0x5eb   :  { %5070 = vmatpush3.msra.mxu0 %v6900_v16  ;;  %5105 = vmatpush3.msra.mxu1 %v6902_v32 }
 0x5ec   :  { %5071 = vmatprep.mubr.msk.f32.mxu0 %vm5614_vm0, %v7470_v20  ;;  %5106 = vmatprep.mubr.msk.f32.mxu1 %vm5614_vm0, %v7470_v20 }
 0x5ed   :  { %5109 = vmatprep.subr.mxu0 %v7470_v20  ;;  %5144 = vmatprep.subr.mxu1 %v7470_v20 }
 0x66a   :  { %v2434_v22 = vpop.f32.mrf.mxu0  ;;  %v2527_v21 = vpop.f32.mrf.mxu1 }
 0x66b   :  { %v2531_v33 = vadd.f32 %v2527_v21, %v7543_v61  ;;  %v2438_v16 = vadd.f32 %v2434_v22, %v7544_v30  ;;  %v7565_v22 = vld [vmem:[#allocation46_spill] sm:$0xff] }
 0x66c   :  { %v4933_v1 = vpop.f32.mrf.mxu0  ;;  %v4968_v63 = vpop.f32.mrf.mxu1 }
 0x66d   :  { %v3629_v25 = vmul.f32 -1.442695, %v2531_v33  ;;  %v3628_v32 = vmul.f32 -1.442695, %v2438_v16 }
 0x66f   :  { %5445 = vpow2.f32 %v3629_v25 }
 0x670   :  { %5447 = vpow2.f32 %v3628_v32 }
 0x67c   :  { %v5446_v5 = vpop.eup %5445 }
 0x67d   :  { %v5448_v11 = vpop.eup %5447  ;;  %v2535_v38 = vadd.f32 1.0, %v5446_v5 }
 0x67e   :  { %v2442_v36 = vadd.f32 1.0, %v5448_v11 }
 0x67f   :  { %5449 = vrcp.f32 %v2535_v38 }
 0x680   :  { %5451 = vrcp.f32 %v2442_v36  ;;  %v7549_v36 = vld [vmem:[#allocation51_spill] sm:$0xff] }
 0x68b   :  { %v2620_v42 = vpop.f32.mrf.mxu0  ;;  %v2708_v31 = vpop.f32.mrf.mxu1 }
 0x68c   :  { %v2624_v24 = vadd.f32 %v2620_v42, %v7545_v9  ;;  %v2712_v1 = vadd.f32 %v2708_v31, %v7546_v29  ;;  %v5450_v33 = vpop.eup %5449  ;;  %v7548_v42 = vld [vmem:[#allocation50_spill] sm:$0xff] }
 0x68d   :  { %v5003_v63 = vpop.f32.mrf.mxu0  ;;  %v5038_v61 = vpop.f32.mrf.mxu1  ;;  %v2719_v16 = vmul.f32 %v5450_v33, %v6917_v60  ;;  %v7564_v60 = vld [vmem:[#allocation45_spill] sm:$0xff] }
 0x68e   :  { %5453 = vtanh.f32 %v2624_v24  ;;  %v3630_v30 = vmul.f32 -1.442695, %v2712_v1  ;;  %v5452_v25 = vpop.eup %5451  ;;  %v7547_v24 = vld [vmem:[#allocation49_spill] sm:$0xff]  ;;  %v7566_v1 = vld [vmem:[#allocation47_spill] sm:$0xff]  ;;  %v7567_v63 = vld [vmem:[#allocation48_spill] sm:$0xff] }
 0x690   :  { %5455 = vpow2.f32 %v3630_v30 }
 0x69b   :  { %v5454_v21 = vpop.eup %5453 }
 0x69c   :  { %v2720_v5 = vmul.f32 %v5454_v21, %v5452_v25  ;;  %v7568_v21 = vld [vmem:[#allocation33_spill] sm:$0xff] }
 0x69d   :  { %v5456_v11 = vpop.eup %5455 }
 0x69e   :  { %v7131_v32 = vadd.f32 %v2720_v5, %v2719_v16  ;;  %v2716_v38 = vadd.f32 1.0, %v5456_v11  ;;  %v7569_v5 = vld [vmem:[#allocation31_spill] sm:$0xff] }
 0x6a0   :  { %5457 = vtanh.f32 %v7131_v32 }
 0x6a1   :  { %5459 = vrcp.f32 %v2716_v38 }
 0x6ad   :  { %v5458_v29 = vpop.eup %5457 }
 0x6ae   :  { %v5460_v9 = vpop.eup %5459 }
 0x6af   :  { %v7134_v31 = vmul.f32 %v5460_v9, %v5458_v29 }
 0x6b1   :  { %5072 = vmatmul.mubr.f32.vlgmr.msra.gmra.mxu0 %v7134_v31  ;;  %5107 = vmatmul.mubr.f32.vlgmr.msra.gmra.mxu1 %v7134_v31 }
 0x6b2   :  { %5110 = vmatpush3.msra.mxu0 %v6922_v17  ;;  %5145 = vmatpush3.msra.mxu1 %v6924_v37 }
 0x6b3   :  { %5111 = vmatprep.subr.mxu0 %v7470_v20  ;;  %5146 = vmatprep.subr.mxu1 %v7470_v20 }
 0x6b4   :  { %5112 = vmatpush3.msra.mxu0 %v6928_v56  ;;  %5147 = vmatpush3.msra.mxu1 %v6930_v3 }
 0x6b5   :  { %5113 = vmatprep.subr.mxu0 %v7470_v20  ;;  %5148 = vmatprep.subr.mxu1 %v7470_v20 }
 0x6b6   :  { %5114 = vmatpush3.msra.mxu0 %v6936_v12  ;;  %5149 = vmatpush3.msra.mxu1 %v6938_v7 }
 0x6b7   :  { %5115 = vmatprep.subr.mxu0 %v7470_v20  ;;  %5150 = vmatprep.subr.mxu1 %v7470_v20 }
 0x6b8   :  { %5116 = vmatpush3.msra.mxu0 %v6944_v2  ;;  %5151 = vmatpush3.msra.mxu1 %v6946_v35 }
 0x6b9   :  { %5117 = vmatprep.subr.mxu0 %v7470_v20  ;;  %5152 = vmatprep.subr.mxu1 %v7470_v20 }
 0x6ba   :  { %5118 = vmatpush3.msra.mxu0 %v6952_v40  ;;  %5153 = vmatpush3.msra.mxu1 %v6954_v62 }
 0x6bb   :  { %5119 = vmatprep.subr.mxu0 %v7470_v20  ;;  %5154 = vmatprep.subr.mxu1 %v7470_v20 }
 0x6bc   :  { %5120 = vmatpush3.msra.mxu0 %v6960_v43  ;;  %5155 = vmatpush3.msra.mxu1 %v6962_v44 }
 0x6bd   :  { %5121 = vmatprep.subr.mxu0 %v7470_v20  ;;  %5156 = vmatprep.subr.mxu1 %v7470_v20 }
 0x6be   :  { %5122 = vmatpush3.msra.mxu0 %v6968_v45  ;;  %5157 = vmatpush3.msra.mxu1 %v6970_v46 }
 0x6bf   :  { %5123 = vmatprep.subr.mxu0 %v7470_v20  ;;  %5158 = vmatprep.subr.mxu1 %v7470_v20 }
 0x6c0   :  { %5124 = vmatpush3.msra.mxu0 %v6976_v47  ;;  %5159 = vmatpush3.msra.mxu1 %v6978_v48 }
 0x6c1   :  { %5125 = vmatprep.subr.mxu0 %v7470_v20  ;;  %5160 = vmatprep.subr.mxu1 %v7470_v20 }
 0x6c2   :  { %5126 = vmatpush3.msra.mxu0 %v6984_v49  ;;  %5161 = vmatpush3.msra.mxu1 %v6986_v50 }
 0x6c3   :  { %5127 = vmatprep.subr.mxu0 %v7470_v20  ;;  %5162 = vmatprep.subr.mxu1 %v7470_v20 }
 0x6c4   :  { %5128 = vmatpush3.msra.mxu0 %v6992_v51  ;;  %5163 = vmatpush3.msra.mxu1 %v6994_v52 }
 0x6c5   :  { %5129 = vmatprep.subr.mxu0 %v7470_v20  ;;  %5164 = vmatprep.subr.mxu1 %v7470_v20 }
 0x6c6   :  { %5130 = vmatpush3.msra.mxu0 %v7000_v53  ;;  %5165 = vmatpush3.msra.mxu1 %v7002_v54 }
 0x6c7   :  { %5131 = vmatprep.subr.mxu0 %v7470_v20  ;;  %5166 = vmatprep.subr.mxu1 %v7470_v20 }
 0x6c8   :  { %5132 = vmatpush3.msra.mxu0 %v7547_v24  ;;  %5167 = vmatpush3.msra.mxu1 %v7548_v42 }
 0x6c9   :  { %5133 = vmatprep.subr.mxu0 %v7470_v20  ;;  %5168 = vmatprep.subr.mxu1 %v7470_v20 }
 0x6ca   :  { %5134 = vmatpush3.msra.mxu0 %v7016_v58  ;;  %5169 = vmatpush3.msra.mxu1 %v7549_v36 }
 0x6cb   :  { %5135 = vmatprep.subr.mxu0 %v7470_v20  ;;  %5170 = vmatprep.subr.mxu1 %v7470_v20 }
 0x6cc   :  { %5136 = vmatpush3.msra.mxu0 %v7024_v27  ;;  %5171 = vmatpush3.msra.mxu1 %v7026_v39 }
 0x6cd   :  { %5137 = vmatprep.subr.mxu0 %v7470_v20  ;;  %5172 = vmatprep.subr.mxu1 %v7470_v20 }
 0x6ce   :  { %5138 = vmatpush3.msra.mxu0 %v7032_v34  ;;  %5173 = vmatpush3.msra.mxu1 %v7034_v55 }
 0x6cf   :  { %5139 = vmatprep.subr.mxu0 %v7470_v20  ;;  %5174 = vmatprep.subr.mxu1 %v7470_v20 }
 0x6d0   :  { %5140 = vmatpush3.msra.mxu0 %v7040_v57  ;;  %5141 = vmatprep.mubr.msk.f32.mxu0 %vm5614_vm0, %v7470_v20 }
 0x6d1   :  { %5175 = vmatpush3.msra.mxu1 %v7044_v59  ;;  %5176 = vmatprep.mubr.msk.f32.mxu1 %vm5614_vm0, %v7470_v20 }
 0x6d2   :  { %5142 = vmatmul.mubr.f32.vlgmr.msra.gmra.mxu0 %v7134_v31  ;;  %5177 = vmatmul.mubr.f32.vlgmr.msra.gmra.mxu1 %v7134_v31 }
 0x6d3   :  { %5179 = vmatprep.subr.mxu0 %v7470_v20  ;;  %5214 = vmatprep.subr.mxu1 %v7470_v20 }
 0x6d4   :  { %5180 = vmatpush3.msra.mxu0 %v6784_v8  ;;  %5215 = vmatpush3.msra.mxu1 %v6786_v15  ;;  %v7550_v8 = vld [vmem:[#allocation52_spill] sm:$0xff]  ;;  %v7551_v15 = vld [vmem:[#allocation53_spill] sm:$0xff] }
 0x6d5   :  { %5181 = vmatprep.subr.mxu0 %v7470_v20  ;;  %5216 = vmatprep.subr.mxu1 %v7470_v20 }
 0x6d6   :  { %5182 = vmatpush3.msra.mxu0 %v6792_v41  ;;  %5217 = vmatpush3.msra.mxu1 %v6794_v19  ;;  %v7552_v41 = vld [vmem:[#allocation54_spill] sm:$0xff]  ;;  %v7553_v19 = vld [vmem:[#allocation55_spill] sm:$0xff] }
 0x6d7   :  { %5183 = vmatprep.subr.mxu0 %v7470_v20  ;;  %5218 = vmatprep.subr.mxu1 %v7470_v20 }
 0x6d8   :  { %5184 = vmatpush3.msra.mxu0 %v6800_v18  ;;  %5219 = vmatpush3.msra.mxu1 %v6802_v26  ;;  %v7554_v18 = vld [vmem:[#allocation56_spill] sm:$0xff]  ;;  %v7555_v26 = vld [vmem:[#allocation57_spill] sm:$0xff] }
 0x6d9   :  { %5185 = vmatprep.subr.mxu0 %v7470_v20  ;;  %5220 = vmatprep.subr.mxu1 %v7470_v20 }
 0x6da   :  { %5186 = vmatpush3.msra.mxu0 %v6808_v10  ;;  %5221 = vmatpush3.msra.mxu1 %v6810_v0  ;;  %v7556_v10 = vld [vmem:[#allocation58_spill] sm:$0xff] }
 0x6db   :  { %5187 = vmatprep.subr.mxu0 %v7470_v20  ;;  %5222 = vmatprep.subr.mxu1 %v7470_v20  ;;  %v7557_v0 = vld [vmem:[#allocation18_spill] sm:$0xff] }
 0x6dc   :  { %5188 = vmatpush3.msra.mxu0 %v6816_v28  ;;  %5223 = vmatpush3.msra.mxu1 %v6818_v4  ;;  %v7558_v28 = vld [vmem:[#allocation39_spill] sm:$0xff]  ;;  %v7559_v4 = vld [vmem:[#allocation40_spill] sm:$0xff] }
 0x6dd   :  { %5189 = vmatprep.subr.mxu0 %v7470_v20  ;;  %5224 = vmatprep.subr.mxu1 %v7470_v20 }
 0x6de   :  { %5190 = vmatpush3.msra.mxu0 %v6824_v14  ;;  %5225 = vmatpush3.msra.mxu1 %v6826_v6  ;;  %v7560_v14 = vld [vmem:[#allocation41_spill] sm:$0xff]  ;;  %v7561_v6 = vld [vmem:[#allocation42_spill] sm:$0xff] }
 0x6df   :  { %5191 = vmatprep.subr.mxu0 %v7470_v20  ;;  %5226 = vmatprep.subr.mxu1 %v7470_v20 }
 0x6e0   :  { %5192 = vmatpush3.msra.mxu0 %v6832_v13  ;;  %5227 = vmatpush3.msra.mxu1 %v6834_v23  ;;  %v7562_v13 = vld [vmem:[#allocation43_spill] sm:$0xff]  ;;  %v7563_v23 = vld [vmem:[#allocation44_spill] sm:$0xff] }
 0x6e1   :  { %5193 = vmatprep.subr.mxu0 %v7470_v20  ;;  %5228 = vmatprep.subr.mxu1 %v7470_v20 }
 0x6e2   :  { %5194 = vmatpush3.msra.mxu0 %v7550_v8  ;;  %5229 = vmatpush3.msra.mxu1 %v7551_v15 }
 0x6e3   :  { %5195 = vmatprep.subr.mxu0 %v7470_v20  ;;  %5230 = vmatprep.subr.mxu1 %v7470_v20 }
 0x6e4   :  { %5196 = vmatpush3.msra.mxu0 %v7552_v41  ;;  %5231 = vmatpush3.msra.mxu1 %v7553_v19 }
 0x6e5   :  { %5197 = vmatprep.subr.mxu0 %v7470_v20  ;;  %5232 = vmatprep.subr.mxu1 %v7470_v20 }
 0x6e6   :  { %5198 = vmatpush3.msra.mxu0 %v7554_v18  ;;  %5233 = vmatpush3.msra.mxu1 %v7555_v26  ;;  %v7570_v18 = vld [vmem:[#allocation32_spill] sm:$0xff] }
 0x6e7   :  { %5199 = vmatprep.subr.mxu0 %v7470_v20  ;;  %5234 = vmatprep.subr.mxu1 %v7470_v20 }
 0x6e8   :  { %5200 = vmatpush3.msra.mxu0 %v7556_v10  ;;  %5235 = vmatpush3.msra.mxu1 %v7557_v0  ;;  %v7571_v10 = vld [vmem:[#allocation34_spill] sm:$0xff] }
 0x6e9   :  { %5201 = vmatprep.subr.mxu0 %v7470_v20  ;;  %5236 = vmatprep.subr.mxu1 %v7470_v20 }
 0x6ea   :  { %5202 = vmatpush3.msra.mxu0 %v7558_v28  ;;  %5237 = vmatpush3.msra.mxu1 %v7559_v4 }
 0x6eb   :  { %5203 = vmatprep.subr.mxu0 %v7470_v20  ;;  %5238 = vmatprep.subr.mxu1 %v7470_v20 }
 0x6ec   :  { %5204 = vmatpush3.msra.mxu0 %v7560_v14  ;;  %5239 = vmatpush3.msra.mxu1 %v7561_v6 }
 0x6ed   :  { %5205 = vmatprep.subr.mxu0 %v7470_v20  ;;  %5240 = vmatprep.subr.mxu1 %v7470_v20 }
 0x6ee   :  { %5206 = vmatpush3.msra.mxu0 %v7562_v13  ;;  %5241 = vmatpush3.msra.mxu1 %v7563_v23 }
 0x6ef   :  { %5207 = vmatprep.subr.mxu0 %v7470_v20  ;;  %5242 = vmatprep.subr.mxu1 %v7470_v20 }
 0x6f0   :  { %5208 = vmatpush3.msra.mxu0 %v7564_v60  ;;  %5243 = vmatpush3.msra.mxu1 %v7565_v22 }
 0x6f1   :  { %5209 = vmatprep.subr.mxu0 %v7470_v20  ;;  %5244 = vmatprep.subr.mxu1 %v7470_v20 }
 0x6f2   :  { %5210 = vmatpush3.msra.mxu0 %v7566_v1  ;;  %5245 = vmatpush3.msra.mxu1 %v7567_v63 }
 0x6f3   :  { %5211 = vmatprep.mubr.msk.f32.mxu0 %vm5614_vm0, %v7470_v20  ;;  %5246 = vmatprep.mubr.msk.f32.mxu1 %vm5614_vm0, %v7470_v20 }
 0x6f4   :  { %5249 = vmatprep.subr.mxu0 %v7470_v20  ;;  %5284 = vmatprep.subr.mxu1 %v7470_v20 }
 0x771   :  { %v2815_v61 = vpop.f32.mrf.mxu0  ;;  %v2908_v30 = vpop.f32.mrf.mxu1 }
 0x772   :  { %v2912_v16 = vadd.f32 %v2908_v30, %v7568_v21  ;;  %v2819_v11 = vadd.f32 %v2815_v61, %v7569_v5  ;;  %v7575_v21 = vld [vmem:[#allocation38_spill] sm:$0xff] }
 0x773   :  { %v5073_v33 = vpop.f32.mrf.mxu0  ;;  %v5108_v25 = vpop.f32.mrf.mxu1 }
 0x774   :  { %v3632_v38 = vmul.f32 -1.442695, %v2912_v16  ;;  %v3631_v29 = vmul.f32 -1.442695, %v2819_v11 }
 0x776   :  { %5461 = vpow2.f32 %v3632_v38 }
 0x777   :  { %5463 = vpow2.f32 %v3631_v29 }
 0x783   :  { %v5462_v9 = vpop.eup %5461 }
 0x784   :  { %v5464_v31 = vpop.eup %5463  ;;  %v2916_v8 = vadd.f32 1.0, %v5462_v9 }
 0x785   :  { %v2823_v15 = vadd.f32 1.0, %v5464_v31 }
 0x786   :  { %5465 = vrcp.f32 %v2916_v8 }
 0x787   :  { %5467 = vrcp.f32 %v2823_v15 }
 0x792   :  { %v3001_v41 = vpop.f32.mrf.mxu0  ;;  %v3089_v19 = vpop.f32.mrf.mxu1 }
 0x793   :  { %v3005_v26 = vadd.f32 %v3001_v41, %v7570_v18  ;;  %v3093_v0 = vadd.f32 %v3089_v19, %v7571_v10  ;;  %v5466_v6 = vpop.eup %5465 }
 0x794   :  { %v5143_v28 = vpop.f32.mrf.mxu0  ;;  %v5178_v4 = vpop.f32.mrf.mxu1  ;;  %v3100_v60 = vmul.f32 %v5466_v6, %v7131_v32 }
 0x795   :  { %5469 = vtanh.f32 %v3005_v26  ;;  %v3633_v14 = vmul.f32 -1.442695, %v3093_v0  ;;  %v5468_v13 = vpop.eup %5467  ;;  %v7576_v28 = vlaneseq }
 0x797   :  { %5471 = vpow2.f32 %v3633_v14  ;;  %v3583_v4 = vand.u32 127, %v7576_v28  ;;  %v3637_v14 = vld [vmem:[%s7391_s5] ss:$0 sm:$0xff]  ;;  %s5577_s5 = scalar_lea.vmem %s3603_s21, 128 }
 0x798   :  { %p5578_p6 = scmp.ne.s32.totalorder %s3603_s21, %s5577_s5  ;;  %p5583_p8 = scmp.lt.s32.totalorder %s5577_s5, %s5577_s5 }
 0x799   :  { %vm3584_vm1 = vcmp.lt.s32.totalorder %v3583_v4, 4 }
 0x79a   :  { %p5584_p9 = por %p5583_p8, %p5582_p7 }
 0x79c   :  { %p5585_p10 = pnand %p5584_p9, %p5578_p6 }
 0x7a2   :  { %v5470_v23 = vpop.eup %5469 }
 0x7a3   :  { %v3101_v22 = vmul.f32 %v5470_v23, %v5468_v13 }
 0x7a4   :  { %v5472_v1 = vpop.eup %5471 }
 0x7a5   :  { %v7281_v63 = vadd.f32 %v3101_v22, %v3100_v60  ;;  %v3097_v61 = vadd.f32 1.0, %v5472_v1 }
 0x7a7   :  { %5473 = vtanh.f32 %v7281_v63 }
 0x7a8   :  { %5475 = vrcp.f32 %v3097_v61 }
 0x7b4   :  { %v5474_v30 = vpop.eup %5473 }
 0x7b5   :  { %v5476_v33 = vpop.eup %5475 }
 0x7b6   :  { %v7284_v25 = vmul.f32 %v5476_v33, %v5474_v30 }
 0x7b8   :  { %5212 = vmatmul.mubr.f32.vlgmr.msra.gmra.mxu0 %v7284_v25  ;;  %5247 = vmatmul.mubr.f32.vlgmr.msra.gmra.mxu1 %v7284_v25 }
 0x7b9   :  { %5250 = vmatpush3.msra.mxu0 %v6922_v17  ;;  %5285 = vmatpush3.msra.mxu1 %v6924_v37  ;;  %v3504_v17 = vld [vmem:[#allocation11 + $0x78] sm:$0xff]  ;;  %v3503_v37 = vld [vmem:[#allocation11 + $0x70] sm:$0xff] }
 0x7ba   :  { %5251 = vmatprep.subr.mxu0 %v7470_v20  ;;  %5286 = vmatprep.subr.mxu1 %v7470_v20 }
 0x7bb   :  { %5252 = vmatpush3.msra.mxu0 %v6928_v56  ;;  %5287 = vmatpush3.msra.mxu1 %v6930_v3  ;;  %v3502_v56 = vld [vmem:[#allocation11 + $0x68] sm:$0xff]  ;;  %v3501_v3 = vld [vmem:[#allocation11 + $0x60] sm:$0xff] }
 0x7bc   :  { %5253 = vmatprep.subr.mxu0 %v7470_v20  ;;  %5288 = vmatprep.subr.mxu1 %v7470_v20 }
 0x7bd   :  { %5254 = vmatpush3.msra.mxu0 %v6936_v12  ;;  %5289 = vmatpush3.msra.mxu1 %v6938_v7  ;;  %v3500_v12 = vld [vmem:[#allocation11 + $0x58] sm:$0xff]  ;;  %v3499_v7 = vld [vmem:[#allocation11 + $0x50] sm:$0xff] }
 0x7be   :  { %5255 = vmatprep.subr.mxu0 %v7470_v20  ;;  %5290 = vmatprep.subr.mxu1 %v7470_v20 }
 0x7bf   :  { %5256 = vmatpush3.msra.mxu0 %v6944_v2  ;;  %5291 = vmatpush3.msra.mxu1 %v6946_v35  ;;  %v3498_v2 = vld [vmem:[#allocation11 + $0x48] sm:$0xff]  ;;  %v3497_v35 = vld [vmem:[#allocation11 + $0x40] sm:$0xff] }
 0x7c0   :  { %5257 = vmatprep.subr.mxu0 %v7470_v20  ;;  %5292 = vmatprep.subr.mxu1 %v7470_v20 }
 0x7c1   :  { %5258 = vmatpush3.msra.mxu0 %v6952_v40  ;;  %5293 = vmatpush3.msra.mxu1 %v6954_v62  ;;  %v3496_v40 = vld [vmem:[#allocation11 + $0x38] sm:$0xff]  ;;  %v3495_v62 = vld [vmem:[#allocation11 + $0x30] sm:$0xff] }
 0x7c2   :  { %5259 = vmatprep.subr.mxu0 %v7470_v20  ;;  %5294 = vmatprep.subr.mxu1 %v7470_v20 }
 0x7c3   :  { %5260 = vmatpush3.msra.mxu0 %v6960_v43  ;;  %5295 = vmatpush3.msra.mxu1 %v6962_v44  ;;  %v3494_v43 = vld [vmem:[#allocation11 + $0x28] sm:$0xff]  ;;  %v3493_v44 = vld [vmem:[#allocation11 + $0x20] sm:$0xff] }
 0x7c4   :  { %5261 = vmatprep.subr.mxu0 %v7470_v20  ;;  %5296 = vmatprep.subr.mxu1 %v7470_v20 }
 0x7c5   :  { %5262 = vmatpush3.msra.mxu0 %v6968_v45  ;;  %5297 = vmatpush3.msra.mxu1 %v6970_v46  ;;  %v3492_v45 = vld [vmem:[#allocation11 + $0x18] sm:$0xff]  ;;  %v3491_v46 = vld [vmem:[#allocation11 + $0x10] sm:$0xff] }
 0x7c6   :  { %5263 = vmatprep.subr.mxu0 %v7470_v20  ;;  %5298 = vmatprep.subr.mxu1 %v7470_v20 }
 0x7c7   :  { %5264 = vmatpush3.msra.mxu0 %v6976_v47  ;;  %5299 = vmatpush3.msra.mxu1 %v6978_v48  ;;  %v3490_v47 = vld [vmem:[#allocation11 + $0x8] sm:$0xff]  ;;  %v3489_v48 = vld [vmem:[#allocation11] sm:$0xff] }
 0x7c8   :  { %5265 = vmatprep.subr.mxu0 %v7470_v20  ;;  %5300 = vmatprep.subr.mxu1 %v7470_v20 }
 0x7c9   :  { %5266 = vmatpush3.msra.mxu0 %v6984_v49  ;;  %5301 = vmatpush3.msra.mxu1 %v6986_v50 }
 0x7ca   :  { %5267 = vmatprep.subr.mxu0 %v7470_v20  ;;  %5302 = vmatprep.subr.mxu1 %v7470_v20 }
 0x7cb   :  { %5268 = vmatpush3.msra.mxu0 %v6992_v51  ;;  %5303 = vmatpush3.msra.mxu1 %v6994_v52 }
 0x7cc   :  { %5269 = vmatprep.subr.mxu0 %v7470_v20  ;;  %5304 = vmatprep.subr.mxu1 %v7470_v20 }
 0x7cd   :  { %5270 = vmatpush3.msra.mxu0 %v7000_v53  ;;  %5305 = vmatpush3.msra.mxu1 %v7002_v54  ;;  %v7572_v53 = vld [vmem:[#allocation37_spill] sm:$0xff] }
 0x7ce   :  { %5271 = vmatprep.subr.mxu0 %v7470_v20  ;;  %5306 = vmatprep.subr.mxu1 %v7470_v20 }
 0x7cf   :  { %5272 = vmatpush3.msra.mxu0 %v7547_v24  ;;  %5307 = vmatpush3.msra.mxu1 %v7548_v42 }
 0x7d0   :  { %5273 = vmatprep.subr.mxu0 %v7470_v20  ;;  %5308 = vmatprep.subr.mxu1 %v7470_v20 }
 0x7d1   :  { %5274 = vmatpush3.msra.mxu0 %v7016_v58  ;;  %5309 = vmatpush3.msra.mxu1 %v7549_v36 }
 0x7d2   :  { %5275 = vmatprep.subr.mxu0 %v7470_v20  ;;  %5310 = vmatprep.subr.mxu1 %v7470_v20 }
 0x7d3   :  { %5276 = vmatpush3.msra.mxu0 %v7024_v27  ;;  %5311 = vmatpush3.msra.mxu1 %v7026_v39 }
 0x7d4   :  { %5277 = vmatprep.subr.mxu0 %v7470_v20  ;;  %5312 = vmatprep.subr.mxu1 %v7470_v20 }
 0x7d5   :  { %5278 = vmatpush3.msra.mxu0 %v7032_v34  ;;  %5313 = vmatpush3.msra.mxu1 %v7034_v55  ;;  %v7573_v55 = vld [vmem:[#allocation35_spill] sm:$0xff] }
 0x7d6   :  { %5279 = vmatprep.subr.mxu0 %v7470_v20  ;;  %5314 = vmatprep.subr.mxu1 %v7470_v20 }
 0x7d7   :  { %5280 = vmatpush3.msra.mxu0 %v7040_v57  ;;  %5281 = vmatprep.mubr.msk.f32.mxu0 %vm5614_vm0, %v7470_v20 }
 0x7d8   :  { %5315 = vmatpush3.msra.mxu1 %v7044_v59  ;;  %5316 = vmatprep.mubr.msk.f32.mxu1 %vm5614_vm0, %v7470_v20 }
 0x7d9   :  { %5282 = vmatmul.mubr.f32.vlgmr.msra.gmra.mxu0 %v7284_v25  ;;  %5317 = vmatmul.mubr.f32.vlgmr.msra.gmra.mxu1 %v7284_v25 }
 0x7da   :  { %5319 = vmatprep.subr.mxu0 %v7470_v20  ;;  %5351 = vmatprep.mubr.msk.f32.mxu0 %vm5614_vm0, %v7470_v20 }
 0x7db   :  { %5320 = vmatpush3.msra.mxu0 %v3504_v17 }
 0x7dc   :  { %5321 = vmatprep.subr.mxu0 %v7470_v20 }
 0x7dd   :  { %5322 = vmatpush3.msra.mxu0 %v3503_v37 }
 0x7de   :  { %5323 = vmatprep.subr.mxu0 %v7470_v20 }
 0x7df   :  { %5324 = vmatpush3.msra.mxu0 %v3502_v56 }
 0x7e0   :  { %5325 = vmatprep.subr.mxu0 %v7470_v20 }
 0x7e1   :  { %5326 = vmatpush3.msra.mxu0 %v3501_v3 }
 0x7e2   :  { %5327 = vmatprep.subr.mxu0 %v7470_v20 }
 0x7e3   :  { %5328 = vmatpush3.msra.mxu0 %v3500_v12 }
 0x7e4   :  { %5329 = vmatprep.subr.mxu0 %v7470_v20 }
 0x7e5   :  { %5330 = vmatpush3.msra.mxu0 %v3499_v7 }
 0x7e6   :  { %5331 = vmatprep.subr.mxu0 %v7470_v20 }
 0x7e7   :  { %5332 = vmatpush3.msra.mxu0 %v3498_v2 }
 0x7e8   :  { %5333 = vmatprep.subr.mxu0 %v7470_v20 }
 0x7e9   :  { %5334 = vmatpush3.msra.mxu0 %v3497_v35 }
 0x7ea   :  { %5335 = vmatprep.subr.mxu0 %v7470_v20 }
 0x7eb   :  { %5336 = vmatpush3.msra.mxu0 %v3496_v40 }
 0x7ec   :  { %5337 = vmatprep.subr.mxu0 %v7470_v20 }
 0x7ed   :  { %5338 = vmatpush3.msra.mxu0 %v3495_v62 }
 0x7ee   :  { %5339 = vmatprep.subr.mxu0 %v7470_v20 }
 0x7ef   :  { %5340 = vmatpush3.msra.mxu0 %v3494_v43 }
 0x7f0   :  { %5341 = vmatprep.subr.mxu0 %v7470_v20 }
 0x7f1   :  { %5342 = vmatpush3.msra.mxu0 %v3493_v44 }
 0x7f2   :  { %5343 = vmatprep.subr.mxu0 %v7470_v20 }
 0x7f3   :  { %5344 = vmatpush3.msra.mxu0 %v3492_v45 }
 0x7f4   :  { %5345 = vmatprep.subr.mxu0 %v7470_v20 }
 0x7f5   :  { %5346 = vmatpush3.msra.mxu0 %v3491_v46 }
 0x7f6   :  { %5347 = vmatprep.subr.mxu0 %v7470_v20 }
 0x7f7   :  { %5348 = vmatpush3.msra.mxu0 %v3490_v47 }
 0x7f8   :  { %5349 = vmatprep.subr.mxu0 %v7470_v20  ;;  %v7574_v20 = vld [vmem:[#allocation36_spill] sm:$0xff] }
 0x7f9   :  { %5350 = vmatpush3.msra.mxu0 %v3489_v48 }
 0x878   :  { %v3196_v49 = vpop.f32.mrf.mxu0  ;;  %v3289_v50 = vpop.f32.mrf.mxu1 }
 0x879   :  { %v3293_v54 = vadd.f32 %v3289_v50, %v7572_v53  ;;  %v3200_v57 = vadd.f32 %v3196_v49, %v7573_v55 }
 0x87a   :  { %v5213_v51 = vpop.f32.mrf.mxu0  ;;  %v5248_v52 = vpop.f32.mrf.mxu1 }
 0x87b   :  { %v3635_v58 = vmul.f32 -1.442695, %v3293_v54  ;;  %v3634_v59 = vmul.f32 -1.442695, %v3200_v57 }
 0x87d   :  { %5477 = vpow2.f32 %v3635_v58 }
 0x87e   :  { %5479 = vpow2.f32 %v3634_v59 }
 0x88a   :  { %v5478_v27 = vpop.eup %5477 }
 0x88b   :  { %v5480_v39 = vpop.eup %5479  ;;  %v3297_v34 = vadd.f32 1.0, %v5478_v27 }
 0x88c   :  { %v3204_v32 = vadd.f32 1.0, %v5480_v39 }
 0x88d   :  { %5481 = vrcp.f32 %v3297_v34 }
 0x88e   :  { %5483 = vrcp.f32 %v3204_v32 }
 0x899   :  { %v3382_v24 = vpop.f32.mrf.mxu0  ;;  %v3470_v42 = vpop.f32.mrf.mxu1 }
 0x89a   :  { %v3386_v36 = vadd.f32 %v3382_v24, %v7574_v20  ;;  %v3474_v16 = vadd.f32 %v3470_v42, %v7575_v21  ;;  %v5482_v29 = vpop.eup %5481 }
 0x89b   :  { %v5283_v5 = vpop.f32.mrf.mxu0  ;;  %v5318_v11 = vpop.f32.mrf.mxu1  ;;  %v3481_v8 = vmul.f32 %v5482_v29, %v7281_v63 }
 0x89c   :  { %5485 = vtanh.f32 %v3386_v36  ;;  %v3636_v38 = vmul.f32 -1.442695, %v3474_v16  ;;  %v5484_v9 = vpop.eup %5483 }
 0x89e   :  { %5487 = vpow2.f32 %v3636_v38 }
 0x8a9   :  { %v5486_v31 = vpop.eup %5485 }
 0x8aa   :  { %v3482_v15 = vmul.f32 %v5486_v31, %v5484_v9 }
 0x8ab   :  { %v5488_v41 = vpop.eup %5487 }
 0x8ac   :  { %v3483_v19 = vadd.f32 %v3482_v15, %v3481_v8  ;;  %v3478_v18 = vadd.f32 1.0, %v5488_v41 }
 0x8ae   :  { %5489 = vtanh.f32 %v3483_v19 }
 0x8af   :  { %5491 = vrcp.f32 %v3478_v18 }
 0x8bb   :  { %v5490_v26 = vpop.eup %5489 }
 0x8bc   :  { %v5492_v10 = vpop.eup %5491 }
 0x8bd   :  { %v3485_v0 = vmul.f32 %v5492_v10, %v5490_v26 }
 0x8bf   :  { %5352 = vmatmul.mubr.f32.vlgmr.msra.gmra.mxu0 %v3485_v0 }
 0x97f   :  { %v3578_v6 = vpop.f32.mrf.mxu0 }
 0x980   :  { %v3579_v13 = vadd.f32 %v3637_v14, %v3578_v6 }
 0x981   :  { %v5353_v23 = vpop.f32.mrf.mxu0 }
 0x982   :  { %v3585_v60 = vsel %vm3584_vm1, %v3579_v13, -1e+30 }
 0x983   :  { %3586 = vmax.xlane.f32.xlu0 %v3585_v60 }
 0xa0c   :  { %v3587_v22 = vpop.xlane.xlu0 %3586 }
 0xa0d   :  { %v3588_v1 = vsub.f32 %v3585_v60, %v3587_v22 }
 0xa0f   :  { %v3589_v63 = vmul.f32 1.442695, %v3588_v1 }
 0xa11   :  { %5493 = vpow2.f32 %v3589_v63 }
 0xa1e   :  { %v5494_v61 = vpop.eup %5493 }
 0xa1f   :  { %3591 = vadd.xlane.f32.xlu0 %v5494_v61 }
 0xaa8   :  { %v3592_v30 = vpop.xlane.xlu0 %3591 }
 0xaa9   :  { %5495 = vrcp.f32 %v3592_v30 }
 0xab6   :  { %v5496_v33 = vpop.eup %5495 }
 0xab7   :  { %v3594_v25 = vmul.f32 %v5496_v33, %v5494_v61 }
 0xab9   :  { %3595 = vst [vmem:[#allocation13] sm:$0xff] %v3594_v25 }
 0xaba   :  { %5588 = shalt.err (!%p5585_p10)
}
 0xabb   :  { %3605 = dma.vmem_to_hbm [thread:$0]  %s3603_s21, 128, %s7392_s6, [#allocation7]  }
 0xabc   :  { %5603 = dma.done.wait [#allocation7], 128  }
 0xabd   :  { %5604 = vsyncadd [#allocation7], 4294967168 }
 0xabe   :  { %3609 = vsyncpa [#allocation6], 1 }
 0xabf   :  { %3610 = vsyncpa [#allocation9], 1 }
 0xac0   :  { %3611 = vsyncpa [#allocation12], 1 }
 0xac1   :  { %3612 = vsyncpa [#allocation7], 1 }

</bundles_post_ra>
